<compile_context>
chip_gen: v6e
topology: v6e:2x2x1
jax: 0.10.0
libtpu: 0.0.40
codegen_flags: <defaults>
</compile_context>

<pallas_src>
import numpy as np
import jax
import jax.numpy as jnp
from jax.experimental import pallas as pl
from jax.experimental.pallas import tpu as pltpu


# ----------------------------------------------------------------------------
# Deterministic constant construction (numpy, trace time)
# ----------------------------------------------------------------------------
def _fspecial_gauss_1d(size, sigma):
    coords = np.arange(size, dtype=np.float32) - (size // 2)
    g = np.exp(-(coords ** 2) / (2.0 * float(sigma) ** 2))
    return (g / g.sum()).astype(np.float32)  # (size,)


def _round_up(x, m):
    return ((x + m - 1) // m) * m


def _filter_band(taps, n_in, do_filter, n_out_pad):
    """(n_out_pad, n_in) band matrix: row i holds the taps at cols i..i+kw-1
    ('valid' cross-correlation).  Rows >= n_out are zero.  Degenerates to the
    identity when this axis is not filtered (dim smaller than the window)."""
    kw = len(taps)
    n_out = n_in - kw + 1 if do_filter else n_in
    m = np.zeros((n_out_pad, n_in), dtype=np.float32)
    for i in range(n_out):
        if do_filter:
            m[i, i:i + kw] = taps
        else:
            m[i, i] = 1.0
    return m


def _pool_band(n_in):
    """(n_out, n_in) 0/1 matrix reproducing one axis of
    F.avg_pool2d(kernel_size=2, stride=2, padding=n_in % 2,
    count_include_pad=True); caller multiplies by 0.25."""
    pad = n_in % 2
    n_out = (n_in + 2 * pad - 2) // 2 + 1
    m = np.zeros((n_out, n_in), dtype=np.float32)
    for i in range(n_out):
        for pos in (2 * i, 2 * i + 1):
            j = pos - pad
            if 0 <= j < n_in:
                m[i, j] = 1.0
    return m


def _block_diag(m, tb):
    r, c = m.shape
    out = np.zeros((tb * r, tb * c), dtype=np.float32)
    for b in range(tb):
        out[b * r:(b + 1) * r, b * c:(b + 1) * c] = m
    return out


def _valid_mask(tb, ho, ho_p, wo, wo_p):
    m = np.zeros((tb * ho_p, wo_p), dtype=np.float32)
    for b in range(tb):
        m[b * ho_p:b * ho_p + ho, :wo] = 1.0
    return m


def _choose_tb(B, H):
    """Planes per grid step: largest divisor of B (<=8) keeping >=2 grid steps
    (v7x megacore) and a sublane-aligned (TB*H) block; fallback = all planes."""
    best = B
    for tb in range(1, min(B, 8) + 1):
        if B % tb == 0 and B // tb >= 2 and (tb * H) % 8 == 0:
            best = tb
    return best


# ----------------------------------------------------------------------------
# Fused multi-level SSIM pyramid kernel
# ----------------------------------------------------------------------------
def ms_ssim_pallas(X, Y, data_range=255.0, size_average=True, win_1d=None,
                   win_size=11, win_sigma=1.5, weights=None, K=(0.01, 0.03)):
    if X.shape != Y.shape:
        raise ValueError(f"Input images should have the same dimensions, "
                         f"but got {X.shape} and {Y.shape}.")
    # mirror ms_ssim(): squeeze trailing size-1 dims (beyond dim 1)
    for d in range(X.ndim - 1, 1, -1):
        if X.shape[d] == 1:
            X = jnp.squeeze(X, axis=d)
            Y = jnp.squeeze(Y, axis=d)
    if X.ndim != 4:
        raise ValueError("only 4-D (N, C, H, W) inputs are supported here")

    if win_1d is None:
        win_1d = _fspecial_gauss_1d(win_size, win_sigma)
    taps = np.asarray(win_1d, dtype=np.float32).reshape(-1)
    win_size = int(taps.shape[0])
    if win_size % 2 != 1:
        raise ValueError("Window size should be odd.")
    smaller_side = min(X.shape[-2:])
    assert smaller_side > (win_size - 1) * 2 ** 4, (
        "Image size should be larger than %d due to the 4 downsamplings in "
        "ms-ssim" % ((win_size - 1) * 2 ** 4))

    if weights is None:
        weights = [0.0448, 0.2856, 0.3001, 0.2363, 0.1333]
    weights_np = np.asarray(weights, dtype=np.float32).reshape(-1)
    levels = int(weights_np.shape[0])

    N, C, H, W = X.shape
    B = N * C
    K1, K2 = K
    C1 = float((K1 * data_range) ** 2)
    C2 = float((K2 * data_range) ** 2)

    TB = _choose_tb(B, H)
    G = B // TB
    LT = levels * TB

    # ---- per-level shape plan ------------------------------------------------
    plan = []
    h, w = H, W
    for l in range(levels):
        do_h, do_w = h >= win_size, w >= win_size
        ho = h - win_size + 1 if do_h else h
        wo = w - win_size + 1 if do_w else w
        plan.append(dict(
            h=h, w=w, do_h=do_h, do_w=do_w, ho=ho, wo=wo,
            ho_p=_round_up(ho, 8), wo_p=_round_up(wo, 128),
            hp=(h + 2 * (h % 2) - 2) // 2 + 1,
            wp=(w + 2 * (w % 2) - 2) // 2 + 1))
        h, w = plan[-1]['hp'], plan[-1]['wp']

    # ---- constant matrices (constant-block inputs, one DMA each) --------------
    const_np = []
    for l, p in enumerate(plan):
        ah = _block_diag(_filter_band(taps, p['h'], p['do_h'], p['ho_p']), TB)
        aw = _filter_band(taps, p['w'], p['do_w'], p['wo_p']).T
        mk = _valid_mask(TB, p['ho'], p['ho_p'], p['wo'], p['wo_p'])
        const_np += [ah, aw, mk]
        if l < levels - 1:
            const_np += [_block_diag(_pool_band(p['h']), TB),
                         _pool_band(p['w']).T]
    n_const = len(const_np)
    const_jnp = [jnp.asarray(c) for c in const_np]

    # ---- kernel ---------------------------------------------------------------
    def kernel(x_ref, y_ref, *rest):
        const = rest[:n_const]
        ssim_ref = rest[n_const]
        cs_ref = rest[n_const + 1]

        x = x_ref[...]          # (TB*H, W), planes stacked along sublanes
        y = y_ref[...]

        ci = 0
        for l, p in enumerate(plan):
            ah = const[ci][...]           # (TB*Ho_p, TB*H_l) block-diag band
            aw = const[ci + 1][...]       # (W_l, Wo_p)
            mk = const[ci + 2][...]       # (TB*Ho_p, Wo_p) valid mask
            ci += 3
            if l < levels - 1:
                sh = const[ci][...]       # (TB*Hp, TB*H_l) block-diag pool
                sw = const[ci + 1][...]   # (W_l, Wp)
                ci += 2

            def gfilt(t, ah=ah, aw=aw):   # separable blur on the MXU
                u = jnp.dot(ah, t, preferred_element_type=jnp.float32)
                return jnp.dot(u, aw, preferred_element_type=jnp.float32)

            mu1 = gfilt(x)
            mu2 = gfilt(y)
            mu1_sq = mu1 * mu1
            mu2_sq = mu2 * mu2
            mu1_mu2 = mu1 * mu2
            lum = (2.0 * mu1_mu2 + C1) / (mu1_sq + mu2_sq + C1)
            sigma1_sq = gfilt(x * x) - mu1_sq
            sigma2_sq = gfilt(y * y) - mu2_sq
            sigma12 = gfilt(x * y) - mu1_mu2
            cs_map = (2.0 * sigma12 + C2) / (sigma1_sq + sigma2_sq + C2)

            cs_m = cs_map * mk            # zero out padded rows / cols
            ssim_m = lum * cs_m

            inv_area = 1.0 / float(p['ho'] * p['wo'])
            for b in range(TB):
                r0 = b * p['ho_p']
                s_val = jnp.sum(ssim_m[r0:r0 + p['ho_p'], :]) * inv_area
                c_val = jnp.sum(cs_m[r0:r0 + p['ho_p'], :]) * inv_area
                row = l * TB + b
                ssim_ref[0, pl.ds(row, 1), :] = jnp.full((1, 128), s_val,
                                                         jnp.float32)
                cs_ref[0, pl.ds(row, 1), :] = jnp.full((1, 128), c_val,
                                                       jnp.float32)

            if l < levels - 1:
                # fused 2x2 avg-pool (count_include_pad) -> next level's planes
                x = 0.25 * jnp.dot(
                    jnp.dot(sh, x, preferred_element_type=jnp.float32),
                    sw, preferred_element_type=jnp.float32)
                y = 0.25 * jnp.dot(
                    jnp.dot(sh, y, preferred_element_type=jnp.float32),
                    sw, preferred_element_type=jnp.float32)

    # ---- specs ----------------------------------------------------------------
    Xf = X.astype(jnp.float32).reshape(B * H, W)
    Yf = Y.astype(jnp.float32).reshape(B * H, W)

    in_specs = [pl.BlockSpec((TB * H, W), lambda g: (g, 0)),
                pl.BlockSpec((TB * H, W), lambda g: (g, 0))]
    for c in const_np:
        in_specs.append(pl.BlockSpec(c.shape, lambda g: (0, 0)))

    out_shapes = (jax.ShapeDtypeStruct((G, LT, 128), jnp.float32),
                  jax.ShapeDtypeStruct((G, LT, 128), jnp.float32))
    out_specs = (pl.BlockSpec((1, LT, 128), lambda g: (g, 0, 0)),
                 pl.BlockSpec((1, LT, 128), lambda g: (g, 0, 0)))

    # ---- advisory cost estimate ------------------------------------------------
    flops = 0
    trans = 0
    for l, p in enumerate(plan):
        tbh, tbho = TB * p['h'], TB * p['ho_p']
        flops += 5 * (2 * tbho * tbh * p['w'] + 2 * tbho * p['w'] * p['wo_p'])
        flops += 40 * tbho * p['wo_p'] + 6 * tbh * p['w']
        trans += 2 * tbho * p['wo_p']
        if l < levels - 1:
            tbhp = TB * p['hp']
            flops += 2 * (2 * tbhp * tbh * p['w'] + 2 * tbhp * p['w'] * p['wp'])
    const_bytes = 4 * sum(int(c.size) for c in const_np)
    cost = pl.CostEstimate(
        flops=int(G * flops), transcendentals=int(G * trans),
        bytes_accessed=int(4 * (2 * B * H * W + 2 * G * LT * 128) + const_bytes))

    ssim_out, cs_out = pl.pallas_call(
        kernel,
        out_shape=out_shapes,
        grid=(G,),
        in_specs=in_specs,
        out_specs=out_specs,
        compiler_params=pltpu.CompilerParams(
            dimension_semantics=("parallel",),   # 2 steps -> both TCs on v7x
            vmem_limit_bytes=48 * 1024 * 1024,   # <=64 MiB (v7x), roomy on v5e/v6e
        ),
        cost_estimate=cost,
    )(Xf, Yf, *const_jnp)

    # ---- plain-JAX combination (tiny) ------------------------------------------
    ssim_lvl = ssim_out[:, :, 0].reshape(G, levels, TB)
    ssim_lvl = ssim_lvl.transpose(1, 0, 2).reshape(levels, N, C)
    cs_lvl = cs_out[:, :, 0].reshape(G, levels, TB)
    cs_lvl = cs_lvl.transpose(1, 0, 2).reshape(levels, N, C)

    w_arr = jnp.asarray(weights_np)
    mcs = jnp.maximum(cs_lvl[:levels - 1], 0.0)                  # torch.relu(cs)
    ssim_last = jnp.maximum(ssim_lvl[levels - 1], 0.0)
    stack = jnp.concatenate([mcs, ssim_last[None]], axis=0)      # (L, N, C)
    ms_ssim_val = jnp.prod(stack ** w_arr.reshape(-1, 1, 1), axis=0)
    if size_average:
        return ms_ssim_val.mean()
    return ms_ssim_val.mean(axis=1)


class MS_SSIM:
    """Pallas/JAX re-implementation of the PyTorch MS_SSIM module's forward."""

    def __init__(self, data_range=255, size_average=True, win_size=11,
                 win_sigma=1.5, channel=3, spatial_dims=2, weights=None,
                 K=(0.01, 0.03), unsqueeze=False):
        self.win_size = win_size
        # The PyTorch module repeats the 1-D gaussian across channels for a
        # grouped conv; applying the same 1-D taps per channel is equivalent.
        self.win_1d = _fspecial_gauss_1d(win_size, win_sigma)        # "win"
        self.win_1d_gray = _fspecial_gauss_1d(win_size, win_sigma)   # "win_gray"
        self.size_average = size_average
        self.data_range = data_range
        self.weights = weights
        self.K = K
        self.unsqueeze = unsqueeze

    def __call__(self, X, Y):
        is_gray = False
        if X.ndim == 3:
            X, Y = X[:, None], Y[:, None]
            is_gray = True
        win = self.win_1d_gray if is_gray else self.win_1d
        return ms_ssim_pallas(
            X, Y,
            data_range=self.data_range,
            size_average=self.size_average,
            win_1d=win,
            weights=self.weights,
            K=self.K,
        )


if __name__ == "__main__":
    # (N, C, H, W) = (2, 3, 64, 64); win_size=3 so min(H, W)=64 > (3-1)*16=32
    # (the 4-downsampling guard in the reference).
    key = jax.random.PRNGKey(0)
    kx, ky = jax.random.split(key)
    X = jax.random.uniform(kx, (2, 3, 64, 64), dtype=jnp.float32)
    Y = jax.random.uniform(ky, (2, 3, 64, 64), dtype=jnp.float32)

    module = MS_SSIM(data_range=1.0, size_average=True, win_size=3,
                     win_sigma=1.5, channel=3, spatial_dims=2)
    fwd = jax.jit(lambda a, b: module(a, b))
    out = jax.block_until_ready(fwd(X, Y))
    assert out.shape == () and bool(jnp.isfinite(out))
    print("KERNEL_OK")
</pallas_src>

<mosaic_0001>
module attributes {stable_mosaic.version = 11 : i64} {
  func.func @kernel(%arg0: i32, %arg1: memref<192x64xf32, #tpu.memory_space<vmem>>, %arg2: memref<192x64xf32, #tpu.memory_space<vmem>>, %arg3: memref<192x192xf32, #tpu.memory_space<vmem>>, %arg4: memref<64x128xf32, #tpu.memory_space<vmem>>, %arg5: memref<192x128xf32, #tpu.memory_space<vmem>>, %arg6: memref<96x192xf32, #tpu.memory_space<vmem>>, %arg7: memref<64x32xf32, #tpu.memory_space<vmem>>, %arg8: memref<96x96xf32, #tpu.memory_space<vmem>>, %arg9: memref<32x128xf32, #tpu.memory_space<vmem>>, %arg10: memref<96x128xf32, #tpu.memory_space<vmem>>, %arg11: memref<48x96xf32, #tpu.memory_space<vmem>>, %arg12: memref<32x16xf32, #tpu.memory_space<vmem>>, %arg13: memref<48x48xf32, #tpu.memory_space<vmem>>, %arg14: memref<16x128xf32, #tpu.memory_space<vmem>>, %arg15: memref<48x128xf32, #tpu.memory_space<vmem>>, %arg16: memref<24x48xf32, #tpu.memory_space<vmem>>, %arg17: memref<16x8xf32, #tpu.memory_space<vmem>>, %arg18: memref<24x24xf32, #tpu.memory_space<vmem>>, %arg19: memref<8x128xf32, #tpu.memory_space<vmem>>, %arg20: memref<24x128xf32, #tpu.memory_space<vmem>>, %arg21: memref<12x24xf32, #tpu.memory_space<vmem>>, %arg22: memref<8x4xf32, #tpu.memory_space<vmem>>, %arg23: memref<24x12xf32, #tpu.memory_space<vmem>>, %arg24: memref<4x128xf32, #tpu.memory_space<vmem>>, %arg25: memref<24x128xf32, #tpu.memory_space<vmem>>, %arg26: memref<1x15x128xf32, #tpu.memory_space<vmem>>, %arg27: memref<1x15x128xf32, #tpu.memory_space<vmem>>) attributes {dimension_semantics = [#tpu.dimension_semantics<parallel>], iteration_bounds = array<i64: 2>, scalar_prefetch = 0 : i64, scratch_operands = 0 : i64, tpu.core_type = #tpu.core_type<tc>, window_params = [{transform_indices = @transform_0, window_bounds = array<i64: 192, 64>}, {transform_indices = @transform_1, window_bounds = array<i64: 192, 64>}, {pipeline_mode = #tpu.pipeline_mode<synchronous>, transform_indices = @transform_2, window_bounds = array<i64: 192, 192>}, {pipeline_mode = #tpu.pipeline_mode<synchronous>, transform_indices = @transform_3, window_bounds = array<i64: 64, 128>}, {pipeline_mode = #tpu.pipeline_mode<synchronous>, transform_indices = @transform_4, window_bounds = array<i64: 192, 128>}, {pipeline_mode = #tpu.pipeline_mode<synchronous>, transform_indices = @transform_5, window_bounds = array<i64: 96, 192>}, {pipeline_mode = #tpu.pipeline_mode<synchronous>, transform_indices = @transform_6, window_bounds = array<i64: 64, 32>}, {pipeline_mode = #tpu.pipeline_mode<synchronous>, transform_indices = @transform_7, window_bounds = array<i64: 96, 96>}, {pipeline_mode = #tpu.pipeline_mode<synchronous>, transform_indices = @transform_8, window_bounds = array<i64: 32, 128>}, {pipeline_mode = #tpu.pipeline_mode<synchronous>, transform_indices = @transform_9, window_bounds = array<i64: 96, 128>}, {pipeline_mode = #tpu.pipeline_mode<synchronous>, transform_indices = @transform_10, window_bounds = array<i64: 48, 96>}, {pipeline_mode = #tpu.pipeline_mode<synchronous>, transform_indices = @transform_11, window_bounds = array<i64: 32, 16>}, {pipeline_mode = #tpu.pipeline_mode<synchronous>, transform_indices = @transform_12, window_bounds = array<i64: 48, 48>}, {pipeline_mode = #tpu.pipeline_mode<synchronous>, transform_indices = @transform_13, window_bounds = array<i64: 16, 128>}, {pipeline_mode = #tpu.pipeline_mode<synchronous>, transform_indices = @transform_14, window_bounds = array<i64: 48, 128>}, {pipeline_mode = #tpu.pipeline_mode<synchronous>, transform_indices = @transform_15, window_bounds = array<i64: 24, 48>}, {pipeline_mode = #tpu.pipeline_mode<synchronous>, transform_indices = @transform_16, window_bounds = array<i64: 16, 8>}, {pipeline_mode = #tpu.pipeline_mode<synchronous>, transform_indices = @transform_17, window_bounds = array<i64: 24, 24>}, {pipeline_mode = #tpu.pipeline_mode<synchronous>, transform_indices = @transform_18, window_bounds = array<i64: 8, 128>}, {pipeline_mode = #tpu.pipeline_mode<synchronous>, transform_indices = @transform_19, window_bounds = array<i64: 24, 128>}, {pipeline_mode = #tpu.pipeline_mode<synchronous>, transform_indices = @transform_20, window_bounds = array<i64: 12, 24>}, {pipeline_mode = #tpu.pipeline_mode<synchronous>, transform_indices = @transform_21, window_bounds = array<i64: 8, 4>}, {pipeline_mode = #tpu.pipeline_mode<synchronous>, transform_indices = @transform_22, window_bounds = array<i64: 24, 12>}, {pipeline_mode = #tpu.pipeline_mode<synchronous>, transform_indices = @transform_23, window_bounds = array<i64: 4, 128>}, {pipeline_mode = #tpu.pipeline_mode<synchronous>, transform_indices = @transform_24, window_bounds = array<i64: 24, 128>}, {transform_indices = @transform_25, window_bounds = array<i64: 1, 15, 128>}, {transform_indices = @transform_26, window_bounds = array<i64: 1, 15, 128>}]} {
    %c0 = arith.constant 0 : index
    %c0_0 = arith.constant 0 : index
    %0 = vector.load %arg1[%c0, %c0_0] : memref<192x64xf32, #tpu.memory_space<vmem>>, vector<192x64xf32>
    %c0_1 = arith.constant 0 : index
    %c0_2 = arith.constant 0 : index
    %1 = vector.load %arg2[%c0_1, %c0_2] : memref<192x64xf32, #tpu.memory_space<vmem>>, vector<192x64xf32>
    %c0_3 = arith.constant 0 : index
    %c0_4 = arith.constant 0 : index
    %2 = vector.load %arg3[%c0_3, %c0_4] : memref<192x192xf32, #tpu.memory_space<vmem>>, vector<192x192xf32>
    %c0_5 = arith.constant 0 : index
    %c0_6 = arith.constant 0 : index
    %3 = vector.load %arg4[%c0_5, %c0_6] : memref<64x128xf32, #tpu.memory_space<vmem>>, vector<64x128xf32>
    %c0_7 = arith.constant 0 : index
    %c0_8 = arith.constant 0 : index
    %4 = vector.load %arg5[%c0_7, %c0_8] : memref<192x128xf32, #tpu.memory_space<vmem>>, vector<192x128xf32>
    %c0_9 = arith.constant 0 : index
    %c0_10 = arith.constant 0 : index
    %5 = vector.load %arg6[%c0_9, %c0_10] : memref<96x192xf32, #tpu.memory_space<vmem>>, vector<96x192xf32>
    %c0_11 = arith.constant 0 : index
    %c0_12 = arith.constant 0 : index
    %6 = vector.load %arg7[%c0_11, %c0_12] : memref<64x32xf32, #tpu.memory_space<vmem>>, vector<64x32xf32>
    %cst = arith.constant dense<0.000000e+00> : vector<192x64xf32>
    %7 = tpu.matmul %2, %0, %cst {dimension_numbers = #tpu.dot_dimension_numbers<[1], [0], [0], [1], [0, 0, 1, 1], [], []>} : vector<192x192xf32>, vector<192x64xf32>, vector<192x64xf32> -> vector<192x64xf32>
    %cst_13 = arith.constant dense<0.000000e+00> : vector<192x128xf32>
    %8 = tpu.matmul %7, %3, %cst_13 {dimension_numbers = #tpu.dot_dimension_numbers<[1], [0], [0], [1], [0, 0, 1, 1], [], []>} : vector<192x64xf32>, vector<64x128xf32>, vector<192x128xf32> -> vector<192x128xf32>
    %cst_14 = arith.constant dense<0.000000e+00> : vector<192x64xf32>
    %9 = tpu.matmul %2, %1, %cst_14 {dimension_numbers = #tpu.dot_dimension_numbers<[1], [0], [0], [1], [0, 0, 1, 1], [], []>} : vector<192x192xf32>, vector<192x64xf32>, vector<192x64xf32> -> vector<192x64xf32>
    %cst_15 = arith.constant dense<0.000000e+00> : vector<192x128xf32>
    %10 = tpu.matmul %9, %3, %cst_15 {dimension_numbers = #tpu.dot_dimension_numbers<[1], [0], [0], [1], [0, 0, 1, 1], [], []>} : vector<192x64xf32>, vector<64x128xf32>, vector<192x128xf32> -> vector<192x128xf32>
    %11 = arith.mulf %8, %8 : vector<192x128xf32>
    %12 = arith.mulf %10, %10 : vector<192x128xf32>
    %13 = arith.mulf %8, %10 : vector<192x128xf32>
    %cst_16 = arith.constant 2.000000e+00 : f32
    %14 = vector.broadcast %cst_16 : f32 to vector<192x128xf32>
    %15 = arith.mulf %14, %13 : vector<192x128xf32>
    %cst_17 = arith.constant 9.99999974E-5 : f32
    %16 = vector.broadcast %cst_17 : f32 to vector<192x128xf32>
    %17 = arith.addf %15, %16 : vector<192x128xf32>
    %18 = arith.addf %11, %12 : vector<192x128xf32>
    %cst_18 = arith.constant 9.99999974E-5 : f32
    %19 = vector.broadcast %cst_18 : f32 to vector<192x128xf32>
    %20 = arith.addf %18, %19 : vector<192x128xf32>
    %21 = arith.divf %17, %20 : vector<192x128xf32>
    %22 = arith.mulf %0, %0 : vector<192x64xf32>
    %cst_19 = arith.constant dense<0.000000e+00> : vector<192x64xf32>
    %23 = tpu.matmul %2, %22, %cst_19 {dimension_numbers = #tpu.dot_dimension_numbers<[1], [0], [0], [1], [0, 0, 1, 1], [], []>} : vector<192x192xf32>, vector<192x64xf32>, vector<192x64xf32> -> vector<192x64xf32>
    %cst_20 = arith.constant dense<0.000000e+00> : vector<192x128xf32>
    %24 = tpu.matmul %23, %3, %cst_20 {dimension_numbers = #tpu.dot_dimension_numbers<[1], [0], [0], [1], [0, 0, 1, 1], [], []>} : vector<192x64xf32>, vector<64x128xf32>, vector<192x128xf32> -> vector<192x128xf32>
    %25 = arith.subf %24, %11 : vector<192x128xf32>
    %26 = arith.mulf %1, %1 : vector<192x64xf32>
    %cst_21 = arith.constant dense<0.000000e+00> : vector<192x64xf32>
    %27 = tpu.matmul %2, %26, %cst_21 {dimension_numbers = #tpu.dot_dimension_numbers<[1], [0], [0], [1], [0, 0, 1, 1], [], []>} : vector<192x192xf32>, vector<192x64xf32>, vector<192x64xf32> -> vector<192x64xf32>
    %cst_22 = arith.constant dense<0.000000e+00> : vector<192x128xf32>
    %28 = tpu.matmul %27, %3, %cst_22 {dimension_numbers = #tpu.dot_dimension_numbers<[1], [0], [0], [1], [0, 0, 1, 1], [], []>} : vector<192x64xf32>, vector<64x128xf32>, vector<192x128xf32> -> vector<192x128xf32>
    %29 = arith.subf %28, %12 : vector<192x128xf32>
    %30 = arith.mulf %0, %1 : vector<192x64xf32>
    %cst_23 = arith.constant dense<0.000000e+00> : vector<192x64xf32>
    %31 = tpu.matmul %2, %30, %cst_23 {dimension_numbers = #tpu.dot_dimension_numbers<[1], [0], [0], [1], [0, 0, 1, 1], [], []>} : vector<192x192xf32>, vector<192x64xf32>, vector<192x64xf32> -> vector<192x64xf32>
    %cst_24 = arith.constant dense<0.000000e+00> : vector<192x128xf32>
    %32 = tpu.matmul %31, %3, %cst_24 {dimension_numbers = #tpu.dot_dimension_numbers<[1], [0], [0], [1], [0, 0, 1, 1], [], []>} : vector<192x64xf32>, vector<64x128xf32>, vector<192x128xf32> -> vector<192x128xf32>
    %33 = arith.subf %32, %13 : vector<192x128xf32>
    %cst_25 = arith.constant 2.000000e+00 : f32
    %34 = vector.broadcast %cst_25 : f32 to vector<192x128xf32>
    %35 = arith.mulf %34, %33 : vector<192x128xf32>
    %cst_26 = arith.constant 8.99999984E-4 : f32
    %36 = vector.broadcast %cst_26 : f32 to vector<192x128xf32>
    %37 = arith.addf %35, %36 : vector<192x128xf32>
    %38 = arith.addf %25, %29 : vector<192x128xf32>
    %cst_27 = arith.constant 8.99999984E-4 : f32
    %39 = vector.broadcast %cst_27 : f32 to vector<192x128xf32>
    %40 = arith.addf %38, %39 : vector<192x128xf32>
    %41 = arith.divf %37, %40 : vector<192x128xf32>
    %42 = arith.mulf %41, %4 : vector<192x128xf32>
    %43 = arith.mulf %21, %42 : vector<192x128xf32>
    %44 = vector.extract_strided_slice %43 {offsets = [0, 0], sizes = [64, 128], strides = [1, 1]} : vector<192x128xf32> to vector<64x128xf32>
    %45 = vector.shape_cast %44 : vector<64x128xf32> to vector<1x64x128xf32>
    %cst_28 = arith.constant dense<0.000000e+00> : vector<1xf32>
    %46 = vector.multi_reduction <add>, %45, %cst_28 [1, 2] : vector<1x64x128xf32> to vector<1xf32>
    %47 = vector.shape_cast %46 : vector<1xf32> to vector<1x1x1xf32>
    %48 = vector.extract %47[0, 0, 0] : f32 from vector<1x1x1xf32>
    %cst_29 = arith.constant 2.60145694E-4 : f32
    %49 = arith.mulf %48, %cst_29 : f32
    %50 = vector.extract_strided_slice %42 {offsets = [0, 0], sizes = [64, 128], strides = [1, 1]} : vector<192x128xf32> to vector<64x128xf32>
    %51 = vector.shape_cast %50 : vector<64x128xf32> to vector<1x64x128xf32>
    %cst_30 = arith.constant dense<0.000000e+00> : vector<1xf32>
    %52 = vector.multi_reduction <add>, %51, %cst_30 [1, 2] : vector<1x64x128xf32> to vector<1xf32>
    %53 = vector.shape_cast %52 : vector<1xf32> to vector<1x1x1xf32>
    %54 = vector.extract %53[0, 0, 0] : f32 from vector<1x1x1xf32>
    %cst_31 = arith.constant 2.60145694E-4 : f32
    %55 = arith.mulf %54, %cst_31 : f32
    %56 = vector.broadcast %49 : f32 to vector<1x128xf32>
    %c0_32 = arith.constant 0 : index
    %c0_33 = arith.constant 0 : index
    %c0_34 = arith.constant 0 : index
    %57 = vector.load %arg26[%c0_32, %c0_33, %c0_34] : memref<1x15x128xf32, #tpu.memory_space<vmem>>, vector<1x1x128xf32>
    %58 = vector.shape_cast %57 : vector<1x1x128xf32> to vector<1x128xf32>
    %59 = vector.shape_cast %56 : vector<1x128xf32> to vector<1x1x128xf32>
    tpu.vector_store %arg26[%c0_32, %c0_33, %c0_34], %59 {strides = array<i32>} : memref<1x15x128xf32, #tpu.memory_space<vmem>>, vector<1x1x128xf32>,
    %60 = vector.broadcast %55 : f32 to vector<1x128xf32>
    %c0_35 = arith.constant 0 : index
    %c0_36 = arith.constant 0 : index
    %c0_37 = arith.constant 0 : index
    %61 = vector.load %arg27[%c0_35, %c0_36, %c0_37] : memref<1x15x128xf32, #tpu.memory_space<vmem>>, vector<1x1x128xf32>
    %62 = vector.shape_cast %61 : vector<1x1x128xf32> to vector<1x128xf32>
    %63 = vector.shape_cast %60 : vector<1x128xf32> to vector<1x1x128xf32>
    tpu.vector_store %arg27[%c0_35, %c0_36, %c0_37], %63 {strides = array<i32>} : memref<1x15x128xf32, #tpu.memory_space<vmem>>, vector<1x1x128xf32>,
    %64 = vector.extract_strided_slice %43 {offsets = [64, 0], sizes = [64, 128], strides = [1, 1]} : vector<192x128xf32> to vector<64x128xf32>
    %65 = vector.shape_cast %64 : vector<64x128xf32> to vector<1x64x128xf32>
    %cst_38 = arith.constant dense<0.000000e+00> : vector<1xf32>
    %66 = vector.multi_reduction <add>, %65, %cst_38 [1, 2] : vector<1x64x128xf32> to vector<1xf32>
    %67 = vector.shape_cast %66 : vector<1xf32> to vector<1x1x1xf32>
    %68 = vector.extract %67[0, 0, 0] : f32 from vector<1x1x1xf32>
    %cst_39 = arith.constant 2.60145694E-4 : f32
    %69 = arith.mulf %68, %cst_39 : f32
    %70 = vector.extract_strided_slice %42 {offsets = [64, 0], sizes = [64, 128], strides = [1, 1]} : vector<192x128xf32> to vector<64x128xf32>
    %71 = vector.shape_cast %70 : vector<64x128xf32> to vector<1x64x128xf32>
    %cst_40 = arith.constant dense<0.000000e+00> : vector<1xf32>
    %72 = vector.multi_reduction <add>, %71, %cst_40 [1, 2] : vector<1x64x128xf32> to vector<1xf32>
    %73 = vector.shape_cast %72 : vector<1xf32> to vector<1x1x1xf32>
    %74 = vector.extract %73[0, 0, 0] : f32 from vector<1x1x1xf32>
    %cst_41 = arith.constant 2.60145694E-4 : f32
    %75 = arith.mulf %74, %cst_41 : f32
    %76 = vector.broadcast %69 : f32 to vector<1x128xf32>
    %c0_42 = arith.constant 0 : index
    %c1 = arith.constant 1 : index
    %c0_43 = arith.constant 0 : index
    %77 = vector.load %arg26[%c0_42, %c1, %c0_43] : memref<1x15x128xf32, #tpu.memory_space<vmem>>, vector<1x1x128xf32>
    %78 = vector.shape_cast %77 : vector<1x1x128xf32> to vector<1x128xf32>
    %79 = vector.shape_cast %76 : vector<1x128xf32> to vector<1x1x128xf32>
    tpu.vector_store %arg26[%c0_42, %c1, %c0_43], %79 {strides = array<i32>} : memref<1x15x128xf32, #tpu.memory_space<vmem>>, vector<1x1x128xf32>,
    %80 = vector.broadcast %75 : f32 to vector<1x128xf32>
    %c0_44 = arith.constant 0 : index
    %c1_45 = arith.constant 1 : index
    %c0_46 = arith.constant 0 : index
    %81 = vector.load %arg27[%c0_44, %c1_45, %c0_46] : memref<1x15x128xf32, #tpu.memory_space<vmem>>, vector<1x1x128xf32>
    %82 = vector.shape_cast %81 : vector<1x1x128xf32> to vector<1x128xf32>
    %83 = vector.shape_cast %80 : vector<1x128xf32> to vector<1x1x128xf32>
    tpu.vector_store %arg27[%c0_44, %c1_45, %c0_46], %83 {strides = array<i32>} : memref<1x15x128xf32, #tpu.memory_space<vmem>>, vector<1x1x128xf32>,
    %84 = vector.extract_strided_slice %43 {offsets = [128, 0], sizes = [64, 128], strides = [1, 1]} : vector<192x128xf32> to vector<64x128xf32>
    %85 = vector.shape_cast %84 : vector<64x128xf32> to vector<1x64x128xf32>
    %cst_47 = arith.constant dense<0.000000e+00> : vector<1xf32>
    %86 = vector.multi_reduction <add>, %85, %cst_47 [1, 2] : vector<1x64x128xf32> to vector<1xf32>
    %87 = vector.shape_cast %86 : vector<1xf32> to vector<1x1x1xf32>
    %88 = vector.extract %87[0, 0, 0] : f32 from vector<1x1x1xf32>
    %cst_48 = arith.constant 2.60145694E-4 : f32
    %89 = arith.mulf %88, %cst_48 : f32
    %90 = vector.extract_strided_slice %42 {offsets = [128, 0], sizes = [64, 128], strides = [1, 1]} : vector<192x128xf32> to vector<64x128xf32>
    %91 = vector.shape_cast %90 : vector<64x128xf32> to vector<1x64x128xf32>
    %cst_49 = arith.constant dense<0.000000e+00> : vector<1xf32>
    %92 = vector.multi_reduction <add>, %91, %cst_49 [1, 2] : vector<1x64x128xf32> to vector<1xf32>
    %93 = vector.shape_cast %92 : vector<1xf32> to vector<1x1x1xf32>
    %94 = vector.extract %93[0, 0, 0] : f32 from vector<1x1x1xf32>
    %cst_50 = arith.constant 2.60145694E-4 : f32
    %95 = arith.mulf %94, %cst_50 : f32
    %96 = vector.broadcast %89 : f32 to vector<1x128xf32>
    %c0_51 = arith.constant 0 : index
    %c2 = arith.constant 2 : index
    %c0_52 = arith.constant 0 : index
    %97 = vector.load %arg26[%c0_51, %c2, %c0_52] : memref<1x15x128xf32, #tpu.memory_space<vmem>>, vector<1x1x128xf32>
    %98 = vector.shape_cast %97 : vector<1x1x128xf32> to vector<1x128xf32>
    %99 = vector.shape_cast %96 : vector<1x128xf32> to vector<1x1x128xf32>
    tpu.vector_store %arg26[%c0_51, %c2, %c0_52], %99 {strides = array<i32>} : memref<1x15x128xf32, #tpu.memory_space<vmem>>, vector<1x1x128xf32>,
    %100 = vector.broadcast %95 : f32 to vector<1x128xf32>
    %c0_53 = arith.constant 0 : index
    %c2_54 = arith.constant 2 : index
    %c0_55 = arith.constant 0 : index
    %101 = vector.load %arg27[%c0_53, %c2_54, %c0_55] : memref<1x15x128xf32, #tpu.memory_space<vmem>>, vector<1x1x128xf32>
    %102 = vector.shape_cast %101 : vector<1x1x128xf32> to vector<1x128xf32>
    %103 = vector.shape_cast %100 : vector<1x128xf32> to vector<1x1x128xf32>
    tpu.vector_store %arg27[%c0_53, %c2_54, %c0_55], %103 {strides = array<i32>} : memref<1x15x128xf32, #tpu.memory_space<vmem>>, vector<1x1x128xf32>,
    %cst_56 = arith.constant dense<0.000000e+00> : vector<96x64xf32>
    %104 = tpu.matmul %5, %0, %cst_56 {dimension_numbers = #tpu.dot_dimension_numbers<[1], [0], [0], [1], [0, 0, 1, 1], [], []>} : vector<96x192xf32>, vector<192x64xf32>, vector<96x64xf32> -> vector<96x64xf32>
    %cst_57 = arith.constant dense<0.000000e+00> : vector<96x32xf32>
    %105 = tpu.matmul %104, %6, %cst_57 {dimension_numbers = #tpu.dot_dimension_numbers<[1], [0], [0], [1], [0, 0, 1, 1], [], []>} : vector<96x64xf32>, vector<64x32xf32>, vector<96x32xf32> -> vector<96x32xf32>
    %cst_58 = arith.constant 2.500000e-01 : f32
    %106 = vector.broadcast %cst_58 : f32 to vector<96x32xf32>
    %107 = arith.mulf %106, %105 : vector<96x32xf32>
    %cst_59 = arith.constant dense<0.000000e+00> : vector<96x64xf32>
    %108 = tpu.matmul %5, %1, %cst_59 {dimension_numbers = #tpu.dot_dimension_numbers<[1], [0], [0], [1], [0, 0, 1, 1], [], []>} : vector<96x192xf32>, vector<192x64xf32>, vector<96x64xf32> -> vector<96x64xf32>
    %cst_60 = arith.constant dense<0.000000e+00> : vector<96x32xf32>
    %109 = tpu.matmul %108, %6, %cst_60 {dimension_numbers = #tpu.dot_dimension_numbers<[1], [0], [0], [1], [0, 0, 1, 1], [], []>} : vector<96x64xf32>, vector<64x32xf32>, vector<96x32xf32> -> vector<96x32xf32>
    %cst_61 = arith.constant 2.500000e-01 : f32
    %110 = vector.broadcast %cst_61 : f32 to vector<96x32xf32>
    %111 = arith.mulf %110, %109 : vector<96x32xf32>
    %c0_62 = arith.constant 0 : index
    %c0_63 = arith.constant 0 : index
    %112 = vector.load %arg8[%c0_62, %c0_63] : memref<96x96xf32, #tpu.memory_space<vmem>>, vector<96x96xf32>
    %c0_64 = arith.constant 0 : index
    %c0_65 = arith.constant 0 : index
    %113 = vector.load %arg9[%c0_64, %c0_65] : memref<32x128xf32, #tpu.memory_space<vmem>>, vector<32x128xf32>
    %c0_66 = arith.constant 0 : index
    %c0_67 = arith.constant 0 : index
    %114 = vector.load %arg10[%c0_66, %c0_67] : memref<96x128xf32, #tpu.memory_space<vmem>>, vector<96x128xf32>
    %c0_68 = arith.constant 0 : index
    %c0_69 = arith.constant 0 : index
    %115 = vector.load %arg11[%c0_68, %c0_69] : memref<48x96xf32, #tpu.memory_space<vmem>>, vector<48x96xf32>
    %c0_70 = arith.constant 0 : index
    %c0_71 = arith.constant 0 : index
    %116 = vector.load %arg12[%c0_70, %c0_71] : memref<32x16xf32, #tpu.memory_space<vmem>>, vector<32x16xf32>
    %cst_72 = arith.constant dense<0.000000e+00> : vector<96x32xf32>
    %117 = tpu.matmul %112, %107, %cst_72 {dimension_numbers = #tpu.dot_dimension_numbers<[1], [0], [0], [1], [0, 0, 1, 1], [], []>} : vector<96x96xf32>, vector<96x32xf32>, vector<96x32xf32> -> vector<96x32xf32>
    %cst_73 = arith.constant dense<0.000000e+00> : vector<96x128xf32>
    %118 = tpu.matmul %117, %113, %cst_73 {dimension_numbers = #tpu.dot_dimension_numbers<[1], [0], [0], [1], [0, 0, 1, 1], [], []>} : vector<96x32xf32>, vector<32x128xf32>, vector<96x128xf32> -> vector<96x128xf32>
    %cst_74 = arith.constant dense<0.000000e+00> : vector<96x32xf32>
    %119 = tpu.matmul %112, %111, %cst_74 {dimension_numbers = #tpu.dot_dimension_numbers<[1], [0], [0], [1], [0, 0, 1, 1], [], []>} : vector<96x96xf32>, vector<96x32xf32>, vector<96x32xf32> -> vector<96x32xf32>
    %cst_75 = arith.constant dense<0.000000e+00> : vector<96x128xf32>
    %120 = tpu.matmul %119, %113, %cst_75 {dimension_numbers = #tpu.dot_dimension_numbers<[1], [0], [0], [1], [0, 0, 1, 1], [], []>} : vector<96x32xf32>, vector<32x128xf32>, vector<96x128xf32> -> vector<96x128xf32>
    %121 = arith.mulf %118, %118 : vector<96x128xf32>
    %122 = arith.mulf %120, %120 : vector<96x128xf32>
    %123 = arith.mulf %118, %120 : vector<96x128xf32>
    %cst_76 = arith.constant 2.000000e+00 : f32
    %124 = vector.broadcast %cst_76 : f32 to vector<96x128xf32>
    %125 = arith.mulf %124, %123 : vector<96x128xf32>
    %cst_77 = arith.constant 9.99999974E-5 : f32
    %126 = vector.broadcast %cst_77 : f32 to vector<96x128xf32>
    %127 = arith.addf %125, %126 : vector<96x128xf32>
    %128 = arith.addf %121, %122 : vector<96x128xf32>
    %cst_78 = arith.constant 9.99999974E-5 : f32
    %129 = vector.broadcast %cst_78 : f32 to vector<96x128xf32>
    %130 = arith.addf %128, %129 : vector<96x128xf32>
    %131 = arith.divf %127, %130 : vector<96x128xf32>
    %132 = arith.mulf %107, %107 : vector<96x32xf32>
    %cst_79 = arith.constant dense<0.000000e+00> : vector<96x32xf32>
    %133 = tpu.matmul %112, %132, %cst_79 {dimension_numbers = #tpu.dot_dimension_numbers<[1], [0], [0], [1], [0, 0, 1, 1], [], []>} : vector<96x96xf32>, vector<96x32xf32>, vector<96x32xf32> -> vector<96x32xf32>
    %cst_80 = arith.constant dense<0.000000e+00> : vector<96x128xf32>
    %134 = tpu.matmul %133, %113, %cst_80 {dimension_numbers = #tpu.dot_dimension_numbers<[1], [0], [0], [1], [0, 0, 1, 1], [], []>} : vector<96x32xf32>, vector<32x128xf32>, vector<96x128xf32> -> vector<96x128xf32>
    %135 = arith.subf %134, %121 : vector<96x128xf32>
    %136 = arith.mulf %111, %111 : vector<96x32xf32>
    %cst_81 = arith.constant dense<0.000000e+00> : vector<96x32xf32>
    %137 = tpu.matmul %112, %136, %cst_81 {dimension_numbers = #tpu.dot_dimension_numbers<[1], [0], [0], [1], [0, 0, 1, 1], [], []>} : vector<96x96xf32>, vector<96x32xf32>, vector<96x32xf32> -> vector<96x32xf32>
    %cst_82 = arith.constant dense<0.000000e+00> : vector<96x128xf32>
    %138 = tpu.matmul %137, %113, %cst_82 {dimension_numbers = #tpu.dot_dimension_numbers<[1], [0], [0], [1], [0, 0, 1, 1], [], []>} : vector<96x32xf32>, vector<32x128xf32>, vector<96x128xf32> -> vector<96x128xf32>
    %139 = arith.subf %138, %122 : vector<96x128xf32>
    %140 = arith.mulf %107, %111 : vector<96x32xf32>
    %cst_83 = arith.constant dense<0.000000e+00> : vector<96x32xf32>
    %141 = tpu.matmul %112, %140, %cst_83 {dimension_numbers = #tpu.dot_dimension_numbers<[1], [0], [0], [1], [0, 0, 1, 1], [], []>} : vector<96x96xf32>, vector<96x32xf32>, vector<96x32xf32> -> vector<96x32xf32>
    %cst_84 = arith.constant dense<0.000000e+00> : vector<96x128xf32>
    %142 = tpu.matmul %141, %113, %cst_84 {dimension_numbers = #tpu.dot_dimension_numbers<[1], [0], [0], [1], [0, 0, 1, 1], [], []>} : vector<96x32xf32>, vector<32x128xf32>, vector<96x128xf32> -> vector<96x128xf32>
    %143 = arith.subf %142, %123 : vector<96x128xf32>
    %cst_85 = arith.constant 2.000000e+00 : f32
    %144 = vector.broadcast %cst_85 : f32 to vector<96x128xf32>
    %145 = arith.mulf %144, %143 : vector<96x128xf32>
    %cst_86 = arith.constant 8.99999984E-4 : f32
    %146 = vector.broadcast %cst_86 : f32 to vector<96x128xf32>
    %147 = arith.addf %145, %146 : vector<96x128xf32>
    %148 = arith.addf %135, %139 : vector<96x128xf32>
    %cst_87 = arith.constant 8.99999984E-4 : f32
    %149 = vector.broadcast %cst_87 : f32 to vector<96x128xf32>
    %150 = arith.addf %148, %149 : vector<96x128xf32>
    %151 = arith.divf %147, %150 : vector<96x128xf32>
    %152 = arith.mulf %151, %114 : vector<96x128xf32>
    %153 = arith.mulf %131, %152 : vector<96x128xf32>
    %154 = vector.extract_strided_slice %153 {offsets = [0, 0], sizes = [32, 128], strides = [1, 1]} : vector<96x128xf32> to vector<32x128xf32>
    %155 = vector.shape_cast %154 : vector<32x128xf32> to vector<1x32x128xf32>
    %cst_88 = arith.constant dense<0.000000e+00> : vector<1xf32>
    %156 = vector.multi_reduction <add>, %155, %cst_88 [1, 2] : vector<1x32x128xf32> to vector<1xf32>
    %157 = vector.shape_cast %156 : vector<1xf32> to vector<1x1x1xf32>
    %158 = vector.extract %157[0, 0, 0] : f32 from vector<1x1x1xf32>
    %cst_89 = arith.constant 0.00111111114 : f32
    %159 = arith.mulf %158, %cst_89 : f32
    %160 = vector.extract_strided_slice %152 {offsets = [0, 0], sizes = [32, 128], strides = [1, 1]} : vector<96x128xf32> to vector<32x128xf32>
    %161 = vector.shape_cast %160 : vector<32x128xf32> to vector<1x32x128xf32>
    %cst_90 = arith.constant dense<0.000000e+00> : vector<1xf32>
    %162 = vector.multi_reduction <add>, %161, %cst_90 [1, 2] : vector<1x32x128xf32> to vector<1xf32>
    %163 = vector.shape_cast %162 : vector<1xf32> to vector<1x1x1xf32>
    %164 = vector.extract %163[0, 0, 0] : f32 from vector<1x1x1xf32>
    %cst_91 = arith.constant 0.00111111114 : f32
    %165 = arith.mulf %164, %cst_91 : f32
    %166 = vector.broadcast %159 : f32 to vector<1x128xf32>
    %c0_92 = arith.constant 0 : index
    %c3 = arith.constant 3 : index
    %c0_93 = arith.constant 0 : index
    %167 = vector.load %arg26[%c0_92, %c3, %c0_93] : memref<1x15x128xf32, #tpu.memory_space<vmem>>, vector<1x1x128xf32>
    %168 = vector.shape_cast %167 : vector<1x1x128xf32> to vector<1x128xf32>
    %169 = vector.shape_cast %166 : vector<1x128xf32> to vector<1x1x128xf32>
    tpu.vector_store %arg26[%c0_92, %c3, %c0_93], %169 {strides = array<i32>} : memref<1x15x128xf32, #tpu.memory_space<vmem>>, vector<1x1x128xf32>,
    %170 = vector.broadcast %165 : f32 to vector<1x128xf32>
    %c0_94 = arith.constant 0 : index
    %c3_95 = arith.constant 3 : index
    %c0_96 = arith.constant 0 : index
    %171 = vector.load %arg27[%c0_94, %c3_95, %c0_96] : memref<1x15x128xf32, #tpu.memory_space<vmem>>, vector<1x1x128xf32>
    %172 = vector.shape_cast %171 : vector<1x1x128xf32> to vector<1x128xf32>
    %173 = vector.shape_cast %170 : vector<1x128xf32> to vector<1x1x128xf32>
    tpu.vector_store %arg27[%c0_94, %c3_95, %c0_96], %173 {strides = array<i32>} : memref<1x15x128xf32, #tpu.memory_space<vmem>>, vector<1x1x128xf32>,
    %174 = vector.extract_strided_slice %153 {offsets = [32, 0], sizes = [32, 128], strides = [1, 1]} : vector<96x128xf32> to vector<32x128xf32>
    %175 = vector.shape_cast %174 : vector<32x128xf32> to vector<1x32x128xf32>
    %cst_97 = arith.constant dense<0.000000e+00> : vector<1xf32>
    %176 = vector.multi_reduction <add>, %175, %cst_97 [1, 2] : vector<1x32x128xf32> to vector<1xf32>
    %177 = vector.shape_cast %176 : vector<1xf32> to vector<1x1x1xf32>
    %178 = vector.extract %177[0, 0, 0] : f32 from vector<1x1x1xf32>
    %cst_98 = arith.constant 0.00111111114 : f32
    %179 = arith.mulf %178, %cst_98 : f32
    %180 = vector.extract_strided_slice %152 {offsets = [32, 0], sizes = [32, 128], strides = [1, 1]} : vector<96x128xf32> to vector<32x128xf32>
    %181 = vector.shape_cast %180 : vector<32x128xf32> to vector<1x32x128xf32>
    %cst_99 = arith.constant dense<0.000000e+00> : vector<1xf32>
    %182 = vector.multi_reduction <add>, %181, %cst_99 [1, 2] : vector<1x32x128xf32> to vector<1xf32>
    %183 = vector.shape_cast %182 : vector<1xf32> to vector<1x1x1xf32>
    %184 = vector.extract %183[0, 0, 0] : f32 from vector<1x1x1xf32>
    %cst_100 = arith.constant 0.00111111114 : f32
    %185 = arith.mulf %184, %cst_100 : f32
    %186 = vector.broadcast %179 : f32 to vector<1x128xf32>
    %c0_101 = arith.constant 0 : index
    %c4 = arith.constant 4 : index
    %c0_102 = arith.constant 0 : index
    %187 = vector.load %arg26[%c0_101, %c4, %c0_102] : memref<1x15x128xf32, #tpu.memory_space<vmem>>, vector<1x1x128xf32>
    %188 = vector.shape_cast %187 : vector<1x1x128xf32> to vector<1x128xf32>
    %189 = vector.shape_cast %186 : vector<1x128xf32> to vector<1x1x128xf32>
    tpu.vector_store %arg26[%c0_101, %c4, %c0_102], %189 {strides = array<i32>} : memref<1x15x128xf32, #tpu.memory_space<vmem>>, vector<1x1x128xf32>,
    %190 = vector.broadcast %185 : f32 to vector<1x128xf32>
    %c0_103 = arith.constant 0 : index
    %c4_104 = arith.constant 4 : index
    %c0_105 = arith.constant 0 : index
    %191 = vector.load %arg27[%c0_103, %c4_104, %c0_105] : memref<1x15x128xf32, #tpu.memory_space<vmem>>, vector<1x1x128xf32>
    %192 = vector.shape_cast %191 : vector<1x1x128xf32> to vector<1x128xf32>
    %193 = vector.shape_cast %190 : vector<1x128xf32> to vector<1x1x128xf32>
    tpu.vector_store %arg27[%c0_103, %c4_104, %c0_105], %193 {strides = array<i32>} : memref<1x15x128xf32, #tpu.memory_space<vmem>>, vector<1x1x128xf32>,
    %194 = vector.extract_strided_slice %153 {offsets = [64, 0], sizes = [32, 128], strides = [1, 1]} : vector<96x128xf32> to vector<32x128xf32>
    %195 = vector.shape_cast %194 : vector<32x128xf32> to vector<1x32x128xf32>
    %cst_106 = arith.constant dense<0.000000e+00> : vector<1xf32>
    %196 = vector.multi_reduction <add>, %195, %cst_106 [1, 2] : vector<1x32x128xf32> to vector<1xf32>
    %197 = vector.shape_cast %196 : vector<1xf32> to vector<1x1x1xf32>
    %198 = vector.extract %197[0, 0, 0] : f32 from vector<1x1x1xf32>
    %cst_107 = arith.constant 0.00111111114 : f32
    %199 = arith.mulf %198, %cst_107 : f32
    %200 = vector.extract_strided_slice %152 {offsets = [64, 0], sizes = [32, 128], strides = [1, 1]} : vector<96x128xf32> to vector<32x128xf32>
    %201 = vector.shape_cast %200 : vector<32x128xf32> to vector<1x32x128xf32>
    %cst_108 = arith.constant dense<0.000000e+00> : vector<1xf32>
    %202 = vector.multi_reduction <add>, %201, %cst_108 [1, 2] : vector<1x32x128xf32> to vector<1xf32>
    %203 = vector.shape_cast %202 : vector<1xf32> to vector<1x1x1xf32>
    %204 = vector.extract %203[0, 0, 0] : f32 from vector<1x1x1xf32>
    %cst_109 = arith.constant 0.00111111114 : f32
    %205 = arith.mulf %204, %cst_109 : f32
    %206 = vector.broadcast %199 : f32 to vector<1x128xf32>
    %c0_110 = arith.constant 0 : index
    %c5 = arith.constant 5 : index
    %c0_111 = arith.constant 0 : index
    %207 = vector.load %arg26[%c0_110, %c5, %c0_111] : memref<1x15x128xf32, #tpu.memory_space<vmem>>, vector<1x1x128xf32>
    %208 = vector.shape_cast %207 : vector<1x1x128xf32> to vector<1x128xf32>
    %209 = vector.shape_cast %206 : vector<1x128xf32> to vector<1x1x128xf32>
    tpu.vector_store %arg26[%c0_110, %c5, %c0_111], %209 {strides = array<i32>} : memref<1x15x128xf32, #tpu.memory_space<vmem>>, vector<1x1x128xf32>,
    %210 = vector.broadcast %205 : f32 to vector<1x128xf32>
    %c0_112 = arith.constant 0 : index
    %c5_113 = arith.constant 5 : index
    %c0_114 = arith.constant 0 : index
    %211 = vector.load %arg27[%c0_112, %c5_113, %c0_114] : memref<1x15x128xf32, #tpu.memory_space<vmem>>, vector<1x1x128xf32>
    %212 = vector.shape_cast %211 : vector<1x1x128xf32> to vector<1x128xf32>
    %213 = vector.shape_cast %210 : vector<1x128xf32> to vector<1x1x128xf32>
    tpu.vector_store %arg27[%c0_112, %c5_113, %c0_114], %213 {strides = array<i32>} : memref<1x15x128xf32, #tpu.memory_space<vmem>>, vector<1x1x128xf32>,
    %cst_115 = arith.constant dense<0.000000e+00> : vector<48x32xf32>
    %214 = tpu.matmul %115, %107, %cst_115 {dimension_numbers = #tpu.dot_dimension_numbers<[1], [0], [0], [1], [0, 0, 1, 1], [], []>} : vector<48x96xf32>, vector<96x32xf32>, vector<48x32xf32> -> vector<48x32xf32>
    %cst_116 = arith.constant dense<0.000000e+00> : vector<48x16xf32>
    %215 = tpu.matmul %214, %116, %cst_116 {dimension_numbers = #tpu.dot_dimension_numbers<[1], [0], [0], [1], [0, 0, 1, 1], [], []>} : vector<48x32xf32>, vector<32x16xf32>, vector<48x16xf32> -> vector<48x16xf32>
    %cst_117 = arith.constant 2.500000e-01 : f32
    %216 = vector.broadcast %cst_117 : f32 to vector<48x16xf32>
    %217 = arith.mulf %216, %215 : vector<48x16xf32>
    %cst_118 = arith.constant dense<0.000000e+00> : vector<48x32xf32>
    %218 = tpu.matmul %115, %111, %cst_118 {dimension_numbers = #tpu.dot_dimension_numbers<[1], [0], [0], [1], [0, 0, 1, 1], [], []>} : vector<48x96xf32>, vector<96x32xf32>, vector<48x32xf32> -> vector<48x32xf32>
    %cst_119 = arith.constant dense<0.000000e+00> : vector<48x16xf32>
    %219 = tpu.matmul %218, %116, %cst_119 {dimension_numbers = #tpu.dot_dimension_numbers<[1], [0], [0], [1], [0, 0, 1, 1], [], []>} : vector<48x32xf32>, vector<32x16xf32>, vector<48x16xf32> -> vector<48x16xf32>
    %cst_120 = arith.constant 2.500000e-01 : f32
    %220 = vector.broadcast %cst_120 : f32 to vector<48x16xf32>
    %221 = arith.mulf %220, %219 : vector<48x16xf32>
    %c0_121 = arith.constant 0 : index
    %c0_122 = arith.constant 0 : index
    %222 = vector.load %arg13[%c0_121, %c0_122] : memref<48x48xf32, #tpu.memory_space<vmem>>, vector<48x48xf32>
    %c0_123 = arith.constant 0 : index
    %c0_124 = arith.constant 0 : index
    %223 = vector.load %arg14[%c0_123, %c0_124] : memref<16x128xf32, #tpu.memory_space<vmem>>, vector<16x128xf32>
    %c0_125 = arith.constant 0 : index
    %c0_126 = arith.constant 0 : index
    %224 = vector.load %arg15[%c0_125, %c0_126] : memref<48x128xf32, #tpu.memory_space<vmem>>, vector<48x128xf32>
    %c0_127 = arith.constant 0 : index
    %c0_128 = arith.constant 0 : index
    %225 = vector.load %arg16[%c0_127, %c0_128] : memref<24x48xf32, #tpu.memory_space<vmem>>, vector<24x48xf32>
    %c0_129 = arith.constant 0 : index
    %c0_130 = arith.constant 0 : index
    %226 = vector.load %arg17[%c0_129, %c0_130] : memref<16x8xf32, #tpu.memory_space<vmem>>, vector<16x8xf32>
    %cst_131 = arith.constant dense<0.000000e+00> : vector<48x16xf32>
    %227 = tpu.matmul %222, %217, %cst_131 {dimension_numbers = #tpu.dot_dimension_numbers<[1], [0], [0], [1], [0, 0, 1, 1], [], []>} : vector<48x48xf32>, vector<48x16xf32>, vector<48x16xf32> -> vector<48x16xf32>
    %cst_132 = arith.constant dense<0.000000e+00> : vector<48x128xf32>
    %228 = tpu.matmul %227, %223, %cst_132 {dimension_numbers = #tpu.dot_dimension_numbers<[1], [0], [0], [1], [0, 0, 1, 1], [], []>} : vector<48x16xf32>, vector<16x128xf32>, vector<48x128xf32> -> vector<48x128xf32>
    %cst_133 = arith.constant dense<0.000000e+00> : vector<48x16xf32>
    %229 = tpu.matmul %222, %221, %cst_133 {dimension_numbers = #tpu.dot_dimension_numbers<[1], [0], [0], [1], [0, 0, 1, 1], [], []>} : vector<48x48xf32>, vector<48x16xf32>, vector<48x16xf32> -> vector<48x16xf32>
    %cst_134 = arith.constant dense<0.000000e+00> : vector<48x128xf32>
    %230 = tpu.matmul %229, %223, %cst_134 {dimension_numbers = #tpu.dot_dimension_numbers<[1], [0], [0], [1], [0, 0, 1, 1], [], []>} : vector<48x16xf32>, vector<16x128xf32>, vector<48x128xf32> -> vector<48x128xf32>
    %231 = arith.mulf %228, %228 : vector<48x128xf32>
    %232 = arith.mulf %230, %230 : vector<48x128xf32>
    %233 = arith.mulf %228, %230 : vector<48x128xf32>
    %cst_135 = arith.constant 2.000000e+00 : f32
    %234 = vector.broadcast %cst_135 : f32 to vector<48x128xf32>
    %235 = arith.mulf %234, %233 : vector<48x128xf32>
    %cst_136 = arith.constant 9.99999974E-5 : f32
    %236 = vector.broadcast %cst_136 : f32 to vector<48x128xf32>
    %237 = arith.addf %235, %236 : vector<48x128xf32>
    %238 = arith.addf %231, %232 : vector<48x128xf32>
    %cst_137 = arith.constant 9.99999974E-5 : f32
    %239 = vector.broadcast %cst_137 : f32 to vector<48x128xf32>
    %240 = arith.addf %238, %239 : vector<48x128xf32>
    %241 = arith.divf %237, %240 : vector<48x128xf32>
    %242 = arith.mulf %217, %217 : vector<48x16xf32>
    %cst_138 = arith.constant dense<0.000000e+00> : vector<48x16xf32>
    %243 = tpu.matmul %222, %242, %cst_138 {dimension_numbers = #tpu.dot_dimension_numbers<[1], [0], [0], [1], [0, 0, 1, 1], [], []>} : vector<48x48xf32>, vector<48x16xf32>, vector<48x16xf32> -> vector<48x16xf32>
    %cst_139 = arith.constant dense<0.000000e+00> : vector<48x128xf32>
    %244 = tpu.matmul %243, %223, %cst_139 {dimension_numbers = #tpu.dot_dimension_numbers<[1], [0], [0], [1], [0, 0, 1, 1], [], []>} : vector<48x16xf32>, vector<16x128xf32>, vector<48x128xf32> -> vector<48x128xf32>
    %245 = arith.subf %244, %231 : vector<48x128xf32>
    %246 = arith.mulf %221, %221 : vector<48x16xf32>
    %cst_140 = arith.constant dense<0.000000e+00> : vector<48x16xf32>
    %247 = tpu.matmul %222, %246, %cst_140 {dimension_numbers = #tpu.dot_dimension_numbers<[1], [0], [0], [1], [0, 0, 1, 1], [], []>} : vector<48x48xf32>, vector<48x16xf32>, vector<48x16xf32> -> vector<48x16xf32>
    %cst_141 = arith.constant dense<0.000000e+00> : vector<48x128xf32>
    %248 = tpu.matmul %247, %223, %cst_141 {dimension_numbers = #tpu.dot_dimension_numbers<[1], [0], [0], [1], [0, 0, 1, 1], [], []>} : vector<48x16xf32>, vector<16x128xf32>, vector<48x128xf32> -> vector<48x128xf32>
    %249 = arith.subf %248, %232 : vector<48x128xf32>
    %250 = arith.mulf %217, %221 : vector<48x16xf32>
    %cst_142 = arith.constant dense<0.000000e+00> : vector<48x16xf32>
    %251 = tpu.matmul %222, %250, %cst_142 {dimension_numbers = #tpu.dot_dimension_numbers<[1], [0], [0], [1], [0, 0, 1, 1], [], []>} : vector<48x48xf32>, vector<48x16xf32>, vector<48x16xf32> -> vector<48x16xf32>
    %cst_143 = arith.constant dense<0.000000e+00> : vector<48x128xf32>
    %252 = tpu.matmul %251, %223, %cst_143 {dimension_numbers = #tpu.dot_dimension_numbers<[1], [0], [0], [1], [0, 0, 1, 1], [], []>} : vector<48x16xf32>, vector<16x128xf32>, vector<48x128xf32> -> vector<48x128xf32>
    %253 = arith.subf %252, %233 : vector<48x128xf32>
    %cst_144 = arith.constant 2.000000e+00 : f32
    %254 = vector.broadcast %cst_144 : f32 to vector<48x128xf32>
    %255 = arith.mulf %254, %253 : vector<48x128xf32>
    %cst_145 = arith.constant 8.99999984E-4 : f32
    %256 = vector.broadcast %cst_145 : f32 to vector<48x128xf32>
    %257 = arith.addf %255, %256 : vector<48x128xf32>
    %258 = arith.addf %245, %249 : vector<48x128xf32>
    %cst_146 = arith.constant 8.99999984E-4 : f32
    %259 = vector.broadcast %cst_146 : f32 to vector<48x128xf32>
    %260 = arith.addf %258, %259 : vector<48x128xf32>
    %261 = arith.divf %257, %260 : vector<48x128xf32>
    %262 = arith.mulf %261, %224 : vector<48x128xf32>
    %263 = arith.mulf %241, %262 : vector<48x128xf32>
    %264 = vector.extract_strided_slice %263 {offsets = [0, 0], sizes = [16, 128], strides = [1, 1]} : vector<48x128xf32> to vector<16x128xf32>
    %265 = vector.shape_cast %264 : vector<16x128xf32> to vector<1x16x128xf32>
    %cst_147 = arith.constant dense<0.000000e+00> : vector<1xf32>
    %266 = vector.multi_reduction <add>, %265, %cst_147 [1, 2] : vector<1x16x128xf32> to vector<1xf32>
    %267 = vector.shape_cast %266 : vector<1xf32> to vector<1x1x1xf32>
    %268 = vector.extract %267[0, 0, 0] : f32 from vector<1x1x1xf32>
    %cst_148 = arith.constant 0.00510204071 : f32
    %269 = arith.mulf %268, %cst_148 : f32
    %270 = vector.extract_strided_slice %262 {offsets = [0, 0], sizes = [16, 128], strides = [1, 1]} : vector<48x128xf32> to vector<16x128xf32>
    %271 = vector.shape_cast %270 : vector<16x128xf32> to vector<1x16x128xf32>
    %cst_149 = arith.constant dense<0.000000e+00> : vector<1xf32>
    %272 = vector.multi_reduction <add>, %271, %cst_149 [1, 2] : vector<1x16x128xf32> to vector<1xf32>
    %273 = vector.shape_cast %272 : vector<1xf32> to vector<1x1x1xf32>
    %274 = vector.extract %273[0, 0, 0] : f32 from vector<1x1x1xf32>
    %cst_150 = arith.constant 0.00510204071 : f32
    %275 = arith.mulf %274, %cst_150 : f32
    %276 = vector.broadcast %269 : f32 to vector<1x128xf32>
    %c0_151 = arith.constant 0 : index
    %c6 = arith.constant 6 : index
    %c0_152 = arith.constant 0 : index
    %277 = vector.load %arg26[%c0_151, %c6, %c0_152] : memref<1x15x128xf32, #tpu.memory_space<vmem>>, vector<1x1x128xf32>
    %278 = vector.shape_cast %277 : vector<1x1x128xf32> to vector<1x128xf32>
    %279 = vector.shape_cast %276 : vector<1x128xf32> to vector<1x1x128xf32>
    tpu.vector_store %arg26[%c0_151, %c6, %c0_152], %279 {strides = array<i32>} : memref<1x15x128xf32, #tpu.memory_space<vmem>>, vector<1x1x128xf32>,
    %280 = vector.broadcast %275 : f32 to vector<1x128xf32>
    %c0_153 = arith.constant 0 : index
    %c6_154 = arith.constant 6 : index
    %c0_155 = arith.constant 0 : index
    %281 = vector.load %arg27[%c0_153, %c6_154, %c0_155] : memref<1x15x128xf32, #tpu.memory_space<vmem>>, vector<1x1x128xf32>
    %282 = vector.shape_cast %281 : vector<1x1x128xf32> to vector<1x128xf32>
    %283 = vector.shape_cast %280 : vector<1x128xf32> to vector<1x1x128xf32>
    tpu.vector_store %arg27[%c0_153, %c6_154, %c0_155], %283 {strides = array<i32>} : memref<1x15x128xf32, #tpu.memory_space<vmem>>, vector<1x1x128xf32>,
    %284 = vector.extract_strided_slice %263 {offsets = [16, 0], sizes = [16, 128], strides = [1, 1]} : vector<48x128xf32> to vector<16x128xf32>
    %285 = vector.shape_cast %284 : vector<16x128xf32> to vector<1x16x128xf32>
    %cst_156 = arith.constant dense<0.000000e+00> : vector<1xf32>
    %286 = vector.multi_reduction <add>, %285, %cst_156 [1, 2] : vector<1x16x128xf32> to vector<1xf32>
    %287 = vector.shape_cast %286 : vector<1xf32> to vector<1x1x1xf32>
    %288 = vector.extract %287[0, 0, 0] : f32 from vector<1x1x1xf32>
    %cst_157 = arith.constant 0.00510204071 : f32
    %289 = arith.mulf %288, %cst_157 : f32
    %290 = vector.extract_strided_slice %262 {offsets = [16, 0], sizes = [16, 128], strides = [1, 1]} : vector<48x128xf32> to vector<16x128xf32>
    %291 = vector.shape_cast %290 : vector<16x128xf32> to vector<1x16x128xf32>
    %cst_158 = arith.constant dense<0.000000e+00> : vector<1xf32>
    %292 = vector.multi_reduction <add>, %291, %cst_158 [1, 2] : vector<1x16x128xf32> to vector<1xf32>
    %293 = vector.shape_cast %292 : vector<1xf32> to vector<1x1x1xf32>
    %294 = vector.extract %293[0, 0, 0] : f32 from vector<1x1x1xf32>
    %cst_159 = arith.constant 0.00510204071 : f32
    %295 = arith.mulf %294, %cst_159 : f32
    %296 = vector.broadcast %289 : f32 to vector<1x128xf32>
    %c0_160 = arith.constant 0 : index
    %c7 = arith.constant 7 : index
    %c0_161 = arith.constant 0 : index
    %297 = vector.load %arg26[%c0_160, %c7, %c0_161] : memref<1x15x128xf32, #tpu.memory_space<vmem>>, vector<1x1x128xf32>
    %298 = vector.shape_cast %297 : vector<1x1x128xf32> to vector<1x128xf32>
    %299 = vector.shape_cast %296 : vector<1x128xf32> to vector<1x1x128xf32>
    tpu.vector_store %arg26[%c0_160, %c7, %c0_161], %299 {strides = array<i32>} : memref<1x15x128xf32, #tpu.memory_space<vmem>>, vector<1x1x128xf32>,
    %300 = vector.broadcast %295 : f32 to vector<1x128xf32>
    %c0_162 = arith.constant 0 : index
    %c7_163 = arith.constant 7 : index
    %c0_164 = arith.constant 0 : index
    %301 = vector.load %arg27[%c0_162, %c7_163, %c0_164] : memref<1x15x128xf32, #tpu.memory_space<vmem>>, vector<1x1x128xf32>
    %302 = vector.shape_cast %301 : vector<1x1x128xf32> to vector<1x128xf32>
    %303 = vector.shape_cast %300 : vector<1x128xf32> to vector<1x1x128xf32>
    tpu.vector_store %arg27[%c0_162, %c7_163, %c0_164], %303 {strides = array<i32>} : memref<1x15x128xf32, #tpu.memory_space<vmem>>, vector<1x1x128xf32>,
    %304 = vector.extract_strided_slice %263 {offsets = [32, 0], sizes = [16, 128], strides = [1, 1]} : vector<48x128xf32> to vector<16x128xf32>
    %305 = vector.shape_cast %304 : vector<16x128xf32> to vector<1x16x128xf32>
    %cst_165 = arith.constant dense<0.000000e+00> : vector<1xf32>
    %306 = vector.multi_reduction <add>, %305, %cst_165 [1, 2] : vector<1x16x128xf32> to vector<1xf32>
    %307 = vector.shape_cast %306 : vector<1xf32> to vector<1x1x1xf32>
    %308 = vector.extract %307[0, 0, 0] : f32 from vector<1x1x1xf32>
    %cst_166 = arith.constant 0.00510204071 : f32
    %309 = arith.mulf %308, %cst_166 : f32
    %310 = vector.extract_strided_slice %262 {offsets = [32, 0], sizes = [16, 128], strides = [1, 1]} : vector<48x128xf32> to vector<16x128xf32>
    %311 = vector.shape_cast %310 : vector<16x128xf32> to vector<1x16x128xf32>
    %cst_167 = arith.constant dense<0.000000e+00> : vector<1xf32>
    %312 = vector.multi_reduction <add>, %311, %cst_167 [1, 2] : vector<1x16x128xf32> to vector<1xf32>
    %313 = vector.shape_cast %312 : vector<1xf32> to vector<1x1x1xf32>
    %314 = vector.extract %313[0, 0, 0] : f32 from vector<1x1x1xf32>
    %cst_168 = arith.constant 0.00510204071 : f32
    %315 = arith.mulf %314, %cst_168 : f32
    %316 = vector.broadcast %309 : f32 to vector<1x128xf32>
    %c0_169 = arith.constant 0 : index
    %c8 = arith.constant 8 : index
    %c0_170 = arith.constant 0 : index
    %317 = vector.load %arg26[%c0_169, %c8, %c0_170] : memref<1x15x128xf32, #tpu.memory_space<vmem>>, vector<1x1x128xf32>
    %318 = vector.shape_cast %317 : vector<1x1x128xf32> to vector<1x128xf32>
    %319 = vector.shape_cast %316 : vector<1x128xf32> to vector<1x1x128xf32>
    tpu.vector_store %arg26[%c0_169, %c8, %c0_170], %319 {strides = array<i32>} : memref<1x15x128xf32, #tpu.memory_space<vmem>>, vector<1x1x128xf32>,
    %320 = vector.broadcast %315 : f32 to vector<1x128xf32>
    %c0_171 = arith.constant 0 : index
    %c8_172 = arith.constant 8 : index
    %c0_173 = arith.constant 0 : index
    %321 = vector.load %arg27[%c0_171, %c8_172, %c0_173] : memref<1x15x128xf32, #tpu.memory_space<vmem>>, vector<1x1x128xf32>
    %322 = vector.shape_cast %321 : vector<1x1x128xf32> to vector<1x128xf32>
    %323 = vector.shape_cast %320 : vector<1x128xf32> to vector<1x1x128xf32>
    tpu.vector_store %arg27[%c0_171, %c8_172, %c0_173], %323 {strides = array<i32>} : memref<1x15x128xf32, #tpu.memory_space<vmem>>, vector<1x1x128xf32>,
    %cst_174 = arith.constant dense<0.000000e+00> : vector<24x16xf32>
    %324 = tpu.matmul %225, %217, %cst_174 {dimension_numbers = #tpu.dot_dimension_numbers<[1], [0], [0], [1], [0, 0, 1, 1], [], []>} : vector<24x48xf32>, vector<48x16xf32>, vector<24x16xf32> -> vector<24x16xf32>
    %cst_175 = arith.constant dense<0.000000e+00> : vector<24x8xf32>
    %325 = tpu.matmul %324, %226, %cst_175 {dimension_numbers = #tpu.dot_dimension_numbers<[1], [0], [0], [1], [0, 0, 1, 1], [], []>} : vector<24x16xf32>, vector<16x8xf32>, vector<24x8xf32> -> vector<24x8xf32>
    %cst_176 = arith.constant 2.500000e-01 : f32
    %326 = vector.broadcast %cst_176 : f32 to vector<24x8xf32>
    %327 = arith.mulf %326, %325 : vector<24x8xf32>
    %cst_177 = arith.constant dense<0.000000e+00> : vector<24x16xf32>
    %328 = tpu.matmul %225, %221, %cst_177 {dimension_numbers = #tpu.dot_dimension_numbers<[1], [0], [0], [1], [0, 0, 1, 1], [], []>} : vector<24x48xf32>, vector<48x16xf32>, vector<24x16xf32> -> vector<24x16xf32>
    %cst_178 = arith.constant dense<0.000000e+00> : vector<24x8xf32>
    %329 = tpu.matmul %328, %226, %cst_178 {dimension_numbers = #tpu.dot_dimension_numbers<[1], [0], [0], [1], [0, 0, 1, 1], [], []>} : vector<24x16xf32>, vector<16x8xf32>, vector<24x8xf32> -> vector<24x8xf32>
    %cst_179 = arith.constant 2.500000e-01 : f32
    %330 = vector.broadcast %cst_179 : f32 to vector<24x8xf32>
    %331 = arith.mulf %330, %329 : vector<24x8xf32>
    %c0_180 = arith.constant 0 : index
    %c0_181 = arith.constant 0 : index
    %332 = vector.load %arg18[%c0_180, %c0_181] : memref<24x24xf32, #tpu.memory_space<vmem>>, vector<24x24xf32>
    %c0_182 = arith.constant 0 : index
    %c0_183 = arith.constant 0 : index
    %333 = vector.load %arg19[%c0_182, %c0_183] : memref<8x128xf32, #tpu.memory_space<vmem>>, vector<8x128xf32>
    %c0_184 = arith.constant 0 : index
    %c0_185 = arith.constant 0 : index
    %334 = vector.load %arg20[%c0_184, %c0_185] : memref<24x128xf32, #tpu.memory_space<vmem>>, vector<24x128xf32>
    %c0_186 = arith.constant 0 : index
    %c0_187 = arith.constant 0 : index
    %335 = vector.load %arg21[%c0_186, %c0_187] : memref<12x24xf32, #tpu.memory_space<vmem>>, vector<12x24xf32>
    %c0_188 = arith.constant 0 : index
    %c0_189 = arith.constant 0 : index
    %336 = vector.load %arg22[%c0_188, %c0_189] : memref<8x4xf32, #tpu.memory_space<vmem>>, vector<8x4xf32>
    %cst_190 = arith.constant dense<0.000000e+00> : vector<24x8xf32>
    %337 = tpu.matmul %332, %327, %cst_190 {dimension_numbers = #tpu.dot_dimension_numbers<[1], [0], [0], [1], [0, 0, 1, 1], [], []>} : vector<24x24xf32>, vector<24x8xf32>, vector<24x8xf32> -> vector<24x8xf32>
    %cst_191 = arith.constant dense<0.000000e+00> : vector<24x128xf32>
    %338 = tpu.matmul %337, %333, %cst_191 {dimension_numbers = #tpu.dot_dimension_numbers<[1], [0], [0], [1], [0, 0, 1, 1], [], []>} : vector<24x8xf32>, vector<8x128xf32>, vector<24x128xf32> -> vector<24x128xf32>
    %cst_192 = arith.constant dense<0.000000e+00> : vector<24x8xf32>
    %339 = tpu.matmul %332, %331, %cst_192 {dimension_numbers = #tpu.dot_dimension_numbers<[1], [0], [0], [1], [0, 0, 1, 1], [], []>} : vector<24x24xf32>, vector<24x8xf32>, vector<24x8xf32> -> vector<24x8xf32>
    %cst_193 = arith.constant dense<0.000000e+00> : vector<24x128xf32>
    %340 = tpu.matmul %339, %333, %cst_193 {dimension_numbers = #tpu.dot_dimension_numbers<[1], [0], [0], [1], [0, 0, 1, 1], [], []>} : vector<24x8xf32>, vector<8x128xf32>, vector<24x128xf32> -> vector<24x128xf32>
    %341 = arith.mulf %338, %338 : vector<24x128xf32>
    %342 = arith.mulf %340, %340 : vector<24x128xf32>
    %343 = arith.mulf %338, %340 : vector<24x128xf32>
    %cst_194 = arith.constant 2.000000e+00 : f32
    %344 = vector.broadcast %cst_194 : f32 to vector<24x128xf32>
    %345 = arith.mulf %344, %343 : vector<24x128xf32>
    %cst_195 = arith.constant 9.99999974E-5 : f32
    %346 = vector.broadcast %cst_195 : f32 to vector<24x128xf32>
    %347 = arith.addf %345, %346 : vector<24x128xf32>
    %348 = arith.addf %341, %342 : vector<24x128xf32>
    %cst_196 = arith.constant 9.99999974E-5 : f32
    %349 = vector.broadcast %cst_196 : f32 to vector<24x128xf32>
    %350 = arith.addf %348, %349 : vector<24x128xf32>
    %351 = arith.divf %347, %350 : vector<24x128xf32>
    %352 = arith.mulf %327, %327 : vector<24x8xf32>
    %cst_197 = arith.constant dense<0.000000e+00> : vector<24x8xf32>
    %353 = tpu.matmul %332, %352, %cst_197 {dimension_numbers = #tpu.dot_dimension_numbers<[1], [0], [0], [1], [0, 0, 1, 1], [], []>} : vector<24x24xf32>, vector<24x8xf32>, vector<24x8xf32> -> vector<24x8xf32>
    %cst_198 = arith.constant dense<0.000000e+00> : vector<24x128xf32>
    %354 = tpu.matmul %353, %333, %cst_198 {dimension_numbers = #tpu.dot_dimension_numbers<[1], [0], [0], [1], [0, 0, 1, 1], [], []>} : vector<24x8xf32>, vector<8x128xf32>, vector<24x128xf32> -> vector<24x128xf32>
    %355 = arith.subf %354, %341 : vector<24x128xf32>
    %356 = arith.mulf %331, %331 : vector<24x8xf32>
    %cst_199 = arith.constant dense<0.000000e+00> : vector<24x8xf32>
    %357 = tpu.matmul %332, %356, %cst_199 {dimension_numbers = #tpu.dot_dimension_numbers<[1], [0], [0], [1], [0, 0, 1, 1], [], []>} : vector<24x24xf32>, vector<24x8xf32>, vector<24x8xf32> -> vector<24x8xf32>
    %cst_200 = arith.constant dense<0.000000e+00> : vector<24x128xf32>
    %358 = tpu.matmul %357, %333, %cst_200 {dimension_numbers = #tpu.dot_dimension_numbers<[1], [0], [0], [1], [0, 0, 1, 1], [], []>} : vector<24x8xf32>, vector<8x128xf32>, vector<24x128xf32> -> vector<24x128xf32>
    %359 = arith.subf %358, %342 : vector<24x128xf32>
    %360 = arith.mulf %327, %331 : vector<24x8xf32>
    %cst_201 = arith.constant dense<0.000000e+00> : vector<24x8xf32>
    %361 = tpu.matmul %332, %360, %cst_201 {dimension_numbers = #tpu.dot_dimension_numbers<[1], [0], [0], [1], [0, 0, 1, 1], [], []>} : vector<24x24xf32>, vector<24x8xf32>, vector<24x8xf32> -> vector<24x8xf32>
    %cst_202 = arith.constant dense<0.000000e+00> : vector<24x128xf32>
    %362 = tpu.matmul %361, %333, %cst_202 {dimension_numbers = #tpu.dot_dimension_numbers<[1], [0], [0], [1], [0, 0, 1, 1], [], []>} : vector<24x8xf32>, vector<8x128xf32>, vector<24x128xf32> -> vector<24x128xf32>
    %363 = arith.subf %362, %343 : vector<24x128xf32>
    %cst_203 = arith.constant 2.000000e+00 : f32
    %364 = vector.broadcast %cst_203 : f32 to vector<24x128xf32>
    %365 = arith.mulf %364, %363 : vector<24x128xf32>
    %cst_204 = arith.constant 8.99999984E-4 : f32
    %366 = vector.broadcast %cst_204 : f32 to vector<24x128xf32>
    %367 = arith.addf %365, %366 : vector<24x128xf32>
    %368 = arith.addf %355, %359 : vector<24x128xf32>
    %cst_205 = arith.constant 8.99999984E-4 : f32
    %369 = vector.broadcast %cst_205 : f32 to vector<24x128xf32>
    %370 = arith.addf %368, %369 : vector<24x128xf32>
    %371 = arith.divf %367, %370 : vector<24x128xf32>
    %372 = arith.mulf %371, %334 : vector<24x128xf32>
    %373 = arith.mulf %351, %372 : vector<24x128xf32>
    %374 = vector.extract_strided_slice %373 {offsets = [0, 0], sizes = [8, 128], strides = [1, 1]} : vector<24x128xf32> to vector<8x128xf32>
    %375 = vector.shape_cast %374 : vector<8x128xf32> to vector<1x8x128xf32>
    %cst_206 = arith.constant dense<0.000000e+00> : vector<1xf32>
    %376 = vector.multi_reduction <add>, %375, %cst_206 [1, 2] : vector<1x8x128xf32> to vector<1xf32>
    %377 = vector.shape_cast %376 : vector<1xf32> to vector<1x1x1xf32>
    %378 = vector.extract %377[0, 0, 0] : f32 from vector<1x1x1xf32>
    %cst_207 = arith.constant 0.027777778 : f32
    %379 = arith.mulf %378, %cst_207 : f32
    %380 = vector.extract_strided_slice %372 {offsets = [0, 0], sizes = [8, 128], strides = [1, 1]} : vector<24x128xf32> to vector<8x128xf32>
    %381 = vector.shape_cast %380 : vector<8x128xf32> to vector<1x8x128xf32>
    %cst_208 = arith.constant dense<0.000000e+00> : vector<1xf32>
    %382 = vector.multi_reduction <add>, %381, %cst_208 [1, 2] : vector<1x8x128xf32> to vector<1xf32>
    %383 = vector.shape_cast %382 : vector<1xf32> to vector<1x1x1xf32>
    %384 = vector.extract %383[0, 0, 0] : f32 from vector<1x1x1xf32>
    %cst_209 = arith.constant 0.027777778 : f32
    %385 = arith.mulf %384, %cst_209 : f32
    %386 = vector.broadcast %379 : f32 to vector<1x128xf32>
    %c0_210 = arith.constant 0 : index
    %c9 = arith.constant 9 : index
    %c0_211 = arith.constant 0 : index
    %387 = vector.load %arg26[%c0_210, %c9, %c0_211] : memref<1x15x128xf32, #tpu.memory_space<vmem>>, vector<1x1x128xf32>
    %388 = vector.shape_cast %387 : vector<1x1x128xf32> to vector<1x128xf32>
    %389 = vector.shape_cast %386 : vector<1x128xf32> to vector<1x1x128xf32>
    tpu.vector_store %arg26[%c0_210, %c9, %c0_211], %389 {strides = array<i32>} : memref<1x15x128xf32, #tpu.memory_space<vmem>>, vector<1x1x128xf32>,
    %390 = vector.broadcast %385 : f32 to vector<1x128xf32>
    %c0_212 = arith.constant 0 : index
    %c9_213 = arith.constant 9 : index
    %c0_214 = arith.constant 0 : index
    %391 = vector.load %arg27[%c0_212, %c9_213, %c0_214] : memref<1x15x128xf32, #tpu.memory_space<vmem>>, vector<1x1x128xf32>
    %392 = vector.shape_cast %391 : vector<1x1x128xf32> to vector<1x128xf32>
    %393 = vector.shape_cast %390 : vector<1x128xf32> to vector<1x1x128xf32>
    tpu.vector_store %arg27[%c0_212, %c9_213, %c0_214], %393 {strides = array<i32>} : memref<1x15x128xf32, #tpu.memory_space<vmem>>, vector<1x1x128xf32>,
    %394 = vector.extract_strided_slice %373 {offsets = [8, 0], sizes = [8, 128], strides = [1, 1]} : vector<24x128xf32> to vector<8x128xf32>
    %395 = vector.shape_cast %394 : vector<8x128xf32> to vector<1x8x128xf32>
    %cst_215 = arith.constant dense<0.000000e+00> : vector<1xf32>
    %396 = vector.multi_reduction <add>, %395, %cst_215 [1, 2] : vector<1x8x128xf32> to vector<1xf32>
    %397 = vector.shape_cast %396 : vector<1xf32> to vector<1x1x1xf32>
    %398 = vector.extract %397[0, 0, 0] : f32 from vector<1x1x1xf32>
    %cst_216 = arith.constant 0.027777778 : f32
    %399 = arith.mulf %398, %cst_216 : f32
    %400 = vector.extract_strided_slice %372 {offsets = [8, 0], sizes = [8, 128], strides = [1, 1]} : vector<24x128xf32> to vector<8x128xf32>
    %401 = vector.shape_cast %400 : vector<8x128xf32> to vector<1x8x128xf32>
    %cst_217 = arith.constant dense<0.000000e+00> : vector<1xf32>
    %402 = vector.multi_reduction <add>, %401, %cst_217 [1, 2] : vector<1x8x128xf32> to vector<1xf32>
    %403 = vector.shape_cast %402 : vector<1xf32> to vector<1x1x1xf32>
    %404 = vector.extract %403[0, 0, 0] : f32 from vector<1x1x1xf32>
    %cst_218 = arith.constant 0.027777778 : f32
    %405 = arith.mulf %404, %cst_218 : f32
    %406 = vector.broadcast %399 : f32 to vector<1x128xf32>
    %c0_219 = arith.constant 0 : index
    %c10 = arith.constant 10 : index
    %c0_220 = arith.constant 0 : index
    %407 = vector.load %arg26[%c0_219, %c10, %c0_220] : memref<1x15x128xf32, #tpu.memory_space<vmem>>, vector<1x1x128xf32>
    %408 = vector.shape_cast %407 : vector<1x1x128xf32> to vector<1x128xf32>
    %409 = vector.shape_cast %406 : vector<1x128xf32> to vector<1x1x128xf32>
    tpu.vector_store %arg26[%c0_219, %c10, %c0_220], %409 {strides = array<i32>} : memref<1x15x128xf32, #tpu.memory_space<vmem>>, vector<1x1x128xf32>,
    %410 = vector.broadcast %405 : f32 to vector<1x128xf32>
    %c0_221 = arith.constant 0 : index
    %c10_222 = arith.constant 10 : index
    %c0_223 = arith.constant 0 : index
    %411 = vector.load %arg27[%c0_221, %c10_222, %c0_223] : memref<1x15x128xf32, #tpu.memory_space<vmem>>, vector<1x1x128xf32>
    %412 = vector.shape_cast %411 : vector<1x1x128xf32> to vector<1x128xf32>
    %413 = vector.shape_cast %410 : vector<1x128xf32> to vector<1x1x128xf32>
    tpu.vector_store %arg27[%c0_221, %c10_222, %c0_223], %413 {strides = array<i32>} : memref<1x15x128xf32, #tpu.memory_space<vmem>>, vector<1x1x128xf32>,
    %414 = vector.extract_strided_slice %373 {offsets = [16, 0], sizes = [8, 128], strides = [1, 1]} : vector<24x128xf32> to vector<8x128xf32>
    %415 = vector.shape_cast %414 : vector<8x128xf32> to vector<1x8x128xf32>
    %cst_224 = arith.constant dense<0.000000e+00> : vector<1xf32>
    %416 = vector.multi_reduction <add>, %415, %cst_224 [1, 2] : vector<1x8x128xf32> to vector<1xf32>
    %417 = vector.shape_cast %416 : vector<1xf32> to vector<1x1x1xf32>
    %418 = vector.extract %417[0, 0, 0] : f32 from vector<1x1x1xf32>
    %cst_225 = arith.constant 0.027777778 : f32
    %419 = arith.mulf %418, %cst_225 : f32
    %420 = vector.extract_strided_slice %372 {offsets = [16, 0], sizes = [8, 128], strides = [1, 1]} : vector<24x128xf32> to vector<8x128xf32>
    %421 = vector.shape_cast %420 : vector<8x128xf32> to vector<1x8x128xf32>
    %cst_226 = arith.constant dense<0.000000e+00> : vector<1xf32>
    %422 = vector.multi_reduction <add>, %421, %cst_226 [1, 2] : vector<1x8x128xf32> to vector<1xf32>
    %423 = vector.shape_cast %422 : vector<1xf32> to vector<1x1x1xf32>
    %424 = vector.extract %423[0, 0, 0] : f32 from vector<1x1x1xf32>
    %cst_227 = arith.constant 0.027777778 : f32
    %425 = arith.mulf %424, %cst_227 : f32
    %426 = vector.broadcast %419 : f32 to vector<1x128xf32>
    %c0_228 = arith.constant 0 : index
    %c11 = arith.constant 11 : index
    %c0_229 = arith.constant 0 : index
    %427 = vector.load %arg26[%c0_228, %c11, %c0_229] : memref<1x15x128xf32, #tpu.memory_space<vmem>>, vector<1x1x128xf32>
    %428 = vector.shape_cast %427 : vector<1x1x128xf32> to vector<1x128xf32>
    %429 = vector.shape_cast %426 : vector<1x128xf32> to vector<1x1x128xf32>
    tpu.vector_store %arg26[%c0_228, %c11, %c0_229], %429 {strides = array<i32>} : memref<1x15x128xf32, #tpu.memory_space<vmem>>, vector<1x1x128xf32>,
    %430 = vector.broadcast %425 : f32 to vector<1x128xf32>
    %c0_230 = arith.constant 0 : index
    %c11_231 = arith.constant 11 : index
    %c0_232 = arith.constant 0 : index
    %431 = vector.load %arg27[%c0_230, %c11_231, %c0_232] : memref<1x15x128xf32, #tpu.memory_space<vmem>>, vector<1x1x128xf32>
    %432 = vector.shape_cast %431 : vector<1x1x128xf32> to vector<1x128xf32>
    %433 = vector.shape_cast %430 : vector<1x128xf32> to vector<1x1x128xf32>
    tpu.vector_store %arg27[%c0_230, %c11_231, %c0_232], %433 {strides = array<i32>} : memref<1x15x128xf32, #tpu.memory_space<vmem>>, vector<1x1x128xf32>,
    %cst_233 = arith.constant dense<0.000000e+00> : vector<12x8xf32>
    %434 = tpu.matmul %335, %327, %cst_233 {dimension_numbers = #tpu.dot_dimension_numbers<[1], [0], [0], [1], [0, 0, 1, 1], [], []>} : vector<12x24xf32>, vector<24x8xf32>, vector<12x8xf32> -> vector<12x8xf32>
    %cst_234 = arith.constant dense<0.000000e+00> : vector<12x4xf32>
    %435 = tpu.matmul %434, %336, %cst_234 {dimension_numbers = #tpu.dot_dimension_numbers<[1], [0], [0], [1], [0, 0, 1, 1], [], []>} : vector<12x8xf32>, vector<8x4xf32>, vector<12x4xf32> -> vector<12x4xf32>
    %cst_235 = arith.constant 2.500000e-01 : f32
    %436 = vector.broadcast %cst_235 : f32 to vector<12x4xf32>
    %437 = arith.mulf %436, %435 : vector<12x4xf32>
    %cst_236 = arith.constant dense<0.000000e+00> : vector<12x8xf32>
    %438 = tpu.matmul %335, %331, %cst_236 {dimension_numbers = #tpu.dot_dimension_numbers<[1], [0], [0], [1], [0, 0, 1, 1], [], []>} : vector<12x24xf32>, vector<24x8xf32>, vector<12x8xf32> -> vector<12x8xf32>
    %cst_237 = arith.constant dense<0.000000e+00> : vector<12x4xf32>
    %439 = tpu.matmul %438, %336, %cst_237 {dimension_numbers = #tpu.dot_dimension_numbers<[1], [0], [0], [1], [0, 0, 1, 1], [], []>} : vector<12x8xf32>, vector<8x4xf32>, vector<12x4xf32> -> vector<12x4xf32>
    %cst_238 = arith.constant 2.500000e-01 : f32
    %440 = vector.broadcast %cst_238 : f32 to vector<12x4xf32>
    %441 = arith.mulf %440, %439 : vector<12x4xf32>
    %c0_239 = arith.constant 0 : index
    %c0_240 = arith.constant 0 : index
    %442 = vector.load %arg23[%c0_239, %c0_240] : memref<24x12xf32, #tpu.memory_space<vmem>>, vector<24x12xf32>
    %c0_241 = arith.constant 0 : index
    %c0_242 = arith.constant 0 : index
    %443 = vector.load %arg24[%c0_241, %c0_242] : memref<4x128xf32, #tpu.memory_space<vmem>>, vector<4x128xf32>
    %c0_243 = arith.constant 0 : index
    %c0_244 = arith.constant 0 : index
    %444 = vector.load %arg25[%c0_243, %c0_244] : memref<24x128xf32, #tpu.memory_space<vmem>>, vector<24x128xf32>
    %cst_245 = arith.constant dense<0.000000e+00> : vector<24x4xf32>
    %445 = tpu.matmul %442, %437, %cst_245 {dimension_numbers = #tpu.dot_dimension_numbers<[1], [0], [0], [1], [0, 0, 1, 1], [], []>} : vector<24x12xf32>, vector<12x4xf32>, vector<24x4xf32> -> vector<24x4xf32>
    %cst_246 = arith.constant dense<0.000000e+00> : vector<24x128xf32>
    %446 = tpu.matmul %445, %443, %cst_246 {dimension_numbers = #tpu.dot_dimension_numbers<[1], [0], [0], [1], [0, 0, 1, 1], [], []>} : vector<24x4xf32>, vector<4x128xf32>, vector<24x128xf32> -> vector<24x128xf32>
    %cst_247 = arith.constant dense<0.000000e+00> : vector<24x4xf32>
    %447 = tpu.matmul %442, %441, %cst_247 {dimension_numbers = #tpu.dot_dimension_numbers<[1], [0], [0], [1], [0, 0, 1, 1], [], []>} : vector<24x12xf32>, vector<12x4xf32>, vector<24x4xf32> -> vector<24x4xf32>
    %cst_248 = arith.constant dense<0.000000e+00> : vector<24x128xf32>
    %448 = tpu.matmul %447, %443, %cst_248 {dimension_numbers = #tpu.dot_dimension_numbers<[1], [0], [0], [1], [0, 0, 1, 1], [], []>} : vector<24x4xf32>, vector<4x128xf32>, vector<24x128xf32> -> vector<24x128xf32>
    %449 = arith.mulf %446, %446 : vector<24x128xf32>
    %450 = arith.mulf %448, %448 : vector<24x128xf32>
    %451 = arith.mulf %446, %448 : vector<24x128xf32>
    %cst_249 = arith.constant 2.000000e+00 : f32
    %452 = vector.broadcast %cst_249 : f32 to vector<24x128xf32>
    %453 = arith.mulf %452, %451 : vector<24x128xf32>
    %cst_250 = arith.constant 9.99999974E-5 : f32
    %454 = vector.broadcast %cst_250 : f32 to vector<24x128xf32>
    %455 = arith.addf %453, %454 : vector<24x128xf32>
    %456 = arith.addf %449, %450 : vector<24x128xf32>
    %cst_251 = arith.constant 9.99999974E-5 : f32
    %457 = vector.broadcast %cst_251 : f32 to vector<24x128xf32>
    %458 = arith.addf %456, %457 : vector<24x128xf32>
    %459 = arith.divf %455, %458 : vector<24x128xf32>
    %460 = arith.mulf %437, %437 : vector<12x4xf32>
    %cst_252 = arith.constant dense<0.000000e+00> : vector<24x4xf32>
    %461 = tpu.matmul %442, %460, %cst_252 {dimension_numbers = #tpu.dot_dimension_numbers<[1], [0], [0], [1], [0, 0, 1, 1], [], []>} : vector<24x12xf32>, vector<12x4xf32>, vector<24x4xf32> -> vector<24x4xf32>
    %cst_253 = arith.constant dense<0.000000e+00> : vector<24x128xf32>
    %462 = tpu.matmul %461, %443, %cst_253 {dimension_numbers = #tpu.dot_dimension_numbers<[1], [0], [0], [1], [0, 0, 1, 1], [], []>} : vector<24x4xf32>, vector<4x128xf32>, vector<24x128xf32> -> vector<24x128xf32>
    %463 = arith.subf %462, %449 : vector<24x128xf32>
    %464 = arith.mulf %441, %441 : vector<12x4xf32>
    %cst_254 = arith.constant dense<0.000000e+00> : vector<24x4xf32>
    %465 = tpu.matmul %442, %464, %cst_254 {dimension_numbers = #tpu.dot_dimension_numbers<[1], [0], [0], [1], [0, 0, 1, 1], [], []>} : vector<24x12xf32>, vector<12x4xf32>, vector<24x4xf32> -> vector<24x4xf32>
    %cst_255 = arith.constant dense<0.000000e+00> : vector<24x128xf32>
    %466 = tpu.matmul %465, %443, %cst_255 {dimension_numbers = #tpu.dot_dimension_numbers<[1], [0], [0], [1], [0, 0, 1, 1], [], []>} : vector<24x4xf32>, vector<4x128xf32>, vector<24x128xf32> -> vector<24x128xf32>
    %467 = arith.subf %466, %450 : vector<24x128xf32>
    %468 = arith.mulf %437, %441 : vector<12x4xf32>
    %cst_256 = arith.constant dense<0.000000e+00> : vector<24x4xf32>
    %469 = tpu.matmul %442, %468, %cst_256 {dimension_numbers = #tpu.dot_dimension_numbers<[1], [0], [0], [1], [0, 0, 1, 1], [], []>} : vector<24x12xf32>, vector<12x4xf32>, vector<24x4xf32> -> vector<24x4xf32>
    %cst_257 = arith.constant dense<0.000000e+00> : vector<24x128xf32>
    %470 = tpu.matmul %469, %443, %cst_257 {dimension_numbers = #tpu.dot_dimension_numbers<[1], [0], [0], [1], [0, 0, 1, 1], [], []>} : vector<24x4xf32>, vector<4x128xf32>, vector<24x128xf32> -> vector<24x128xf32>
    %471 = arith.subf %470, %451 : vector<24x128xf32>
    %cst_258 = arith.constant 2.000000e+00 : f32
    %472 = vector.broadcast %cst_258 : f32 to vector<24x128xf32>
    %473 = arith.mulf %472, %471 : vector<24x128xf32>
    %cst_259 = arith.constant 8.99999984E-4 : f32
    %474 = vector.broadcast %cst_259 : f32 to vector<24x128xf32>
    %475 = arith.addf %473, %474 : vector<24x128xf32>
    %476 = arith.addf %463, %467 : vector<24x128xf32>
    %cst_260 = arith.constant 8.99999984E-4 : f32
    %477 = vector.broadcast %cst_260 : f32 to vector<24x128xf32>
    %478 = arith.addf %476, %477 : vector<24x128xf32>
    %479 = arith.divf %475, %478 : vector<24x128xf32>
    %480 = arith.mulf %479, %444 : vector<24x128xf32>
    %481 = arith.mulf %459, %480 : vector<24x128xf32>
    %482 = vector.extract_strided_slice %481 {offsets = [0, 0], sizes = [8, 128], strides = [1, 1]} : vector<24x128xf32> to vector<8x128xf32>
    %483 = vector.shape_cast %482 : vector<8x128xf32> to vector<1x8x128xf32>
    %cst_261 = arith.constant dense<0.000000e+00> : vector<1xf32>
    %484 = vector.multi_reduction <add>, %483, %cst_261 [1, 2] : vector<1x8x128xf32> to vector<1xf32>
    %485 = vector.shape_cast %484 : vector<1xf32> to vector<1x1x1xf32>
    %486 = vector.extract %485[0, 0, 0] : f32 from vector<1x1x1xf32>
    %cst_262 = arith.constant 2.500000e-01 : f32
    %487 = arith.mulf %486, %cst_262 : f32
    %488 = vector.extract_strided_slice %480 {offsets = [0, 0], sizes = [8, 128], strides = [1, 1]} : vector<24x128xf32> to vector<8x128xf32>
    %489 = vector.shape_cast %488 : vector<8x128xf32> to vector<1x8x128xf32>
    %cst_263 = arith.constant dense<0.000000e+00> : vector<1xf32>
    %490 = vector.multi_reduction <add>, %489, %cst_263 [1, 2] : vector<1x8x128xf32> to vector<1xf32>
    %491 = vector.shape_cast %490 : vector<1xf32> to vector<1x1x1xf32>
    %492 = vector.extract %491[0, 0, 0] : f32 from vector<1x1x1xf32>
    %cst_264 = arith.constant 2.500000e-01 : f32
    %493 = arith.mulf %492, %cst_264 : f32
    %494 = vector.broadcast %487 : f32 to vector<1x128xf32>
    %c0_265 = arith.constant 0 : index
    %c12 = arith.constant 12 : index
    %c0_266 = arith.constant 0 : index
    %495 = vector.load %arg26[%c0_265, %c12, %c0_266] : memref<1x15x128xf32, #tpu.memory_space<vmem>>, vector<1x1x128xf32>
    %496 = vector.shape_cast %495 : vector<1x1x128xf32> to vector<1x128xf32>
    %497 = vector.shape_cast %494 : vector<1x128xf32> to vector<1x1x128xf32>
    tpu.vector_store %arg26[%c0_265, %c12, %c0_266], %497 {strides = array<i32>} : memref<1x15x128xf32, #tpu.memory_space<vmem>>, vector<1x1x128xf32>,
    %498 = vector.broadcast %493 : f32 to vector<1x128xf32>
    %c0_267 = arith.constant 0 : index
    %c12_268 = arith.constant 12 : index
    %c0_269 = arith.constant 0 : index
    %499 = vector.load %arg27[%c0_267, %c12_268, %c0_269] : memref<1x15x128xf32, #tpu.memory_space<vmem>>, vector<1x1x128xf32>
    %500 = vector.shape_cast %499 : vector<1x1x128xf32> to vector<1x128xf32>
    %501 = vector.shape_cast %498 : vector<1x128xf32> to vector<1x1x128xf32>
    tpu.vector_store %arg27[%c0_267, %c12_268, %c0_269], %501 {strides = array<i32>} : memref<1x15x128xf32, #tpu.memory_space<vmem>>, vector<1x1x128xf32>,
    %502 = vector.extract_strided_slice %481 {offsets = [8, 0], sizes = [8, 128], strides = [1, 1]} : vector<24x128xf32> to vector<8x128xf32>
    %503 = vector.shape_cast %502 : vector<8x128xf32> to vector<1x8x128xf32>
    %cst_270 = arith.constant dense<0.000000e+00> : vector<1xf32>
    %504 = vector.multi_reduction <add>, %503, %cst_270 [1, 2] : vector<1x8x128xf32> to vector<1xf32>
    %505 = vector.shape_cast %504 : vector<1xf32> to vector<1x1x1xf32>
    %506 = vector.extract %505[0, 0, 0] : f32 from vector<1x1x1xf32>
    %cst_271 = arith.constant 2.500000e-01 : f32
    %507 = arith.mulf %506, %cst_271 : f32
    %508 = vector.extract_strided_slice %480 {offsets = [8, 0], sizes = [8, 128], strides = [1, 1]} : vector<24x128xf32> to vector<8x128xf32>
    %509 = vector.shape_cast %508 : vector<8x128xf32> to vector<1x8x128xf32>
    %cst_272 = arith.constant dense<0.000000e+00> : vector<1xf32>
    %510 = vector.multi_reduction <add>, %509, %cst_272 [1, 2] : vector<1x8x128xf32> to vector<1xf32>
    %511 = vector.shape_cast %510 : vector<1xf32> to vector<1x1x1xf32>
    %512 = vector.extract %511[0, 0, 0] : f32 from vector<1x1x1xf32>
    %cst_273 = arith.constant 2.500000e-01 : f32
    %513 = arith.mulf %512, %cst_273 : f32
    %514 = vector.broadcast %507 : f32 to vector<1x128xf32>
    %c0_274 = arith.constant 0 : index
    %c13 = arith.constant 13 : index
    %c0_275 = arith.constant 0 : index
    %515 = vector.load %arg26[%c0_274, %c13, %c0_275] : memref<1x15x128xf32, #tpu.memory_space<vmem>>, vector<1x1x128xf32>
    %516 = vector.shape_cast %515 : vector<1x1x128xf32> to vector<1x128xf32>
    %517 = vector.shape_cast %514 : vector<1x128xf32> to vector<1x1x128xf32>
    tpu.vector_store %arg26[%c0_274, %c13, %c0_275], %517 {strides = array<i32>} : memref<1x15x128xf32, #tpu.memory_space<vmem>>, vector<1x1x128xf32>,
    %518 = vector.broadcast %513 : f32 to vector<1x128xf32>
    %c0_276 = arith.constant 0 : index
    %c13_277 = arith.constant 13 : index
    %c0_278 = arith.constant 0 : index
    %519 = vector.load %arg27[%c0_276, %c13_277, %c0_278] : memref<1x15x128xf32, #tpu.memory_space<vmem>>, vector<1x1x128xf32>
    %520 = vector.shape_cast %519 : vector<1x1x128xf32> to vector<1x128xf32>
    %521 = vector.shape_cast %518 : vector<1x128xf32> to vector<1x1x128xf32>
    tpu.vector_store %arg27[%c0_276, %c13_277, %c0_278], %521 {strides = array<i32>} : memref<1x15x128xf32, #tpu.memory_space<vmem>>, vector<1x1x128xf32>,
    %522 = vector.extract_strided_slice %481 {offsets = [16, 0], sizes = [8, 128], strides = [1, 1]} : vector<24x128xf32> to vector<8x128xf32>
    %523 = vector.shape_cast %522 : vector<8x128xf32> to vector<1x8x128xf32>
    %cst_279 = arith.constant dense<0.000000e+00> : vector<1xf32>
    %524 = vector.multi_reduction <add>, %523, %cst_279 [1, 2] : vector<1x8x128xf32> to vector<1xf32>
    %525 = vector.shape_cast %524 : vector<1xf32> to vector<1x1x1xf32>
    %526 = vector.extract %525[0, 0, 0] : f32 from vector<1x1x1xf32>
    %cst_280 = arith.constant 2.500000e-01 : f32
    %527 = arith.mulf %526, %cst_280 : f32
    %528 = vector.extract_strided_slice %480 {offsets = [16, 0], sizes = [8, 128], strides = [1, 1]} : vector<24x128xf32> to vector<8x128xf32>
    %529 = vector.shape_cast %528 : vector<8x128xf32> to vector<1x8x128xf32>
    %cst_281 = arith.constant dense<0.000000e+00> : vector<1xf32>
    %530 = vector.multi_reduction <add>, %529, %cst_281 [1, 2] : vector<1x8x128xf32> to vector<1xf32>
    %531 = vector.shape_cast %530 : vector<1xf32> to vector<1x1x1xf32>
    %532 = vector.extract %531[0, 0, 0] : f32 from vector<1x1x1xf32>
    %cst_282 = arith.constant 2.500000e-01 : f32
    %533 = arith.mulf %532, %cst_282 : f32
    %534 = vector.broadcast %527 : f32 to vector<1x128xf32>
    %c0_283 = arith.constant 0 : index
    %c14 = arith.constant 14 : index
    %c0_284 = arith.constant 0 : index
    %535 = vector.load %arg26[%c0_283, %c14, %c0_284] : memref<1x15x128xf32, #tpu.memory_space<vmem>>, vector<1x1x128xf32>
    %536 = vector.shape_cast %535 : vector<1x1x128xf32> to vector<1x128xf32>
    %537 = vector.shape_cast %534 : vector<1x128xf32> to vector<1x1x128xf32>
    tpu.vector_store %arg26[%c0_283, %c14, %c0_284], %537 {strides = array<i32>} : memref<1x15x128xf32, #tpu.memory_space<vmem>>, vector<1x1x128xf32>,
    %538 = vector.broadcast %533 : f32 to vector<1x128xf32>
    %c0_285 = arith.constant 0 : index
    %c14_286 = arith.constant 14 : index
    %c0_287 = arith.constant 0 : index
    %539 = vector.load %arg27[%c0_285, %c14_286, %c0_287] : memref<1x15x128xf32, #tpu.memory_space<vmem>>, vector<1x1x128xf32>
    %540 = vector.shape_cast %539 : vector<1x1x128xf32> to vector<1x128xf32>
    %541 = vector.shape_cast %538 : vector<1x128xf32> to vector<1x1x128xf32>
    tpu.vector_store %arg27[%c0_285, %c14_286, %c0_287], %541 {strides = array<i32>} : memref<1x15x128xf32, #tpu.memory_space<vmem>>, vector<1x1x128xf32>,
    return
  }
  func.func @transform_0(%arg0: i32) -> (i32, i32) {
    %c0_i32 = arith.constant 0 : i32
    %c0_i32_0 = arith.constant 0 : i32
    return %arg0, %c0_i32 : i32, i32
  }
  func.func @transform_1(%arg0: i32) -> (i32, i32) {
    %c0_i32 = arith.constant 0 : i32
    %c0_i32_0 = arith.constant 0 : i32
    return %arg0, %c0_i32 : i32, i32
  }
  func.func @transform_2(%arg0: i32) -> (i32, i32) {
    %c0_i32 = arith.constant 0 : i32
    %c0_i32_0 = arith.constant 0 : i32
    %c0_i32_1 = arith.constant 0 : i32
    return %c0_i32, %c0_i32_0 : i32, i32
  }
  func.func @transform_3(%arg0: i32) -> (i32, i32) {
    %c0_i32 = arith.constant 0 : i32
    %c0_i32_0 = arith.constant 0 : i32
    %c0_i32_1 = arith.constant 0 : i32
    return %c0_i32, %c0_i32_0 : i32, i32
  }
  func.func @transform_4(%arg0: i32) -> (i32, i32) {
    %c0_i32 = arith.constant 0 : i32
    %c0_i32_0 = arith.constant 0 : i32
    %c0_i32_1 = arith.constant 0 : i32
    return %c0_i32, %c0_i32_0 : i32, i32
  }
  func.func @transform_5(%arg0: i32) -> (i32, i32) {
    %c0_i32 = arith.constant 0 : i32
    %c0_i32_0 = arith.constant 0 : i32
    %c0_i32_1 = arith.constant 0 : i32
    return %c0_i32, %c0_i32_0 : i32, i32
  }
  func.func @transform_6(%arg0: i32) -> (i32, i32) {
    %c0_i32 = arith.constant 0 : i32
    %c0_i32_0 = arith.constant 0 : i32
    %c0_i32_1 = arith.constant 0 : i32
    return %c0_i32, %c0_i32_0 : i32, i32
  }
  func.func @transform_7(%arg0: i32) -> (i32, i32) {
    %c0_i32 = arith.constant 0 : i32
    %c0_i32_0 = arith.constant 0 : i32
    %c0_i32_1 = arith.constant 0 : i32
    return %c0_i32, %c0_i32_0 : i32, i32
  }
  func.func @transform_8(%arg0: i32) -> (i32, i32) {
    %c0_i32 = arith.constant 0 : i32
    %c0_i32_0 = arith.constant 0 : i32
    %c0_i32_1 = arith.constant 0 : i32
    return %c0_i32, %c0_i32_0 : i32, i32
  }
  func.func @transform_9(%arg0: i32) -> (i32, i32) {
    %c0_i32 = arith.constant 0 : i32
    %c0_i32_0 = arith.constant 0 : i32
    %c0_i32_1 = arith.constant 0 : i32
    return %c0_i32, %c0_i32_0 : i32, i32
  }
  func.func @transform_10(%arg0: i32) -> (i32, i32) {
    %c0_i32 = arith.constant 0 : i32
    %c0_i32_0 = arith.constant 0 : i32
    %c0_i32_1 = arith.constant 0 : i32
    return %c0_i32, %c0_i32_0 : i32, i32
  }
  func.func @transform_11(%arg0: i32) -> (i32, i32) {
    %c0_i32 = arith.constant 0 : i32
    %c0_i32_0 = arith.constant 0 : i32
    %c0_i32_1 = arith.constant 0 : i32
    return %c0_i32, %c0_i32_0 : i32, i32
  }
  func.func @transform_12(%arg0: i32) -> (i32, i32) {
    %c0_i32 = arith.constant 0 : i32
    %c0_i32_0 = arith.constant 0 : i32
    %c0_i32_1 = arith.constant 0 : i32
    return %c0_i32, %c0_i32_0 : i32, i32
  }
  func.func @transform_13(%arg0: i32) -> (i32, i32) {
    %c0_i32 = arith.constant 0 : i32
    %c0_i32_0 = arith.constant 0 : i32
    %c0_i32_1 = arith.constant 0 : i32
    return %c0_i32, %c0_i32_0 : i32, i32
  }
  func.func @transform_14(%arg0: i32) -> (i32, i32) {
    %c0_i32 = arith.constant 0 : i32
    %c0_i32_0 = arith.constant 0 : i32
    %c0_i32_1 = arith.constant 0 : i32
    return %c0_i32, %c0_i32_0 : i32, i32
  }
  func.func @transform_15(%arg0: i32) -> (i32, i32) {
    %c0_i32 = arith.constant 0 : i32
    %c0_i32_0 = arith.constant 0 : i32
    %c0_i32_1 = arith.constant 0 : i32
    return %c0_i32, %c0_i32_0 : i32, i32
  }
  func.func @transform_16(%arg0: i32) -> (i32, i32) {
    %c0_i32 = arith.constant 0 : i32
    %c0_i32_0 = arith.constant 0 : i32
    %c0_i32_1 = arith.constant 0 : i32
    return %c0_i32, %c0_i32_0 : i32, i32
  }
  func.func @transform_17(%arg0: i32) -> (i32, i32) {
    %c0_i32 = arith.constant 0 : i32
    %c0_i32_0 = arith.constant 0 : i32
    %c0_i32_1 = arith.constant 0 : i32
    return %c0_i32, %c0_i32_0 : i32, i32
  }
  func.func @transform_18(%arg0: i32) -> (i32, i32) {
    %c0_i32 = arith.constant 0 : i32
    %c0_i32_0 = arith.constant 0 : i32
    %c0_i32_1 = arith.constant 0 : i32
    return %c0_i32, %c0_i32_0 : i32, i32
  }
  func.func @transform_19(%arg0: i32) -> (i32, i32) {
    %c0_i32 = arith.constant 0 : i32
    %c0_i32_0 = arith.constant 0 : i32
    %c0_i32_1 = arith.constant 0 : i32
    return %c0_i32, %c0_i32_0 : i32, i32
  }
  func.func @transform_20(%arg0: i32) -> (i32, i32) {
    %c0_i32 = arith.constant 0 : i32
    %c0_i32_0 = arith.constant 0 : i32
    %c0_i32_1 = arith.constant 0 : i32
    return %c0_i32, %c0_i32_0 : i32, i32
  }
  func.func @transform_21(%arg0: i32) -> (i32, i32) {
    %c0_i32 = arith.constant 0 : i32
    %c0_i32_0 = arith.constant 0 : i32
    %c0_i32_1 = arith.constant 0 : i32
    return %c0_i32, %c0_i32_0 : i32, i32
  }
  func.func @transform_22(%arg0: i32) -> (i32, i32) {
    %c0_i32 = arith.constant 0 : i32
    %c0_i32_0 = arith.constant 0 : i32
    %c0_i32_1 = arith.constant 0 : i32
    return %c0_i32, %c0_i32_0 : i32, i32
  }
  func.func @transform_23(%arg0: i32) -> (i32, i32) {
    %c0_i32 = arith.constant 0 : i32
    %c0_i32_0 = arith.constant 0 : i32
    %c0_i32_1 = arith.constant 0 : i32
    return %c0_i32, %c0_i32_0 : i32, i32
  }
  func.func @transform_24(%arg0: i32) -> (i32, i32) {
    %c0_i32 = arith.constant 0 : i32
    %c0_i32_0 = arith.constant 0 : i32
    %c0_i32_1 = arith.constant 0 : i32
    return %c0_i32, %c0_i32_0 : i32, i32
  }
  func.func @transform_25(%arg0: i32) -> (i32, i32, i32) {
    %c0_i32 = arith.constant 0 : i32
    %c0_i32_0 = arith.constant 0 : i32
    %c0_i32_1 = arith.constant 0 : i32
    return %arg0, %c0_i32, %c0_i32_0 : i32, i32, i32
  }
  func.func @transform_26(%arg0: i32) -> (i32, i32, i32) {
    %c0_i32 = arith.constant 0 : i32
    %c0_i32_0 = arith.constant 0 : i32
    %c0_i32_1 = arith.constant 0 : i32
    return %arg0, %c0_i32, %c0_i32_0 : i32, i32, i32
  }
}

</mosaic_0001>

<bundles_post_ra>
// kernel: squeeze.4
= control target key start
LH: loop header
LB: loop body
LE: loop exit
PB: predicated region body
PF: predicated region fallthrough
CT: control target
= control target key end

     0   :  { %s43_s8 = smov 125   ;;  %vm8_vm0 = vcmask 23552   ;;  %s44_s11 = smov 116   ;;  %s79_s0 = inlined_call_operand.vmem [shape: f32[2,15], index: 0, kind: input, shape index: {}]   ;;  %s80_s1 = inlined_call_operand.vmem [shape: f32[2,5,3], index: 1, kind: output, shape index: {}]  }
   0x1   :  { %v5_v0 = vld [vmem:[%s79_s0] sm:$0x3]  ;;  %s42_s0 = smov 119   ;;  %s45_s12 = smov 122  }
   0x2   :  { %6 = vst [vmem:[#allocation0] sm:$0x3] %v5_v0 }
   0x9   :  { %v22_v1 = vld [vmem:[#allocation0] sm:$0x3]  }
   0xa   :  { %v10_v2 = vld [vmem:[#allocation0] sm:$0x3]   ;;  %23 = vrot.lane.b32.xlu1 %v22_v1, %s42_s0 }
   0xb   :  { %11 = vrot.lane.b32.xlu0 %v10_v2, %s43_s8  ;;  %v7_v3 = vld [vmem:[#allocation0] sm:$0x3]  }
   0xc   :  { %v28_v4 = vld [vmem:[#allocation0] sm:$0x3]   ;;  %9 = vst.msk [vmem:[%s80_s1] ss:$8 sm:$0x3] %vm8_vm0, %v7_v3  }
   0xd   :  { %v16_v5 = vld [vmem:[#allocation0] sm:$0x3]  }
   0xe   :  { %29 = vrot.lane.b32.xlu1 %v28_v4, %s44_s11 }
   0xf   :  { %17 = vrot.lane.b32.xlu0 %v16_v5, %s45_s12 }
  0x7c   :  { %v24_v6 = vpop.permute.xlu1 %23  }
  0x7d   :  { %v12_v7 = vpop.permute.xlu0 %11   ;;  %36 = vst.msk [vmem:[%s80_s1 + $0x3] ss:$8 sm:$0x3] %vm8_vm0, %v24_v6  }
  0x7e   :  { %34 = vst.msk [vmem:[%s80_s1 + $0x1] ss:$8 sm:$0x3] %vm8_vm0, %v12_v7  }
  0x80   :  { %v30_v8 = vpop.permute.xlu1 %29  }
  0x81   :  { %v18_v9 = vpop.permute.xlu0 %17   ;;  %37 = vst.msk [vmem:[%s80_s1 + $0x4] ss:$8 sm:$0x3] %vm8_vm0, %v30_v8  }
  0x82   :  { %35 = vst.msk [vmem:[%s80_s1 + $0x2] ss:$8 sm:$0x3] %vm8_vm0, %v18_v9  }

// kernel: _lambda_.1
= control target key start
LH: loop header
LB: loop body
LE: loop exit
PB: predicated region body
PF: predicated region fallthrough
CT: control target
= control target key end

     0   :  { %s19900_s0 = inlined_call_operand.hbm [shape: f32[384,64], index: 0, kind: input, shape index: {}]   ;;  %s19901_s1 = inlined_call_operand.hbm [shape: f32[384,64], index: 1, kind: input, shape index: {}]   ;;  %s19902_s2 = inlined_call_operand.hbm [shape: f32[192,192], index: 2, kind: input, shape index: {}]   ;;  %s19903_s3 = inlined_call_operand.hbm [shape: f32[64,128], index: 3, kind: input, shape index: {}]   ;;  %s19904_s4 = inlined_call_operand.hbm [shape: f32[192,128], index: 4, kind: input, shape index: {}]   ;;  %s19905_s5 = inlined_call_operand.hbm [shape: f32[96,192], index: 5, kind: input, shape index: {}]   ;;  %s19906_s6 = inlined_call_operand.hbm [shape: f32[64,32], index: 6, kind: input, shape index: {}]   ;;  %s19907_s7 = inlined_call_operand.hbm [shape: f32[96,96], index: 7, kind: input, shape index: {}]   ;;  %s19908_s8 = inlined_call_operand.hbm [shape: f32[32,128], index: 8, kind: input, shape index: {}]   ;;  %s19909_s9 = inlined_call_operand.hbm [shape: f32[96,128], index: 9, kind: input, shape index: {}]   ;;  %s19910_s10 = inlined_call_operand.hbm [shape: f32[48,96], index: 10, kind: input, shape index: {}]   ;;  %s19911_s11 = inlined_call_operand.hbm [shape: f32[32,16], index: 11, kind: input, shape index: {}]   ;;  %s19912_s12 = inlined_call_operand.hbm [shape: f32[48,48], index: 12, kind: input, shape index: {}]   ;;  %s19913_s13 = inlined_call_operand.hbm [shape: f32[16,128], index: 13, kind: input, shape index: {}]   ;;  %s19914_s14 = inlined_call_operand.hbm [shape: f32[48,128], index: 14, kind: input, shape index: {}]   ;;  %s19915_s15 = inlined_call_operand.hbm [shape: f32[24,48], index: 15, kind: input, shape index: {}]   ;;  %s19916_s16 = inlined_call_operand.hbm [shape: f32[16,8], index: 16, kind: input, shape index: {}]   ;;  %s19917_s17 = inlined_call_operand.hbm [shape: f32[24,24], index: 17, kind: input, shape index: {}]   ;;  %s19918_s18 = inlined_call_operand.hbm [shape: f32[8,128], index: 18, kind: input, shape index: {}]   ;;  %s19919_s19 = inlined_call_operand.hbm [shape: f32[24,128], index: 19, kind: input, shape index: {}]   ;;  %s19920_s20 = inlined_call_operand.hbm [shape: f32[12,24], index: 20, kind: input, shape index: {}]   ;;  %s19921_s21 = inlined_call_operand.hbm [shape: f32[8,4], index: 21, kind: input, shape index: {}]   ;;  %s19922_s22 = inlined_call_operand.vmem [shape: f32[24,12], index: 22, kind: input, shape index: {}]   ;;  %s19923_s23 = inlined_call_operand.hbm [shape: f32[4,128], index: 23, kind: input, shape index: {}]   ;;  %s19924_s24 = inlined_call_operand.vmem [shape: f32[24,128], index: 24, kind: input, shape index: {}]   ;;  %s19925_s25 = inlined_call_operand.vmem [shape: f32[2,15,128], index: 25, kind: output, shape index: {0}]   ;;  %s19926_s26 = inlined_call_operand.vmem [shape: f32[2,15,128], index: 26, kind: output, shape index: {1}]  }
   0x1   :  { %20134 = sst [smem:[#allocation173_spill]] %s19900_s0 }
   0x2   :  { %20135 = sst [smem:[#allocation174_spill]] %s19901_s1 }
   0x3   :  { %20136 = sst [smem:[#allocation175_spill]] %s19902_s2 }
   0x4   :  { %20137 = sst [smem:[#allocation176_spill]] %s19903_s3 }
   0x5   :  { %20138 = sst [smem:[#allocation177_spill]] %s19904_s4 }
   0x6   :  { %20139 = sst [smem:[#allocation178_spill]] %s19905_s5 }
   0x7   :  { %20140 = sst [smem:[#allocation179_spill]] %s19906_s6 }
   0x8   :  { %20141 = sst [smem:[#allocation180_spill]] %s19907_s7 }
   0x9   :  { %20142 = sst [smem:[#allocation181_spill]] %s19908_s8 }
   0xa   :  { %20143 = sst [smem:[#allocation182_spill]] %s19909_s9 }
   0xb   :  { %20144 = sst [smem:[#allocation183_spill]] %s19910_s10 }
   0xc   :  { %20145 = sst [smem:[#allocation184_spill]] %s19911_s11 }
   0xd   :  { %20146 = sst [smem:[#allocation185_spill]] %s19912_s12 }
   0xe   :  { %20147 = sst [smem:[#allocation186_spill]] %s19913_s13 }
   0xf   :  { %20148 = sst [smem:[#allocation187_spill]] %s19914_s14 }
  0x10   :  { %20149 = sst [smem:[#allocation188_spill]] %s19922_s22 }
  0x11   :  { %20150 = sst [smem:[#allocation189_spill]] %s19924_s24 }
  0x12   :  { %20151 = sst [smem:[#allocation190_spill]] %s19925_s25 }
  0x13   :  { %20152 = sst [smem:[#allocation191_spill]] %s19926_s26 }
  0x14   :  { %32 = vsyncpa [#allocation3], 0 }
  0x15   :  { %34 = vsyncpa [#allocation3 + $0x1], 0 }
  0x16   :  { %35 = vsyncpa [#allocation5], 0 }
  0x17   :  { %37 = vsyncpa [#allocation5 + $0x1], 0 }
  0x18   :  { %38 = vsyncpa [#allocation8], 0 }
  0x19   :  { %39 = vsyncpa [#allocation11], 0 }
  0x1a   :  { %40 = vsyncpa [#allocation14], 0 }
  0x1b   :  { %41 = vsyncpa [#allocation17], 0 }
  0x1c   :  { %42 = vsyncpa [#allocation20], 0 }
  0x1d   :  { %43 = vsyncpa [#allocation23], 0 }
  0x1e   :  { %44 = vsyncpa [#allocation26], 0 }
  0x1f   :  { %45 = vsyncpa [#allocation29], 0 }
  0x20   :  { %46 = vsyncpa [#allocation32], 0 }
  0x21   :  { %47 = vsyncpa [#allocation35], 0  ;;  %s15640_s27 = smov 0   ;;  %s15642_s3 = smov 0  }
  0x22   :  { %s15644_s7 = smov 0   ;;  %s15646_s28 = smov 0  }
  0x23 LB: > { %s15476_s8 = smov [#allocation6]   ;;  %s15661_s29 = sadd.s32 4294967295, %s15474_s28   ;;  %s15474_s28 = sphi %s15646_s28, %s20635_s28   ;;  %s15470_s7 = sphi %s15644_s7, %s20634_s7   ;;  %s15466_s3 = sphi %s15642_s3, %s20633_s3   ;;  %s15462_s27 = sphi %s15640_s27, %s20632_s27  }
  0x24   : > { %s657_s4 = sshll.u32 %s15476_s8, 4  ;;  %20153 = sst [smem:[#allocation50_spill]] %s15661_s29  ;;  %s658_s4 = int_to_ptr.vmem [resolvable:$true] %s657_s4 }
  0x25   : > { %p11544_p0 = scmp.ge.s32.totalorder %s15474_s28, 1  ;;  %p19939_p1 = scmp.eq.s32.totalorder %s15661_s29, 0 }
  0x26   : > { %p645_p2 = scmp.lt.s32.totalorder %s15474_s28, 3  ;;  %s15477_s9 = smov [#allocation7]  }
  0x27   : > { %s670_s30 = sshll.u32 %s15477_s9, 4  ;;  %s15478_s5 = smov [#allocation10]   ;;  %s15678_s30 = int_to_ptr.vmem [resolvable:$true] %s670_s30 }
  0x28   : > { %p15666_p3 = pnand %p11544_p0, %p645_p2  ;;  %s15680_s10 = sshll.u32 %s15478_s5, 4  ;;  %s697_s10 = int_to_ptr.vmem [resolvable:$true] %s15680_s10 }
  0x29   : > { %s14801_s1 = scalar_lea.vmem %s658_s4, 6144  ;;  %p14809_p10 = scmp.lt.s32.totalorder %s658_s4, %s658_s4 }
  0x2a   : > { %s20154_s0 = scalar_select %p15666_p3, 1, 0 }
  0x2b   : > { %p14313_p4 = pneg %p15666_p3  ;;  %p14802_p7 = scmp.ne.s32.totalorder %s658_s4, %s14801_s1 }
  0x2c   : > { %20155 = sst [smem:[#allocation51_spill]] %s20154_s0  ;;  %p14810_p11 = scmp.lt.s32.totalorder %s14801_s1, %s14801_s1 }
  0x2d   : > { %p15674_p5 = pnand %p14313_p4, %p19939_p1 }
  0x2e   : > { %p14811_p12 = por %p14810_p11, %p14809_p10 }
  0x2f   : > { %p15684_p6 = pneg %p15674_p5 }
  0x31   : > { %p14804_p8 = pnand %p14802_p7, %p15684_p6 }
  0x33   : > { %p14805_p9 = pneg %p14804_p8 }
  0x35   : > { %p14812_p13 = pnand %p14811_p12, %p14805_p9 }
  0x37   : > { %14815 = shalt.err (!%p14812_p13)
}
  0x38   : > { %s15479_s8 = smov 256   ;;  %s15480_s9 = smov 16  }
  0x39   : > { %s20158_s22 = sld [smem:[#allocation175_spill]]  ;;  %s14827_s26 = scalar_lea.vmem %s15678_s30, 1024 }
  0x3a   : > { %p14828_p0 = scmp.ne.s32.totalorder %s15678_s30, %s14827_s26  ;;  %p14835_p7 = scmp.lt.s32.totalorder %s15678_s30, %s15678_s30 }
  0x3b   : > { %p14836_p8 = scmp.lt.s32.totalorder %s14827_s26, %s14827_s26 }
  0x3c   : > { %p14830_p2 = pnand %p14828_p0, %p15684_p6 }
  0x3d   : > { %p14837_p9 = por %p14836_p8, %p14835_p7 }
  0x3e   : > { %p14831_p4 = pneg %p14830_p2 }
  0x3f   : > { %14316 = dma.hbm_to_vmem [thread:$0]  (!%p15674_p5), %s20158_s22, 6144, %s658_s4, [#allocation5], %s15479_s8, %s15479_s8, %s15480_s9  }
  0x40   : > { %p14838_p10 = pnand %p14837_p9, %p14831_p4 }
  0x42   : > { %14841 = shalt.err (!%p14838_p10)
}
  0x43   : > { %s19934_s1 = smov 128   ;;  %s19936_s25 = smov 8  }
  0x44   : > { %s20159_s4 = sld [smem:[#allocation176_spill]]  ;;  %s14853_s5 = scalar_lea.vmem %s697_s10, 3072 }
  0x45   : > { %p14854_p11 = scmp.ne.s32.totalorder %s697_s10, %s14853_s5  ;;  %p14861_p0 = scmp.lt.s32.totalorder %s697_s10, %s697_s10 }
  0x46   : > { %p14862_p2 = scmp.lt.s32.totalorder %s14853_s5, %s14853_s5 }
  0x47   : > { %p14856_p12 = pnand %p14854_p11, %p15684_p6 }
  0x48   : > { %p14863_p4 = por %p14862_p2, %p14861_p0 }
  0x49   : > { %p14857_p13 = pneg %p14856_p12 }
  0x4a   : > { %14319 = dma.hbm_to_vmem [thread:$0]  (!%p15674_p5), %s20159_s4, 1024, %s15678_s30, [#allocation8], %s19934_s1, %s19934_s1, %s19936_s25  }
  0x4b   : > { %p14864_p7 = pnand %p14863_p4, %p14857_p13 }
  0x4d   : > { %14867 = shalt.err (!%p14864_p7)
}
  0x4e   : > { %s20160_s29 = sld [smem:[#allocation178_spill]]  ;;  %s15483_s22 = smov [#allocation13]  }
  0x4f   : > { %s722_s30 = sshll.u32 %s15483_s22, 4  ;;  %s15484_s24 = smov [#allocation16]   ;;  %s723_s30 = int_to_ptr.vmem [resolvable:$true] %s722_s30 }
  0x50   : > { %s748_s4 = sshll.u32 %s15484_s24, 4  ;;  %s14879_s1 = scalar_lea.vmem %s723_s30, 1536  ;;  %s749_s4 = int_to_ptr.vmem [resolvable:$true] %s748_s4 }
  0x51   : > { %p14880_p8 = scmp.ne.s32.totalorder %s723_s30, %s14879_s1  ;;  %p14887_p11 = scmp.lt.s32.totalorder %s723_s30, %s723_s30 }
  0x52   : > { %p14888_p12 = scmp.lt.s32.totalorder %s14879_s1, %s14879_s1 }
  0x53   : > { %p14882_p9 = pnand %p14880_p8, %p15684_p6 }
  0x54   : > { %14325 = dma.hbm_to_vmem [thread:$0]  (!%p15674_p5), %s20160_s29, 3072, %s697_s10, [#allocation11], %s15479_s8, %s15479_s8, %s15480_s9  }
  0x55   : > { %p14883_p10 = pneg %p14882_p9  ;;  %p14889_p13 = por %p14888_p12, %p14887_p11 }
  0x57   : > { %p14890_p0 = pnand %p14889_p13, %p14883_p10 }
  0x59   : > { %14893 = shalt.err (!%p14890_p0)
}
  0x5a   : > { %s20161_s0 = smov 128   ;;  %s20162_s8 = sld [smem:[#allocation180_spill]] }
  0x5b   : > { %s14905_s9 = scalar_lea.vmem %s749_s4, 1536  ;;  %p14913_p8 = scmp.lt.s32.totalorder %s749_s4, %s749_s4 }
  0x5c   : > { %p14906_p2 = scmp.ne.s32.totalorder %s749_s4, %s14905_s9  ;;  %p14914_p9 = scmp.lt.s32.totalorder %s14905_s9, %s14905_s9 }
  0x5e   : > { %p14908_p4 = pnand %p14906_p2, %p15684_p6  ;;  %p14915_p10 = por %p14914_p9, %p14913_p8 }
  0x60   : > { %14331 = dma.hbm_to_vmem [thread:$0]  (!%p15674_p5), %s20162_s8, 1536, %s723_s30, [#allocation14], %s20161_s0, %s20161_s0, %s19936_s25  }
  0x61   : > { %p14909_p7 = pneg %p14908_p4 }
  0x63   : > { %p14916_p11 = pnand %p14915_p10, %p14909_p7 }
  0x65   : > { %14919 = shalt.err (!%p14916_p11)
}
  0x66   : > { %s20163_s26 = sld [smem:[#allocation182_spill]]  ;;  %s15485_s22 = smov [#allocation19]  }
  0x67   : > { %s774_s30 = sshll.u32 %s15485_s22, 4  ;;  %s15486_s24 = smov [#allocation22]   ;;  %s775_s30 = int_to_ptr.vmem [resolvable:$true] %s774_s30 }
  0x68   : > { %s800_s29 = sshll.u32 %s15486_s24, 4  ;;  %s14931_s10 = scalar_lea.vmem %s775_s30, 512  ;;  %s801_s29 = int_to_ptr.vmem [resolvable:$true] %s800_s29 }
  0x69   : > { %p14932_p12 = scmp.ne.s32.totalorder %s775_s30, %s14931_s10  ;;  %p14939_p2 = scmp.lt.s32.totalorder %s775_s30, %s775_s30 }
  0x6a   : > { %p14940_p4 = scmp.lt.s32.totalorder %s14931_s10, %s14931_s10 }
  0x6b   : > { %p14934_p13 = pnand %p14932_p12, %p15684_p6 }
  0x6c   : > { %14337 = dma.hbm_to_vmem [thread:$0]  (!%p15674_p5), %s20163_s26, 1536, %s749_s4, [#allocation17], %s20161_s0, %s20161_s0, %s19936_s25  }
  0x6d   : > { %p14935_p0 = pneg %p14934_p13  ;;  %p14941_p7 = por %p14940_p4, %p14939_p2 }
  0x6f   : > { %p14942_p8 = pnand %p14941_p7, %p14935_p0 }
  0x71   : > { %14945 = shalt.err (!%p14942_p8)
}
  0x72   : > { %s20164_s11 = sld [smem:[#allocation184_spill]]  ;;  %s14957_s9 = scalar_lea.vmem %s801_s29, 256 }
  0x73   : > { %p14958_p9 = scmp.ne.s32.totalorder %s801_s29, %s14957_s9  ;;  %p14965_p12 = scmp.lt.s32.totalorder %s801_s29, %s801_s29 }
  0x74   : > { %p14966_p13 = scmp.lt.s32.totalorder %s14957_s9, %s14957_s9 }
  0x75   : > { %p14960_p10 = pnand %p14958_p9, %p15684_p6 }
  0x76   : > { %p14967_p0 = por %p14966_p13, %p14965_p12 }
  0x77   : > { %p14961_p11 = pneg %p14960_p10 }
  0x78   : > { %14343 = dma.hbm_to_vmem [thread:$0]  (!%p15674_p5), %s20164_s11, 512, %s775_s30, [#allocation20], %s20161_s0, %s20161_s0, %s19936_s25  }
  0x79   : > { %p14968_p2 = pnand %p14967_p0, %p14961_p11 }
  0x7b   : > { %14971 = shalt.err (!%p14968_p2)
}
  0x7c   : > { %s20165_s13 = sld [smem:[#allocation186_spill]]  ;;  %s15487_s26 = smov [#allocation25]  }
  0x7d   : > { %s826_s22 = sshll.u32 %s15487_s26, 4  ;;  %s15488_s30 = smov [#allocation28]   ;;  %s827_s22 = int_to_ptr.vmem [resolvable:$true] %s826_s22 }
  0x7e   : > { %s852_s24 = sshll.u32 %s15488_s30, 4  ;;  %s14983_s10 = scalar_lea.vmem %s827_s22, 384  ;;  %s853_s24 = int_to_ptr.vmem [resolvable:$true] %s852_s24 }
  0x7f   : > { %p14984_p4 = scmp.ne.s32.totalorder %s827_s22, %s14983_s10  ;;  %p14991_p9 = scmp.lt.s32.totalorder %s827_s22, %s827_s22 }
  0x80   : > { %p14992_p10 = scmp.lt.s32.totalorder %s14983_s10, %s14983_s10 }
  0x81   : > { %p14986_p7 = pnand %p14984_p4, %p15684_p6 }
  0x82   : > { %14349 = dma.hbm_to_vmem [thread:$0]  (!%p15674_p5), %s20165_s13, 256, %s801_s29, [#allocation23], %s20161_s0, %s20161_s0, %s19936_s25  }
  0x83   : > { %p14987_p8 = pneg %p14986_p7  ;;  %p14993_p11 = por %p14992_p10, %p14991_p9 }
  0x85   : > { %p14994_p12 = pnand %p14993_p11, %p14987_p8 }
  0x87   : > { %14997 = shalt.err (!%p14994_p12)
}
  0x88   : > { %14355 = dma.hbm_to_vmem [thread:$0]  (!%p15674_p5), %s19915_s15, 384, %s827_s22, [#allocation26], %s20161_s0, %s20161_s0, %s19936_s25  }
  0x89   : > { %s15009_s8 = scalar_lea.vmem %s853_s24, 384  ;;  %p15017_p4 = scmp.lt.s32.totalorder %s853_s24, %s853_s24 }
  0x8a   : > { %p15010_p13 = scmp.ne.s32.totalorder %s853_s24, %s15009_s8  ;;  %p15018_p7 = scmp.lt.s32.totalorder %s15009_s8, %s15009_s8 }
  0x8c   : > { %p15012_p0 = pnand %p15010_p13, %p15684_p6  ;;  %p15019_p8 = por %p15018_p7, %p15017_p4 }
  0x8e   : > { %p15013_p2 = pneg %p15012_p0 }
  0x90   : > { %p15020_p9 = pnand %p15019_p8, %p15013_p2 }
  0x92   : > { %15023 = shalt.err (!%p15020_p9)
}
  0x93   : > { %14361 = dma.hbm_to_vmem [thread:$0]  (!%p15674_p5), %s19917_s17, 384, %s853_s24, [#allocation29], %s20161_s0, %s20161_s0, %s19936_s25  }
  0x94   : > { %s15489_s5 = smov [#allocation31]   ;;  %s15490_s22 = smov [#allocation34]  }
  0x95   : > { %s876_s26 = sshll.u32 %s15489_s5, 4  ;;  %s903_s30 = sshll.u32 %s15490_s22, 4  ;;  %s877_s26 = int_to_ptr.vmem [resolvable:$true] %s876_s26  ;;  %s904_s30 = int_to_ptr.vmem [resolvable:$true] %s903_s30 }
  0x96   : > { %s15035_s10 = scalar_lea.vmem %s877_s26, 384  ;;  %p15043_p13 = scmp.lt.s32.totalorder %s877_s26, %s877_s26 }
  0x97   : > { %p15036_p10 = scmp.ne.s32.totalorder %s877_s26, %s15035_s10  ;;  %p15044_p0 = scmp.lt.s32.totalorder %s15035_s10, %s15035_s10 }
  0x99   : > { %p15038_p11 = pnand %p15036_p10, %p15684_p6  ;;  %p15045_p2 = por %p15044_p0, %p15043_p13 }
  0x9b   : > { %p15039_p12 = pneg %p15038_p11 }
  0x9d   : > { %p15046_p4 = pnand %p15045_p2, %p15039_p12 }
  0x9f   : > { %15049 = shalt.err (!%p15046_p4)
}
  0xa0   : > { %14367 = dma.hbm_to_vmem [thread:$0]  (!%p15674_p5), %s19919_s19, 384, %s877_s26, [#allocation32], %s20161_s0, %s20161_s0, %s19936_s25  }
  0xa1   : > { %s15061_s4 = scalar_lea.vmem %s904_s30, 128  ;;  %p15069_p10 = scmp.lt.s32.totalorder %s904_s30, %s904_s30 }
  0xa2   : > { %p15062_p7 = scmp.ne.s32.totalorder %s904_s30, %s15061_s4  ;;  %p15070_p11 = scmp.lt.s32.totalorder %s15061_s4, %s15061_s4 }
  0xa4   : > { %p15064_p8 = pnand %p15062_p7, %p15684_p6  ;;  %p15071_p12 = por %p15070_p11, %p15069_p10 }
  0xa6   : > { %p15065_p9 = pneg %p15064_p8 }
  0xa8   : > { %p15072_p13 = pnand %p15071_p12, %p15065_p9 }
  0xaa   : > { %15075 = shalt.err (!%p15072_p13)
}
  0xab   : > { %14373 = dma.hbm_to_vmem [thread:$0]  (!%p15674_p5), %s19921_s21, 128, %s904_s30, [#allocation35]  }
  0xac   : > { %s15491_s1 = smov [#allocation9]   ;;  %s15492_s26 = smov [#allocation12]  }
  0xad   : > { %s683_s5 = sshll.u32 %s15491_s1, 4  ;;  %s709_s22 = sshll.u32 %s15492_s26, 4  ;;  %s684_s5 = int_to_ptr.vmem [resolvable:$true] %s683_s5  ;;  %s710_s22 = int_to_ptr.vmem [resolvable:$true] %s709_s22 }
  0xae   : > { %s15087_s10 = scalar_lea.vmem %s684_s5, 3072  ;;  %p15095_p7 = scmp.lt.s32.totalorder %s684_s5, %s684_s5 }
  0xaf   : > { %p15088_p0 = scmp.ne.s32.totalorder %s684_s5, %s15087_s10  ;;  %p15096_p8 = scmp.lt.s32.totalorder %s15087_s10, %s15087_s10 }
  0xb1   : > { %p15090_p2 = pnand %p15088_p0, %p15684_p6  ;;  %p15097_p9 = por %p15096_p8, %p15095_p7 }
  0xb3   : > { %p15091_p4 = pneg %p15090_p2 }
  0xb5   : > { %p15098_p10 = pnand %p15097_p9, %p15091_p4 }
  0xb7   : > { %15101 = shalt.err (!%p15098_p10)
}
  0xb8   : > { %s20166_s29 = sld [smem:[#allocation177_spill]]  ;;  %s15113_s4 = scalar_lea.vmem %s710_s22, 1024 }
  0xb9   : > { %p15114_p11 = scmp.ne.s32.totalorder %s710_s22, %s15113_s4  ;;  %p15121_p0 = scmp.lt.s32.totalorder %s710_s22, %s710_s22 }
  0xba   : > { %p15122_p2 = scmp.lt.s32.totalorder %s15113_s4, %s15113_s4 }
  0xbb   : > { %p15116_p12 = pnand %p15114_p11, %p15684_p6 }
  0xbc   : > { %p15123_p4 = por %p15122_p2, %p15121_p0 }
  0xbd   : > { %p15117_p13 = pneg %p15116_p12 }
  0xbe   : > { %14322 = dma.hbm_to_vmem [thread:$0]  (!%p15674_p5), %s20166_s29, 3072, %s684_s5, [#allocation8], %s20161_s0, %s20161_s0, %s19936_s25  }
  0xbf   : > { %p15124_p7 = pnand %p15123_p4, %p15117_p13 }
  0xc1   : > { %15127 = shalt.err (!%p15124_p7)
}
  0xc2   : > { %s20167_s1 = sld [smem:[#allocation179_spill]]  ;;  %s15493_s5 = smov [#allocation15]  }
  0xc3   : > { %s735_s26 = sshll.u32 %s15493_s5, 4  ;;  %s15494_s10 = smov [#allocation18]   ;;  %s736_s26 = int_to_ptr.vmem [resolvable:$true] %s735_s26 }
  0xc4   : > { %s761_s30 = sshll.u32 %s15494_s10, 4  ;;  %s15139_s24 = scalar_lea.vmem %s736_s26, 512  ;;  %s762_s30 = int_to_ptr.vmem [resolvable:$true] %s761_s30 }
  0xc5   : > { %p15140_p8 = scmp.ne.s32.totalorder %s736_s26, %s15139_s24  ;;  %p15147_p11 = scmp.lt.s32.totalorder %s736_s26, %s736_s26 }
  0xc6   : > { %p15148_p12 = scmp.lt.s32.totalorder %s15139_s24, %s15139_s24 }
  0xc7   : > { %p15142_p9 = pnand %p15140_p8, %p15684_p6 }
  0xc8   : > { %14328 = dma.hbm_to_vmem [thread:$0]  (!%p15674_p5), %s20167_s1, 1024, %s710_s22, [#allocation11], %s20161_s0, %s20161_s0, %s19936_s25  }
  0xc9   : > { %p15143_p10 = pneg %p15142_p9  ;;  %p15149_p13 = por %p15148_p12, %p15147_p11 }
  0xcb   : > { %p15150_p0 = pnand %p15149_p13, %p15143_p10 }
  0xcd   : > { %15153 = shalt.err (!%p15150_p0)
}
  0xce   : > { %s20168_s4 = sld [smem:[#allocation181_spill]]  ;;  %s15165_s8 = scalar_lea.vmem %s762_s30, 768 }
  0xcf   : > { %p15166_p2 = scmp.ne.s32.totalorder %s762_s30, %s15165_s8  ;;  %p15173_p8 = scmp.lt.s32.totalorder %s762_s30, %s762_s30 }
  0xd0   : > { %p15174_p9 = scmp.lt.s32.totalorder %s15165_s8, %s15165_s8 }
  0xd1   : > { %p15168_p4 = pnand %p15166_p2, %p15684_p6 }
  0xd2   : > { %p15175_p10 = por %p15174_p9, %p15173_p8 }
  0xd3   : > { %p15169_p7 = pneg %p15168_p4 }
  0xd4   : > { %14334 = dma.hbm_to_vmem [thread:$0]  (!%p15674_p5), %s20168_s4, 512, %s736_s26, [#allocation14], %s20161_s0, %s20161_s0, %s19936_s25  }
  0xd5   : > { %p15176_p11 = pnand %p15175_p10, %p15169_p7 }
  0xd7   : > { %15179 = shalt.err (!%p15176_p11)
}
  0xd8   : > { %s20169_s5 = sld [smem:[#allocation183_spill]]  ;;  %s15495_s26 = smov [#allocation21]  }
  0xd9   : > { %s787_s10 = sshll.u32 %s15495_s26, 4  ;;  %s15496_s24 = smov [#allocation24]   ;;  %s788_s10 = int_to_ptr.vmem [resolvable:$true] %s787_s10 }
  0xda   : > { %s813_s22 = sshll.u32 %s15496_s24, 4  ;;  %s15191_s29 = scalar_lea.vmem %s788_s10, 768  ;;  %s814_s22 = int_to_ptr.vmem [resolvable:$true] %s813_s22 }
  0xdb   : > { %p15192_p12 = scmp.ne.s32.totalorder %s788_s10, %s15191_s29  ;;  %p15199_p2 = scmp.lt.s32.totalorder %s788_s10, %s788_s10 }
  0xdc   : > { %p15200_p4 = scmp.lt.s32.totalorder %s15191_s29, %s15191_s29 }
  0xdd   : > { %p15194_p13 = pnand %p15192_p12, %p15684_p6 }
  0xde   : > { %14340 = dma.hbm_to_vmem [thread:$0]  (!%p15674_p5), %s20169_s5, 768, %s762_s30, [#allocation17], %s20161_s0, %s20161_s0, %s19936_s25  }
  0xdf   : > { %p15195_p0 = pneg %p15194_p13  ;;  %p15201_p7 = por %p15200_p4, %p15199_p2 }
  0xe1   : > { %p15202_p8 = pnand %p15201_p7, %p15195_p0 }
  0xe3   : > { %15205 = shalt.err (!%p15202_p8)
}
  0xe4   : > { %s20170_s12 = sld [smem:[#allocation185_spill]]  ;;  %s15217_s8 = scalar_lea.vmem %s814_s22, 768 }
  0xe5   : > { %p15218_p9 = scmp.ne.s32.totalorder %s814_s22, %s15217_s8  ;;  %p15225_p12 = scmp.lt.s32.totalorder %s814_s22, %s814_s22 }
  0xe6   : > { %p15226_p13 = scmp.lt.s32.totalorder %s15217_s8, %s15217_s8 }
  0xe7   : > { %p15220_p10 = pnand %p15218_p9, %p15684_p6 }
  0xe8   : > { %p15227_p0 = por %p15226_p13, %p15225_p12 }
  0xe9   : > { %p15221_p11 = pneg %p15220_p10 }
  0xea   : > { %14346 = dma.hbm_to_vmem [thread:$0]  (!%p15674_p5), %s20170_s12, 768, %s788_s10, [#allocation20], %s20161_s0, %s20161_s0, %s19936_s25  }
  0xeb   : > { %p15228_p2 = pnand %p15227_p0, %p15221_p11 }
  0xed   : > { %15231 = shalt.err (!%p15228_p2)
}
  0xee   : > { %s20171_s14 = sld [smem:[#allocation187_spill]]  ;;  %s15497_s5 = smov [#allocation27]  }
  0xef   : > { %s839_s26 = sshll.u32 %s15497_s5, 4  ;;  %s15498_s10 = smov [#allocation30]   ;;  %s840_s26 = int_to_ptr.vmem [resolvable:$true] %s839_s26 }
  0xf0   : > { %s866_s24 = sshll.u32 %s15498_s10, 4  ;;  %s15243_s29 = scalar_lea.vmem %s840_s26, 256  ;;  %s867_s24 = int_to_ptr.vmem [resolvable:$true] %s866_s24 }
  0xf1   : > { %p15244_p4 = scmp.ne.s32.totalorder %s840_s26, %s15243_s29  ;;  %p15251_p9 = scmp.lt.s32.totalorder %s840_s26, %s840_s26 }
  0xf2   : > { %p15252_p10 = scmp.lt.s32.totalorder %s15243_s29, %s15243_s29 }
  0xf3   : > { %p15246_p7 = pnand %p15244_p4, %p15684_p6 }
  0xf4   : > { %14352 = dma.hbm_to_vmem [thread:$0]  (!%p15674_p5), %s20171_s14, 768, %s814_s22, [#allocation23], %s20161_s0, %s20161_s0, %s19936_s25  }
  0xf5   : > { %p15247_p8 = pneg %p15246_p7  ;;  %p15253_p11 = por %p15252_p10, %p15251_p9 }
  0xf7   : > { %p15254_p12 = pnand %p15253_p11, %p15247_p8 }
  0xf9   : > { %15257 = shalt.err (!%p15254_p12)
}
  0xfa   : > { %14358 = dma.hbm_to_vmem [thread:$0]  (!%p15674_p5), %s19916_s16, 256, %s840_s26, [#allocation26], %s20161_s0, %s20161_s0, %s19936_s25  }
  0xfb   : > { %s15269_s4 = scalar_lea.vmem %s867_s24, 128  ;;  %p15277_p4 = scmp.lt.s32.totalorder %s867_s24, %s867_s24 }
  0xfc   : > { %p15270_p13 = scmp.ne.s32.totalorder %s867_s24, %s15269_s4  ;;  %p15278_p7 = scmp.lt.s32.totalorder %s15269_s4, %s15269_s4 }
  0xfe   : > { %p15272_p0 = pnand %p15270_p13, %p15684_p6  ;;  %p15279_p8 = por %p15278_p7, %p15277_p4 }
 0x100   : > { %p15273_p2 = pneg %p15272_p0 }
 0x102   : > { %p15280_p9 = pnand %p15279_p8, %p15273_p2 }
 0x104   : > { %15283 = shalt.err (!%p15280_p9)
}
 0x105   : > { %14364 = dma.hbm_to_vmem [thread:$0]  (!%p15674_p5), %s19918_s18, 128, %s867_s24, [#allocation29]  }
 0x106   : > { %s15499_s1 = smov [#allocation33]   ;;  %s15500_s26 = smov [#allocation36]  }
 0x107   : > { %s889_s5 = sshll.u32 %s15499_s1, 4  ;;  %s917_s10 = sshll.u32 %s15500_s26, 4  ;;  %s890_s5 = int_to_ptr.vmem [resolvable:$true] %s889_s5  ;;  %s918_s10 = int_to_ptr.vmem [resolvable:$true] %s917_s10 }
 0x108   : > { %s15295_s29 = scalar_lea.vmem %s890_s5, 256  ;;  %p15303_p13 = scmp.lt.s32.totalorder %s890_s5, %s890_s5 }
 0x109   : > { %p15296_p10 = scmp.ne.s32.totalorder %s890_s5, %s15295_s29  ;;  %p15304_p0 = scmp.lt.s32.totalorder %s15295_s29, %s15295_s29 }
 0x10b   : > { %p15298_p11 = pnand %p15296_p10, %p15684_p6  ;;  %p15305_p2 = por %p15304_p0, %p15303_p13 }
 0x10d   : > { %p15299_p12 = pneg %p15298_p11 }
 0x10f   : > { %p15306_p4 = pnand %p15305_p2, %p15299_p12 }
 0x111   : > { %15309 = shalt.err (!%p15306_p4)
}
 0x112   : > { %14370 = dma.hbm_to_vmem [thread:$0]  (!%p15674_p5), %s19920_s20, 256, %s890_s5, [#allocation32], %s20161_s0, %s20161_s0, %s19936_s25  }
 0x113   : > { %s15321_s30 = scalar_lea.vmem %s918_s10, 64  ;;  %p15329_p10 = scmp.lt.s32.totalorder %s918_s10, %s918_s10 }
 0x114   : > { %p15322_p7 = scmp.ne.s32.totalorder %s918_s10, %s15321_s30  ;;  %p15330_p11 = scmp.lt.s32.totalorder %s15321_s30, %s15321_s30 }
 0x116   : > { %p15324_p8 = pnand %p15322_p7, %p15684_p6  ;;  %p15331_p12 = por %p15330_p11, %p15329_p10 }
 0x118   : > { %p15325_p9 = pneg %p15324_p8 }
 0x11a   : > { %p15332_p13 = pnand %p15331_p12, %p15325_p9 }
 0x11c   : > { %15335 = shalt.err (!%p15332_p13)
}
 0x11d   : > { %14376 = dma.hbm_to_vmem [thread:$0]  (!%p15674_p5), %s19923_s23, 64, %s918_s10, [#allocation35]  }
 0x11e   : > { %s15890_s9 = sadd.s32 1, %s15474_s28   ;;  %s60_s1 = sadd.s32 1, %s15470_s7 }
 0x11f   : > { %s57_s2 = ssub.s32 %s15474_s28, %s15890_s9  ;;  %p67_p0 = scmp.ne.s32.totalorder %s15470_s7, %s15466_s3 }
 0x120   : > { %p58_p6 = scmp.eq.s32.totalorder %s57_s2, 0  ;;  %p68_p2 = scmp.eq.s32.totalorder %s15474_s28, 0 }
 0x121   : > { %p73_p4 = scmp.ne.s32.totalorder %s15466_s3, %s15462_s27  ;;  %p14405_p5 = scmp.lt.s32.totalorder %s15474_s28, 2 }
 0x122   : > { %s15901_s5 = scalar_select %p58_p6, %s15470_s7, %s60_s1  }
 0x123   : > { %p69_p7 = por %p68_p2, %p67_p0  ;;  %p15905_p8 = por %p19939_p1, %p73_p4 }
 0x124   : > { %s931_s10 = sand.u32 1, %s15470_s7   ;;  %s19938_s24 = smul.u32 3072, %s15474_s28 }
 0x125   : > { %s20173_s26 = scalar_select %p15905_p8, 1, 0 }
 0x126   : > { %s15911_s29 = smul.u32 192, %s931_s10  ;;  %p15914_p9 = pnand %p14405_p5, %p69_p7 }
 0x127   : > { %s20175_s8 = sld [smem:[#allocation173_spill]]  ;;  %s15929_s25 = scalar_lea.sflag [#allocation3], %s931_s10 }
 0x128   : > { %s935_s2 = scalar_lea.vmem [#allocation2], %s15911_s29  ;;  %p15338_p11 = pneg %p15914_p9 }
 0x129   : > { %s942_s1 = sshll.u32 %s935_s2, 4  ;;  %s15927_s1 = int_to_ptr.vmem [resolvable:$true] %s942_s1 }
 0x12d   : > { %s15924_s6 = scalar_lea.hbm %s20175_s8, %s19938_s24  ;;  %s15341_s27 = scalar_lea.hbm %s20175_s8, 6144 }
 0x12e   : > { %s15336_s11 = scalar_lea.hbm %s15924_s6, 3072  ;;  %p15342_p6 = scmp.lt.s32.totalorder %s15924_s6, %s20175_s8 }
 0x12f   : > { %p15337_p10 = scmp.ne.s32.totalorder %s15924_s6, %s15336_s11  ;;  %p15343_p0 = scmp.lt.s32.totalorder %s15341_s27, %s15336_s11 }
 0x131   : > { %p15339_p12 = pnand %p15338_p11, %p15337_p10  ;;  %p15344_p2 = por %p15343_p0, %p15342_p6 }
 0x133   : > { %p15340_p13 = pneg %p15339_p12 }
 0x135   : > { %p15345_p4 = pnand %p15344_p2, %p15340_p13 }
 0x137   : > { %15348 = shalt.err (!%p15345_p4)
}
 0x138   : > { %s15349_s10 = scalar_lea.vmem %s15927_s1, 3072  ;;  %s15501_s2 = smov [#allocation2]  }
 0x139   : > { %p15350_p7 = scmp.ne.s32.totalorder %s15927_s1, %s15349_s10  ;;  %s15354_s30 = sshll.u32 %s15501_s2, 4  ;;  %s15355_s30 = int_to_ptr.vmem [resolvable:$false] %s15354_s30 }
 0x13a   : > { %s15356_s4 = scalar_lea.vmem %s15355_s30, 6144  ;;  %p15357_p12 = scmp.lt.s32.totalorder %s15927_s1, %s15355_s30 }
 0x13b   : > { %p15352_p5 = pnand %p15350_p7, %p15338_p11  ;;  %p15358_p1 = scmp.lt.s32.totalorder %s15356_s4, %s15349_s10 }
 0x13d   : > { %p15353_p10 = pneg %p15352_p5  ;;  %p15359_p8 = por %p15358_p1, %p15357_p12 }
 0x13f   : > { %p15360_p6 = pnand %p15359_p8, %p15353_p10 }
 0x141   : > { %15363 = shalt.err (!%p15360_p6)
}
 0x142   : > { %s20176_s11 = smov 8   ;;  %s20177_s12 = smul.u32 3072, %s15474_s28 }
 0x143   : > { %14380 = dma.hbm_to_vmem [thread:$0]  (!%p15914_p9), %s15924_s6, 3072, %s15927_s1, %s15929_s25, %s20161_s0, %s20161_s0, %s20176_s11  }
 0x144   : > { %s20178_s10 = sld [smem:[#allocation174_spill]]  ;;  %s956_s30 = scalar_lea.vmem [#allocation4], %s15911_s29 }
 0x145   : > { %s963_s4 = sshll.u32 %s956_s30, 4  ;;  %s20179_s8 = sand.u32 1, %s15474_s28   ;;  %s15967_s4 = int_to_ptr.vmem [resolvable:$true] %s963_s4 }
 0x146   : > { %s953_s13 = scalar_lea.sflag [#allocation5], %s20179_s8 }
 0x14a   : > { %s15964_s2 = scalar_lea.hbm %s20178_s10, %s20177_s12  ;;  %s15369_s1 = scalar_lea.hbm %s20178_s10, 6144 }
 0x14b   : > { %s15364_s14 = scalar_lea.hbm %s15964_s2, 3072  ;;  %p15370_p0 = scmp.lt.s32.totalorder %s15964_s2, %s20178_s10 }
 0x14c   : > { %p15365_p1 = scmp.ne.s32.totalorder %s15964_s2, %s15364_s14  ;;  %p15371_p2 = scmp.lt.s32.totalorder %s15369_s1, %s15364_s14 }
 0x14e   : > { %p15367_p8 = pnand %p15365_p1, %p15338_p11  ;;  %p15372_p4 = por %p15371_p2, %p15370_p0 }
 0x150   : > { %p15368_p13 = pneg %p15367_p8 }
 0x152   : > { %p15373_p7 = pnand %p15372_p4, %p15368_p13 }
 0x154   : > { %15376 = shalt.err (!%p15373_p7)
}
 0x155   : > { %s15377_s28 = scalar_lea.vmem %s15967_s4, 3072  ;;  %s15502_s29 = smov [#allocation4]  }
 0x156   : > { %p15378_p5 = scmp.ne.s32.totalorder %s15967_s4, %s15377_s28  ;;  %s15382_s8 = sshll.u32 %s15502_s29, 4  ;;  %s15383_s8 = int_to_ptr.vmem [resolvable:$false] %s15382_s8 }
 0x157   : > { %s15384_s27 = scalar_lea.vmem %s15383_s8, 6144  ;;  %p15385_p6 = scmp.lt.s32.totalorder %s15967_s4, %s15383_s8 }
 0x158   : > { %p15380_p10 = pnand %p15378_p5, %p15338_p11  ;;  %p15386_p1 = scmp.lt.s32.totalorder %s15384_s27, %s15377_s28 }
 0x15a   : > { %p15381_p12 = pneg %p15380_p10  ;;  %p15387_p8 = por %p15386_p1, %p15385_p6 }
 0x15c   : > { %p15388_p0 = pnand %p15387_p8, %p15381_p12 }
 0x15e   : > { %15391 = shalt.err (!%p15388_p0)
}
 0x15f   : > { %14383 = dma.hbm_to_vmem [thread:$0]  (!%p15914_p9), %s15964_s2, 3072, %s15967_s4, %s953_s13, %s20161_s0, %s20161_s0, %s20176_s11  }
 0x160   : > { %975 = sbr.rel (%p15666_p3) target bundleno = 4661 (0x1235), region = 120 }
 0x165   : > { %s977_s30 = sand.u32 1, %s15466_s3   ;;  %p20181_p11 = scmp.ne.s32.totalorder %s20173_s26, 0 }
 0x166   : > { %s14164_s25 = smul.u32 192, %s977_s30  ;;  %s978_s6 = scalar_lea.sflag [#allocation3], %s977_s30 }
 0x168   : > { %s15999_s1 = scalar_lea.vmem [#allocation2], %s14164_s25 }
 0x169   : > { %15409 = dma.done.wait (%p20181_p11), %s978_s6, 3072  }
 0x16a   : > { %15411 = vsyncadd (%p20181_p11), %s978_s6, 4294964224  ;;  %s20182_s22 = sld [smem:[#allocation50_spill]]  ;;  %s16006_s13 = scalar_lea.vmem [#allocation4], %s14164_s25 }
 0x170   : > { %s986_s12 = sand.u32 1, %s20182_s22  }
 0x171   : > { %s987_s24 = scalar_lea.sflag [#allocation5], %s986_s12 }
 0x172   : > { %15413 = dma.done.wait (%p20181_p11), %s987_s24, 3072  }
 0x173   : > { %15415 = vsyncadd (%p20181_p11), %s987_s24, 4294964224  ;;  %p20183_p3 = scmp.eq.s32.totalorder %s20182_s22, 0 }
 0x175   : > { %15417 = dma.done.wait (%p20183_p3), [#allocation5], 6144   ;;  %p20184_p9 = pmov %p20183_p3 }
 0x176   : > { %p20185_p13 = pmov %p20183_p3 }
 0x177   : > { %15419 = vsyncadd (%p20184_p9), [#allocation5], 4294961152 }
 0x178   : > { %15421 = dma.done.wait (%p20185_p13), [#allocation8], 4096   ;;  %p20186_p2 = pmov %p20183_p3 }
 0x17a   : > { %15423 = vsyncadd (%p20186_p2), [#allocation8], 4294963200  ;;  %p20187_p4 = pmov %p20186_p2 }
 0x17b   : > { %p20188_p7 = pmov %p20186_p2 }
 0x17c   : > { %15425 = dma.done.wait (%p20187_p4), [#allocation11], 4096  }
 0x17d   : > { %15427 = vsyncadd (%p20188_p7), [#allocation11], 4294963200  ;;  %p20189_p5 = pmov %p20186_p2 }
 0x17e   : > { %p20190_p10 = pmov %p20186_p2 }
 0x17f   : > { %15429 = dma.done.wait (%p20189_p5), [#allocation14], 2048  }
 0x180   : > { %15431 = vsyncadd (%p20190_p10), [#allocation14], 4294965248  ;;  %p20191_p12 = pmov %p20186_p2 }
 0x181   : > { %p20192_p6 = pmov %p20186_p2 }
 0x182   : > { %15433 = dma.done.wait (%p20191_p12), [#allocation17], 2304  }
 0x183   : > { %15435 = vsyncadd (%p20192_p6), [#allocation17], 4294964992  ;;  %p20193_p1 = pmov %p20186_p2 }
 0x185   : > { %15437 = dma.done.wait (%p20193_p1), [#allocation20], 1280   ;;  %p20194_p8 = pmov %p20193_p1 }
 0x186   : > { %p20195_p0 = pmov %p20193_p1 }
 0x187   : > { %15439 = vsyncadd (%p20194_p8), [#allocation20], 4294966016 }
 0x188   : > { %15441 = dma.done.wait (%p20195_p0), [#allocation23], 1024   ;;  %p20196_p11 = pmov %p20195_p0 }
 0x189   : > { %p20197_p3 = pmov %p20195_p0 }
 0x18a   : > { %15443 = vsyncadd (%p20196_p11), [#allocation23], 4294966272 }
 0x18b   : > { %15445 = dma.done.wait (%p20197_p3), [#allocation26], 640   ;;  %p20198_p9 = pmov %p20195_p0 }
 0x18c   : > { %p20199_p13 = pmov %p20195_p0 }
 0x18d   : > { %15447 = vsyncadd (%p20198_p9), [#allocation26], 4294966656 }
 0x18e   : > { %15449 = dma.done.wait (%p20199_p13), [#allocation29], 512   ;;  %p20200_p2 = pmov %p20195_p0 }
 0x18f   : > { %p20201_p4 = pmov %p20195_p0 }
 0x190   : > { %15451 = vsyncadd (%p20200_p2), [#allocation29], 4294966784 }
 0x191   : > { %15453 = dma.done.wait (%p20201_p4), [#allocation32], 640   ;;  %p20202_p7 = pmov %p20195_p0 }
 0x192   : > { %p20203_p5 = pmov %p20195_p0 }
 0x193   : > { %15455 = vsyncadd (%p20202_p7), [#allocation32], 4294966656 }
 0x194   : > { %15457 = dma.done.wait (%p20203_p5), [#allocation35], 192   ;;  %p20204_p10 = pmov %p20195_p0 }
 0x195   : > { %v19942_v0 = vmov 0.0   ;;  %v16058_v1 = vld [vmem:[%s15999_s1 + $0x78] sm:$0xff]  ;;  %v16061_v2 = vld [vmem:[%s15999_s1 + $0x70] sm:$0xff]  ;;  %v16066_v3 = vld [vmem:[%s15999_s1 + $0x68] sm:$0xff]  ;;  %vm1325_vm0 = vcmask 523264   ;;  %p1155_p12 = scmp.lt.s32.totalorder %s20182_s22, 1 }
 0x196   : > { %15459 = vsyncadd (%p20204_p10), [#allocation35], 4294967104  ;;  %1398 = vmatprep.subr.mxu0 %v19942_v0  ;;  %v16071_v4 = vld [vmem:[%s15999_s1 + $0x60] sm:$0xff]  ;;  %v16076_v5 = vld [vmem:[%s15999_s1 + $0x58] sm:$0xff]  ;;  %s20611_s2 = sld [smem:[#allocation190_spill]]  ;;  %vm4944_vm1 = vcmask 785408  }
 0x197   : > { %1399 = vmatpush1.msra.mxu0 %v16058_v1  ;;  %v16081_v6 = vld [vmem:[%s15999_s1 + $0x50] sm:$0xff]  ;;  %v16083_v7 = vld [vmem:[#allocation6 + $0x8] sm:$0xff]  ;;  %v16095_v9 = vld [vmem:[%s15999_s1 + $0x40] sm:$0xff]  ;;  %s20637_s22 = smov (!%p1155_p12, %s20182_s22), 1  ;;  %s20612_s30 = sld [smem:[#allocation191_spill]]  ;;  %vm5106_vm2 = vcmask 261120  }
 0x198   : > { %1400 = vmatprep.subr.mxu0 %v19942_v0  ;;  %11595 = vmatprep.mubr.msk.f32.mxu0 %vm1325_vm0, %v16083_v7  ;;  %v16090_v8 = vld [vmem:[%s15999_s1 + $0x48] sm:$0xff]  ;;  %v16100_v10 = vld [vmem:[%s15999_s1 + $0x38] sm:$0xff]  ;;  %v16105_v11 = vld [vmem:[%s15999_s1 + $0x30] sm:$0xff]  ;;  %s12181_s0 = sshll.u32 %s20637_s22, 4  ;;  %vm7243_vm3 = vcmask 392192   ;;  %vm15504_vm4 = vmmov 0  }
 0x199   : > { %1401 = vmatpush1.msra.mxu0 %v16061_v2  ;;  %v16110_v12 = vld [vmem:[%s15999_s1 + $0x28] sm:$0xff]  ;;  %v16115_v13 = vld [vmem:[%s15999_s1 + $0x20] sm:$0xff]  ;;  %v16120_v14 = vld [vmem:[%s15999_s1 + $0x18] sm:$0xff]  ;;  %vm7357_vm5 = vcmask 130048   ;;  %vm8882_vm6 = vcmask 195584   ;;  %vm8972_vm7 = vcmask 64512  }
 0x19a   : > { %1402 = vmatprep.subr.mxu0 %v19942_v0  ;;  %v16125_v15 = vld [vmem:[%s15999_s1 + $0x10] sm:$0xff]  ;;  %v16127_v16 = vld [vmem:[#allocation7 + $0x38] sm:$0xff]  ;;  %v16135_v18 = vld [vmem:[%s15999_s1 + $0x8] sm:$0xff]  ;;  %vm10218_vm8 = vcmask 1043456   ;;  %vm10208_vm9 = vcmask 97280   ;;  %vm10302_vm10 = vcmask 31744  }
 0x19b   : > { %1403 = vmatpush1.msra.mxu0 %v16066_v3  ;;  %v16129_v17 = vld [vmem:[#allocation7 + $0x30] sm:$0xff]  ;;  %12878 = vmatprep.subr.mxu1 %v16127_v16  ;;  %v16138_v19 = vld [vmem:[#allocation7 + $0x28] sm:$0xff]  ;;  %v16144_v20 = vld [vmem:[%s15999_s1] sm:$0xff] }
 0x19c   : > { %1404 = vmatprep.subr.mxu0 %v19942_v0  ;;  %20205 = vst [vmem:[#allocation52_spill] sm:$0xff] %v16129_v17  ;;  %12879 = vmatpush3.msra.mxu1 %v16127_v16  ;;  %20206 = vst [vmem:[#allocation53_spill] sm:$0xff] %v16138_v19  ;;  %v16147_v21 = vld [vmem:[#allocation7 + $0x20] sm:$0xff]  ;;  %v16153_v22 = vld [vmem:[%s15999_s1 + $0xb8] sm:$0xff]  ;;  %s18379_s4 = scalar_lea.vmem %s20611_s2, %s12181_s0 }
 0x19d   : > { %1405 = vmatpush1.msra.mxu0 %v16071_v4  ;;  %12880 = vmatprep.subr.mxu1 %v16129_v17  ;;  %20207 = vst [vmem:[#allocation54_spill] sm:$0xff] %v16147_v21  ;;  %v16156_v23 = vld [vmem:[#allocation7 + $0x18] sm:$0xff]  ;;  %v16162_v24 = vld [vmem:[%s15999_s1 + $0xb0] sm:$0xff]  ;;  %v16171_v26 = vld [vmem:[%s15999_s1 + $0xa8] sm:$0xff]  ;;  %s18384_s25 = scalar_lea.vmem %s20612_s30, %s12181_s0 }
 0x19e   : > { %1406 = vmatprep.subr.mxu0 %v19942_v0  ;;  %12881 = vmatpush3.msra.mxu1 %v16129_v17  ;;  %20208 = vst [vmem:[#allocation55_spill] sm:$0xff] %v16156_v23  ;;  %v16165_v25 = vld [vmem:[#allocation7 + $0x10] sm:$0xff]  ;;  %v16178_v27 = vld [vmem:[%s15999_s1 + $0xa0] sm:$0xff]  ;;  %v16184_v28 = vld [vmem:[%s15999_s1 + $0x98] sm:$0xff] }
 0x19f   : > { %1407 = vmatpush1.msra.mxu0 %v16076_v5  ;;  %12882 = vmatprep.subr.mxu1 %v16138_v19  ;;  %20209 = vst [vmem:[#allocation56_spill] sm:$0xff] %v16165_v25  ;;  %v16189_v29 = vld [vmem:[%s15999_s1 + $0x90] sm:$0xff]  ;;  %v16194_v30 = vld [vmem:[%s15999_s1 + $0x88] sm:$0xff]  ;;  %v16199_v31 = vld [vmem:[%s15999_s1 + $0x80] sm:$0xff] }
 0x1a0   : > { %1408 = vmatprep.subr.mxu0 %v19942_v0  ;;  %12883 = vmatpush3.msra.mxu1 %v16138_v19  ;;  %v16202_v32 = vld [vmem:[#allocation6] sm:$0xff]  ;;  %v16205_v33 = vld [vmem:[#allocation6 + $0x18] sm:$0xff]  ;;  %v16212_v34 = vld [vmem:[#allocation6 + $0x10] sm:$0xff] }
 0x1a1   : > { %1409 = vmatpush1.msra.mxu0 %v16081_v6  ;;  %12884 = vmatprep.subr.mxu1 %v16147_v21  ;;  %v16215_v35 = vld [vmem:[#allocation6 + $0x28] sm:$0xff]  ;;  %v16223_v36 = vld [vmem:[#allocation6 + $0x20] sm:$0xff]  ;;  %v16226_v37 = vld [vmem:[#allocation6 + $0x38] sm:$0xff] }
 0x1a2   : > { %1410 = vmatprep.subr.mxu0 %v19942_v0  ;;  %12885 = vmatpush3.msra.mxu1 %v16147_v21  ;;  %v16234_v38 = vld [vmem:[#allocation6 + $0x30] sm:$0xff]  ;;  %v16237_v39 = vld [vmem:[#allocation6 + $0x48] sm:$0xff]  ;;  %v16244_v40 = vld [vmem:[#allocation6 + $0x40] sm:$0xff] }
 0x1a3   : > { %1411 = vmatpush1.msra.mxu0 %v16090_v8  ;;  %12886 = vmatprep.subr.mxu1 %v16156_v23  ;;  %v16246_v41 = vld [vmem:[#allocation6 + $0x58] sm:$0xff]  ;;  %v16251_v42 = vld [vmem:[#allocation6 + $0x50] sm:$0xff]  ;;  %v16253_v43 = vld [vmem:[#allocation6 + $0x68] sm:$0xff] }
 0x1a4   : > { %1412 = vmatprep.subr.mxu0 %v19942_v0  ;;  %12887 = vmatpush3.msra.mxu1 %v16156_v23  ;;  %v16258_v44 = vld [vmem:[#allocation6 + $0x60] sm:$0xff]  ;;  %v16260_v45 = vld [vmem:[#allocation6 + $0x78] sm:$0xff]  ;;  %v16265_v46 = vld [vmem:[#allocation6 + $0x70] sm:$0xff] }
 0x1a5   : > { %1413 = vmatpush1.msra.mxu0 %v16095_v9  ;;  %12888 = vmatprep.subr.mxu1 %v16165_v25  ;;  %v16267_v47 = vld [vmem:[#allocation6 + $0x88] sm:$0xff]  ;;  %v16272_v48 = vld [vmem:[#allocation6 + $0x80] sm:$0xff]  ;;  %v16274_v49 = vld [vmem:[#allocation6 + $0x98] sm:$0xff] }
 0x1a6   : > { %1414 = vmatprep.subr.mxu0 %v19942_v0  ;;  %12889 = vmatpush3.msra.mxu1 %v16165_v25  ;;  %v16279_v50 = vld [vmem:[#allocation6 + $0x90] sm:$0xff]  ;;  %v16281_v51 = vld [vmem:[#allocation6 + $0xa8] sm:$0xff]  ;;  %v16286_v52 = vld [vmem:[#allocation6 + $0xa0] sm:$0xff] }
 0x1a7   : > { %1415 = vmatpush1.msra.mxu0 %v16100_v10  ;;  %v16288_v53 = vld [vmem:[#allocation6 + $0xb8] sm:$0xff]  ;;  %v16293_v54 = vld [vmem:[#allocation6 + $0xb0] sm:$0xff]  ;;  %v16295_v55 = vld [vmem:[#allocation6 + $0xc8] sm:$0xff] }
 0x1a8   : > { %1416 = vmatprep.subr.mxu0 %v19942_v0  ;;  %v16300_v56 = vld [vmem:[#allocation6 + $0xc0] sm:$0xff]  ;;  %v16302_v57 = vld [vmem:[#allocation6 + $0xd8] sm:$0xff]  ;;  %v16307_v58 = vld [vmem:[#allocation6 + $0xd0] sm:$0xff] }
 0x1a9   : > { %1417 = vmatpush1.msra.mxu0 %v16105_v11  ;;  %20210 = vst [vmem:[#allocation57_spill] sm:$0xff] %v16307_v58  ;;  %v16309_v59 = vld [vmem:[#allocation6 + $0xe8] sm:$0xff]  ;;  %v16314_v60 = vld [vmem:[#allocation6 + $0xe0] sm:$0xff]  ;;  %v16316_v61 = vld [vmem:[#allocation6 + $0xf8] sm:$0xff] }
 0x1aa   : > { %1418 = vmatprep.subr.mxu0 %v19942_v0  ;;  %20211 = vst [vmem:[#allocation58_spill] sm:$0xff] %v16309_v59  ;;  %20212 = vst [vmem:[#allocation59_spill] sm:$0xff] %v16314_v60  ;;  %v16321_v62 = vld [vmem:[#allocation6 + $0xf0] sm:$0xff]  ;;  %v16323_v63 = vld [vmem:[#allocation6 + $0x108] sm:$0xff] }
 0x1ab   : > { %1419 = vmatpush1.msra.mxu0 %v16110_v12  ;;  %20213 = vst [vmem:[#allocation60_spill] sm:$0xff] %v16316_v61  ;;  %20214 = vst [vmem:[#allocation61_spill] sm:$0xff] %v16321_v62 }
 0x1ac   : > { %1420 = vmatprep.subr.mxu0 %v19942_v0  ;;  %20215 = vst [vmem:[#allocation62_spill] sm:$0xff] %v16323_v63 }
 0x1ad   : > { %1421 = vmatpush1.msra.mxu0 %v16115_v13 }
 0x1ae   : > { %1422 = vmatprep.subr.mxu0 %v19942_v0 }
 0x1af   : > { %1423 = vmatpush1.msra.mxu0 %v16120_v14 }
 0x1b0   : > { %1424 = vmatprep.subr.mxu0 %v19942_v0 }
 0x1b1   : > { %1425 = vmatpush1.msra.mxu0 %v16125_v15 }
 0x1b2   : > { %1426 = vmatprep.subr.mxu0 %v19942_v0 }
 0x1b3   : > { %1427 = vmatpush1.msra.mxu0 %v16135_v18 }
 0x1b4   : > { %1428 = vmatprep.subr.mxu0 %v19942_v0 }
 0x1b5   : > { %1429 = vmatpush1.msra.mxu0 %v16144_v20 }
 0x1b6   : > { %1446 = vmatprep.subr.mxu0 %v19942_v0 }
 0x1b7   : > { %1447 = vmatpush2.msra.mxu0 %v16153_v22 }
 0x1b8   : > { %1448 = vmatprep.subr.mxu0 %v19942_v0 }
 0x1b9   : > { %1449 = vmatpush2.msra.mxu0 %v16162_v24 }
 0x1ba   : > { %1450 = vmatprep.subr.mxu0 %v19942_v0 }
 0x1bb   : > { %1451 = vmatpush2.msra.mxu0 %v16171_v26 }
 0x1bc   : > { %1452 = vmatprep.subr.mxu0 %v19942_v0 }
 0x1bd   : > { %1453 = vmatpush2.msra.mxu0 %v16178_v27 }
 0x1be   : > { %1454 = vmatprep.subr.mxu0 %v19942_v0 }
 0x1bf   : > { %1455 = vmatpush2.msra.mxu0 %v16184_v28 }
 0x1c0   : > { %1456 = vmatprep.subr.mxu0 %v19942_v0 }
 0x1c1   : > { %1457 = vmatpush2.msra.mxu0 %v16189_v29 }
 0x1c2   : > { %1458 = vmatprep.subr.mxu0 %v19942_v0 }
 0x1c3   : > { %1459 = vmatpush2.msra.mxu0 %v16194_v30 }
 0x1c4   : > { %1460 = vmatprep.subr.mxu0 %v19942_v0  ;;  %v16328_v0 = vld [vmem:[#allocation6 + $0x100] sm:$0xff] }
 0x1c5   : > { %1461 = vmatpush2.msra.mxu0 %v16199_v31  ;;  %20216 = vst [vmem:[#allocation63_spill] sm:$0xff] %v16328_v0 }
 0x1c6   : > { %1463 = vmatmul.mubr.f32.vlgmr.msra.gmra.mxu0 %v16202_v32  ;;  %12930 = vmatprep.subr.mxu0 %v16127_v16 }
 0x1c7   : > { %11596 = vmatprep.mubr.msk.f32.mxu0 %vm1325_vm0, %v16205_v33  ;;  %12931 = vmatpush3.msra.mxu0 %v16127_v16 }
 0x1c8   : > { %12932 = vmatprep.subr.mxu0 %v16129_v17 }
 0x1c9   : > { %12933 = vmatpush3.msra.mxu0 %v16129_v17  ;;  %v16343_v17 = vld [vmem:[#allocation7] sm:$0xff] }
 0x1ca   : > { %1468 = vmatmul.mubr.f32.gmra.mxu0 %v16212_v34  ;;  %12934 = vmatprep.subr.mxu0 %v16138_v19  ;;  %20221 = vst [vmem:[#allocation68_spill] sm:$0xff] %v16343_v17 }
 0x1cb   : > { %11597 = vmatprep.mubr.msk.f32.mxu0 %vm1325_vm0, %v16215_v35  ;;  %12935 = vmatpush3.msra.mxu0 %v16138_v19  ;;  %v16340_v19 = vld [vmem:[#allocation6 + $0x128] sm:$0xff] }
 0x1cc   : > { %12936 = vmatprep.subr.mxu0 %v16147_v21  ;;  %20220 = vst [vmem:[#allocation67_spill] sm:$0xff] %v16340_v19 }
 0x1cd   : > { %12937 = vmatpush3.msra.mxu0 %v16147_v21  ;;  %v16337_v21 = vld [vmem:[#allocation6 + $0x110] sm:$0xff] }
 0x1ce   : > { %1473 = vmatmul.mubr.f32.gmra.mxu0 %v16223_v36  ;;  %12938 = vmatprep.subr.mxu0 %v16156_v23  ;;  %20219 = vst [vmem:[#allocation66_spill] sm:$0xff] %v16337_v21 }
 0x1cf   : > { %11598 = vmatprep.mubr.msk.f32.mxu0 %vm1325_vm0, %v16226_v37  ;;  %12939 = vmatpush3.msra.mxu0 %v16156_v23  ;;  %v16333_v23 = vld [vmem:[#allocation7 + $0x8] sm:$0xff] }
 0x1d0   : > { %12940 = vmatprep.subr.mxu0 %v16165_v25  ;;  %20218 = vst [vmem:[#allocation65_spill] sm:$0xff] %v16333_v23  ;;  %12890 = vmatprep.subr.mxu1 %v16333_v23 }
 0x1d1   : > { %12941 = vmatpush3.msra.mxu0 %v16165_v25  ;;  %v16330_v25 = vld [vmem:[#allocation6 + $0x118] sm:$0xff]  ;;  %12891 = vmatpush3.msra.mxu1 %v16333_v23 }
 0x1d2   : > { %1478 = vmatmul.mubr.f32.gmra.mxu0 %v16234_v38  ;;  %20217 = vst [vmem:[#allocation64_spill] sm:$0xff] %v16330_v25  ;;  %12942 = vmatprep.subr.mxu0 %v16333_v23 }
 0x1d3   : > { %11599 = vmatprep.mubr.msk.f32.mxu0 %vm1325_vm0, %v16237_v39  ;;  %12892 = vmatprep.subr.mxu1 %v16343_v17 }
 0x1d4   : > { %12943 = vmatpush3.msra.mxu0 %v16333_v23  ;;  %12893 = vmatpush3.msra.mxu1 %v16343_v17  ;;  %v16363_v23 = vld [vmem:[#allocation6 + $0x130] sm:$0xff] }
 0x1d5   : > { %12944 = vmatprep.subr.mxu0 %v16343_v17  ;;  %20225 = vst [vmem:[#allocation71_spill] sm:$0xff] %v16363_v23 }
 0x1d6   : > { %1483 = vmatmul.mubr.f32.gmra.mxu0 %v16244_v40 }
 0x1d7   : > { %11600 = vmatprep.mubr.msk.f32.mxu0 %vm1325_vm0, %v16246_v41  ;;  %12945 = vmatpush3.msra.mxu0 %v16343_v17  ;;  %v16377_v17 = vld [vmem:[#allocation6 + $0x150] sm:$0xff] }
 0x1d8   : > { %12982 = vmatprep.subr.mxu0 %v16127_v16  ;;  %20229 = vst [vmem:[#allocation75_spill] sm:$0xff] %v16377_v17 }
 0x1da   : > { %1488 = vmatmul.mubr.f32.gmra.mxu0 %v16251_v42 }
 0x1db   : > { %11601 = vmatprep.mubr.msk.f32.mxu0 %vm1325_vm0, %v16253_v43 }
 0x1de   : > { %1493 = vmatmul.mubr.f32.gmra.mxu0 %v16258_v44 }
 0x1df   : > { %11602 = vmatprep.mubr.msk.f32.mxu0 %vm1325_vm0, %v16260_v45 }
 0x1e2   : > { %1498 = vmatmul.mubr.f32.gmra.mxu0 %v16265_v46 }
 0x1e3   : > { %11603 = vmatprep.mubr.msk.f32.mxu0 %vm1325_vm0, %v16267_v47 }
 0x1e6   : > { %1503 = vmatmul.mubr.f32.gmra.mxu0 %v16272_v48 }
 0x1e7   : > { %11604 = vmatprep.mubr.msk.f32.mxu0 %vm1325_vm0, %v16274_v49 }
 0x1ea   : > { %1508 = vmatmul.mubr.f32.gmra.mxu0 %v16279_v50 }
 0x1eb   : > { %11605 = vmatprep.mubr.msk.f32.mxu0 %vm1325_vm0, %v16281_v51 }
 0x1ee   : > { %1513 = vmatmul.mubr.f32.gmra.mxu0 %v16286_v52 }
 0x1ef   : > { %11606 = vmatprep.mubr.msk.f32.mxu0 %vm1325_vm0, %v16288_v53 }
 0x1f2   : > { %1518 = vmatmul.mubr.f32.gmra.mxu0 %v16293_v54 }
 0x1f3   : > { %11607 = vmatprep.mubr.msk.f32.mxu0 %vm1325_vm0, %v16295_v55 }
 0x1f6   : > { %1523 = vmatmul.mubr.f32.gmra.mxu0 %v16300_v56 }
 0x1f7   : > { %11608 = vmatprep.mubr.msk.f32.mxu0 %vm1325_vm0, %v16302_v57 }
 0x1fa   : > { %1528 = vmatmul.mubr.f32.gmra.mxu0 %v16307_v58 }
 0x1fb   : > { %11609 = vmatprep.mubr.msk.f32.mxu0 %vm1325_vm0, %v16309_v59 }
 0x1fe   : > { %1533 = vmatmul.mubr.f32.gmra.mxu0 %v16314_v60 }
 0x1ff   : > { %11610 = vmatprep.mubr.msk.f32.mxu0 %vm1325_vm0, %v16316_v61  ;;  %v16400_v61 = vld [vmem:[%s16006_s13 + $0x70] sm:$0xff] }
 0x200   : > { %20235 = vst [vmem:[#allocation81_spill] sm:$0xff] %v16400_v61 }
 0x202   : > { %1538 = vmatmul.mubr.f32.gmra.mxu0 %v16321_v62  ;;  %v16372_v62 = vld [vmem:[#allocation6 + $0x158] sm:$0xff] }
 0x203   : > { %11611 = vmatprep.mubr.msk.f32.mxu0 %vm1325_vm0, %v16323_v63  ;;  %v16355_v63 = vld [vmem:[#allocation6 + $0x138] sm:$0xff]  ;;  %20228 = vst [vmem:[#allocation74_spill] sm:$0xff] %v16372_v62 }
 0x204   : > { %20224 = vst [vmem:[#allocation70_spill] sm:$0xff] %v16355_v63 }
 0x206   : > { %1543 = vmatmul.mubr.f32.gmra.mxu0 %v16328_v0  ;;  %v20223_v0 = vmov 0.0  }
 0x207   : > { %11612 = vmatprep.mubr.msk.f32.mxu0 %vm1325_vm0, %v16330_v25  ;;  %v16352_v25 = vld [vmem:[#allocation6 + $0x120] sm:$0xff]  ;;  %1840 = vmatprep.subr.mxu1 %v20223_v0 }
 0x208   : > { %20222 = vst [vmem:[#allocation69_spill] sm:$0xff] %v16352_v25 }
 0x20a   : > { %1548 = vmatmul.mubr.f32.gmra.mxu0 %v16337_v21  ;;  %v16370_v21 = vld [vmem:[#allocation6 + $0x140] sm:$0xff] }
 0x20b   : > { %11613 = vmatprep.mubr.msk.f32.mxu0 %vm1325_vm0, %v16340_v19  ;;  %v16365_v19 = vld [vmem:[#allocation6 + $0x148] sm:$0xff]  ;;  %20227 = vst [vmem:[#allocation73_spill] sm:$0xff] %v16370_v21 }
 0x20c   : > { %20226 = vst [vmem:[#allocation72_spill] sm:$0xff] %v16365_v19 }
 0x20e   : > { %1553 = vmatmul.mubr.f32.gmra.mxu0 %v16352_v25 }
 0x20f   : > { %11614 = vmatprep.mubr.msk.f32.mxu0 %vm1325_vm0, %v16355_v63  ;;  %v16379_v63 = vld [vmem:[#allocation6 + $0x168] sm:$0xff] }
 0x210   : > { %20230 = vst [vmem:[#allocation76_spill] sm:$0xff] %v16379_v63 }
 0x212   : > { %1558 = vmatmul.mubr.f32.gmra.mxu0 %v16363_v23  ;;  %v16386_v23 = vld [vmem:[#allocation6 + $0x178] sm:$0xff] }
 0x213   : > { %11615 = vmatprep.mubr.msk.f32.mxu0 %vm1325_vm0, %v16365_v19  ;;  %v16384_v19 = vld [vmem:[#allocation6 + $0x160] sm:$0xff]  ;;  %20232 = vst [vmem:[#allocation78_spill] sm:$0xff] %v16386_v23 }
 0x214   : > { %20231 = vst [vmem:[#allocation77_spill] sm:$0xff] %v16384_v19 }
 0x216   : > { %1563 = vmatmul.mubr.f32.gmra.mxu0 %v16370_v21 }
 0x217   : > { %11616 = vmatprep.mubr.msk.f32.mxu0 %vm1325_vm0, %v16372_v62  ;;  %v16391_v62 = vld [vmem:[#allocation6 + $0x170] sm:$0xff] }
 0x218   : > { %20233 = vst [vmem:[#allocation79_spill] sm:$0xff] %v16391_v62 }
 0x21a   : > { %1568 = vmatmul.mubr.f32.gmra.mxu0 %v16377_v17 }
 0x21b   : > { %11617 = vmatprep.mubr.msk.f32.mxu0 %vm1325_vm0, %v16379_v63  ;;  %v16396_v63 = vld [vmem:[%s16006_s13 + $0x78] sm:$0xff] }
 0x21c   : > { %20234 = vst [vmem:[#allocation80_spill] sm:$0xff] %v16396_v63 }
 0x21e   : > { %1573 = vmatmul.mubr.f32.gmra.mxu0 %v16384_v19 }
 0x21f   : > { %11618 = vmatprep.mubr.msk.f32.mxu0 %vm1325_vm0, %v16386_v23 }
 0x222   : > { %1578 = vmatmul.mubr.f32.gmra.mxu0 %v16391_v62  ;;  %v16405_v62 = vld [vmem:[%s16006_s13 + $0x68] sm:$0xff] }
 0x223   : > { %20236 = vst [vmem:[#allocation82_spill] sm:$0xff] %v16405_v62 }
 0x286   : > { %v1464_v21 = vpop.f32.mrf.mxu0 }
 0x287   : > { %12894 = vmatprep.mubr.msk.f32.mxu1 %vm1325_vm0, %v1464_v21 }
 0x288   : > { %v1466_v17 = vpop.f32.mrf.mxu0 }
 0x289   : > { %v16411_v17 = vld [vmem:[%s16006_s13 + $0x60] sm:$0xff] }
 0x28a   : > { %v1469_v25 = vpop.f32.mrf.mxu0  ;;  %20237 = vst [vmem:[#allocation83_spill] sm:$0xff] %v16411_v17 }
 0x28b   : > { %12895 = vmatmul.mubr.msk.f32.vlgmr.msra.gmra.mxu1 %vm1325_vm0, %v1469_v25 }
 0x28c   : > { %v1471_v19 = vpop.f32.mrf.mxu0  ;;  %1841 = vmatpush1.msra.mxu1 %v16396_v63 }
 0x28d   : > { %1842 = vmatprep.subr.mxu1 %v20223_v0  ;;  %v16416_v19 = vld [vmem:[%s16006_s13 + $0x58] sm:$0xff] }
 0x28e   : > { %v1474_v23 = vpop.f32.mrf.mxu0  ;;  %1843 = vmatpush1.msra.mxu1 %v16400_v61  ;;  %20238 = vst [vmem:[#allocation84_spill] sm:$0xff] %v16416_v19 }
 0x28f   : > { %12897 = vmatprep.mubr.msk.f32.mxu1 %vm1325_vm0, %v1474_v23  ;;  %1844 = vmatprep.subr.mxu1 %v20223_v0  ;;  %v16422_v23 = vld [vmem:[%s16006_s13 + $0x50] sm:$0xff] }
 0x290   : > { %v1476_v21 = vpop.f32.mrf.mxu0  ;;  %1845 = vmatpush1.msra.mxu1 %v16405_v62  ;;  %20239 = vst [vmem:[#allocation85_spill] sm:$0xff] %v16422_v23 }
 0x291   : > { %1846 = vmatprep.subr.mxu1 %v20223_v0  ;;  %v16427_v21 = vld [vmem:[%s16006_s13 + $0x48] sm:$0xff] }
 0x292   : > { %v1479_v25 = vpop.f32.mrf.mxu0  ;;  %1847 = vmatpush1.msra.mxu1 %v16411_v17  ;;  %20240 = vst [vmem:[#allocation86_spill] sm:$0xff] %v16427_v21 }
 0x293   : > { %12898 = vmatmul.mubr.msk.f32.gmra.mxu1 %vm1325_vm0, %v1479_v25  ;;  %1848 = vmatprep.subr.mxu1 %v20223_v0  ;;  %v16433_v25 = vld [vmem:[%s16006_s13 + $0x40] sm:$0xff] }
 0x294   : > { %v1481_v61 = vpop.f32.mrf.mxu0  ;;  %1849 = vmatpush1.msra.mxu1 %v16416_v19  ;;  %20241 = vst [vmem:[#allocation87_spill] sm:$0xff] %v16433_v25 }
 0x295   : > { %1850 = vmatprep.subr.mxu1 %v20223_v0  ;;  %v16438_v61 = vld [vmem:[%s16006_s13 + $0x38] sm:$0xff] }
 0x296   : > { %v1484_v62 = vpop.f32.mrf.mxu0  ;;  %1851 = vmatpush1.msra.mxu1 %v16422_v23  ;;  %20242 = vst [vmem:[#allocation88_spill] sm:$0xff] %v16438_v61 }
 0x297   : > { %12900 = vmatprep.mubr.msk.f32.mxu1 %vm1325_vm0, %v1484_v62  ;;  %1852 = vmatprep.subr.mxu1 %v20223_v0  ;;  %v16444_v62 = vld [vmem:[%s16006_s13 + $0x30] sm:$0xff] }
 0x298   : > { %v1486_v17 = vpop.f32.mrf.mxu0  ;;  %1853 = vmatpush1.msra.mxu1 %v16427_v21  ;;  %20243 = vst [vmem:[#allocation89_spill] sm:$0xff] %v16444_v62 }
 0x299   : > { %1854 = vmatprep.subr.mxu1 %v20223_v0  ;;  %v16449_v17 = vld [vmem:[%s16006_s13 + $0x28] sm:$0xff] }
 0x29a   : > { %v1489_v19 = vpop.f32.mrf.mxu0  ;;  %1855 = vmatpush1.msra.mxu1 %v16433_v25  ;;  %20244 = vst [vmem:[#allocation90_spill] sm:$0xff] %v16449_v17 }
 0x29b   : > { %12901 = vmatmul.mubr.msk.f32.gmra.mxu1 %vm1325_vm0, %v1489_v19  ;;  %1856 = vmatprep.subr.mxu1 %v20223_v0  ;;  %v16455_v19 = vld [vmem:[%s16006_s13 + $0x20] sm:$0xff] }
 0x29c   : > { %v1491_v23 = vpop.f32.mrf.mxu0  ;;  %1857 = vmatpush1.msra.mxu1 %v16438_v61  ;;  %20245 = vst [vmem:[#allocation91_spill] sm:$0xff] %v16455_v19 }
 0x29d   : > { %1858 = vmatprep.subr.mxu1 %v20223_v0  ;;  %v16460_v23 = vld [vmem:[%s16006_s13 + $0x18] sm:$0xff] }
 0x29e   : > { %v1494_v21 = vpop.f32.mrf.mxu0  ;;  %1859 = vmatpush1.msra.mxu1 %v16444_v62  ;;  %20246 = vst [vmem:[#allocation92_spill] sm:$0xff] %v16460_v23 }
 0x29f   : > { %12903 = vmatprep.mubr.msk.f32.mxu1 %vm1325_vm0, %v1494_v21  ;;  %1860 = vmatprep.subr.mxu1 %v20223_v0  ;;  %v16466_v21 = vld [vmem:[%s16006_s13 + $0x10] sm:$0xff] }
 0x2a0   : > { %v1496_v25 = vpop.f32.mrf.mxu0  ;;  %1861 = vmatpush1.msra.mxu1 %v16449_v17  ;;  %20247 = vst [vmem:[#allocation93_spill] sm:$0xff] %v16466_v21 }
 0x2a1   : > { %1862 = vmatprep.subr.mxu1 %v20223_v0  ;;  %v16471_v25 = vld [vmem:[%s16006_s13 + $0x8] sm:$0xff] }
 0x2a2   : > { %v1499_v61 = vpop.f32.mrf.mxu0  ;;  %1863 = vmatpush1.msra.mxu1 %v16455_v19  ;;  %20248 = vst [vmem:[#allocation94_spill] sm:$0xff] %v16471_v25 }
 0x2a3   : > { %12904 = vmatmul.mubr.msk.f32.gmra.mxu1 %vm1325_vm0, %v1499_v61  ;;  %1864 = vmatprep.subr.mxu1 %v20223_v0  ;;  %v16477_v61 = vld [vmem:[%s16006_s13] sm:$0xff] }
 0x2a4   : > { %v1501_v62 = vpop.f32.mrf.mxu0  ;;  %1865 = vmatpush1.msra.mxu1 %v16460_v23  ;;  %20249 = vst [vmem:[#allocation95_spill] sm:$0xff] %v16477_v61 }
 0x2a5   : > { %1866 = vmatprep.subr.mxu1 %v20223_v0  ;;  %v16482_v62 = vld [vmem:[%s16006_s13 + $0xb8] sm:$0xff] }
 0x2a6   : > { %v1504_v17 = vpop.f32.mrf.mxu0  ;;  %1867 = vmatpush1.msra.mxu1 %v16466_v21  ;;  %20250 = vst [vmem:[#allocation96_spill] sm:$0xff] %v16482_v62 }
 0x2a7   : > { %12906 = vmatprep.mubr.msk.f32.mxu1 %vm1325_vm0, %v1504_v17  ;;  %1868 = vmatprep.subr.mxu1 %v20223_v0  ;;  %v16488_v17 = vld [vmem:[%s16006_s13 + $0xb0] sm:$0xff] }
 0x2a8   : > { %v1506_v19 = vpop.f32.mrf.mxu0  ;;  %1869 = vmatpush1.msra.mxu1 %v16471_v25  ;;  %20251 = vst [vmem:[#allocation97_spill] sm:$0xff] %v16488_v17 }
 0x2a9   : > { %1870 = vmatprep.subr.mxu1 %v20223_v0  ;;  %v16493_v19 = vld [vmem:[%s16006_s13 + $0xa8] sm:$0xff] }
 0x2aa   : > { %v1509_v23 = vpop.f32.mrf.mxu0  ;;  %1871 = vmatpush1.msra.mxu1 %v16477_v61  ;;  %20252 = vst [vmem:[#allocation98_spill] sm:$0xff] %v16493_v19 }
 0x2ab   : > { %12907 = vmatmul.mubr.msk.f32.gmra.mxu1 %vm1325_vm0, %v1509_v23  ;;  %1888 = vmatprep.subr.mxu1 %v20223_v0  ;;  %v16499_v23 = vld [vmem:[%s16006_s13 + $0xa0] sm:$0xff] }
 0x2ac   : > { %v1511_v21 = vpop.f32.mrf.mxu0  ;;  %1889 = vmatpush2.msra.mxu1 %v16482_v62  ;;  %20253 = vst [vmem:[#allocation99_spill] sm:$0xff] %v16499_v23 }
 0x2ad   : > { %1890 = vmatprep.subr.mxu1 %v20223_v0  ;;  %v16504_v21 = vld [vmem:[%s16006_s13 + $0x98] sm:$0xff] }
 0x2ae   : > { %v1514_v25 = vpop.f32.mrf.mxu0  ;;  %1891 = vmatpush2.msra.mxu1 %v16488_v17  ;;  %20254 = vst [vmem:[#allocation100_spill] sm:$0xff] %v16504_v21 }
 0x2af   : > { %12909 = vmatprep.mubr.msk.f32.mxu1 %vm1325_vm0, %v1514_v25  ;;  %1892 = vmatprep.subr.mxu1 %v20223_v0  ;;  %v16510_v25 = vld [vmem:[%s16006_s13 + $0x90] sm:$0xff] }
 0x2b0   : > { %v1516_v61 = vpop.f32.mrf.mxu0  ;;  %1893 = vmatpush2.msra.mxu1 %v16493_v19  ;;  %20255 = vst [vmem:[#allocation101_spill] sm:$0xff] %v16510_v25 }
 0x2b1   : > { %1894 = vmatprep.subr.mxu1 %v20223_v0  ;;  %v16515_v61 = vld [vmem:[%s16006_s13 + $0x88] sm:$0xff] }
 0x2b2   : > { %v1519_v62 = vpop.f32.mrf.mxu0  ;;  %1895 = vmatpush2.msra.mxu1 %v16499_v23  ;;  %20256 = vst [vmem:[#allocation102_spill] sm:$0xff] %v16515_v61  ;;  %v16521_v23 = vld [vmem:[%s16006_s13 + $0x80] sm:$0xff] }
 0x2b3   : > { %12910 = vmatmul.mubr.msk.f32.gmra.mxu1 %vm1325_vm0, %v1519_v62  ;;  %1896 = vmatprep.subr.mxu1 %v20223_v0  ;;  %20257 = vst [vmem:[#allocation103_spill] sm:$0xff] %v16521_v23 }
 0x2b4   : > { %v1521_v17 = vpop.f32.mrf.mxu0  ;;  %1897 = vmatpush2.msra.mxu1 %v16504_v21 }
 0x2b5   : > { %1898 = vmatprep.subr.mxu1 %v20223_v0 }
 0x2b6   : > { %v1524_v19 = vpop.f32.mrf.mxu0  ;;  %1899 = vmatpush2.msra.mxu1 %v16510_v25 }
 0x2b7   : > { %12912 = vmatprep.mubr.msk.f32.mxu1 %vm1325_vm0, %v1524_v19  ;;  %1900 = vmatprep.subr.mxu1 %v20223_v0 }
 0x2b8   : > { %v1526_v62 = vpop.f32.mrf.mxu0  ;;  %1901 = vmatpush2.msra.mxu1 %v16515_v61 }
 0x2b9   : > { %1902 = vmatprep.subr.mxu1 %v20223_v0 }
 0x2ba   : > { %v1529_v17 = vpop.f32.mrf.mxu0  ;;  %1903 = vmatpush2.msra.mxu1 %v16521_v23 }
 0x2bb   : > { %12913 = vmatmul.mubr.msk.f32.gmra.mxu1 %vm1325_vm0, %v1529_v17  ;;  %2522 = vmatprep.subr.mxu1 %v20223_v0 }
 0x2bc   : > { %v1531_v21 = vpop.f32.mrf.mxu0 }
 0x2be   : > { %v1534_v25 = vpop.f32.mrf.mxu0 }
 0x2bf   : > { %12915 = vmatprep.mubr.msk.f32.mxu1 %vm1325_vm0, %v1534_v25 }
 0x2c0   : > { %v1536_v19 = vpop.f32.mrf.mxu0 }
 0x2c2   : > { %v1539_v63 = vpop.f32.mrf.mxu0 }
 0x2c3   : > { %12916 = vmatmul.mubr.msk.f32.gmra.mxu1 %vm1325_vm0, %v1539_v63 }
 0x2c4   : > { %v1541_v62 = vpop.f32.mrf.mxu0 }
 0x2c6   : > { %v1544_v60 = vpop.f32.mrf.mxu0 }
 0x2c7   : > { %12918 = vmatprep.mubr.msk.f32.mxu1 %vm1325_vm0, %v1544_v60 }
 0x2c8   : > { %v1546_v61 = vpop.f32.mrf.mxu0 }
 0x2ca   : > { %v1549_v59 = vpop.f32.mrf.mxu0 }
 0x2cb   : > { %12919 = vmatmul.mubr.msk.f32.gmra.mxu1 %vm1325_vm0, %v1549_v59 }
 0x2cc   : > { %v1551_v23 = vpop.f32.mrf.mxu0 }
 0x2ce   : > { %v1554_v17 = vpop.f32.mrf.mxu0 }
 0x2cf   : > { %12921 = vmatprep.mubr.msk.f32.mxu1 %vm1325_vm0, %v1554_v17 }
 0x2d0   : > { %v1556_v21 = vpop.f32.mrf.mxu0 }
 0x2d1   : > { %v2512_v21 = vmul.f32 %v16061_v2, %v16061_v2  ;;  %v2508_v2 = vmul.f32 %v16081_v6, %v16081_v6  ;;  %v2504_v6 = vmul.f32 %v16105_v11, %v16105_v11  ;;  %v2500_v11 = vmul.f32 %v16125_v15, %v16125_v15 }
 0x2d2   : > { %v1559_v58 = vpop.f32.mrf.mxu0  ;;  %v2520_v15 = vmul.f32 %v16162_v24, %v16162_v24  ;;  %v2516_v24 = vmul.f32 %v16189_v29, %v16189_v29  ;;  %v20259_v29 = vld [vmem:[#allocation58_spill] sm:$0xff] }
 0x2d3   : > { %12922 = vmatmul.mubr.msk.f32.gmra.mxu1 %vm1325_vm0, %v1559_v58  ;;  %v2513_v58 = vmul.f32 %v16058_v1, %v16058_v1  ;;  %v2509_v1 = vmul.f32 %v16076_v5, %v16076_v5  ;;  %v2505_v5 = vmul.f32 %v16100_v10, %v16100_v10  ;;  %v2501_v10 = vmul.f32 %v16120_v14, %v16120_v14 }
 0x2d4   : > { %v1561_v25 = vpop.f32.mrf.mxu0  ;;  %v2521_v14 = vmul.f32 %v16153_v22, %v16153_v22  ;;  %v2517_v22 = vmul.f32 %v16184_v28, %v16184_v28  ;;  %v20258_v28 = vld [vmem:[#allocation57_spill] sm:$0xff] }
 0x2d5   : > { %v2511_v25 = vmul.f32 %v16066_v3, %v16066_v3  ;;  %v2507_v3 = vmul.f32 %v16090_v8, %v16090_v8  ;;  %v2503_v8 = vmul.f32 %v16110_v12, %v16110_v12  ;;  %v2499_v12 = vmul.f32 %v16135_v18, %v16135_v18 }
 0x2d6   : > { %v1564_v19 = vpop.f32.mrf.mxu0  ;;  %v2519_v18 = vmul.f32 %v16171_v26, %v16171_v26  ;;  %v2515_v26 = vmul.f32 %v16194_v30, %v16194_v30  ;;  %v20260_v30 = vld [vmem:[#allocation59_spill] sm:$0xff] }
 0x2d7   : > { %12924 = vmatprep.mubr.msk.f32.mxu1 %vm1325_vm0, %v1564_v19  ;;  %v2510_v19 = vmul.f32 %v16071_v4, %v16071_v4  ;;  %v2506_v4 = vmul.f32 %v16095_v9, %v16095_v9  ;;  %v2502_v9 = vmul.f32 %v16115_v13, %v16115_v13  ;;  %v2498_v13 = vmul.f32 %v16144_v20, %v16144_v20 }
 0x2d8   : > { %v1566_v63 = vpop.f32.mrf.mxu0  ;;  %v2518_v20 = vmul.f32 %v16178_v27, %v16178_v27  ;;  %v2514_v27 = vmul.f32 %v16199_v31, %v16199_v31  ;;  %v20261_v31 = vld [vmem:[#allocation60_spill] sm:$0xff] }
 0x2d9   : > { %v20262_v63 = vld [vmem:[#allocation61_spill] sm:$0xff] }
 0x2da   : > { %v1569_v62 = vpop.f32.mrf.mxu0 }
 0x2db   : > { %12925 = vmatmul.mubr.msk.f32.gmra.mxu1 %vm1325_vm0, %v1569_v62  ;;  %v20263_v62 = vld [vmem:[#allocation62_spill] sm:$0xff] }
 0x2dc   : > { %v1571_v60 = vpop.f32.mrf.mxu0 }
 0x2dd   : > { %v20264_v60 = vld [vmem:[#allocation63_spill] sm:$0xff] }
 0x2de   : > { %v1574_v61 = vpop.f32.mrf.mxu0 }
 0x2df   : > { %12927 = vmatprep.mubr.msk.f32.mxu1 %vm1325_vm0, %v1574_v61  ;;  %v20265_v61 = vld [vmem:[#allocation64_spill] sm:$0xff] }
 0x2e0   : > { %v1576_v59 = vpop.f32.mrf.mxu0 }
 0x2e1   : > { %v20266_v59 = vld [vmem:[#allocation66_spill] sm:$0xff] }
 0x2e2   : > { %v1579_v23 = vpop.f32.mrf.mxu0 }
 0x2e3   : > { %12928 = vmatmul.mubr.msk.f32.gmra.mxu1 %vm1325_vm0, %v1579_v23  ;;  %v20267_v23 = vld [vmem:[#allocation67_spill] sm:$0xff] }
 0x2e4   : > { %v1581_v17 = vpop.f32.mrf.mxu0  ;;  %11643 = vmatprep.mubr.msk.f32.mxu1 %vm1325_vm0, %v16083_v7 }
 0x2e5   : > { %v20268_v17 = vld [vmem:[#allocation69_spill] sm:$0xff] }
 0x2e7   : > { %1905 = vmatmul.mubr.f32.vlgmr.msra.gmra.mxu1 %v16202_v32 }
 0x2e8   : > { %11644 = vmatprep.mubr.msk.f32.mxu1 %vm1325_vm0, %v16205_v33  ;;  %2523 = vmatpush1.msra.mxu1 %v2513_v58  ;;  %v20269_v58 = vld [vmem:[#allocation70_spill] sm:$0xff] }
 0x2e9   : > { %2524 = vmatprep.subr.mxu1 %v20223_v0 }
 0x2ea   : > { %2525 = vmatpush1.msra.mxu1 %v2512_v21  ;;  %v20270_v21 = vld [vmem:[#allocation71_spill] sm:$0xff] }
 0x2eb   : > { %1910 = vmatmul.mubr.f32.gmra.mxu1 %v16212_v34  ;;  %2526 = vmatprep.subr.mxu1 %v20223_v0 }
 0x2ec   : > { %11645 = vmatprep.mubr.msk.f32.mxu1 %vm1325_vm0, %v16215_v35  ;;  %2527 = vmatpush1.msra.mxu1 %v2511_v25  ;;  %v20271_v25 = vld [vmem:[#allocation72_spill] sm:$0xff] }
 0x2ed   : > { %2528 = vmatprep.subr.mxu1 %v20223_v0 }
 0x2ee   : > { %2529 = vmatpush1.msra.mxu1 %v2510_v19  ;;  %v20272_v19 = vld [vmem:[#allocation73_spill] sm:$0xff] }
 0x2ef   : > { %1915 = vmatmul.mubr.f32.gmra.mxu1 %v16223_v36  ;;  %2530 = vmatprep.subr.mxu1 %v20223_v0 }
 0x2f0   : > { %11646 = vmatprep.mubr.msk.f32.mxu1 %vm1325_vm0, %v16226_v37  ;;  %2531 = vmatpush1.msra.mxu1 %v2509_v1  ;;  %v20273_v1 = vld [vmem:[#allocation74_spill] sm:$0xff] }
 0x2f1   : > { %2532 = vmatprep.subr.mxu1 %v20223_v0 }
 0x2f2   : > { %2533 = vmatpush1.msra.mxu1 %v2508_v2  ;;  %v20274_v2 = vld [vmem:[#allocation75_spill] sm:$0xff] }
 0x2f3   : > { %1920 = vmatmul.mubr.f32.gmra.mxu1 %v16234_v38  ;;  %2534 = vmatprep.subr.mxu1 %v20223_v0 }
 0x2f4   : > { %11647 = vmatprep.mubr.msk.f32.mxu1 %vm1325_vm0, %v16237_v39  ;;  %2535 = vmatpush1.msra.mxu1 %v2507_v3  ;;  %v20275_v3 = vld [vmem:[#allocation76_spill] sm:$0xff] }
 0x2f5   : > { %2536 = vmatprep.subr.mxu1 %v20223_v0 }
 0x2f6   : > { %2537 = vmatpush1.msra.mxu1 %v2506_v4  ;;  %v20276_v4 = vld [vmem:[#allocation77_spill] sm:$0xff] }
 0x2f7   : > { %1925 = vmatmul.mubr.f32.gmra.mxu1 %v16244_v40  ;;  %2538 = vmatprep.subr.mxu1 %v20223_v0 }
 0x2f8   : > { %11648 = vmatprep.mubr.msk.f32.mxu1 %vm1325_vm0, %v16246_v41  ;;  %2539 = vmatpush1.msra.mxu1 %v2505_v5  ;;  %v20277_v5 = vld [vmem:[#allocation78_spill] sm:$0xff] }
 0x2f9   : > { %2540 = vmatprep.subr.mxu1 %v20223_v0 }
 0x2fa   : > { %2541 = vmatpush1.msra.mxu1 %v2504_v6  ;;  %v20278_v6 = vld [vmem:[#allocation79_spill] sm:$0xff] }
 0x2fb   : > { %1930 = vmatmul.mubr.f32.gmra.mxu1 %v16251_v42  ;;  %2542 = vmatprep.subr.mxu1 %v20223_v0 }
 0x2fc   : > { %11649 = vmatprep.mubr.msk.f32.mxu1 %vm1325_vm0, %v16253_v43  ;;  %2543 = vmatpush1.msra.mxu1 %v2503_v8  ;;  %v20279_v8 = vld [vmem:[#allocation52_spill] sm:$0xff] }
 0x2fd   : > { %2544 = vmatprep.subr.mxu1 %v20223_v0 }
 0x2fe   : > { %2545 = vmatpush1.msra.mxu1 %v2502_v9  ;;  %v20280_v9 = vld [vmem:[#allocation53_spill] sm:$0xff] }
 0x2ff   : > { %1935 = vmatmul.mubr.f32.gmra.mxu1 %v16258_v44  ;;  %2546 = vmatprep.subr.mxu1 %v20223_v0 }
 0x300   : > { %11650 = vmatprep.mubr.msk.f32.mxu1 %vm1325_vm0, %v16260_v45  ;;  %2547 = vmatpush1.msra.mxu1 %v2501_v10 }
 0x301   : > { %2548 = vmatprep.subr.mxu1 %v20223_v0 }
 0x302   : > { %2549 = vmatpush1.msra.mxu1 %v2500_v11 }
 0x303   : > { %1940 = vmatmul.mubr.f32.gmra.mxu1 %v16265_v46  ;;  %2550 = vmatprep.subr.mxu1 %v20223_v0 }
 0x304   : > { %11651 = vmatprep.mubr.msk.f32.mxu1 %vm1325_vm0, %v16267_v47  ;;  %2551 = vmatpush1.msra.mxu1 %v2499_v12 }
 0x305   : > { %2552 = vmatprep.subr.mxu1 %v20223_v0 }
 0x306   : > { %2553 = vmatpush1.msra.mxu1 %v2498_v13 }
 0x307   : > { %1945 = vmatmul.mubr.f32.gmra.mxu1 %v16272_v48  ;;  %2570 = vmatprep.subr.mxu1 %v20223_v0 }
 0x308   : > { %11652 = vmatprep.mubr.msk.f32.mxu1 %vm1325_vm0, %v16274_v49  ;;  %2571 = vmatpush2.msra.mxu1 %v2521_v14 }
 0x309   : > { %2572 = vmatprep.subr.mxu1 %v20223_v0 }
 0x30a   : > { %2573 = vmatpush2.msra.mxu1 %v2520_v15  ;;  %v16820_v15 = vld [vmem:[#allocation7 + $0x38] sm:$0xff] }
 0x30b   : > { %1950 = vmatmul.mubr.f32.gmra.mxu1 %v16279_v50  ;;  %2574 = vmatprep.subr.mxu1 %v20223_v0 }
 0x30c   : > { %11653 = vmatprep.mubr.msk.f32.mxu1 %vm1325_vm0, %v16281_v51  ;;  %2575 = vmatpush2.msra.mxu1 %v2519_v18  ;;  %v16823_v18 = vld [vmem:[#allocation7 + $0x30] sm:$0xff] }
 0x30d   : > { %2576 = vmatprep.subr.mxu1 %v20223_v0 }
 0x30e   : > { %2577 = vmatpush2.msra.mxu1 %v2518_v20 }
 0x30f   : > { %1955 = vmatmul.mubr.f32.gmra.mxu1 %v16286_v52  ;;  %2578 = vmatprep.subr.mxu1 %v20223_v0 }
 0x310   : > { %11654 = vmatprep.mubr.msk.f32.mxu1 %vm1325_vm0, %v16288_v53  ;;  %2579 = vmatpush2.msra.mxu1 %v2517_v22  ;;  %v16828_v22 = vld [vmem:[#allocation7 + $0x28] sm:$0xff] }
 0x311   : > { %2580 = vmatprep.subr.mxu1 %v20223_v0 }
 0x312   : > { %2581 = vmatpush2.msra.mxu1 %v2516_v24 }
 0x313   : > { %1960 = vmatmul.mubr.f32.gmra.mxu1 %v16293_v54  ;;  %2582 = vmatprep.subr.mxu1 %v20223_v0 }
 0x314   : > { %11655 = vmatprep.mubr.msk.f32.mxu1 %vm1325_vm0, %v16295_v55  ;;  %2583 = vmatpush2.msra.mxu1 %v2515_v26  ;;  %v16832_v26 = vld [vmem:[#allocation7 + $0x20] sm:$0xff] }
 0x315   : > { %2584 = vmatprep.subr.mxu1 %v20223_v0 }
 0x316   : > { %2585 = vmatpush2.msra.mxu1 %v2514_v27 }
 0x317   : > { %1965 = vmatmul.mubr.f32.gmra.mxu1 %v16300_v56  ;;  %13034 = vmatprep.subr.mxu1 %v16127_v16 }
 0x318   : > { %11656 = vmatprep.mubr.msk.f32.mxu1 %vm1325_vm0, %v16302_v57 }
 0x31b   : > { %1970 = vmatmul.mubr.f32.gmra.mxu1 %v20258_v28 }
 0x31c   : > { %11657 = vmatprep.mubr.msk.f32.mxu1 %vm1325_vm0, %v20259_v29 }
 0x31f   : > { %1975 = vmatmul.mubr.f32.gmra.mxu1 %v20260_v30 }
 0x320   : > { %11658 = vmatprep.mubr.msk.f32.mxu1 %vm1325_vm0, %v20261_v31 }
 0x323   : > { %1980 = vmatmul.mubr.f32.gmra.mxu1 %v20262_v63 }
 0x324   : > { %11659 = vmatprep.mubr.msk.f32.mxu1 %vm1325_vm0, %v20263_v62 }
 0x327   : > { %1985 = vmatmul.mubr.f32.gmra.mxu1 %v20264_v60 }
 0x328   : > { %11660 = vmatprep.mubr.msk.f32.mxu1 %vm1325_vm0, %v20265_v61 }
 0x32b   : > { %1990 = vmatmul.mubr.f32.gmra.mxu1 %v20266_v59 }
 0x32c   : > { %11661 = vmatprep.mubr.msk.f32.mxu1 %vm1325_vm0, %v20267_v23 }
 0x32f   : > { %1995 = vmatmul.mubr.f32.gmra.mxu1 %v20268_v17 }
 0x330   : > { %11662 = vmatprep.mubr.msk.f32.mxu1 %vm1325_vm0, %v20269_v58 }
 0x333   : > { %2000 = vmatmul.mubr.f32.gmra.mxu1 %v20270_v21 }
 0x334   : > { %11663 = vmatprep.mubr.msk.f32.mxu1 %vm1325_vm0, %v20271_v25 }
 0x337   : > { %2005 = vmatmul.mubr.f32.gmra.mxu1 %v20272_v19 }
 0x338   : > { %11664 = vmatprep.mubr.msk.f32.mxu1 %vm1325_vm0, %v20273_v1 }
 0x33b   : > { %2010 = vmatmul.mubr.f32.gmra.mxu1 %v20274_v2 }
 0x33c   : > { %11665 = vmatprep.mubr.msk.f32.mxu1 %vm1325_vm0, %v20275_v3 }
 0x33f   : > { %2015 = vmatmul.mubr.f32.gmra.mxu1 %v20276_v4 }
 0x340   : > { %11666 = vmatprep.mubr.msk.f32.mxu1 %vm1325_vm0, %v20277_v5 }
 0x343   : > { %2020 = vmatmul.mubr.f32.gmra.mxu1 %v20278_v6 }
 0x344   : > { %11691 = vmatprep.mubr.msk.f32.mxu1 %vm1325_vm0, %v16083_v7  ;;  %v20281_v7 = vld [vmem:[#allocation54_spill] sm:$0xff] }
 0x347   : > { %2587 = vmatmul.mubr.f32.vlgmr.msra.gmra.mxu1 %v16202_v32  ;;  %v20283_v32 = vld [vmem:[#allocation56_spill] sm:$0xff] }
 0x348   : > { %11692 = vmatprep.mubr.msk.f32.mxu1 %vm1325_vm0, %v16205_v33  ;;  %13035 = vmatpush3.msra.mxu1 %v16127_v16  ;;  %v20282_v16 = vld [vmem:[#allocation55_spill] sm:$0xff]  ;;  %v20284_v33 = vld [vmem:[#allocation65_spill] sm:$0xff] }
 0x349   : > { %13036 = vmatprep.subr.mxu1 %v20279_v8 }
 0x34a   : > { %13037 = vmatpush3.msra.mxu1 %v20279_v8 }
 0x34b   : > { %2592 = vmatmul.mubr.f32.gmra.mxu1 %v16212_v34  ;;  %13038 = vmatprep.subr.mxu1 %v20280_v9  ;;  %v20285_v34 = vld [vmem:[#allocation68_spill] sm:$0xff] }
 0x34c   : > { %11693 = vmatprep.mubr.msk.f32.mxu1 %vm1325_vm0, %v16215_v35  ;;  %13039 = vmatpush3.msra.mxu1 %v20280_v9  ;;  %v16721_v35 = vpop.f32.mrf.mxu1 }
 0x34d   : > { %13040 = vmatprep.subr.mxu1 %v20281_v7 }
 0x34e   : > { %13041 = vmatpush3.msra.mxu1 %v20281_v7 }
 0x34f   : > { %2597 = vmatmul.mubr.f32.gmra.mxu1 %v16223_v36  ;;  %13042 = vmatprep.subr.mxu1 %v20282_v16  ;;  %v16726_v36 = vpop.f32.mrf.mxu1 }
 0x350   : > { %11694 = vmatprep.mubr.msk.f32.mxu1 %vm1325_vm0, %v16226_v37  ;;  %13043 = vmatpush3.msra.mxu1 %v20282_v16  ;;  %20286 = vst [vmem:[#allocation57_spill] sm:$0xff] %v16726_v36  ;;  %v17147_v36 = vld [vmem:[#allocation6 + $0x158] sm:$0xff] }
 0x351   : > { %13044 = vmatprep.subr.mxu1 %v20283_v32 }
 0x352   : > { %13045 = vmatpush3.msra.mxu1 %v20283_v32 }
 0x353   : > { %2602 = vmatmul.mubr.f32.gmra.mxu1 %v16234_v38  ;;  %13046 = vmatprep.subr.mxu1 %v20284_v33  ;;  %v16728_v37 = vpop.f32.mrf.mxu1 }
 0x354   : > { %11695 = vmatprep.mubr.msk.f32.mxu1 %vm1325_vm0, %v16237_v39  ;;  %13047 = vmatpush3.msra.mxu1 %v20284_v33 }
 0x355   : > { %13048 = vmatprep.subr.mxu1 %v20285_v34  ;;  %v16733_v38 = vpop.f32.mrf.mxu1 }
 0x356   : > { %13049 = vmatpush3.msra.mxu1 %v20285_v34  ;;  %20287 = vst [vmem:[#allocation58_spill] sm:$0xff] %v16733_v38 }
 0x357   : > { %2607 = vmatmul.mubr.f32.gmra.mxu1 %v16244_v40  ;;  %3502 = vmatprep.subr.mxu1 %v20223_v0 }
 0x358   : > { %11696 = vmatprep.mubr.msk.f32.mxu1 %vm1325_vm0, %v16246_v41 }
 0x35b   : > { %2612 = vmatmul.mubr.f32.gmra.mxu1 %v16251_v42  ;;  %v16738_v39 = vpop.f32.mrf.mxu1 }
 0x35c   : > { %11697 = vmatprep.mubr.msk.f32.mxu1 %vm1325_vm0, %v16253_v43  ;;  %20288 = vst [vmem:[#allocation59_spill] sm:$0xff] %v16738_v39 }
 0x35d   : > { %v16743_v40 = vpop.f32.mrf.mxu1 }
 0x35e   : > { %20289 = vst [vmem:[#allocation60_spill] sm:$0xff] %v16743_v40  ;;  %v17133_v40 = vld [vmem:[#allocation6 + $0x130] sm:$0xff] }
 0x35f   : > { %2617 = vmatmul.mubr.f32.gmra.mxu1 %v16258_v44 }
 0x360   : > { %11698 = vmatprep.mubr.msk.f32.mxu1 %vm1325_vm0, %v16260_v45 }
 0x363   : > { %2622 = vmatmul.mubr.f32.gmra.mxu1 %v16265_v46  ;;  %v16745_v41 = vpop.f32.mrf.mxu1 }
 0x364   : > { %11699 = vmatprep.mubr.msk.f32.mxu1 %vm1325_vm0, %v16267_v47  ;;  %20290 = vst [vmem:[#allocation61_spill] sm:$0xff] %v16745_v41 }
 0x365   : > { %v16750_v42 = vpop.f32.mrf.mxu1 }
 0x366   : > { %20291 = vst [vmem:[#allocation62_spill] sm:$0xff] %v16750_v42 }
 0x367   : > { %2627 = vmatmul.mubr.f32.gmra.mxu1 %v16272_v48 }
 0x368   : > { %11700 = vmatprep.mubr.msk.f32.mxu1 %vm1325_vm0, %v16274_v49 }
 0x36b   : > { %2632 = vmatmul.mubr.f32.gmra.mxu1 %v16279_v50  ;;  %v16755_v43 = vpop.f32.mrf.mxu1 }
 0x36c   : > { %11701 = vmatprep.mubr.msk.f32.mxu1 %vm1325_vm0, %v16281_v51  ;;  %20292 = vst [vmem:[#allocation63_spill] sm:$0xff] %v16755_v43 }
 0x36d   : > { %v16760_v44 = vpop.f32.mrf.mxu1 }
 0x36e   : > { %20293 = vst [vmem:[#allocation64_spill] sm:$0xff] %v16760_v44  ;;  %v17127_v44 = vld [vmem:[#allocation6 + $0x138] sm:$0xff] }
 0x36f   : > { %2637 = vmatmul.mubr.f32.gmra.mxu1 %v16286_v52 }
 0x370   : > { %11702 = vmatprep.mubr.msk.f32.mxu1 %vm1325_vm0, %v16288_v53 }
 0x373   : > { %2642 = vmatmul.mubr.f32.gmra.mxu1 %v16293_v54  ;;  %v16762_v45 = vpop.f32.mrf.mxu1 }
 0x374   : > { %11703 = vmatprep.mubr.msk.f32.mxu1 %vm1325_vm0, %v16295_v55  ;;  %20294 = vst [vmem:[#allocation66_spill] sm:$0xff] %v16762_v45 }
 0x375   : > { %v16767_v46 = vpop.f32.mrf.mxu1 }
 0x376   : > { %20295 = vst [vmem:[#allocation67_spill] sm:$0xff] %v16767_v46  ;;  %v17124_v46 = vld [vmem:[#allocation6 + $0x120] sm:$0xff] }
 0x377   : > { %2647 = vmatmul.mubr.f32.gmra.mxu1 %v16300_v56 }
 0x378   : > { %11704 = vmatprep.mubr.msk.f32.mxu1 %vm1325_vm0, %v16302_v57 }
 0x37b   : > { %2652 = vmatmul.mubr.f32.gmra.mxu1 %v20258_v28  ;;  %v16772_v47 = vpop.f32.mrf.mxu1  ;;  %v16837_v28 = vld [vmem:[#allocation7 + $0x18] sm:$0xff] }
 0x37c   : > { %11705 = vmatprep.mubr.msk.f32.mxu1 %vm1325_vm0, %v20259_v29  ;;  %20296 = vst [vmem:[#allocation69_spill] sm:$0xff] %v16772_v47  ;;  %v17173_v47 = vld [vmem:[#allocation6 + $0x170] sm:$0xff] }
 0x37d   : > { %v16777_v48 = vpop.f32.mrf.mxu1 }
 0x37e   : > { %20297 = vst [vmem:[#allocation70_spill] sm:$0xff] %v16777_v48 }
 0x37f   : > { %2657 = vmatmul.mubr.f32.gmra.mxu1 %v20260_v30  ;;  %v16841_v30 = vld [vmem:[#allocation7 + $0x10] sm:$0xff] }
 0x380   : > { %11706 = vmatprep.mubr.msk.f32.mxu1 %vm1325_vm0, %v20261_v31 }
 0x383   : > { %2662 = vmatmul.mubr.f32.gmra.mxu1 %v20262_v63  ;;  %v16779_v49 = vpop.f32.mrf.mxu1 }
 0x384   : > { %11707 = vmatprep.mubr.msk.f32.mxu1 %vm1325_vm0, %v20263_v62  ;;  %20298 = vst [vmem:[#allocation71_spill] sm:$0xff] %v16779_v49 }
 0x385   : > { %v16784_v50 = vpop.f32.mrf.mxu1 }
 0x386   : > { %20299 = vst [vmem:[#allocation72_spill] sm:$0xff] %v16784_v50  ;;  %v17118_v50 = vld [vmem:[#allocation6 + $0x128] sm:$0xff] }
 0x387   : > { %2667 = vmatmul.mubr.f32.gmra.mxu1 %v20264_v60 }
 0x388   : > { %11708 = vmatprep.mubr.msk.f32.mxu1 %vm1325_vm0, %v20265_v61 }
 0x38b   : > { %2672 = vmatmul.mubr.f32.gmra.mxu1 %v20266_v59  ;;  %v16789_v51 = vpop.f32.mrf.mxu1 }
 0x38c   : > { %11709 = vmatprep.mubr.msk.f32.mxu1 %vm1325_vm0, %v20267_v23  ;;  %20300 = vst [vmem:[#allocation73_spill] sm:$0xff] %v16789_v51  ;;  %v17165_v51 = vld [vmem:[#allocation6 + $0x178] sm:$0xff] }
 0x38d   : > { %v16794_v52 = vpop.f32.mrf.mxu1 }
 0x38e   : > { %20301 = vst [vmem:[#allocation74_spill] sm:$0xff] %v16794_v52  ;;  %v17115_v52 = vld [vmem:[#allocation6 + $0x110] sm:$0xff] }
 0x38f   : > { %2677 = vmatmul.mubr.f32.gmra.mxu1 %v20268_v17 }
 0x390   : > { %11710 = vmatprep.mubr.msk.f32.mxu1 %vm1325_vm0, %v20269_v58 }
 0x393   : > { %2682 = vmatmul.mubr.f32.gmra.mxu1 %v20270_v21  ;;  %v16796_v53 = vpop.f32.mrf.mxu1 }
 0x394   : > { %11711 = vmatprep.mubr.msk.f32.mxu1 %vm1325_vm0, %v20271_v25  ;;  %20302 = vst [vmem:[#allocation75_spill] sm:$0xff] %v16796_v53  ;;  %v17162_v53 = vld [vmem:[#allocation6 + $0x160] sm:$0xff] }
 0x395   : > { %v16801_v54 = vpop.f32.mrf.mxu1 }
 0x396   : > { %20303 = vst [vmem:[#allocation76_spill] sm:$0xff] %v16801_v54 }
 0x397   : > { %2687 = vmatmul.mubr.f32.gmra.mxu1 %v20272_v19 }
 0x398   : > { %11712 = vmatprep.mubr.msk.f32.mxu1 %vm1325_vm0, %v20273_v1 }
 0x39b   : > { %2692 = vmatmul.mubr.f32.gmra.mxu1 %v20274_v2  ;;  %v16806_v55 = vpop.f32.mrf.mxu1 }
 0x39c   : > { %11713 = vmatprep.mubr.msk.f32.mxu1 %vm1325_vm0, %v20275_v3  ;;  %20304 = vst [vmem:[#allocation77_spill] sm:$0xff] %v16806_v55  ;;  %v17156_v55 = vld [vmem:[#allocation6 + $0x168] sm:$0xff] }
 0x39d   : > { %v16811_v56 = vpop.f32.mrf.mxu1 }
 0x39e   : > { %20305 = vst [vmem:[#allocation78_spill] sm:$0xff] %v16811_v56 }
 0x39f   : > { %2697 = vmatmul.mubr.f32.gmra.mxu1 %v20276_v4 }
 0x3a0   : > { %11714 = vmatprep.mubr.msk.f32.mxu1 %vm1325_vm0, %v20277_v5 }
 0x3a3   : > { %v16813_v57 = vpop.f32.mrf.mxu1  ;;  %2702 = vmatmul.mubr.f32.gmra.mxu1 %v20278_v6 }
 0x3a4   : > { %20306 = vst [vmem:[#allocation79_spill] sm:$0xff] %v16813_v57  ;;  %v17153_v57 = vld [vmem:[#allocation6 + $0x150] sm:$0xff] }
 0x3a5   : > { %v16816_v10 = vpop.f32.mrf.mxu1 }
 0x3a6   : > { %20307 = vst [vmem:[#allocation52_spill] sm:$0xff] %v16816_v10  ;;  %v17107_v10 = vld [vmem:[#allocation6 + $0x118] sm:$0xff] }
 0x3a7   : > { %v1906_v11 = vpop.f32.mrf.mxu1 }
 0x3a8   : > { %12946 = vmatprep.mubr.msk.f32.mxu0 %vm1325_vm0, %v1906_v11 }
 0x3a9   : > { %v1908_v12 = vpop.f32.mrf.mxu1 }
 0x3ab   : > { %v1911_v13 = vpop.f32.mrf.mxu1 }
 0x3ac   : > { %12947 = vmatmul.mubr.msk.f32.vlgmr.msra.gmra.mxu0 %vm1325_vm0, %v1911_v13 }
 0x3ad   : > { %v1913_v14 = vpop.f32.mrf.mxu1  ;;  %12983 = vmatpush3.msra.mxu0 %v16820_v15 }
 0x3ae   : > { %12984 = vmatprep.subr.mxu0 %v16823_v18 }
 0x3af   : > { %v1916_v20 = vpop.f32.mrf.mxu1  ;;  %12985 = vmatpush3.msra.mxu0 %v16823_v18 }
 0x3b0   : > { %12949 = vmatprep.mubr.msk.f32.mxu0 %vm1325_vm0, %v1916_v20  ;;  %12986 = vmatprep.subr.mxu0 %v16828_v22 }
 0x3b1   : > { %v1918_v24 = vpop.f32.mrf.mxu1  ;;  %12987 = vmatpush3.msra.mxu0 %v16828_v22 }
 0x3b2   : > { %12988 = vmatprep.subr.mxu0 %v16832_v26 }
 0x3b3   : > { %v1921_v27 = vpop.f32.mrf.mxu1  ;;  %12989 = vmatpush3.msra.mxu0 %v16832_v26 }
 0x3b4   : > { %12950 = vmatmul.mubr.msk.f32.gmra.mxu0 %vm1325_vm0, %v1921_v27  ;;  %12990 = vmatprep.subr.mxu0 %v16837_v28 }
 0x3b5   : > { %v1923_v29 = vpop.f32.mrf.mxu1  ;;  %12991 = vmatpush3.msra.mxu0 %v16837_v28 }
 0x3b6   : > { %12992 = vmatprep.subr.mxu0 %v16841_v30 }
 0x3b7   : > { %v1926_v31 = vpop.f32.mrf.mxu1  ;;  %12993 = vmatpush3.msra.mxu0 %v16841_v30 }
 0x3b8   : > { %12952 = vmatprep.mubr.msk.f32.mxu0 %vm1325_vm0, %v1926_v31  ;;  %12994 = vmatprep.subr.mxu0 %v20284_v33 }
 0x3b9   : > { %v1928_v63 = vpop.f32.mrf.mxu1  ;;  %12995 = vmatpush3.msra.mxu0 %v20284_v33 }
 0x3ba   : > { %12996 = vmatprep.subr.mxu0 %v20285_v34 }
 0x3bb   : > { %v1931_v62 = vpop.f32.mrf.mxu1  ;;  %12997 = vmatpush3.msra.mxu0 %v20285_v34 }
 0x3bc   : > { %12953 = vmatmul.mubr.msk.f32.gmra.mxu0 %vm1325_vm0, %v1931_v62  ;;  %3012 = vmatprep.subr.mxu0 %v20223_v0 }
 0x3bd   : > { %v1933_v60 = vpop.f32.mrf.mxu1 }
 0x3bf   : > { %v1936_v61 = vpop.f32.mrf.mxu1 }
 0x3c0   : > { %12955 = vmatprep.mubr.msk.f32.mxu0 %vm1325_vm0, %v1936_v61 }
 0x3c1   : > { %v1938_v59 = vpop.f32.mrf.mxu1 }
 0x3c3   : > { %v1941_v23 = vpop.f32.mrf.mxu1 }
 0x3c4   : > { %12956 = vmatmul.mubr.msk.f32.gmra.mxu0 %vm1325_vm0, %v1941_v23 }
 0x3c5   : > { %v1943_v17 = vpop.f32.mrf.mxu1 }
 0x3c7   : > { %v1946_v58 = vpop.f32.mrf.mxu1 }
 0x3c8   : > { %12958 = vmatprep.mubr.msk.f32.mxu0 %vm1325_vm0, %v1946_v58 }
 0x3c9   : > { %v1948_v21 = vpop.f32.mrf.mxu1 }
 0x3ca   : > { %v20308_v21 = vld [vmem:[#allocation80_spill] sm:$0xff] }
 0x3cb   : > { %v1951_v25 = vpop.f32.mrf.mxu1 }
 0x3cc   : > { %12959 = vmatmul.mubr.msk.f32.gmra.mxu0 %vm1325_vm0, %v1951_v25  ;;  %v3003_v25 = vmul.f32 %v20308_v21, %v20308_v21  ;;  %v20319_v21 = vld [vmem:[#allocation91_spill] sm:$0xff] }
 0x3cd   : > { %v1953_v19 = vpop.f32.mrf.mxu1 }
 0x3cf   : > { %v1956_v1 = vpop.f32.mrf.mxu1 }
 0x3d0   : > { %12961 = vmatprep.mubr.msk.f32.mxu0 %vm1325_vm0, %v1956_v1  ;;  %v20309_v1 = vld [vmem:[#allocation81_spill] sm:$0xff] }
 0x3d1   : > { %v1958_v2 = vpop.f32.mrf.mxu1 }
 0x3d2   : > { %v3002_v2 = vmul.f32 %v20309_v1, %v20309_v1  ;;  %v20320_v1 = vld [vmem:[#allocation92_spill] sm:$0xff] }
 0x3d3   : > { %v1961_v3 = vpop.f32.mrf.mxu1 }
 0x3d4   : > { %12962 = vmatmul.mubr.msk.f32.gmra.mxu0 %vm1325_vm0, %v1961_v3 }
 0x3d5   : > { %v1963_v4 = vpop.f32.mrf.mxu1 }
 0x3d6   : > { %v20310_v4 = vld [vmem:[#allocation82_spill] sm:$0xff] }
 0x3d7   : > { %v1966_v5 = vpop.f32.mrf.mxu1 }
 0x3d8   : > { %12964 = vmatprep.mubr.msk.f32.mxu0 %vm1325_vm0, %v1966_v5  ;;  %v3001_v5 = vmul.f32 %v20310_v4, %v20310_v4  ;;  %v20321_v4 = vld [vmem:[#allocation93_spill] sm:$0xff] }
 0x3d9   : > { %v1968_v6 = vpop.f32.mrf.mxu1 }
 0x3db   : > { %v1971_v8 = vpop.f32.mrf.mxu1 }
 0x3dc   : > { %12965 = vmatmul.mubr.msk.f32.gmra.mxu0 %vm1325_vm0, %v1971_v8  ;;  %v20311_v8 = vld [vmem:[#allocation83_spill] sm:$0xff] }
 0x3dd   : > { %v1973_v9 = vpop.f32.mrf.mxu1 }
 0x3de   : > { %v3000_v9 = vmul.f32 %v20311_v8, %v20311_v8  ;;  %v20322_v8 = vld [vmem:[#allocation94_spill] sm:$0xff] }
 0x3df   : > { %v1976_v7 = vpop.f32.mrf.mxu1 }
 0x3e0   : > { %12967 = vmatprep.mubr.msk.f32.mxu0 %vm1325_vm0, %v1976_v7 }
 0x3e1   : > { %v1978_v16 = vpop.f32.mrf.mxu1 }
 0x3e2   : > { %v20312_v16 = vld [vmem:[#allocation84_spill] sm:$0xff] }
 0x3e3   : > { %v1981_v32 = vpop.f32.mrf.mxu1 }
 0x3e4   : > { %12968 = vmatmul.mubr.msk.f32.gmra.mxu0 %vm1325_vm0, %v1981_v32  ;;  %v2999_v32 = vmul.f32 %v20312_v16, %v20312_v16  ;;  %v20323_v16 = vld [vmem:[#allocation95_spill] sm:$0xff] }
 0x3e5   : > { %v1983_v33 = vpop.f32.mrf.mxu1 }
 0x3e7   : > { %v1986_v34 = vpop.f32.mrf.mxu1 }
 0x3e8   : > { %12970 = vmatprep.mubr.msk.f32.mxu0 %vm1325_vm0, %v1986_v34  ;;  %v20313_v34 = vld [vmem:[#allocation85_spill] sm:$0xff] }
 0x3e9   : > { %v1988_v11 = vpop.f32.mrf.mxu1 }
 0x3ea   : > { %v2998_v11 = vmul.f32 %v20313_v34, %v20313_v34  ;;  %v20324_v34 = vld [vmem:[#allocation96_spill] sm:$0xff] }
 0x3eb   : > { %v1991_v12 = vpop.f32.mrf.mxu1 }
 0x3ec   : > { %12971 = vmatmul.mubr.msk.f32.gmra.mxu0 %vm1325_vm0, %v1991_v12 }
 0x3ed   : > { %v1993_v13 = vpop.f32.mrf.mxu1 }
 0x3ee   : > { %v20314_v13 = vld [vmem:[#allocation86_spill] sm:$0xff] }
 0x3ef   : > { %v1996_v14 = vpop.f32.mrf.mxu1 }
 0x3f0   : > { %12973 = vmatprep.mubr.msk.f32.mxu0 %vm1325_vm0, %v1996_v14  ;;  %v2997_v14 = vmul.f32 %v20314_v13, %v20314_v13  ;;  %v20325_v13 = vld [vmem:[#allocation97_spill] sm:$0xff] }
 0x3f1   : > { %v1998_v20 = vpop.f32.mrf.mxu1 }
 0x3f3   : > { %v2001_v24 = vpop.f32.mrf.mxu1 }
 0x3f4   : > { %12974 = vmatmul.mubr.msk.f32.gmra.mxu0 %vm1325_vm0, %v2001_v24  ;;  %v20315_v24 = vld [vmem:[#allocation87_spill] sm:$0xff] }
 0x3f5   : > { %v2003_v27 = vpop.f32.mrf.mxu1 }
 0x3f6   : > { %v2996_v27 = vmul.f32 %v20315_v24, %v20315_v24  ;;  %v20326_v24 = vld [vmem:[#allocation98_spill] sm:$0xff] }
 0x3f7   : > { %v2006_v29 = vpop.f32.mrf.mxu1 }
 0x3f8   : > { %12976 = vmatprep.mubr.msk.f32.mxu0 %vm1325_vm0, %v2006_v29 }
 0x3f9   : > { %v2008_v31 = vpop.f32.mrf.mxu1 }
 0x3fa   : > { %v20316_v31 = vld [vmem:[#allocation88_spill] sm:$0xff] }
 0x3fb   : > { %v2011_v63 = vpop.f32.mrf.mxu1 }
 0x3fc   : > { %12977 = vmatmul.mubr.msk.f32.gmra.mxu0 %vm1325_vm0, %v2011_v63  ;;  %v2995_v63 = vmul.f32 %v20316_v31, %v20316_v31  ;;  %v20327_v31 = vld [vmem:[#allocation99_spill] sm:$0xff] }
 0x3fd   : > { %v2013_v62 = vpop.f32.mrf.mxu1 }
 0x3ff   : > { %v2016_v60 = vpop.f32.mrf.mxu1 }
 0x400   : > { %12979 = vmatprep.mubr.msk.f32.mxu0 %vm1325_vm0, %v2016_v60  ;;  %v20317_v60 = vld [vmem:[#allocation89_spill] sm:$0xff] }
 0x401   : > { %v2018_v61 = vpop.f32.mrf.mxu1 }
 0x402   : > { %v2994_v61 = vmul.f32 %v20317_v60, %v20317_v60  ;;  %v20328_v60 = vld [vmem:[#allocation100_spill] sm:$0xff] }
 0x403   : > { %v2021_v59 = vpop.f32.mrf.mxu1 }
 0x404   : > { %12980 = vmatmul.mubr.msk.f32.gmra.mxu0 %vm1325_vm0, %v2021_v59 }
 0x405   : > { %v2023_v23 = vpop.f32.mrf.mxu1 }
 0x406   : > { %v20318_v23 = vld [vmem:[#allocation90_spill] sm:$0xff] }
 0x407   : > { %v2588_v17 = vpop.f32.mrf.mxu1 }
 0x408   : > { %12998 = vmatprep.mubr.msk.f32.mxu0 %vm1325_vm0, %v2588_v17  ;;  %v2993_v17 = vmul.f32 %v20318_v23, %v20318_v23  ;;  %v20329_v23 = vld [vmem:[#allocation101_spill] sm:$0xff] }
 0x409   : > { %v2590_v58 = vpop.f32.mrf.mxu1 }
 0x40b   : > { %v2593_v19 = vpop.f32.mrf.mxu1 }
 0x40c   : > { %12999 = vmatmul.mubr.msk.f32.vlgmr.msra.gmra.mxu0 %vm1325_vm0, %v2593_v19 }
 0x40d   : > { %v2595_v3 = vpop.f32.mrf.mxu1  ;;  %3013 = vmatpush1.msra.mxu0 %v3003_v25  ;;  %v2992_v25 = vmul.f32 %v20319_v21, %v20319_v21  ;;  %v20330_v21 = vld [vmem:[#allocation102_spill] sm:$0xff] }
 0x40e   : > { %3014 = vmatprep.subr.mxu0 %v20223_v0 }
 0x40f   : > { %v2598_v6 = vpop.f32.mrf.mxu1  ;;  %3015 = vmatpush1.msra.mxu0 %v3002_v2  ;;  %v2991_v2 = vmul.f32 %v20320_v1, %v20320_v1  ;;  %v20331_v1 = vld [vmem:[#allocation103_spill] sm:$0xff] }
 0x410   : > { %13001 = vmatprep.mubr.msk.f32.mxu0 %vm1325_vm0, %v2598_v6  ;;  %3016 = vmatprep.subr.mxu0 %v20223_v0 }
 0x411   : > { %v2600_v7 = vpop.f32.mrf.mxu1  ;;  %3017 = vmatpush1.msra.mxu0 %v3001_v5  ;;  %v2990_v5 = vmul.f32 %v20321_v4, %v20321_v4 }
 0x412   : > { %3018 = vmatprep.subr.mxu0 %v20223_v0 }
 0x413   : > { %v2603_v33 = vpop.f32.mrf.mxu1  ;;  %3019 = vmatpush1.msra.mxu0 %v3000_v9  ;;  %v2989_v9 = vmul.f32 %v20322_v8, %v20322_v8 }
 0x414   : > { %13002 = vmatmul.mubr.msk.f32.gmra.mxu0 %vm1325_vm0, %v2603_v33  ;;  %3020 = vmatprep.subr.mxu0 %v20223_v0 }
 0x415   : > { %v2605_v12 = vpop.f32.mrf.mxu1  ;;  %3021 = vmatpush1.msra.mxu0 %v2999_v32  ;;  %v2988_v32 = vmul.f32 %v20323_v16, %v20323_v16 }
 0x416   : > { %3022 = vmatprep.subr.mxu0 %v20223_v0 }
 0x417   : > { %v2608_v20 = vpop.f32.mrf.mxu1  ;;  %3023 = vmatpush1.msra.mxu0 %v2998_v11  ;;  %v3011_v11 = vmul.f32 %v20324_v34, %v20324_v34 }
 0x418   : > { %13004 = vmatprep.mubr.msk.f32.mxu0 %vm1325_vm0, %v2608_v20  ;;  %3024 = vmatprep.subr.mxu0 %v20223_v0 }
 0x419   : > { %v2610_v29 = vpop.f32.mrf.mxu1  ;;  %3025 = vmatpush1.msra.mxu0 %v2997_v14  ;;  %v3010_v14 = vmul.f32 %v20325_v13, %v20325_v13 }
 0x41a   : > { %3026 = vmatprep.subr.mxu0 %v20223_v0 }
 0x41b   : > { %v2613_v62 = vpop.f32.mrf.mxu1  ;;  %3027 = vmatpush1.msra.mxu0 %v2996_v27  ;;  %v3009_v27 = vmul.f32 %v20326_v24, %v20326_v24 }
 0x41c   : > { %13005 = vmatmul.mubr.msk.f32.gmra.mxu0 %vm1325_vm0, %v2613_v62  ;;  %3028 = vmatprep.subr.mxu0 %v20223_v0 }
 0x41d   : > { %v2615_v59 = vpop.f32.mrf.mxu1  ;;  %3029 = vmatpush1.msra.mxu0 %v2995_v63  ;;  %v3008_v63 = vmul.f32 %v20327_v31, %v20327_v31 }
 0x41e   : > { %3030 = vmatprep.subr.mxu0 %v20223_v0 }
 0x41f   : > { %v2618_v58 = vpop.f32.mrf.mxu1  ;;  %3031 = vmatpush1.msra.mxu0 %v2994_v61  ;;  %v3007_v61 = vmul.f32 %v20328_v60, %v20328_v60 }
 0x420   : > { %13007 = vmatprep.mubr.msk.f32.mxu0 %vm1325_vm0, %v2618_v58  ;;  %3032 = vmatprep.subr.mxu0 %v20223_v0 }
 0x421   : > { %v2620_v19 = vpop.f32.mrf.mxu1  ;;  %3033 = vmatpush1.msra.mxu0 %v2993_v17  ;;  %v3006_v17 = vmul.f32 %v20329_v23, %v20329_v23  ;;  %v16973_v23 = vld [vmem:[#allocation6 + $0x18] sm:$0xff] }
 0x422   : > { %3034 = vmatprep.subr.mxu0 %v20223_v0 }
 0x423   : > { %v2623_v3 = vpop.f32.mrf.mxu1  ;;  %3035 = vmatpush1.msra.mxu0 %v2992_v25  ;;  %v3005_v25 = vmul.f32 %v20330_v21, %v20330_v21  ;;  %v17005_v21 = vld [vmem:[#allocation6 + $0x48] sm:$0xff] }
 0x424   : > { %13008 = vmatmul.mubr.msk.f32.gmra.mxu0 %vm1325_vm0, %v2623_v3  ;;  %3036 = vmatprep.subr.mxu0 %v20223_v0 }
 0x425   : > { %v2625_v6 = vpop.f32.mrf.mxu1  ;;  %3037 = vmatpush1.msra.mxu0 %v2991_v2  ;;  %v3004_v2 = vmul.f32 %v20331_v1, %v20331_v1  ;;  %v17020_v1 = vld [vmem:[#allocation6 + $0x68] sm:$0xff] }
 0x426   : > { %3038 = vmatprep.subr.mxu0 %v20223_v0 }
 0x427   : > { %v2628_v7 = vpop.f32.mrf.mxu1  ;;  %3039 = vmatpush1.msra.mxu0 %v2990_v5 }
 0x428   : > { %13010 = vmatprep.mubr.msk.f32.mxu0 %vm1325_vm0, %v2628_v7  ;;  %3040 = vmatprep.subr.mxu0 %v20223_v0 }
 0x429   : > { %v2630_v33 = vpop.f32.mrf.mxu1  ;;  %3041 = vmatpush1.msra.mxu0 %v2989_v9 }
 0x42a   : > { %3042 = vmatprep.subr.mxu0 %v20223_v0 }
 0x42b   : > { %v2633_v12 = vpop.f32.mrf.mxu1  ;;  %3043 = vmatpush1.msra.mxu0 %v2988_v32 }
 0x42c   : > { %13011 = vmatmul.mubr.msk.f32.gmra.mxu0 %vm1325_vm0, %v2633_v12  ;;  %3060 = vmatprep.subr.mxu0 %v20223_v0 }
 0x42d   : > { %v2635_v20 = vpop.f32.mrf.mxu1  ;;  %3061 = vmatpush2.msra.mxu0 %v3011_v11 }
 0x42e   : > { %3062 = vmatprep.subr.mxu0 %v20223_v0 }
 0x42f   : > { %v2638_v29 = vpop.f32.mrf.mxu1  ;;  %3063 = vmatpush2.msra.mxu0 %v3010_v14 }
 0x430   : > { %13013 = vmatprep.mubr.msk.f32.mxu0 %vm1325_vm0, %v2638_v29  ;;  %3064 = vmatprep.subr.mxu0 %v20223_v0 }
 0x431   : > { %v2640_v62 = vpop.f32.mrf.mxu1  ;;  %3065 = vmatpush2.msra.mxu0 %v3009_v27 }
 0x432   : > { %3066 = vmatprep.subr.mxu0 %v20223_v0 }
 0x433   : > { %v2643_v59 = vpop.f32.mrf.mxu1  ;;  %3067 = vmatpush2.msra.mxu0 %v3008_v63 }
 0x434   : > { %13014 = vmatmul.mubr.msk.f32.gmra.mxu0 %vm1325_vm0, %v2643_v59  ;;  %3068 = vmatprep.subr.mxu0 %v20223_v0  ;;  %v16970_v59 = vld [vmem:[#allocation6] sm:$0xff] }
 0x435   : > { %v2645_v58 = vpop.f32.mrf.mxu1  ;;  %3069 = vmatpush2.msra.mxu0 %v3007_v61  ;;  %v16966_v61 = vld [vmem:[#allocation6 + $0x8] sm:$0xff] }
 0x436   : > { %3070 = vmatprep.subr.mxu0 %v20223_v0  ;;  %v16984_v58 = vld [vmem:[#allocation6 + $0x28] sm:$0xff] }
 0x437   : > { %v2648_v19 = vpop.f32.mrf.mxu1  ;;  %3071 = vmatpush2.msra.mxu0 %v3006_v17  ;;  %v16980_v17 = vld [vmem:[#allocation6 + $0x10] sm:$0xff] }
 0x438   : > { %13016 = vmatprep.mubr.msk.f32.mxu0 %vm1325_vm0, %v2648_v19  ;;  %3072 = vmatprep.subr.mxu0 %v20223_v0  ;;  %v17017_v19 = vld [vmem:[#allocation6 + $0x50] sm:$0xff] }
 0x439   : > { %v2650_v3 = vpop.f32.mrf.mxu1  ;;  %3073 = vmatpush2.msra.mxu0 %v3005_v25  ;;  %v14694_v25 = vld [vmem:[#allocation7] sm:$0xff] }
 0x43a   : > { %3074 = vmatprep.subr.mxu0 %v20223_v0  ;;  %v17027_v3 = vld [vmem:[#allocation6 + $0x78] sm:$0xff] }
 0x43b   : > { %v2653_v4 = vpop.f32.mrf.mxu1  ;;  %3075 = vmatpush2.msra.mxu0 %v3004_v2  ;;  %v17024_v2 = vld [vmem:[#allocation6 + $0x60] sm:$0xff] }
 0x43c   : > { %13017 = vmatmul.mubr.msk.f32.gmra.mxu0 %vm1325_vm0, %v2653_v4  ;;  %13086 = vmatprep.subr.mxu0 %v16820_v15  ;;  %v17031_v4 = vld [vmem:[#allocation6 + $0x70] sm:$0xff] }
 0x43d   : > { %v2655_v5 = vpop.f32.mrf.mxu1 }
 0x43e   : > { %v17034_v5 = vld [vmem:[#allocation6 + $0x88] sm:$0xff] }
 0x43f   : > { %v2658_v6 = vpop.f32.mrf.mxu1 }
 0x440   : > { %13019 = vmatprep.mubr.msk.f32.mxu0 %vm1325_vm0, %v2658_v6  ;;  %v17038_v6 = vld [vmem:[#allocation6 + $0x80] sm:$0xff] }
 0x441   : > { %v2660_v8 = vpop.f32.mrf.mxu1 }
 0x442   : > { %v17041_v8 = vld [vmem:[#allocation6 + $0x98] sm:$0xff] }
 0x443   : > { %v2663_v9 = vpop.f32.mrf.mxu1 }
 0x444   : > { %13020 = vmatmul.mubr.msk.f32.gmra.mxu0 %vm1325_vm0, %v2663_v9  ;;  %v17045_v9 = vld [vmem:[#allocation6 + $0x90] sm:$0xff] }
 0x445   : > { %v2665_v7 = vpop.f32.mrf.mxu1 }
 0x446   : > { %v17048_v7 = vld [vmem:[#allocation6 + $0xa8] sm:$0xff] }
 0x447   : > { %v2668_v16 = vpop.f32.mrf.mxu1 }
 0x448   : > { %13022 = vmatprep.mubr.msk.f32.mxu0 %vm1325_vm0, %v2668_v16  ;;  %v17052_v16 = vld [vmem:[#allocation6 + $0xa0] sm:$0xff] }
 0x449   : > { %v2670_v32 = vpop.f32.mrf.mxu1 }
 0x44a   : > { %v17055_v32 = vld [vmem:[#allocation6 + $0xb8] sm:$0xff] }
 0x44b   : > { %v2673_v33 = vpop.f32.mrf.mxu1 }
 0x44c   : > { %13023 = vmatmul.mubr.msk.f32.gmra.mxu0 %vm1325_vm0, %v2673_v33  ;;  %v17059_v33 = vld [vmem:[#allocation6 + $0xb0] sm:$0xff] }
 0x44d   : > { %v2675_v34 = vpop.f32.mrf.mxu1 }
 0x44e   : > { %v17062_v34 = vld [vmem:[#allocation6 + $0xc8] sm:$0xff] }
 0x44f   : > { %v2678_v11 = vpop.f32.mrf.mxu1 }
 0x450   : > { %13025 = vmatprep.mubr.msk.f32.mxu0 %vm1325_vm0, %v2678_v11  ;;  %v17066_v11 = vld [vmem:[#allocation6 + $0xc0] sm:$0xff] }
 0x451   : > { %v2680_v12 = vpop.f32.mrf.mxu1 }
 0x452   : > { %v17069_v12 = vld [vmem:[#allocation6 + $0xd8] sm:$0xff] }
 0x453   : > { %v2683_v13 = vpop.f32.mrf.mxu1 }
 0x454   : > { %13026 = vmatmul.mubr.msk.f32.gmra.mxu0 %vm1325_vm0, %v2683_v13 }
 0x455   : > { %v2685_v14 = vpop.f32.mrf.mxu1 }
 0x456   : > { %v17075_v14 = vld [vmem:[#allocation6 + $0xd0] sm:$0xff] }
 0x457   : > { %v2688_v20 = vpop.f32.mrf.mxu1 }
 0x458   : > { %13028 = vmatprep.mubr.msk.f32.mxu0 %vm1325_vm0, %v2688_v20  ;;  %v17078_v20 = vld [vmem:[#allocation6 + $0xe8] sm:$0xff] }
 0x459   : > { %v2690_v24 = vpop.f32.mrf.mxu1 }
 0x45b   : > { %v2693_v27 = vpop.f32.mrf.mxu1 }
 0x45c   : > { %13029 = vmatmul.mubr.msk.f32.gmra.mxu0 %vm1325_vm0, %v2693_v27 }
 0x45d   : > { %v2695_v29 = vpop.f32.mrf.mxu1 }
 0x45e   : > { %v17086_v29 = vld [vmem:[#allocation6 + $0xe0] sm:$0xff] }
 0x45f   : > { %v2698_v31 = vpop.f32.mrf.mxu1 }
 0x460   : > { %13031 = vmatprep.mubr.msk.f32.mxu0 %vm1325_vm0, %v2698_v31  ;;  %v17089_v31 = vld [vmem:[#allocation6 + $0xf8] sm:$0xff] }
 0x461   : > { %v2700_v63 = vpop.f32.mrf.mxu1 }
 0x463   : > { %v2703_v62 = vpop.f32.mrf.mxu1 }
 0x464   : > { %13032 = vmatmul.mubr.msk.f32.gmra.mxu0 %vm1325_vm0, %v2703_v62  ;;  %v17095_v62 = vld [vmem:[#allocation6 + $0xf0] sm:$0xff] }
 0x465   : > { %v2705_v60 = vpop.f32.mrf.mxu1  ;;  %11739 = vmatprep.mubr.msk.f32.mxu0 %vm1325_vm0, %v16966_v61 }
 0x466   : > { %v17098_v60 = vld [vmem:[#allocation6 + $0x108] sm:$0xff] }
 0x468   : > { %3077 = vmatmul.mubr.f32.vlgmr.msra.gmra.mxu0 %v16970_v59 }
 0x469   : > { %11740 = vmatprep.mubr.msk.f32.mxu0 %vm1325_vm0, %v16973_v23  ;;  %13087 = vmatpush3.msra.mxu0 %v16820_v15  ;;  %v16991_v15 = vld [vmem:[#allocation6 + $0x20] sm:$0xff] }
 0x46a   : > { %13088 = vmatprep.subr.mxu0 %v16823_v18 }
 0x46b   : > { %13089 = vmatpush3.msra.mxu0 %v16823_v18  ;;  %v16995_v18 = vld [vmem:[#allocation6 + $0x38] sm:$0xff] }
 0x46c   : > { %3082 = vmatmul.mubr.f32.gmra.mxu0 %v16980_v17  ;;  %13090 = vmatprep.subr.mxu0 %v16828_v22  ;;  %v17073_v13 = vpop.f32.mrf.mxu0 }
 0x46d   : > { %11741 = vmatprep.mubr.msk.f32.mxu0 %vm1325_vm0, %v16984_v58  ;;  %13091 = vmatpush3.msra.mxu0 %v16828_v22  ;;  %v17002_v22 = vld [vmem:[#allocation6 + $0x30] sm:$0xff] }
 0x46e   : > { %13092 = vmatprep.subr.mxu0 %v16832_v26  ;;  %v17082_v24 = vpop.f32.mrf.mxu0 }
 0x46f   : > { %13093 = vmatpush3.msra.mxu0 %v16832_v26  ;;  %v14692_v26 = vld [vmem:[#allocation7 + $0x8] sm:$0xff]  ;;  %20332 = vst [vmem:[#allocation53_spill] sm:$0xff] %v17082_v24 }
 0x470   : > { %3087 = vmatmul.mubr.f32.gmra.mxu0 %v16991_v15  ;;  %13094 = vmatprep.subr.mxu0 %v16837_v28 }
 0x471   : > { %11742 = vmatprep.mubr.msk.f32.mxu0 %vm1325_vm0, %v16995_v18  ;;  %13095 = vmatpush3.msra.mxu0 %v16837_v28  ;;  %v17009_v28 = vld [vmem:[#allocation6 + $0x40] sm:$0xff] }
 0x472   : > { %13096 = vmatprep.subr.mxu0 %v16841_v30 }
 0x473   : > { %13097 = vmatpush3.msra.mxu0 %v16841_v30  ;;  %v17013_v30 = vld [vmem:[#allocation6 + $0x58] sm:$0xff] }
 0x474   : > { %3092 = vmatmul.mubr.f32.gmra.mxu0 %v17002_v22  ;;  %13098 = vmatprep.subr.mxu0 %v14692_v26  ;;  %v17084_v27 = vpop.f32.mrf.mxu0 }
 0x475   : > { %11743 = vmatprep.mubr.msk.f32.mxu0 %vm1325_vm0, %v17005_v21  ;;  %13099 = vmatpush3.msra.mxu0 %v14692_v26  ;;  %20333 = vst [vmem:[#allocation54_spill] sm:$0xff] %v17084_v27 }
 0x476   : > { %13100 = vmatprep.subr.mxu0 %v14694_v25  ;;  %v17093_v63 = vpop.f32.mrf.mxu0 }
 0x477   : > { %13101 = vmatpush3.msra.mxu0 %v14694_v25  ;;  %20334 = vst [vmem:[#allocation55_spill] sm:$0xff] %v17093_v63  ;;  %v17104_v25 = vld [vmem:[#allocation6 + $0x100] sm:$0xff] }
 0x478   : > { %3097 = vmatmul.mubr.f32.gmra.mxu0 %v17009_v28  ;;  %4310 = vmatprep.subr.mxu0 %v20223_v0  ;;  %v17144_v63 = vld [vmem:[#allocation6 + $0x140] sm:$0xff] }
 0x479   : > { %11744 = vmatprep.mubr.msk.f32.mxu0 %vm1325_vm0, %v17013_v30 }
 0x47c   : > { %3102 = vmatmul.mubr.f32.gmra.mxu0 %v17017_v19  ;;  %v17102_v26 = vpop.f32.mrf.mxu0 }
 0x47d   : > { %11745 = vmatprep.mubr.msk.f32.mxu0 %vm1325_vm0, %v17020_v1  ;;  %20335 = vst [vmem:[#allocation56_spill] sm:$0xff] %v17102_v26 }
 0x47e   : > { %v17111_v56 = vpop.f32.mrf.mxu0 }
 0x47f   : > { %20336 = vst [vmem:[#allocation65_spill] sm:$0xff] %v17111_v56  ;;  %v17136_v56 = vld [vmem:[#allocation6 + $0x148] sm:$0xff] }
 0x480   : > { %3107 = vmatmul.mubr.f32.gmra.mxu0 %v17024_v2 }
 0x481   : > { %11746 = vmatprep.mubr.msk.f32.mxu0 %vm1325_vm0, %v17027_v3 }
 0x484   : > { %3112 = vmatmul.mubr.f32.gmra.mxu0 %v17031_v4  ;;  %v17113_v54 = vpop.f32.mrf.mxu0 }
 0x485   : > { %11747 = vmatprep.mubr.msk.f32.mxu0 %vm1325_vm0, %v17034_v5  ;;  %20337 = vst [vmem:[#allocation68_spill] sm:$0xff] %v17113_v54 }
 0x486   : > { %v17122_v48 = vpop.f32.mrf.mxu0 }
 0x487   : > { %20338 = vst [vmem:[#allocation80_spill] sm:$0xff] %v17122_v48 }
 0x488   : > { %3117 = vmatmul.mubr.f32.gmra.mxu0 %v17038_v6 }
 0x489   : > { %11748 = vmatprep.mubr.msk.f32.mxu0 %vm1325_vm0, %v17041_v8 }
 0x48c   : > { %3122 = vmatmul.mubr.f32.gmra.mxu0 %v17045_v9  ;;  %v17131_v42 = vpop.f32.mrf.mxu0 }
 0x48d   : > { %11749 = vmatprep.mubr.msk.f32.mxu0 %vm1325_vm0, %v17048_v7  ;;  %20339 = vst [vmem:[#allocation81_spill] sm:$0xff] %v17131_v42 }
 0x48e   : > { %v17140_v48 = vpop.f32.mrf.mxu0 }
 0x48f   : > { %20340 = vst [vmem:[#allocation82_spill] sm:$0xff] %v17140_v48 }
 0x490   : > { %3127 = vmatmul.mubr.f32.gmra.mxu0 %v17052_v16 }
 0x491   : > { %11750 = vmatprep.mubr.msk.f32.mxu0 %vm1325_vm0, %v17055_v32 }
 0x494   : > { %3132 = vmatmul.mubr.f32.gmra.mxu0 %v17059_v33  ;;  %v17142_v38 = vpop.f32.mrf.mxu0 }
 0x495   : > { %11751 = vmatprep.mubr.msk.f32.mxu0 %vm1325_vm0, %v17062_v34  ;;  %20341 = vst [vmem:[#allocation83_spill] sm:$0xff] %v17142_v38 }
 0x496   : > { %v17151_v24 = vpop.f32.mrf.mxu0 }
 0x497   : > { %20342 = vst [vmem:[#allocation84_spill] sm:$0xff] %v17151_v24 }
 0x498   : > { %3137 = vmatmul.mubr.f32.gmra.mxu0 %v17066_v11 }
 0x499   : > { %11752 = vmatprep.mubr.msk.f32.mxu0 %vm1325_vm0, %v17069_v12 }
 0x49c   : > { %3142 = vmatmul.mubr.f32.gmra.mxu0 %v17075_v14  ;;  %v17160_v48 = vpop.f32.mrf.mxu0 }
 0x49d   : > { %11753 = vmatprep.mubr.msk.f32.mxu0 %vm1325_vm0, %v17078_v20  ;;  %20343 = vst [vmem:[#allocation85_spill] sm:$0xff] %v17160_v48 }
 0x49e   : > { %v17169_v24 = vpop.f32.mrf.mxu0 }
 0x49f   : > { %20344 = vst [vmem:[#allocation86_spill] sm:$0xff] %v17169_v24 }
 0x4a0   : > { %3147 = vmatmul.mubr.f32.gmra.mxu0 %v17086_v29 }
 0x4a1   : > { %11754 = vmatprep.mubr.msk.f32.mxu0 %vm1325_vm0, %v17089_v31 }
 0x4a4   : > { %3152 = vmatmul.mubr.f32.gmra.mxu0 %v17095_v62  ;;  %v17171_v49 = vpop.f32.mrf.mxu0 }
 0x4a5   : > { %11755 = vmatprep.mubr.msk.f32.mxu0 %vm1325_vm0, %v17098_v60  ;;  %20345 = vst [vmem:[#allocation87_spill] sm:$0xff] %v17171_v49 }
 0x4a6   : > { %v17176_v38 = vpop.f32.mrf.mxu0 }
 0x4a7   : > { %20346 = vst [vmem:[#allocation88_spill] sm:$0xff] %v17176_v38 }
 0x4a8   : > { %3157 = vmatmul.mubr.f32.gmra.mxu0 %v17104_v25 }
 0x4a9   : > { %11756 = vmatprep.mubr.msk.f32.mxu0 %vm1325_vm0, %v17107_v10 }
 0x4ac   : > { %3162 = vmatmul.mubr.f32.gmra.mxu0 %v17115_v52  ;;  %v17178_v48 = vpop.f32.mrf.mxu0 }
 0x4ad   : > { %11757 = vmatprep.mubr.msk.f32.mxu0 %vm1325_vm0, %v17118_v50  ;;  %20347 = vst [vmem:[#allocation89_spill] sm:$0xff] %v17178_v48 }
 0x4ae   : > { %v17180_v45 = vpop.f32.mrf.mxu0 }
 0x4af   : > { %20348 = vst [vmem:[#allocation90_spill] sm:$0xff] %v17180_v45 }
 0x4b0   : > { %3167 = vmatmul.mubr.f32.gmra.mxu0 %v17124_v46 }
 0x4b1   : > { %11758 = vmatprep.mubr.msk.f32.mxu0 %vm1325_vm0, %v17127_v44 }
 0x4b4   : > { %3172 = vmatmul.mubr.f32.gmra.mxu0 %v17133_v40  ;;  %v17182_v42 = vpop.f32.mrf.mxu0 }
 0x4b5   : > { %11759 = vmatprep.mubr.msk.f32.mxu0 %vm1325_vm0, %v17136_v56  ;;  %20349 = vst [vmem:[#allocation91_spill] sm:$0xff] %v17182_v42 }
 0x4b6   : > { %v17184_v43 = vpop.f32.mrf.mxu0 }
 0x4b7   : > { %20350 = vst [vmem:[#allocation92_spill] sm:$0xff] %v17184_v43 }
 0x4b8   : > { %3177 = vmatmul.mubr.f32.gmra.mxu0 %v17144_v63 }
 0x4b9   : > { %11760 = vmatprep.mubr.msk.f32.mxu0 %vm1325_vm0, %v17147_v36 }
 0x4bc   : > { %3182 = vmatmul.mubr.f32.gmra.mxu0 %v17153_v57  ;;  %v17186_v54 = vpop.f32.mrf.mxu0 }
 0x4bd   : > { %11761 = vmatprep.mubr.msk.f32.mxu0 %vm1325_vm0, %v17156_v55  ;;  %20351 = vst [vmem:[#allocation93_spill] sm:$0xff] %v17186_v54 }
 0x4be   : > { %v17188_v41 = vpop.f32.mrf.mxu0 }
 0x4bf   : > { %20352 = vst [vmem:[#allocation94_spill] sm:$0xff] %v17188_v41 }
 0x4c0   : > { %3187 = vmatmul.mubr.f32.gmra.mxu0 %v17162_v53 }
 0x4c1   : > { %11762 = vmatprep.mubr.msk.f32.mxu0 %vm1325_vm0, %v17165_v51 }
 0x4c4   : > { %3192 = vmatmul.mubr.f32.gmra.mxu0 %v17173_v47  ;;  %v17190_v24 = vpop.f32.mrf.mxu0 }
 0x4c5   : > { %20353 = vst [vmem:[#allocation95_spill] sm:$0xff] %v17190_v24 }
 0x4c6   : > { %v17192_v49 = vpop.f32.mrf.mxu0 }
 0x4c7   : > { %20354 = vst [vmem:[#allocation96_spill] sm:$0xff] %v17192_v49 }
 0x4cc   : > { %v17194_v26 = vpop.f32.mrf.mxu0 }
 0x4ce   : > { %v17196_v39 = vpop.f32.mrf.mxu0 }
 0x4cf   : > { %20355 = vst [vmem:[#allocation97_spill] sm:$0xff] %v17196_v39 }
 0x4d4   : > { %v17198_v38 = vpop.f32.mrf.mxu0 }
 0x4d5   : > { %20356 = vst [vmem:[#allocation98_spill] sm:$0xff] %v17198_v38  ;;  %v17460_v38 = vld [vmem:[%s15999_s1 + $0x80] sm:$0xff] }
 0x4d6   : > { %v17200_v48 = vpop.f32.mrf.mxu0  ;;  %20424 = vst [vmem:[#allocation166_spill] sm:$0xff] %v17460_v38 }
 0x4d7   : > { %20357 = vst [vmem:[#allocation99_spill] sm:$0xff] %v17200_v48 }
 0x4dc   : > { %v17202_v45 = vpop.f32.mrf.mxu0 }
 0x4dd   : > { %20358 = vst [vmem:[#allocation100_spill] sm:$0xff] %v17202_v45 }
 0x4de   : > { %v17204_v42 = vpop.f32.mrf.mxu0 }
 0x4df   : > { %20359 = vst [vmem:[#allocation101_spill] sm:$0xff] %v17204_v42 }
 0x4e4   : > { %v17206_v43 = vpop.f32.mrf.mxu0 }
 0x4e5   : > { %20360 = vst [vmem:[#allocation102_spill] sm:$0xff] %v17206_v43  ;;  %v17244_v43 = vld [vmem:[%s15999_s1 + $0x78] sm:$0xff] }
 0x4e6   : > { %v17208_v54 = vpop.f32.mrf.mxu0  ;;  %20378 = vst [vmem:[#allocation120_spill] sm:$0xff] %v17244_v43 }
 0x4e7   : > { %20361 = vst [vmem:[#allocation103_spill] sm:$0xff] %v17208_v54 }
 0x4ec   : > { %v17210_v41 = vpop.f32.mrf.mxu0 }
 0x4ed   : > { %20362 = vst [vmem:[#allocation104_spill] sm:$0xff] %v17210_v41 }
 0x4ee   : > { %v17212_v24 = vpop.f32.mrf.mxu0 }
 0x4ef   : > { %20363 = vst [vmem:[#allocation105_spill] sm:$0xff] %v17212_v24 }
 0x4f4   : > { %v17214_v49 = vpop.f32.mrf.mxu0 }
 0x4f5   : > { %20364 = vst [vmem:[#allocation106_spill] sm:$0xff] %v17214_v49 }
 0x4f6   : > { %v17216_v27 = vpop.f32.mrf.mxu0 }
 0x4f7   : > { %20365 = vst [vmem:[#allocation107_spill] sm:$0xff] %v17216_v27 }
 0x4fc   : > { %v17218_v39 = vpop.f32.mrf.mxu0 }
 0x4fd   : > { %20366 = vst [vmem:[#allocation108_spill] sm:$0xff] %v17218_v39 }
 0x4fe   : > { %v17220_v48 = vpop.f32.mrf.mxu0 }
 0x4ff   : > { %20367 = vst [vmem:[#allocation109_spill] sm:$0xff] %v17220_v48 }
 0x504   : > { %v17222_v45 = vpop.f32.mrf.mxu0 }
 0x505   : > { %20368 = vst [vmem:[#allocation110_spill] sm:$0xff] %v17222_v45 }
 0x506   : > { %v17224_v42 = vpop.f32.mrf.mxu0 }
 0x507   : > { %20369 = vst [vmem:[#allocation111_spill] sm:$0xff] %v17224_v42 }
 0x50c   : > { %v17226_v54 = vpop.f32.mrf.mxu0 }
 0x50d   : > { %20370 = vst [vmem:[#allocation112_spill] sm:$0xff] %v17226_v54 }
 0x50e   : > { %v17228_v41 = vpop.f32.mrf.mxu0 }
 0x50f   : > { %20371 = vst [vmem:[#allocation113_spill] sm:$0xff] %v17228_v41  ;;  %v17247_v41 = vld [vmem:[%s16006_s13 + $0x78] sm:$0xff] }
 0x510   : > { %20379 = vst [vmem:[#allocation121_spill] sm:$0xff] %v17247_v41 }
 0x514   : > { %v17230_v24 = vpop.f32.mrf.mxu0 }
 0x515   : > { %20372 = vst [vmem:[#allocation114_spill] sm:$0xff] %v17230_v24  ;;  %v17264_v24 = vld [vmem:[%s16006_s13 + $0x68] sm:$0xff] }
 0x516   : > { %v17232_v49 = vpop.f32.mrf.mxu0  ;;  %20383 = vst [vmem:[#allocation125_spill] sm:$0xff] %v17264_v24 }
 0x517   : > { %20373 = vst [vmem:[#allocation115_spill] sm:$0xff] %v17232_v49  ;;  %v3493_v49 = vmul.f32 %v17247_v41, %v17244_v43 }
 0x51c   : > { %v17234_v27 = vpop.f32.mrf.mxu0 }
 0x51d   : > { %20374 = vst [vmem:[#allocation116_spill] sm:$0xff] %v17234_v27  ;;  %v17252_v27 = vld [vmem:[%s15999_s1 + $0x70] sm:$0xff] }
 0x51e   : > { %v17236_v39 = vpop.f32.mrf.mxu0  ;;  %20380 = vst [vmem:[#allocation122_spill] sm:$0xff] %v17252_v27 }
 0x51f   : > { %20375 = vst [vmem:[#allocation117_spill] sm:$0xff] %v17236_v39 }
 0x524   : > { %v17238_v48 = vpop.f32.mrf.mxu0 }
 0x525   : > { %20376 = vst [vmem:[#allocation118_spill] sm:$0xff] %v17238_v48  ;;  %v17255_v48 = vld [vmem:[%s16006_s13 + $0x70] sm:$0xff] }
 0x526   : > { %v17240_v45 = vpop.f32.mrf.mxu0  ;;  %20381 = vst [vmem:[#allocation123_spill] sm:$0xff] %v17255_v48 }
 0x527   : > { %20377 = vst [vmem:[#allocation119_spill] sm:$0xff] %v17240_v45  ;;  %v3492_v45 = vmul.f32 %v17255_v48, %v17252_v27  ;;  %v17270_v48 = vld [vmem:[%s15999_s1 + $0x60] sm:$0xff] }
 0x528   : > { %v3078_v42 = vpop.f32.mrf.mxu0  ;;  %20384 = vst [vmem:[#allocation126_spill] sm:$0xff] %v17270_v48 }
 0x529   : > { %13050 = vmatprep.mubr.msk.f32.mxu1 %vm1325_vm0, %v3078_v42 }
 0x52a   : > { %v3080_v54 = vpop.f32.mrf.mxu0 }
 0x52b   : > { %v17261_v54 = vld [vmem:[%s15999_s1 + $0x68] sm:$0xff] }
 0x52c   : > { %v3083_v39 = vpop.f32.mrf.mxu0  ;;  %20382 = vst [vmem:[#allocation124_spill] sm:$0xff] %v17261_v54  ;;  %v3491_v41 = vmul.f32 %v17264_v24, %v17261_v54  ;;  %v17280_v24 = vld [vmem:[%s15999_s1 + $0x58] sm:$0xff] }
 0x52d   : > { %13051 = vmatmul.mubr.msk.f32.vlgmr.msra.gmra.mxu1 %vm1325_vm0, %v3083_v39  ;;  %v17273_v39 = vld [vmem:[%s16006_s13 + $0x60] sm:$0xff]  ;;  %20386 = vst [vmem:[#allocation128_spill] sm:$0xff] %v17280_v24  ;;  %v17283_v54 = vld [vmem:[%s16006_s13 + $0x58] sm:$0xff] }
 0x52e   : > { %v3085_v42 = vpop.f32.mrf.mxu0  ;;  %3503 = vmatpush1.msra.mxu1 %v3493_v49  ;;  %20385 = vst [vmem:[#allocation127_spill] sm:$0xff] %v17273_v39  ;;  %v3490_v49 = vmul.f32 %v17273_v39, %v17270_v48  ;;  %20387 = vst [vmem:[#allocation129_spill] sm:$0xff] %v17283_v54  ;;  %v17292_v39 = vld [vmem:[%s16006_s13 + $0x50] sm:$0xff] }
 0x52f   : > { %3504 = vmatprep.subr.mxu1 %v20223_v0  ;;  %20389 = vst [vmem:[#allocation131_spill] sm:$0xff] %v17292_v39 }
 0x530   : > { %v3088_v43 = vpop.f32.mrf.mxu0  ;;  %3505 = vmatpush1.msra.mxu1 %v3492_v45  ;;  %v3489_v45 = vmul.f32 %v17283_v54, %v17280_v24  ;;  %v17299_v54 = vld [vmem:[%s15999_s1 + $0x48] sm:$0xff] }
 0x531   : > { %13053 = vmatprep.mubr.msk.f32.mxu1 %vm1325_vm0, %v3088_v43  ;;  %3506 = vmatprep.subr.mxu1 %v20223_v0  ;;  %v17289_v43 = vld [vmem:[%s15999_s1 + $0x50] sm:$0xff]  ;;  %20390 = vst [vmem:[#allocation132_spill] sm:$0xff] %v17299_v54  ;;  %v17302_v24 = vld [vmem:[%s16006_s13 + $0x48] sm:$0xff] }
 0x532   : > { %v3090_v42 = vpop.f32.mrf.mxu0  ;;  %3507 = vmatpush1.msra.mxu1 %v3491_v41  ;;  %20388 = vst [vmem:[#allocation130_spill] sm:$0xff] %v17289_v43  ;;  %v3488_v41 = vmul.f32 %v17292_v39, %v17289_v43  ;;  %20391 = vst [vmem:[#allocation133_spill] sm:$0xff] %v17302_v24  ;;  %v17311_v39 = vld [vmem:[%s16006_s13 + $0x40] sm:$0xff] }
 0x533   : > { %3508 = vmatprep.subr.mxu1 %v20223_v0  ;;  %20393 = vst [vmem:[#allocation135_spill] sm:$0xff] %v17311_v39 }
 0x534   : > { %v3093_v27 = vpop.f32.mrf.mxu0  ;;  %3509 = vmatpush1.msra.mxu1 %v3490_v49  ;;  %v3487_v49 = vmul.f32 %v17302_v24, %v17299_v54  ;;  %v17318_v24 = vld [vmem:[%s15999_s1 + $0x38] sm:$0xff] }
 0x535   : > { %13054 = vmatmul.mubr.msk.f32.gmra.mxu1 %vm1325_vm0, %v3093_v27  ;;  %3510 = vmatprep.subr.mxu1 %v20223_v0  ;;  %v17308_v27 = vld [vmem:[%s15999_s1 + $0x40] sm:$0xff]  ;;  %20394 = vst [vmem:[#allocation136_spill] sm:$0xff] %v17318_v24  ;;  %v17321_v54 = vld [vmem:[%s16006_s13 + $0x38] sm:$0xff] }
 0x536   : > { %v3095_v42 = vpop.f32.mrf.mxu0  ;;  %3511 = vmatpush1.msra.mxu1 %v3489_v45  ;;  %20392 = vst [vmem:[#allocation134_spill] sm:$0xff] %v17308_v27  ;;  %v3486_v45 = vmul.f32 %v17311_v39, %v17308_v27  ;;  %20395 = vst [vmem:[#allocation137_spill] sm:$0xff] %v17321_v54  ;;  %v17330_v39 = vld [vmem:[%s16006_s13 + $0x30] sm:$0xff] }
 0x537   : > { %3512 = vmatprep.subr.mxu1 %v20223_v0  ;;  %20397 = vst [vmem:[#allocation139_spill] sm:$0xff] %v17330_v39 }
 0x538   : > { %v3098_v48 = vpop.f32.mrf.mxu0  ;;  %3513 = vmatpush1.msra.mxu1 %v3488_v41  ;;  %v3485_v41 = vmul.f32 %v17321_v54, %v17318_v24  ;;  %v17337_v54 = vld [vmem:[%s15999_s1 + $0x28] sm:$0xff] }
 0x539   : > { %13056 = vmatprep.mubr.msk.f32.mxu1 %vm1325_vm0, %v3098_v48  ;;  %3514 = vmatprep.subr.mxu1 %v20223_v0  ;;  %v17327_v48 = vld [vmem:[%s15999_s1 + $0x30] sm:$0xff]  ;;  %20398 = vst [vmem:[#allocation140_spill] sm:$0xff] %v17337_v54  ;;  %v17340_v24 = vld [vmem:[%s16006_s13 + $0x28] sm:$0xff] }
 0x53a   : > { %v3100_v42 = vpop.f32.mrf.mxu0  ;;  %3515 = vmatpush1.msra.mxu1 %v3487_v49  ;;  %20396 = vst [vmem:[#allocation138_spill] sm:$0xff] %v17327_v48  ;;  %v3484_v49 = vmul.f32 %v17330_v39, %v17327_v48  ;;  %20399 = vst [vmem:[#allocation141_spill] sm:$0xff] %v17340_v24  ;;  %v17349_v39 = vld [vmem:[%s16006_s13 + $0x20] sm:$0xff] }
 0x53b   : > { %3516 = vmatprep.subr.mxu1 %v20223_v0  ;;  %20401 = vst [vmem:[#allocation143_spill] sm:$0xff] %v17349_v39 }
 0x53c   : > { %v3103_v43 = vpop.f32.mrf.mxu0  ;;  %3517 = vmatpush1.msra.mxu1 %v3486_v45  ;;  %v3483_v45 = vmul.f32 %v17340_v24, %v17337_v54  ;;  %v17356_v24 = vld [vmem:[%s15999_s1 + $0x18] sm:$0xff] }
 0x53d   : > { %13057 = vmatmul.mubr.msk.f32.gmra.mxu1 %vm1325_vm0, %v3103_v43  ;;  %3518 = vmatprep.subr.mxu1 %v20223_v0  ;;  %v17346_v43 = vld [vmem:[%s15999_s1 + $0x20] sm:$0xff]  ;;  %20402 = vst [vmem:[#allocation144_spill] sm:$0xff] %v17356_v24  ;;  %v17359_v54 = vld [vmem:[%s16006_s13 + $0x18] sm:$0xff] }
 0x53e   : > { %v3105_v42 = vpop.f32.mrf.mxu0  ;;  %3519 = vmatpush1.msra.mxu1 %v3485_v41  ;;  %20400 = vst [vmem:[#allocation142_spill] sm:$0xff] %v17346_v43  ;;  %v3482_v41 = vmul.f32 %v17349_v39, %v17346_v43  ;;  %20403 = vst [vmem:[#allocation145_spill] sm:$0xff] %v17359_v54  ;;  %v17368_v39 = vld [vmem:[%s16006_s13 + $0x10] sm:$0xff] }
 0x53f   : > { %3520 = vmatprep.subr.mxu1 %v20223_v0  ;;  %20405 = vst [vmem:[#allocation147_spill] sm:$0xff] %v17368_v39 }
 0x540   : > { %v3108_v27 = vpop.f32.mrf.mxu0  ;;  %3521 = vmatpush1.msra.mxu1 %v3484_v49  ;;  %v3481_v49 = vmul.f32 %v17359_v54, %v17356_v24  ;;  %v17375_v54 = vld [vmem:[%s15999_s1 + $0x8] sm:$0xff] }
 0x541   : > { %13059 = vmatprep.mubr.msk.f32.mxu1 %vm1325_vm0, %v3108_v27  ;;  %3522 = vmatprep.subr.mxu1 %v20223_v0  ;;  %v17365_v27 = vld [vmem:[%s15999_s1 + $0x10] sm:$0xff]  ;;  %20406 = vst [vmem:[#allocation148_spill] sm:$0xff] %v17375_v54  ;;  %v17378_v24 = vld [vmem:[%s16006_s13 + $0x8] sm:$0xff] }
 0x542   : > { %v3110_v42 = vpop.f32.mrf.mxu0  ;;  %3523 = vmatpush1.msra.mxu1 %v3483_v45  ;;  %20404 = vst [vmem:[#allocation146_spill] sm:$0xff] %v17365_v27  ;;  %v3480_v45 = vmul.f32 %v17368_v39, %v17365_v27  ;;  %20407 = vst [vmem:[#allocation149_spill] sm:$0xff] %v17378_v24  ;;  %v17387_v39 = vld [vmem:[%s16006_s13] sm:$0xff] }
 0x543   : > { %3524 = vmatprep.subr.mxu1 %v20223_v0  ;;  %20409 = vst [vmem:[#allocation151_spill] sm:$0xff] %v17387_v39 }
 0x544   : > { %v3113_v48 = vpop.f32.mrf.mxu0  ;;  %3525 = vmatpush1.msra.mxu1 %v3482_v41  ;;  %v3479_v41 = vmul.f32 %v17378_v24, %v17375_v54  ;;  %v17394_v24 = vld [vmem:[%s15999_s1 + $0xb8] sm:$0xff] }
 0x545   : > { %13060 = vmatmul.mubr.msk.f32.gmra.mxu1 %vm1325_vm0, %v3113_v48  ;;  %3526 = vmatprep.subr.mxu1 %v20223_v0  ;;  %v17384_v48 = vld [vmem:[%s15999_s1] sm:$0xff]  ;;  %20410 = vst [vmem:[#allocation152_spill] sm:$0xff] %v17394_v24  ;;  %v17397_v54 = vld [vmem:[%s16006_s13 + $0xb8] sm:$0xff] }
 0x546   : > { %v3115_v42 = vpop.f32.mrf.mxu0  ;;  %3527 = vmatpush1.msra.mxu1 %v3481_v49  ;;  %20408 = vst [vmem:[#allocation150_spill] sm:$0xff] %v17384_v48  ;;  %v3478_v49 = vmul.f32 %v17387_v39, %v17384_v48  ;;  %20411 = vst [vmem:[#allocation153_spill] sm:$0xff] %v17397_v54  ;;  %v17406_v39 = vld [vmem:[%s16006_s13 + $0xb0] sm:$0xff] }
 0x547   : > { %3528 = vmatprep.subr.mxu1 %v20223_v0  ;;  %20413 = vst [vmem:[#allocation155_spill] sm:$0xff] %v17406_v39 }
 0x548   : > { %v3118_v43 = vpop.f32.mrf.mxu0  ;;  %3529 = vmatpush1.msra.mxu1 %v3480_v45  ;;  %v3501_v45 = vmul.f32 %v17397_v54, %v17394_v24  ;;  %v17413_v54 = vld [vmem:[%s15999_s1 + $0xa8] sm:$0xff] }
 0x549   : > { %13062 = vmatprep.mubr.msk.f32.mxu1 %vm1325_vm0, %v3118_v43  ;;  %3530 = vmatprep.subr.mxu1 %v20223_v0  ;;  %v17403_v43 = vld [vmem:[%s15999_s1 + $0xb0] sm:$0xff]  ;;  %20414 = vst [vmem:[#allocation156_spill] sm:$0xff] %v17413_v54  ;;  %v17416_v24 = vld [vmem:[%s16006_s13 + $0xa8] sm:$0xff] }
 0x54a   : > { %v3120_v42 = vpop.f32.mrf.mxu0  ;;  %3531 = vmatpush1.msra.mxu1 %v3479_v41  ;;  %20412 = vst [vmem:[#allocation154_spill] sm:$0xff] %v17403_v43  ;;  %v3500_v41 = vmul.f32 %v17406_v39, %v17403_v43  ;;  %20415 = vst [vmem:[#allocation157_spill] sm:$0xff] %v17416_v24  ;;  %v17425_v39 = vld [vmem:[%s16006_s13 + $0xa0] sm:$0xff] }
 0x54b   : > { %3532 = vmatprep.subr.mxu1 %v20223_v0  ;;  %20417 = vst [vmem:[#allocation159_spill] sm:$0xff] %v17425_v39 }
 0x54c   : > { %v3123_v27 = vpop.f32.mrf.mxu0  ;;  %3533 = vmatpush1.msra.mxu1 %v3478_v49  ;;  %v3499_v49 = vmul.f32 %v17416_v24, %v17413_v54  ;;  %v17432_v24 = vld [vmem:[%s15999_s1 + $0x98] sm:$0xff] }
 0x54d   : > { %13063 = vmatmul.mubr.msk.f32.gmra.mxu1 %vm1325_vm0, %v3123_v27  ;;  %3550 = vmatprep.subr.mxu1 %v20223_v0  ;;  %v17422_v27 = vld [vmem:[%s15999_s1 + $0xa0] sm:$0xff]  ;;  %20418 = vst [vmem:[#allocation160_spill] sm:$0xff] %v17432_v24  ;;  %v17435_v54 = vld [vmem:[%s16006_s13 + $0x98] sm:$0xff] }
 0x54e   : > { %v3125_v42 = vpop.f32.mrf.mxu0  ;;  %3551 = vmatpush2.msra.mxu1 %v3501_v45  ;;  %20416 = vst [vmem:[#allocation158_spill] sm:$0xff] %v17422_v27  ;;  %v3498_v45 = vmul.f32 %v17425_v39, %v17422_v27  ;;  %20419 = vst [vmem:[#allocation161_spill] sm:$0xff] %v17435_v54  ;;  %v17444_v39 = vld [vmem:[%s16006_s13 + $0x90] sm:$0xff] }
 0x54f   : > { %3552 = vmatprep.subr.mxu1 %v20223_v0  ;;  %20421 = vst [vmem:[#allocation163_spill] sm:$0xff] %v17444_v39 }
 0x550   : > { %v3128_v48 = vpop.f32.mrf.mxu0  ;;  %3553 = vmatpush2.msra.mxu1 %v3500_v41  ;;  %v3497_v41 = vmul.f32 %v17435_v54, %v17432_v24  ;;  %v17451_v54 = vld [vmem:[%s15999_s1 + $0x88] sm:$0xff] }
 0x551   : > { %13065 = vmatprep.mubr.msk.f32.mxu1 %vm1325_vm0, %v3128_v48  ;;  %3554 = vmatprep.subr.mxu1 %v20223_v0  ;;  %v17441_v48 = vld [vmem:[%s15999_s1 + $0x90] sm:$0xff]  ;;  %20422 = vst [vmem:[#allocation164_spill] sm:$0xff] %v17451_v54  ;;  %v17454_v24 = vld [vmem:[%s16006_s13 + $0x88] sm:$0xff] }
 0x552   : > { %v3130_v42 = vpop.f32.mrf.mxu0  ;;  %3555 = vmatpush2.msra.mxu1 %v3499_v49  ;;  %20420 = vst [vmem:[#allocation162_spill] sm:$0xff] %v17441_v48  ;;  %v3496_v49 = vmul.f32 %v17444_v39, %v17441_v48  ;;  %20423 = vst [vmem:[#allocation165_spill] sm:$0xff] %v17454_v24  ;;  %v17463_v39 = vld [vmem:[%s16006_s13 + $0x80] sm:$0xff] }
 0x553   : > { %3556 = vmatprep.subr.mxu1 %v20223_v0  ;;  %20425 = vst [vmem:[#allocation167_spill] sm:$0xff] %v17463_v39 }
 0x554   : > { %v3133_v43 = vpop.f32.mrf.mxu0  ;;  %3557 = vmatpush2.msra.mxu1 %v3498_v45  ;;  %v3495_v45 = vmul.f32 %v17454_v24, %v17451_v54 }
 0x555   : > { %13066 = vmatmul.mubr.msk.f32.gmra.mxu1 %vm1325_vm0, %v3133_v43  ;;  %3558 = vmatprep.subr.mxu1 %v20223_v0  ;;  %v3494_v43 = vmul.f32 %v17463_v39, %v17460_v38 }
 0x556   : > { %v3135_v42 = vpop.f32.mrf.mxu0  ;;  %3559 = vmatpush2.msra.mxu1 %v3497_v41 }
 0x557   : > { %3560 = vmatprep.subr.mxu1 %v20223_v0 }
 0x558   : > { %v3138_v27 = vpop.f32.mrf.mxu0  ;;  %3561 = vmatpush2.msra.mxu1 %v3496_v49 }
 0x559   : > { %13068 = vmatprep.mubr.msk.f32.mxu1 %vm1325_vm0, %v3138_v27  ;;  %3562 = vmatprep.subr.mxu1 %v20223_v0 }
 0x55a   : > { %v3140_v41 = vpop.f32.mrf.mxu0  ;;  %3563 = vmatpush2.msra.mxu1 %v3495_v45 }
 0x55b   : > { %3564 = vmatprep.subr.mxu1 %v20223_v0 }
 0x55c   : > { %v3143_v42 = vpop.f32.mrf.mxu0  ;;  %3565 = vmatpush2.msra.mxu1 %v3494_v43 }
 0x55d   : > { %13069 = vmatmul.mubr.msk.f32.gmra.mxu1 %vm1325_vm0, %v3143_v42 }
 0x55e   : > { %v3145_v49 = vpop.f32.mrf.mxu0 }
 0x560   : > { %v3148_v24 = vpop.f32.mrf.mxu0 }
 0x561   : > { %13071 = vmatprep.mubr.msk.f32.mxu1 %vm1325_vm0, %v3148_v24 }
 0x562   : > { %v3150_v54 = vpop.f32.mrf.mxu0 }
 0x564   : > { %v3153_v48 = vpop.f32.mrf.mxu0 }
 0x565   : > { %13072 = vmatmul.mubr.msk.f32.gmra.mxu1 %vm1325_vm0, %v3153_v48 }
 0x566   : > { %v3155_v39 = vpop.f32.mrf.mxu0 }
 0x568   : > { %v3158_v27 = vpop.f32.mrf.mxu0 }
 0x569   : > { %13074 = vmatprep.mubr.msk.f32.mxu1 %vm1325_vm0, %v3158_v27 }
 0x56a   : > { %v3160_v41 = vpop.f32.mrf.mxu0 }
 0x56c   : > { %v3163_v45 = vpop.f32.mrf.mxu0 }
 0x56d   : > { %13075 = vmatmul.mubr.msk.f32.gmra.mxu1 %vm1325_vm0, %v3163_v45 }
 0x56e   : > { %v3165_v38 = vpop.f32.mrf.mxu0 }
 0x570   : > { %v3168_v43 = vpop.f32.mrf.mxu0 }
 0x571   : > { %13077 = vmatprep.mubr.msk.f32.mxu1 %vm1325_vm0, %v3168_v43 }
 0x572   : > { %v3170_v42 = vpop.f32.mrf.mxu0 }
 0x574   : > { %v3173_v49 = vpop.f32.mrf.mxu0 }
 0x575   : > { %13078 = vmatmul.mubr.msk.f32.gmra.mxu1 %vm1325_vm0, %v3173_v49 }
 0x576   : > { %v3175_v24 = vpop.f32.mrf.mxu0 }
 0x577   : > { %v20440_v24 = vld [vmem:[#allocation106_spill] sm:$0xff] }
 0x578   : > { %v3178_v54 = vpop.f32.mrf.mxu0 }
 0x579   : > { %13080 = vmatprep.mubr.msk.f32.mxu1 %vm1325_vm0, %v3178_v54 }
 0x57a   : > { %v3180_v39 = vpop.f32.mrf.mxu0 }
 0x57c   : > { %v3183_v48 = vpop.f32.mrf.mxu0 }
 0x57d   : > { %13081 = vmatmul.mubr.msk.f32.gmra.mxu1 %vm1325_vm0, %v3183_v48 }
 0x57e   : > { %v3185_v27 = vpop.f32.mrf.mxu0 }
 0x580   : > { %v3188_v41 = vpop.f32.mrf.mxu0 }
 0x581   : > { %13083 = vmatprep.mubr.msk.f32.mxu1 %vm1325_vm0, %v3188_v41  ;;  %v20443_v41 = vld [vmem:[#allocation69_spill] sm:$0xff] }
 0x582   : > { %v3190_v38 = vpop.f32.mrf.mxu0 }
 0x583   : > { %v17645_v38 = vmul.f32 %v20443_v41, %v20443_v41 }
 0x584   : > { %v3193_v45 = vpop.f32.mrf.mxu0 }
 0x585   : > { %13084 = vmatmul.mubr.msk.f32.gmra.mxu1 %vm1325_vm0, %v3193_v45  ;;  %v20445_v45 = vld [vmem:[#allocation85_spill] sm:$0xff] }
 0x586   : > { %v3195_v43 = vpop.f32.mrf.mxu0  ;;  %11787 = vmatprep.mubr.msk.f32.mxu1 %vm1325_vm0, %v16966_v61 }
 0x587   : > { %v17649_v43 = vmul.f32 %v20445_v45, %v20445_v45 }
 0x589   : > { %3567 = vmatmul.mubr.f32.vlgmr.msra.gmra.mxu1 %v16970_v59 }
 0x58a   : > { %11788 = vmatprep.mubr.msk.f32.mxu1 %vm1325_vm0, %v16973_v23 }
 0x58d   : > { %3572 = vmatmul.mubr.f32.gmra.mxu1 %v16980_v17  ;;  %v20428_v17 = vld [vmem:[#allocation59_spill] sm:$0xff] }
 0x58e   : > { %11789 = vmatprep.mubr.msk.f32.mxu1 %vm1325_vm0, %v16984_v58  ;;  %v17585_v58 = vmul.f32 %v20428_v17, %v20428_v17 }
 0x591   : > { %3577 = vmatmul.mubr.f32.gmra.mxu1 %v16991_v15  ;;  %v20429_v15 = vld [vmem:[#allocation56_spill] sm:$0xff] }
 0x592   : > { %11790 = vmatprep.mubr.msk.f32.mxu1 %vm1325_vm0, %v16995_v18  ;;  %v17589_v18 = vmul.f32 %v20429_v15, %v20429_v15  ;;  %20444 = vst [vmem:[#allocation56_spill] sm:$0xff] %v17645_v38 }
 0x595   : > { %3582 = vmatmul.mubr.f32.gmra.mxu1 %v17002_v22 }
 0x596   : > { %11791 = vmatprep.mubr.msk.f32.mxu1 %vm1325_vm0, %v17005_v21  ;;  %v20430_v21 = vld [vmem:[#allocation100_spill] sm:$0xff] }
 0x597   : > { %20446 = vst [vmem:[#allocation100_spill] sm:$0xff] %v17649_v43 }
 0x599   : > { %3587 = vmatmul.mubr.f32.gmra.mxu1 %v17009_v28  ;;  %v2969_v28 = vsub.f32 %v20430_v21, %v17585_v58  ;;  %v20452_v21 = vld [vmem:[#allocation87_spill] sm:$0xff] }
 0x59a   : > { %11792 = vmatprep.mubr.msk.f32.mxu1 %vm1325_vm0, %v17013_v30 }
 0x59d   : > { %3592 = vmatmul.mubr.f32.gmra.mxu1 %v17017_v19 }
 0x59e   : > { %11793 = vmatprep.mubr.msk.f32.mxu1 %vm1325_vm0, %v17020_v1 }
 0x5a1   : > { %3597 = vmatmul.mubr.f32.gmra.mxu1 %v17024_v2  ;;  %v20431_v2 = vld [vmem:[#allocation61_spill] sm:$0xff] }
 0x5a2   : > { %11794 = vmatprep.mubr.msk.f32.mxu1 %vm1325_vm0, %v17027_v3  ;;  %v17600_v3 = vmul.f32 %v20431_v2, %v20431_v2 }
 0x5a5   : > { %3602 = vmatmul.mubr.f32.gmra.mxu1 %v17031_v4  ;;  %v20432_v4 = vld [vmem:[#allocation68_spill] sm:$0xff] }
 0x5a6   : > { %11795 = vmatprep.mubr.msk.f32.mxu1 %vm1325_vm0, %v17034_v5  ;;  %v17604_v5 = vmul.f32 %v20432_v4, %v20432_v4 }
 0x5a9   : > { %3607 = vmatmul.mubr.f32.gmra.mxu1 %v17038_v6 }
 0x5aa   : > { %11796 = vmatprep.mubr.msk.f32.mxu1 %vm1325_vm0, %v17041_v8  ;;  %v20433_v8 = vld [vmem:[#allocation102_spill] sm:$0xff] }
 0x5ad   : > { %3612 = vmatmul.mubr.f32.gmra.mxu1 %v17045_v9  ;;  %v2971_v9 = vsub.f32 %v20433_v8, %v17600_v3 }
 0x5ae   : > { %11797 = vmatprep.mubr.msk.f32.mxu1 %vm1325_vm0, %v17048_v7 }
 0x5b1   : > { %3617 = vmatmul.mubr.f32.gmra.mxu1 %v17052_v16 }
 0x5b2   : > { %11798 = vmatprep.mubr.msk.f32.mxu1 %vm1325_vm0, %v17055_v32 }
 0x5b5   : > { %3622 = vmatmul.mubr.f32.gmra.mxu1 %v17059_v33  ;;  %v20434_v33 = vld [vmem:[#allocation63_spill] sm:$0xff] }
 0x5b6   : > { %11799 = vmatprep.mubr.msk.f32.mxu1 %vm1325_vm0, %v17062_v34  ;;  %v17615_v34 = vmul.f32 %v20434_v33, %v20434_v33 }
 0x5b9   : > { %3627 = vmatmul.mubr.f32.gmra.mxu1 %v17066_v11  ;;  %v20435_v11 = vld [vmem:[#allocation81_spill] sm:$0xff] }
 0x5ba   : > { %11800 = vmatprep.mubr.msk.f32.mxu1 %vm1325_vm0, %v17069_v12  ;;  %v17619_v12 = vmul.f32 %v20435_v11, %v20435_v11 }
 0x5bd   : > { %3632 = vmatmul.mubr.f32.gmra.mxu1 %v17075_v14 }
 0x5be   : > { %11801 = vmatprep.mubr.msk.f32.mxu1 %vm1325_vm0, %v17078_v20  ;;  %v20436_v20 = vld [vmem:[#allocation104_spill] sm:$0xff] }
 0x5c1   : > { %3637 = vmatmul.mubr.f32.gmra.mxu1 %v17086_v29  ;;  %v2973_v29 = vsub.f32 %v20436_v20, %v17615_v34  ;;  %v20457_v20 = vld [vmem:[#allocation73_spill] sm:$0xff] }
 0x5c2   : > { %11802 = vmatprep.mubr.msk.f32.mxu1 %vm1325_vm0, %v17089_v31 }
 0x5c5   : > { %3642 = vmatmul.mubr.f32.gmra.mxu1 %v17095_v62 }
 0x5c6   : > { %11803 = vmatprep.mubr.msk.f32.mxu1 %vm1325_vm0, %v17098_v60  ;;  %v20438_v60 = vld [vmem:[#allocation66_spill] sm:$0xff] }
 0x5c9   : > { %3647 = vmatmul.mubr.f32.gmra.mxu1 %v17104_v25  ;;  %v20439_v25 = vld [vmem:[#allocation83_spill] sm:$0xff] }
 0x5ca   : > { %11804 = vmatprep.mubr.msk.f32.mxu1 %vm1325_vm0, %v17107_v10  ;;  %v17634_v42 = vmul.f32 %v20439_v25, %v20439_v25 }
 0x5cd   : > { %3652 = vmatmul.mubr.f32.gmra.mxu1 %v17115_v52 }
 0x5ce   : > { %11805 = vmatprep.mubr.msk.f32.mxu1 %vm1325_vm0, %v17118_v50 }
 0x5d1   : > { %3657 = vmatmul.mubr.f32.gmra.mxu1 %v17124_v46 }
 0x5d2   : > { %11806 = vmatprep.mubr.msk.f32.mxu1 %vm1325_vm0, %v17127_v44  ;;  %v17559_v44 = vmul.f32 %v17073_v13, %v17073_v13 }
 0x5d5   : > { %3662 = vmatmul.mubr.f32.gmra.mxu1 %v17133_v40  ;;  %v17555_v40 = vmul.f32 %v16721_v35, %v16721_v35 }
 0x5d6   : > { %11807 = vmatprep.mubr.msk.f32.mxu1 %vm1325_vm0, %v17136_v56 }
 0x5d7   : > { %v2965_v46 = vsub.f32 %v17194_v26, %v17555_v40  ;;  %v17630_v26 = vmul.f32 %v20438_v60, %v20438_v60 }
 0x5d9   : > { %3667 = vmatmul.mubr.f32.gmra.mxu1 %v17144_v63  ;;  %v2975_v54 = vsub.f32 %v20440_v24, %v17630_v26 }
 0x5da   : > { %11808 = vmatprep.mubr.msk.f32.mxu1 %vm1325_vm0, %v17147_v36 }
 0x5dd   : > { %3672 = vmatmul.mubr.f32.gmra.mxu1 %v17153_v57  ;;  %v20427_v57 = vld [vmem:[#allocation98_spill] sm:$0xff] }
 0x5de   : > { %11809 = vmatprep.mubr.msk.f32.mxu1 %vm1325_vm0, %v17156_v55 }
 0x5e1   : > { %3677 = vmatmul.mubr.f32.gmra.mxu1 %v17162_v53 }
 0x5e2   : > { %11810 = vmatprep.mubr.msk.f32.mxu1 %vm1325_vm0, %v17165_v51  ;;  %v20426_v51 = vld [vmem:[#allocation54_spill] sm:$0xff] }
 0x5e3   : > { %v17574_v55 = vmul.f32 %v20426_v51, %v20426_v51 }
 0x5e5   : > { %3682 = vmatmul.mubr.f32.gmra.mxu1 %v17173_v47  ;;  %v17570_v47 = vmul.f32 %v16728_v37, %v16728_v37 }
 0x5e7   : > { %v2967_v10 = vsub.f32 %v20427_v57, %v17570_v47 }
 0x5ed   : > { %v13052_v36 = vpop.f32.mrf.mxu1 }
 0x5ee   : > { %v3455_v50 = vsub.f32 %v13052_v36, %v17559_v44 }
 0x5ef   : > { %v17566_v53 = vpop.f32.mrf.mxu1 }
 0x5f0   : > { %v17564_v52 = vadd.f32 %v3455_v50, %v2965_v46  ;;  %v20447_v46 = vld [vmem:[#allocation108_spill] sm:$0xff] }
 0x5f1   : > { %v2977_v50 = vsub.f32 %v20447_v46, %v17645_v38  ;;  %v1324_v38 = vld [vmem:[#allocation12 + $0x38] sm:$0xff] }
 0x5f2   : > { %13138 = vmatprep.subr.mxu1 %v1324_v38 }
 0x5f3   : > { %13139 = vmatpush3.msra.mxu1 %v1324_v38 }
 0x5f5   : > { %v13055_v56 = vpop.f32.mrf.mxu1 }
 0x5f6   : > { %v3457_v61 = vsub.f32 %v13055_v56, %v17574_v55 }
 0x5f7   : > { %v17581_v23 = vpop.f32.mrf.mxu1 }
 0x5f8   : > { %v17579_v59 = vadd.f32 %v3457_v61, %v2967_v10  ;;  %v20450_v61 = vld [vmem:[#allocation71_spill] sm:$0xff] }
 0x5fd   : > { %v13058_v22 = vpop.f32.mrf.mxu1 }
 0x5fe   : > { %v3459_v30 = vsub.f32 %v13058_v22, %v17589_v18  ;;  %v17660_v22 = vmul.f32 %v20450_v61, %v20450_v61  ;;  %v20526_v61 = vld [vmem:[#allocation155_spill] sm:$0xff] }
 0x5ff   : > { %v17596_v1 = vpop.f32.mrf.mxu1 }
 0x600   : > { %v17594_v19 = vadd.f32 %v3459_v30, %v2969_v28  ;;  %20451 = vst [vmem:[#allocation102_spill] sm:$0xff] %v17660_v22  ;;  %v17664_v28 = vmul.f32 %v20452_v21, %v20452_v21  ;;  %v17908_v21 = vld [vmem:[#allocation10 + $0xa8] sm:$0xff] }
 0x602   : > { %20453 = vst [vmem:[#allocation63_spill] sm:$0xff] %v17664_v28 }
 0x605   : > { %v13061_v6 = vpop.f32.mrf.mxu1 }
 0x606   : > { %v3461_v7 = vsub.f32 %v13061_v6, %v17604_v5  ;;  %v20454_v6 = vld [vmem:[#allocation110_spill] sm:$0xff] }
 0x607   : > { %v17611_v32 = vpop.f32.mrf.mxu1  ;;  %v2979_v8 = vsub.f32 %v20454_v6, %v17660_v22  ;;  %v20466_v6 = vld [vmem:[#allocation91_spill] sm:$0xff] }
 0x608   : > { %v17609_v16 = vadd.f32 %v3461_v7, %v2971_v9  ;;  %v20522_v22 = vld [vmem:[#allocation147_spill] sm:$0xff] }
 0x60d   : > { %v13064_v14 = vpop.f32.mrf.mxu1 }
 0x60e   : > { %v3463_v31 = vsub.f32 %v13064_v14, %v17619_v12 }
 0x60f   : > { %v17626_v62 = vpop.f32.mrf.mxu1 }
 0x610   : > { %v17624_v63 = vadd.f32 %v3463_v31, %v2973_v29  ;;  %v17675_v29 = vmul.f32 %v20457_v20, %v20457_v20  ;;  %v20459_v31 = vld [vmem:[#allocation89_spill] sm:$0xff]  ;;  %v17875_v20 = vld [vmem:[#allocation10 + $0x78] sm:$0xff] }
 0x612   : > { %20437 = vst [vmem:[#allocation54_spill] sm:$0xff] %v17624_v63  ;;  %20458 = vst [vmem:[#allocation66_spill] sm:$0xff] %v17675_v29  ;;  %v20528_v63 = vld [vmem:[#allocation159_spill] sm:$0xff] }
 0x615   : > { %v13067_v49 = vpop.f32.mrf.mxu1 }
 0x616   : > { %v3465_v39 = vsub.f32 %v13067_v49, %v17634_v42  ;;  %v17679_v49 = vmul.f32 %v20459_v31, %v20459_v31  ;;  %v20518_v31 = vld [vmem:[#allocation139_spill] sm:$0xff] }
 0x617   : > { %v17641_v27 = vpop.f32.mrf.mxu1 }
 0x618   : > { %v17639_v48 = vadd.f32 %v3465_v39, %v2975_v54  ;;  %20442 = vst [vmem:[#allocation59_spill] sm:$0xff] %v17641_v27  ;;  %20460 = vst [vmem:[#allocation83_spill] sm:$0xff] %v17679_v49  ;;  %v20461_v54 = vld [vmem:[#allocation112_spill] sm:$0xff] }
 0x619   : > { %v2981_v39 = vsub.f32 %v20461_v54, %v17675_v29  ;;  %v17919_v27 = vld [vmem:[#allocation10 + $0xb8] sm:$0xff] }
 0x61a   : > { %20441 = vst [vmem:[#allocation98_spill] sm:$0xff] %v17639_v48  ;;  %v20524_v48 = vld [vmem:[#allocation151_spill] sm:$0xff] }
 0x61d   : > { %v13070_v36 = vpop.f32.mrf.mxu1 }
 0x61e   : > { %v3467_v56 = vsub.f32 %v13070_v36, %v17649_v43  ;;  %v20530_v43 = vld [vmem:[#allocation163_spill] sm:$0xff] }
 0x61f   : > { %v17656_v10 = vpop.f32.mrf.mxu1 }
 0x620   : > { %v17654_v57 = vadd.f32 %v3467_v56, %v2977_v50  ;;  %20449 = vst [vmem:[#allocation68_spill] sm:$0xff] %v17656_v10  ;;  %v20464_v56 = vld [vmem:[#allocation75_spill] sm:$0xff] }
 0x621   : > { %v17897_v10 = vld [vmem:[#allocation10 + $0x98] sm:$0xff] }
 0x622   : > { %20448 = vst [vmem:[#allocation61_spill] sm:$0xff] %v17654_v57  ;;  %v20520_v57 = vld [vmem:[#allocation143_spill] sm:$0xff] }
 0x625   : > { %v13073_v30 = vpop.f32.mrf.mxu1 }
 0x626   : > { %v3469_v9 = vsub.f32 %v13073_v30, %v17664_v28  ;;  %v17690_v30 = vmul.f32 %v20464_v56, %v20464_v56  ;;  %v20473_v56 = vld [vmem:[#allocation93_spill] sm:$0xff] }
 0x627   : > { %v17671_v14 = vpop.f32.mrf.mxu1  ;;  %v17886_v28 = vld [vmem:[#allocation10 + $0x88] sm:$0xff] }
 0x628   : > { %v17669_v7 = vadd.f32 %v3469_v9, %v2979_v8  ;;  %20456 = vst [vmem:[#allocation104_spill] sm:$0xff] %v17671_v14  ;;  %20465 = vst [vmem:[#allocation85_spill] sm:$0xff] %v17690_v30  ;;  %v17694_v8 = vmul.f32 %v20466_v6, %v20466_v6 }
 0x62a   : > { %20455 = vst [vmem:[#allocation81_spill] sm:$0xff] %v17669_v7  ;;  %20467 = vst [vmem:[#allocation108_spill] sm:$0xff] %v17694_v8  ;;  %v20468_v7 = vld [vmem:[#allocation114_spill] sm:$0xff] }
 0x62b   : > { %v2983_v14 = vsub.f32 %v20468_v7, %v17690_v30 }
 0x62d   : > { %v13076_v24 = vpop.f32.mrf.mxu1 }
 0x62e   : > { %v3471_v36 = vsub.f32 %v13076_v24, %v17679_v49 }
 0x62f   : > { %v17686_v50 = vpop.f32.mrf.mxu1 }
 0x630   : > { %v17684_v46 = vadd.f32 %v3471_v36, %v2981_v39  ;;  %20463 = vst [vmem:[#allocation69_spill] sm:$0xff] %v17686_v50  ;;  %v20471_v39 = vld [vmem:[#allocation77_spill] sm:$0xff]  ;;  %v20475_v50 = vld [vmem:[#allocation116_spill] sm:$0xff] }
 0x631   : > { %v17705_v36 = vmul.f32 %v20471_v39, %v20471_v39  ;;  %v20480_v39 = vld [vmem:[#allocation95_spill] sm:$0xff] }
 0x632   : > { %20462 = vst [vmem:[#allocation106_spill] sm:$0xff] %v17684_v46  ;;  %v17709_v46 = vmul.f32 %v20473_v56, %v20473_v56 }
 0x633   : > { %20472 = vst [vmem:[#allocation114_spill] sm:$0xff] %v17705_v36  ;;  %v2985_v49 = vsub.f32 %v20475_v50, %v17705_v36 }
 0x634   : > { %20474 = vst [vmem:[#allocation168_spill] sm:$0xff] %v17709_v46 }
 0x635   : > { %v13079_v9 = vpop.f32.mrf.mxu1 }
 0x636   : > { %v3473_v54 = vsub.f32 %v13079_v9, %v17694_v8  ;;  %v20478_v9 = vld [vmem:[#allocation79_spill] sm:$0xff] }
 0x637   : > { %v17701_v24 = vpop.f32.mrf.mxu1 }
 0x638   : > { %v17699_v29 = vadd.f32 %v3473_v54, %v2983_v14  ;;  %20470 = vst [vmem:[#allocation112_spill] sm:$0xff] %v17701_v24  ;;  %v17720_v54 = vmul.f32 %v20478_v9, %v20478_v9  ;;  %v20482_v24 = vld [vmem:[#allocation118_spill] sm:$0xff] }
 0x63a   : > { %20469 = vst [vmem:[#allocation110_spill] sm:$0xff] %v17699_v29  ;;  %20479 = vst [vmem:[#allocation170_spill] sm:$0xff] %v17720_v54  ;;  %v17724_v29 = vmul.f32 %v20480_v39, %v20480_v39  ;;  %v2987_v8 = vsub.f32 %v20482_v24, %v17720_v54  ;;  %v20485_v39 = vld [vmem:[#allocation120_spill] sm:$0xff]  ;;  %v20486_v24 = vld [vmem:[#allocation122_spill] sm:$0xff] }
 0x63b   : > { %v20516_v54 = vld [vmem:[#allocation135_spill] sm:$0xff] }
 0x63c   : > { %20481 = vst [vmem:[#allocation171_spill] sm:$0xff] %v17724_v29 }
 0x63d   : > { %v13082_v6 = vpop.f32.mrf.mxu1 }
 0x63e   : > { %v3475_v7 = vsub.f32 %v13082_v6, %v17709_v46  ;;  %v17864_v46 = vld [vmem:[#allocation10 + $0x68] sm:$0xff] }
 0x63f   : > { %v17716_v14 = vpop.f32.mrf.mxu1 }
 0x640   : > { %v17714_v30 = vadd.f32 %v3475_v7, %v2985_v49  ;;  %20477 = vst [vmem:[#allocation169_spill] sm:$0xff] %v17716_v14 }
 0x642   : > { %20476 = vst [vmem:[#allocation116_spill] sm:$0xff] %v17714_v30 }
 0x645   : > { %v13085_v56 = vpop.f32.mrf.mxu1 }
 0x646   : > { %v3477_v50 = vsub.f32 %v13085_v56, %v17724_v29  ;;  %v17853_v29 = vld [vmem:[#allocation10 + $0x58] sm:$0xff] }
 0x647   : > { %v17729_v36 = vpop.f32.mrf.mxu1 }
 0x648   : > { %20483 = vst [vmem:[#allocation118_spill] sm:$0xff] %v17729_v36  ;;  %v17731_v49 = vadd.f32 %v3477_v50, %v2987_v8  ;;  %v20487_v8 = vld [vmem:[#allocation124_spill] sm:$0xff]  ;;  %v20514_v36 = vld [vmem:[#allocation131_spill] sm:$0xff] }
 0x649   : > { %v3568_v6 = vpop.f32.mrf.mxu1 }
 0x64a   : > { %20484 = vst [vmem:[#allocation172_spill] sm:$0xff] %v17731_v49  ;;  %13102 = vmatprep.mubr.msk.f32.mxu0 %vm1325_vm0, %v3568_v6  ;;  %v20488_v6 = vld [vmem:[#allocation126_spill] sm:$0xff] }
 0x64b   : > { %v3570_v7 = vpop.f32.mrf.mxu1 }
 0x64d   : > { %v3573_v9 = vpop.f32.mrf.mxu1 }
 0x64e   : > { %13103 = vmatmul.mubr.msk.f32.vlgmr.msra.gmra.mxu0 %vm1325_vm0, %v3573_v9  ;;  %v20490_v9 = vld [vmem:[#allocation130_spill] sm:$0xff] }
 0x64f   : > { %v3575_v30 = vpop.f32.mrf.mxu1  ;;  %4311 = vmatpush1.msra.mxu0 %v20485_v39  ;;  %v20489_v39 = vld [vmem:[#allocation128_spill] sm:$0xff] }
 0x650   : > { %4312 = vmatprep.subr.mxu0 %v20223_v0 }
 0x651   : > { %v3578_v14 = vpop.f32.mrf.mxu1  ;;  %4313 = vmatpush1.msra.mxu0 %v20486_v24  ;;  %v20491_v24 = vld [vmem:[#allocation132_spill] sm:$0xff] }
 0x652   : > { %13105 = vmatprep.mubr.msk.f32.mxu0 %vm1325_vm0, %v3578_v14  ;;  %4314 = vmatprep.subr.mxu0 %v20223_v0 }
 0x653   : > { %v3580_v56 = vpop.f32.mrf.mxu1  ;;  %4315 = vmatpush1.msra.mxu0 %v20487_v8  ;;  %v20492_v8 = vld [vmem:[#allocation134_spill] sm:$0xff] }
 0x654   : > { %4316 = vmatprep.subr.mxu0 %v20223_v0 }
 0x655   : > { %v3583_v50 = vpop.f32.mrf.mxu1  ;;  %4317 = vmatpush1.msra.mxu0 %v20488_v6  ;;  %v20493_v6 = vld [vmem:[#allocation136_spill] sm:$0xff] }
 0x656   : > { %13106 = vmatmul.mubr.msk.f32.gmra.mxu0 %vm1325_vm0, %v3583_v50  ;;  %4318 = vmatprep.subr.mxu0 %v20223_v0 }
 0x657   : > { %v3585_v30 = vpop.f32.mrf.mxu1  ;;  %4319 = vmatpush1.msra.mxu0 %v20489_v39  ;;  %v20494_v39 = vld [vmem:[#allocation138_spill] sm:$0xff] }
 0x658   : > { %4320 = vmatprep.subr.mxu0 %v20223_v0 }
 0x659   : > { %v3588_v14 = vpop.f32.mrf.mxu1  ;;  %4321 = vmatpush1.msra.mxu0 %v20490_v9  ;;  %v20495_v9 = vld [vmem:[#allocation140_spill] sm:$0xff] }
 0x65a   : > { %13108 = vmatprep.mubr.msk.f32.mxu0 %vm1325_vm0, %v3588_v14  ;;  %4322 = vmatprep.subr.mxu0 %v20223_v0 }
 0x65b   : > { %v3590_v7 = vpop.f32.mrf.mxu1  ;;  %4323 = vmatpush1.msra.mxu0 %v20491_v24  ;;  %v20496_v24 = vld [vmem:[#allocation142_spill] sm:$0xff] }
 0x65c   : > { %4324 = vmatprep.subr.mxu0 %v20223_v0 }
 0x65d   : > { %v3593_v56 = vpop.f32.mrf.mxu1  ;;  %4325 = vmatpush1.msra.mxu0 %v20492_v8  ;;  %v20497_v8 = vld [vmem:[#allocation144_spill] sm:$0xff] }
 0x65e   : > { %13109 = vmatmul.mubr.msk.f32.gmra.mxu0 %vm1325_vm0, %v3593_v56  ;;  %4326 = vmatprep.subr.mxu0 %v20223_v0 }
 0x65f   : > { %v3595_v50 = vpop.f32.mrf.mxu1  ;;  %4327 = vmatpush1.msra.mxu0 %v20493_v6  ;;  %v20498_v6 = vld [vmem:[#allocation146_spill] sm:$0xff] }
 0x660   : > { %4328 = vmatprep.subr.mxu0 %v20223_v0 }
 0x661   : > { %v3598_v30 = vpop.f32.mrf.mxu1  ;;  %4329 = vmatpush1.msra.mxu0 %v20494_v39  ;;  %v20499_v39 = vld [vmem:[#allocation148_spill] sm:$0xff] }
 0x662   : > { %13111 = vmatprep.mubr.msk.f32.mxu0 %vm1325_vm0, %v3598_v30  ;;  %4330 = vmatprep.subr.mxu0 %v20223_v0 }
 0x663   : > { %v3600_v14 = vpop.f32.mrf.mxu1  ;;  %4331 = vmatpush1.msra.mxu0 %v20495_v9  ;;  %v20500_v9 = vld [vmem:[#allocation150_spill] sm:$0xff] }
 0x664   : > { %4332 = vmatprep.subr.mxu0 %v20223_v0 }
 0x665   : > { %v3603_v7 = vpop.f32.mrf.mxu1  ;;  %4333 = vmatpush1.msra.mxu0 %v20496_v24  ;;  %v20501_v24 = vld [vmem:[#allocation152_spill] sm:$0xff] }
 0x666   : > { %13112 = vmatmul.mubr.msk.f32.gmra.mxu0 %vm1325_vm0, %v3603_v7  ;;  %4334 = vmatprep.subr.mxu0 %v20223_v0 }
 0x667   : > { %v3605_v56 = vpop.f32.mrf.mxu1  ;;  %4335 = vmatpush1.msra.mxu0 %v20497_v8  ;;  %v20502_v8 = vld [vmem:[#allocation154_spill] sm:$0xff] }
 0x668   : > { %4336 = vmatprep.subr.mxu0 %v20223_v0 }
 0x669   : > { %v3608_v50 = vpop.f32.mrf.mxu1  ;;  %4337 = vmatpush1.msra.mxu0 %v20498_v6  ;;  %v20503_v6 = vld [vmem:[#allocation156_spill] sm:$0xff] }
 0x66a   : > { %13114 = vmatprep.mubr.msk.f32.mxu0 %vm1325_vm0, %v3608_v50  ;;  %4338 = vmatprep.subr.mxu0 %v20223_v0 }
 0x66b   : > { %v3610_v30 = vpop.f32.mrf.mxu1  ;;  %4339 = vmatpush1.msra.mxu0 %v20499_v39  ;;  %v20504_v39 = vld [vmem:[#allocation158_spill] sm:$0xff] }
 0x66c   : > { %4340 = vmatprep.subr.mxu0 %v20223_v0 }
 0x66d   : > { %v3613_v14 = vpop.f32.mrf.mxu1  ;;  %4341 = vmatpush1.msra.mxu0 %v20500_v9  ;;  %v20505_v9 = vld [vmem:[#allocation160_spill] sm:$0xff] }
 0x66e   : > { %13115 = vmatmul.mubr.msk.f32.gmra.mxu0 %vm1325_vm0, %v3613_v14  ;;  %4358 = vmatprep.subr.mxu0 %v20223_v0 }
 0x66f   : > { %v3615_v7 = vpop.f32.mrf.mxu1  ;;  %4359 = vmatpush2.msra.mxu0 %v20501_v24  ;;  %v20506_v24 = vld [vmem:[#allocation162_spill] sm:$0xff] }
 0x670   : > { %4360 = vmatprep.subr.mxu0 %v20223_v0 }
 0x671   : > { %v3618_v56 = vpop.f32.mrf.mxu1  ;;  %4361 = vmatpush2.msra.mxu0 %v20502_v8  ;;  %v20507_v8 = vld [vmem:[#allocation164_spill] sm:$0xff] }
 0x672   : > { %13117 = vmatprep.mubr.msk.f32.mxu0 %vm1325_vm0, %v3618_v56  ;;  %4362 = vmatprep.subr.mxu0 %v20223_v0 }
 0x673   : > { %v3620_v50 = vpop.f32.mrf.mxu1  ;;  %4363 = vmatpush2.msra.mxu0 %v20503_v6  ;;  %v20508_v6 = vld [vmem:[#allocation166_spill] sm:$0xff] }
 0x674   : > { %4364 = vmatprep.subr.mxu0 %v20223_v0 }
 0x675   : > { %v3623_v30 = vpop.f32.mrf.mxu1  ;;  %4365 = vmatpush2.msra.mxu0 %v20504_v39 }
 0x676   : > { %13118 = vmatmul.mubr.msk.f32.gmra.mxu0 %vm1325_vm0, %v3623_v30  ;;  %4366 = vmatprep.subr.mxu0 %v20223_v0 }
 0x677   : > { %v3625_v14 = vpop.f32.mrf.mxu1  ;;  %4367 = vmatpush2.msra.mxu0 %v20505_v9 }
 0x678   : > { %4368 = vmatprep.subr.mxu0 %v20223_v0 }
 0x679   : > { %v3628_v7 = vpop.f32.mrf.mxu1  ;;  %4369 = vmatpush2.msra.mxu0 %v20506_v24 }
 0x67a   : > { %13120 = vmatprep.mubr.msk.f32.mxu0 %vm1325_vm0, %v3628_v7  ;;  %4370 = vmatprep.subr.mxu0 %v20223_v0 }
 0x67b   : > { %v3630_v56 = vpop.f32.mrf.mxu1  ;;  %4371 = vmatpush2.msra.mxu0 %v20507_v8 }
 0x67c   : > { %4372 = vmatprep.subr.mxu0 %v20223_v0 }
 0x67d   : > { %v3633_v50 = vpop.f32.mrf.mxu1  ;;  %4373 = vmatpush2.msra.mxu0 %v20508_v6 }
 0x67e   : > { %13121 = vmatmul.mubr.msk.f32.gmra.mxu0 %vm1325_vm0, %v3633_v50  ;;  %4608 = vmatprep.subr.mxu0 %v20223_v0 }
 0x67f   : > { %v3635_v30 = vpop.f32.mrf.mxu1 }
 0x681   : > { %v3638_v39 = vpop.f32.mrf.mxu1 }
 0x682   : > { %13123 = vmatprep.mubr.msk.f32.mxu0 %vm1325_vm0, %v3638_v39 }
 0x683   : > { %v3640_v14 = vpop.f32.mrf.mxu1 }
 0x685   : > { %v3643_v9 = vpop.f32.mrf.mxu1 }
 0x686   : > { %13124 = vmatmul.mubr.msk.f32.gmra.mxu0 %vm1325_vm0, %v3643_v9 }
 0x687   : > { %v3645_v7 = vpop.f32.mrf.mxu1 }
 0x689   : > { %v3648_v24 = vpop.f32.mrf.mxu1 }
 0x68a   : > { %13126 = vmatprep.mubr.msk.f32.mxu0 %vm1325_vm0, %v3648_v24 }
 0x68b   : > { %v3650_v56 = vpop.f32.mrf.mxu1 }
 0x68d   : > { %v3653_v8 = vpop.f32.mrf.mxu1 }
 0x68e   : > { %13127 = vmatmul.mubr.msk.f32.gmra.mxu0 %vm1325_vm0, %v3653_v8 }
 0x68f   : > { %v3655_v6 = vpop.f32.mrf.mxu1 }
 0x690   : > { %v17804_v6 = vld [vmem:[#allocation10 + $0x8] sm:$0xff] }
 0x691   : > { %v3658_v50 = vpop.f32.mrf.mxu1 }
 0x692   : > { %13129 = vmatprep.mubr.msk.f32.mxu0 %vm1325_vm0, %v3658_v50 }
 0x693   : > { %v3660_v30 = vpop.f32.mrf.mxu1 }
 0x695   : > { %v3663_v49 = vpop.f32.mrf.mxu1 }
 0x696   : > { %13130 = vmatmul.mubr.msk.f32.gmra.mxu0 %vm1325_vm0, %v3663_v49  ;;  %v17809_v49 = vld [vmem:[#allocation10] sm:$0xff] }
 0x697   : > { %v3665_v39 = vpop.f32.mrf.mxu1 }
 0x698   : > { %v17811_v39 = vld [vmem:[#allocation10 + $0x18] sm:$0xff] }
 0x699   : > { %v3668_v14 = vpop.f32.mrf.mxu1 }
 0x69a   : > { %13132 = vmatprep.mubr.msk.f32.mxu0 %vm1325_vm0, %v3668_v14  ;;  %v20509_v14 = vld [vmem:[#allocation121_spill] sm:$0xff] }
 0x69b   : > { %v3670_v9 = vpop.f32.mrf.mxu1 }
 0x69c   : > { %v17817_v9 = vld [vmem:[#allocation10 + $0x10] sm:$0xff] }
 0x69d   : > { %v3673_v7 = vpop.f32.mrf.mxu1 }
 0x69e   : > { %13133 = vmatmul.mubr.msk.f32.gmra.mxu0 %vm1325_vm0, %v3673_v7  ;;  %v17820_v7 = vld [vmem:[#allocation10 + $0x28] sm:$0xff] }
 0x69f   : > { %v3675_v24 = vpop.f32.mrf.mxu1 }
 0x6a0   : > { %v20510_v24 = vld [vmem:[#allocation123_spill] sm:$0xff] }
 0x6a1   : > { %v3678_v56 = vpop.f32.mrf.mxu1 }
 0x6a2   : > { %13135 = vmatprep.mubr.msk.f32.mxu0 %vm1325_vm0, %v3678_v56  ;;  %v20511_v56 = vld [vmem:[#allocation125_spill] sm:$0xff] }
 0x6a3   : > { %v3680_v8 = vpop.f32.mrf.mxu1 }
 0x6a4   : > { %v17828_v8 = vld [vmem:[#allocation10 + $0x20] sm:$0xff] }
 0x6a5   : > { %v3683_v50 = vpop.f32.mrf.mxu1 }
 0x6a6   : > { %13136 = vmatmul.mubr.msk.f32.gmra.mxu0 %vm1325_vm0, %v3683_v50  ;;  %v17831_v50 = vld [vmem:[#allocation10 + $0x38] sm:$0xff] }
 0x6a7   : > { %v3685_v30 = vpop.f32.mrf.mxu1  ;;  %11835 = vmatprep.mubr.msk.f32.mxu0 %vm1325_vm0, %v17804_v6 }
 0x6a8   : > { %v20512_v30 = vld [vmem:[#allocation127_spill] sm:$0xff] }
 0x6aa   : > { %4375 = vmatmul.mubr.f32.vlgmr.msra.gmra.mxu0 %v17809_v49 }
 0x6ab   : > { %4609 = vmatpush1.msra.mxu0 %v20509_v14  ;;  %11836 = vmatprep.mubr.msk.f32.mxu0 %vm1325_vm0, %v17811_v39  ;;  %v20513_v14 = vld [vmem:[#allocation129_spill] sm:$0xff] }
 0x6ac   : > { %4610 = vmatprep.subr.mxu0 %v20223_v0 }
 0x6ad   : > { %4611 = vmatpush1.msra.mxu0 %v20510_v24  ;;  %v17839_v24 = vld [vmem:[#allocation10 + $0x30] sm:$0xff] }
 0x6ae   : > { %4380 = vmatmul.mubr.f32.gmra.mxu0 %v17817_v9  ;;  %4612 = vmatprep.subr.mxu0 %v20223_v0 }
 0x6af   : > { %4613 = vmatpush1.msra.mxu0 %v20511_v56  ;;  %11837 = vmatprep.mubr.msk.f32.mxu0 %vm1325_vm0, %v17820_v7  ;;  %v17842_v56 = vld [vmem:[#allocation10 + $0x48] sm:$0xff] }
 0x6b0   : > { %4614 = vmatprep.subr.mxu0 %v20223_v0 }
 0x6b1   : > { %4615 = vmatpush1.msra.mxu0 %v20512_v30  ;;  %v20515_v30 = vld [vmem:[#allocation133_spill] sm:$0xff] }
 0x6b2   : > { %4385 = vmatmul.mubr.f32.gmra.mxu0 %v17828_v8  ;;  %4616 = vmatprep.subr.mxu0 %v20223_v0 }
 0x6b3   : > { %4617 = vmatpush1.msra.mxu0 %v20513_v14  ;;  %11838 = vmatprep.mubr.msk.f32.mxu0 %vm1325_vm0, %v17831_v50  ;;  %v17850_v14 = vld [vmem:[#allocation10 + $0x40] sm:$0xff] }
 0x6b4   : > { %4618 = vmatprep.subr.mxu0 %v20223_v0 }
 0x6b5   : > { %4619 = vmatpush1.msra.mxu0 %v20514_v36  ;;  %v20517_v36 = vld [vmem:[#allocation137_spill] sm:$0xff] }
 0x6b6   : > { %4390 = vmatmul.mubr.f32.gmra.mxu0 %v17839_v24  ;;  %4620 = vmatprep.subr.mxu0 %v20223_v0 }
 0x6b7   : > { %4621 = vmatpush1.msra.mxu0 %v20515_v30  ;;  %11839 = vmatprep.mubr.msk.f32.mxu0 %vm1325_vm0, %v17842_v56  ;;  %v17861_v30 = vld [vmem:[#allocation10 + $0x50] sm:$0xff] }
 0x6b8   : > { %4622 = vmatprep.subr.mxu0 %v20223_v0 }
 0x6b9   : > { %4623 = vmatpush1.msra.mxu0 %v20516_v54  ;;  %v20519_v54 = vld [vmem:[#allocation141_spill] sm:$0xff] }
 0x6ba   : > { %4395 = vmatmul.mubr.f32.gmra.mxu0 %v17850_v14  ;;  %4624 = vmatprep.subr.mxu0 %v20223_v0 }
 0x6bb   : > { %4625 = vmatpush1.msra.mxu0 %v20517_v36  ;;  %11840 = vmatprep.mubr.msk.f32.mxu0 %vm1325_vm0, %v17853_v29  ;;  %v17872_v36 = vld [vmem:[#allocation10 + $0x60] sm:$0xff] }
 0x6bc   : > { %4626 = vmatprep.subr.mxu0 %v20223_v0 }
 0x6bd   : > { %4627 = vmatpush1.msra.mxu0 %v20518_v31  ;;  %v20521_v31 = vld [vmem:[#allocation145_spill] sm:$0xff] }
 0x6be   : > { %4400 = vmatmul.mubr.f32.gmra.mxu0 %v17861_v30  ;;  %4628 = vmatprep.subr.mxu0 %v20223_v0 }
 0x6bf   : > { %4629 = vmatpush1.msra.mxu0 %v20519_v54  ;;  %11841 = vmatprep.mubr.msk.f32.mxu0 %vm1325_vm0, %v17864_v46  ;;  %v17883_v54 = vld [vmem:[#allocation10 + $0x70] sm:$0xff] }
 0x6c0   : > { %4630 = vmatprep.subr.mxu0 %v20223_v0 }
 0x6c1   : > { %4631 = vmatpush1.msra.mxu0 %v20520_v57  ;;  %v20523_v57 = vld [vmem:[#allocation149_spill] sm:$0xff] }
 0x6c2   : > { %4405 = vmatmul.mubr.f32.gmra.mxu0 %v17872_v36  ;;  %4632 = vmatprep.subr.mxu0 %v20223_v0 }
 0x6c3   : > { %4633 = vmatpush1.msra.mxu0 %v20521_v31  ;;  %11842 = vmatprep.mubr.msk.f32.mxu0 %vm1325_vm0, %v17875_v20  ;;  %v17894_v31 = vld [vmem:[#allocation10 + $0x80] sm:$0xff] }
 0x6c4   : > { %4634 = vmatprep.subr.mxu0 %v20223_v0 }
 0x6c5   : > { %4635 = vmatpush1.msra.mxu0 %v20522_v22  ;;  %v20525_v22 = vld [vmem:[#allocation153_spill] sm:$0xff] }
 0x6c6   : > { %4410 = vmatmul.mubr.f32.gmra.mxu0 %v17883_v54  ;;  %4636 = vmatprep.subr.mxu0 %v20223_v0 }
 0x6c7   : > { %4637 = vmatpush1.msra.mxu0 %v20523_v57  ;;  %11843 = vmatprep.mubr.msk.f32.mxu0 %vm1325_vm0, %v17886_v28  ;;  %v17905_v57 = vld [vmem:[#allocation10 + $0x90] sm:$0xff] }
 0x6c8   : > { %4638 = vmatprep.subr.mxu0 %v20223_v0 }
 0x6c9   : > { %4639 = vmatpush1.msra.mxu0 %v20524_v48  ;;  %v20527_v48 = vld [vmem:[#allocation157_spill] sm:$0xff] }
 0x6ca   : > { %4415 = vmatmul.mubr.f32.gmra.mxu0 %v17894_v31  ;;  %4656 = vmatprep.subr.mxu0 %v20223_v0 }
 0x6cb   : > { %4657 = vmatpush2.msra.mxu0 %v20525_v22  ;;  %11844 = vmatprep.mubr.msk.f32.mxu0 %vm1325_vm0, %v17897_v10  ;;  %v17916_v22 = vld [vmem:[#allocation10 + $0xa0] sm:$0xff] }
 0x6cc   : > { %4658 = vmatprep.subr.mxu0 %v20223_v0 }
 0x6cd   : > { %4659 = vmatpush2.msra.mxu0 %v20526_v61  ;;  %v20529_v61 = vld [vmem:[#allocation161_spill] sm:$0xff] }
 0x6ce   : > { %4420 = vmatmul.mubr.f32.gmra.mxu0 %v17905_v57  ;;  %4660 = vmatprep.subr.mxu0 %v20223_v0 }
 0x6cf   : > { %4661 = vmatpush2.msra.mxu0 %v20527_v48  ;;  %11845 = vmatprep.mubr.msk.f32.mxu0 %vm1325_vm0, %v17908_v21  ;;  %v17927_v48 = vld [vmem:[#allocation10 + $0xb0] sm:$0xff] }
 0x6d0   : > { %4662 = vmatprep.subr.mxu0 %v20223_v0 }
 0x6d1   : > { %4663 = vmatpush2.msra.mxu0 %v20528_v63  ;;  %v20531_v63 = vld [vmem:[#allocation165_spill] sm:$0xff] }
 0x6d2   : > { %4425 = vmatmul.mubr.f32.gmra.mxu0 %v17916_v22  ;;  %4664 = vmatprep.subr.mxu0 %v20223_v0 }
 0x6d3   : > { %4665 = vmatpush2.msra.mxu0 %v20529_v61  ;;  %11846 = vmatprep.mubr.msk.f32.mxu0 %vm1325_vm0, %v17919_v27  ;;  %v20532_v61 = vld [vmem:[#allocation167_spill] sm:$0xff] }
 0x6d4   : > { %4666 = vmatprep.subr.mxu0 %v20223_v0 }
 0x6d5   : > { %4667 = vmatpush2.msra.mxu0 %v20530_v43  ;;  %v1323_v43 = vld [vmem:[#allocation12 + $0x30] sm:$0xff] }
 0x6d6   : > { %4430 = vmatmul.mubr.f32.gmra.mxu0 %v17927_v48  ;;  %4668 = vmatprep.subr.mxu0 %v20223_v0 }
 0x6d7   : > { %4669 = vmatpush2.msra.mxu0 %v20531_v63  ;;  %11859 = vmatprep.mubr.msk.f32.mxu0 %vm1325_vm0, %v17804_v6  ;;  %v1322_v6 = vld [vmem:[#allocation12 + $0x28] sm:$0xff]  ;;  %v20535_v63 = vld [vmem:[#allocation55_spill] sm:$0xff] }
 0x6d8   : > { %4670 = vmatprep.subr.mxu0 %v20223_v0  ;;  %13140 = vmatprep.subr.mxu1 %v1323_v43 }
 0x6d9   : > { %4671 = vmatpush2.msra.mxu0 %v20532_v61  ;;  %13141 = vmatpush3.msra.mxu1 %v1323_v43  ;;  %v20536_v61 = vld [vmem:[#allocation58_spill] sm:$0xff] }
 0x6da   : > { %4673 = vmatmul.mubr.f32.vlgmr.msra.gmra.mxu0 %v17809_v49  ;;  %13142 = vmatprep.subr.mxu1 %v1322_v6  ;;  %v1321_v49 = vld [vmem:[#allocation12 + $0x20] sm:$0xff]  ;;  %v17971_v43 = vmul.f32 %v20536_v61, %v20536_v61 }
 0x6db   : > { %11860 = vmatprep.mubr.msk.f32.mxu0 %vm1325_vm0, %v17811_v39  ;;  %13143 = vmatpush3.msra.mxu1 %v1322_v6  ;;  %v1320_v39 = vld [vmem:[#allocation12 + $0x18] sm:$0xff]  ;;  %v20537_v6 = vld [vmem:[#allocation65_spill] sm:$0xff] }
 0x6dc   : > { %13144 = vmatprep.subr.mxu1 %v1321_v49 }
 0x6dd   : > { %13145 = vmatpush3.msra.mxu1 %v1321_v49  ;;  %v17982_v49 = vmul.f32 %v20537_v6, %v20537_v6 }
 0x6de   : > { %4678 = vmatmul.mubr.f32.gmra.mxu0 %v17817_v9  ;;  %13146 = vmatprep.subr.mxu1 %v1320_v39  ;;  %v1319_v9 = vld [vmem:[#allocation12 + $0x10] sm:$0xff] }
 0x6df   : > { %11861 = vmatprep.mubr.msk.f32.mxu0 %vm1325_vm0, %v17820_v7  ;;  %13147 = vmatpush3.msra.mxu1 %v1320_v39  ;;  %v1318_v7 = vld [vmem:[#allocation12 + $0x8] sm:$0xff] }
 0x6e0   : > { %13148 = vmatprep.subr.mxu1 %v1319_v9 }
 0x6e1   : > { %13149 = vmatpush3.msra.mxu1 %v1319_v9 }
 0x6e2   : > { %4683 = vmatmul.mubr.f32.gmra.mxu0 %v17828_v8  ;;  %13150 = vmatprep.subr.mxu1 %v1318_v7  ;;  %v1317_v8 = vld [vmem:[#allocation12] sm:$0xff] }
 0x6e3   : > { %11862 = vmatprep.mubr.msk.f32.mxu0 %vm1325_vm0, %v17831_v50  ;;  %13151 = vmatpush3.msra.mxu1 %v1318_v7  ;;  %v20533_v50 = vld [vmem:[#allocation53_spill] sm:$0xff] }
 0x6e4   : > { %13152 = vmatprep.subr.mxu1 %v1317_v8 }
 0x6e5   : > { %13153 = vmatpush3.msra.mxu1 %v1317_v8  ;;  %v20541_v8 = vld [vmem:[#allocation97_spill] sm:$0xff] }
 0x6e6   : > { %4688 = vmatmul.mubr.f32.gmra.mxu0 %v17839_v24  ;;  %v2306_v24 = vmul.f32 %v20533_v50, %v20533_v50  ;;  %13172 = vmatprep.subr.mxu1 %v1324_v38  ;;  %v2405_v38 = vadd.f32 %v17574_v55, %v17570_v47  ;;  %v2407_v47 = vadd.f32 %v17589_v18, %v17585_v58  ;;  %v20538_v55 = vld [vmem:[#allocation60_spill] sm:$0xff] }
 0x6e7   : > { %11863 = vmatprep.mubr.msk.f32.mxu0 %vm1325_vm0, %v17842_v56  ;;  %v20534_v56 = vld [vmem:[#allocation57_spill] sm:$0xff]  ;;  %v20540_v18 = vld [vmem:[#allocation64_spill] sm:$0xff] }
 0x6e8   : > { %v3454_v39 = vsub.f32 %v17566_v53, %v2306_v24  ;;  %v2431_v7 = vadd.f32 0.0001, %v2407_v47  ;;  %v20542_v53 = vld [vmem:[#allocation67_spill] sm:$0xff] }
 0x6ea   : > { %4693 = vmatmul.mubr.f32.gmra.mxu0 %v17850_v14  ;;  %v2282_v14 = vmul.f32 %v20534_v56, %v20534_v56 }
 0x6eb   : > { %11864 = vmatprep.mubr.msk.f32.mxu0 %vm1325_vm0, %v17853_v29  ;;  %v2403_v29 = vadd.f32 %v17559_v44, %v17555_v40 }
 0x6ee   : > { %4698 = vmatmul.mubr.f32.gmra.mxu0 %v17861_v30  ;;  %v2402_v30 = vadd.f32 %v2306_v24, %v2282_v14  ;;  %v18010_v24 = vmul.f32 %v20542_v53, %v20542_v53 }
 0x6ef   : > { %11865 = vmatprep.mubr.msk.f32.mxu0 %vm1325_vm0, %v17864_v46  ;;  %v17967_v46 = vmul.f32 %v20535_v63, %v20535_v63 }
 0x6f0   : > { %v2426_v40 = vadd.f32 0.0001, %v2402_v30  ;;  %v18018_v30 = vmul.f32 %v20533_v50, %v20534_v56  ;;  %v18038_v50 = vmul.f32 %v20426_v51, %v16728_v37  ;;  %v18042_v56 = vmul.f32 %v20535_v63, %v20536_v61  ;;  %v20548_v37 = vld [vmem:[#allocation78_spill] sm:$0xff] }
 0x6f1   : > { %v2404_v44 = vadd.f32 %v17967_v46, %v17971_v43  ;;  %v18056_v51 = vmul.f32 %v20548_v37, %v20548_v37  ;;  %v18062_v61 = vmul.f32 %v20429_v15, %v20428_v17  ;;  %v18081_v15 = vmul.f32 %v20432_v4, %v20431_v2 }
 0x6f2   : > { %4703 = vmatmul.mubr.f32.gmra.mxu0 %v17872_v36  ;;  %v2427_v36 = vadd.f32 0.0001, %v2403_v29  ;;  %v2964_v29 = vsub.f32 %v20541_v8, %v2282_v14  ;;  %v20544_v14 = vld [vmem:[#allocation72_spill] sm:$0xff]  ;;  %v2357_v0 = vmul.f32 2.0, %v18038_v50  ;;  %v2356_v17 = vmul.f32 2.0, %v18042_v56 }
 0x6f3   : > { %11866 = vmatprep.mubr.msk.f32.mxu0 %vm1325_vm0, %v17875_v20  ;;  %v2429_v20 = vadd.f32 0.0001, %v2405_v38  ;;  %v20543_v38 = vld [vmem:[#allocation70_spill] sm:$0xff]  ;;  %v2359_v37 = vmul.f32 2.0, %v18062_v61 }
 0x6f4   : > { %14486 = vrcp.f32 %v2427_v36  ;;  %v18022_v36 = vmul.f32 %v20543_v38, %v20543_v38  ;;  %v2381_v4 = vadd.f32 0.0001, %v2357_v0 }
 0x6f5   : > { %14488 = vrcp.f32 %v2426_v40  ;;  %v20545_v40 = vld [vmem:[#allocation80_spill] sm:$0xff] }
 0x6f6   : > { %4708 = vmatmul.mubr.f32.gmra.mxu0 %v17883_v54  ;;  %v2428_v54 = vadd.f32 0.0001, %v2404_v44  ;;  %14490 = vrcp.f32 %v2429_v20  ;;  %v18030_v44 = vmul.f32 %v20545_v40, %v20545_v40  ;;  %v4016_v20 = vadd.f32 %v3454_v39, %v2964_v29 }
 0x6f7   : > { %11867 = vmatprep.mubr.msk.f32.mxu0 %vm1325_vm0, %v17886_v28  ;;  %v17991_v28 = vmul.f32 %v20538_v55, %v20538_v55  ;;  %v2409_v39 = vadd.f32 %v17604_v5, %v17600_v3  ;;  %v4041_v29 = vadd.f32 0.0009, %v17564_v52  ;;  %v18066_v3 = vmul.f32 %v20537_v6, %v20538_v55  ;;  %v20551_v55 = vld [vmem:[#allocation99_spill] sm:$0xff] }
 0x6f8   : > { %14492 = vrcp.f32 %v2428_v54  ;;  %v20547_v54 = vld [vmem:[#allocation76_spill] sm:$0xff]  ;;  %v4040_v5 = vadd.f32 0.0009, %v4016_v20  ;;  %v2966_v20 = vsub.f32 %v20551_v55, %v17971_v43  ;;  %v18093_v43 = vmul.f32 %v20435_v11, %v20434_v33 }
 0x6f9   : > { %v2406_v9 = vadd.f32 %v17982_v49, %v17991_v28  ;;  %v18047_v8 = vmul.f32 %v20547_v54, %v20547_v54  ;;  %14494 = vrcp.f32 %v2431_v7  ;;  %v2433_v6 = vadd.f32 0.0001, %v2409_v39 }
 0x6fa   : > { %4713 = vmatmul.mubr.f32.gmra.mxu0 %v17894_v31  ;;  %v20539_v31 = vld [vmem:[#allocation62_spill] sm:$0xff]  ;;  %v2380_v39 = vadd.f32 0.0001, %v2356_v17 }
 0x6fb   : > { %11868 = vmatprep.mubr.msk.f32.mxu0 %vm1325_vm0, %v17897_v10  ;;  %v17999_v58 = vmul.f32 %v20539_v31, %v20539_v31  ;;  %v18003_v10 = vmul.f32 %v20540_v18, %v20540_v18  ;;  %v2430_v47 = vadd.f32 0.0001, %v2406_v9  ;;  %v20549_v9 = vld [vmem:[#allocation52_spill] sm:$0xff] }
 0x6fc   : > { %v18074_v7 = vmul.f32 %v20549_v9, %v20549_v9 }
 0x6fd   : > { %v2408_v52 = vadd.f32 %v18030_v44, %v17999_v58  ;;  %14496 = vrcp.f32 %v2430_v47 }
 0x6fe   : > { %4718 = vmatmul.mubr.f32.gmra.mxu0 %v17905_v57  ;;  %v18014_v57 = vmul.f32 %v17073_v13, %v16721_v35  ;;  %v20546_v35 = vld [vmem:[#allocation74_spill] sm:$0xff]  ;;  %20550 = vst [vmem:[#allocation120_spill] sm:$0xff] %v18074_v7  ;;  %14498 = vrcp.f32 %v4041_v29  ;;  %v18088_v7 = vmul.f32 %v20545_v40, %v20539_v31  ;;  %v2411_v29 = vadd.f32 %v17619_v12, %v17615_v34 }
 0x6ff   : > { %11869 = vmatprep.mubr.msk.f32.mxu0 %vm1325_vm0, %v17908_v21  ;;  %v18026_v21 = vmul.f32 %v20544_v14, %v20544_v14  ;;  %v18034_v13 = vmul.f32 %v20546_v35, %v20546_v35  ;;  %v2432_v54 = vadd.f32 0.0001, %v2408_v52  ;;  %14500 = vrcp.f32 %v4040_v5 }
 0x700   : > { %v2355_v63 = vmul.f32 2.0, %v18014_v57  ;;  %v2361_v31 = vmul.f32 2.0, %v18081_v15  ;;  %14502 = vrcp.f32 %v2433_v6  ;;  %v4043_v40 = vadd.f32 0.0009, %v17579_v59 }
 0x701   : > { %v2383_v5 = vadd.f32 0.0001, %v2359_v37  ;;  %v2360_v0 = vmul.f32 2.0, %v18088_v7  ;;  %14504 = vrcp.f32 %v2432_v54  ;;  %v3458_v12 = vsub.f32 %v17596_v1, %v17982_v49 }
 0x702   : > { %4723 = vmatmul.mubr.f32.gmra.mxu0 %v17916_v22  ;;  %v2354_v22 = vmul.f32 2.0, %v18018_v30  ;;  %v2363_v59 = vmul.f32 2.0, %v18093_v43  ;;  %14506 = vrcp.f32 %v4043_v40 }
 0x703   : > { %11870 = vmatprep.mubr.msk.f32.mxu0 %vm1325_vm0, %v17919_v27  ;;  %v3456_v27 = vsub.f32 %v17581_v23, %v17967_v46  ;;  %v14487_v23 = vpop.eup %14486  ;;  %v2379_v46 = vadd.f32 0.0001, %v2355_v63  ;;  %v18122_v1 = vadd.f32 0.0001, %v2360_v0 }
 0x704   : > { %v2378_v9 = vadd.f32 0.0001, %v2354_v22  ;;  %v14489_v47 = vpop.eup %14488 }
 0x705   : > { %v4018_v2 = vadd.f32 %v3456_v27, %v2966_v20  ;;  %v14491_v63 = vpop.eup %14490  ;;  %v18097_v22 = vmul.f32 %v14487_v23, %v2379_v46  ;;  %v20552_v27 = vld [vmem:[#allocation82_spill] sm:$0xff]  ;;  %v2385_v20 = vadd.f32 0.0001, %v2361_v31  ;;  %v18130_v31 = vadd.f32 0.0001, %v2363_v59 }
 0x706   : > { %4728 = vmatmul.mubr.f32.gmra.mxu0 %v17927_v48  ;;  %v2358_v48 = vmul.f32 2.0, %v18066_v3  ;;  %v18101_v52 = vmul.f32 %v14489_v47, %v2378_v9  ;;  %v18106_v33 = vmul.f32 %v20552_v27, %v20540_v18  ;;  %v14493_v11 = vpop.eup %14492  ;;  %v18110_v55 = vmul.f32 %v14491_v63, %v2381_v4  ;;  %v20553_v18 = vld [vmem:[#allocation101_spill] sm:$0xff] }
 0x707   : > { %v4042_v34 = vadd.f32 0.0009, %v4018_v2  ;;  %v2435_v9 = vadd.f32 0.0001, %v2411_v29  ;;  %v18115_v37 = vmul.f32 %v20552_v27, %v20552_v27  ;;  %v2968_v23 = vsub.f32 %v20553_v18, %v17991_v28  ;;  %v14495_v46 = vpop.eup %14494 }
 0x708   : > { %v2382_v17 = vadd.f32 0.0001, %v2358_v48  ;;  %v18120_v47 = vmul.f32 %v14493_v11, %v2380_v39  ;;  %v2362_v49 = vmul.f32 2.0, %v18106_v33  ;;  %v20554_v48 = vld [vmem:[#allocation84_spill] sm:$0xff]  ;;  %v18136_v39 = vmul.f32 %v20439_v25, %v20438_v60  ;;  %v1270_v25 = vld [vmem:[#allocation9 + $0x8] sm:$0xff] }
 0x709   : > { %v18127_v2 = vmul.f32 %v20554_v48, %v20554_v48  ;;  %14508 = vrcp.f32 %v4042_v34  ;;  %v4020_v29 = vadd.f32 %v3458_v12, %v2968_v23  ;;  %v18138_v0 = vmul.f32 %v14495_v46, %v2383_v5 }
 0x70a   : > { %14510 = vrcp.f32 %v2435_v9  ;;  %v14497_v40 = vpop.eup %14496  ;;  %v4045_v27 = vadd.f32 0.0009, %v17594_v19  ;;  %v18145_v59 = vmul.f32 %v20554_v48, %v20542_v53  ;;  %v3460_v60 = vsub.f32 %v17611_v32, %v18030_v44  ;;  %v20555_v53 = vld [vmem:[#allocation103_spill] sm:$0xff] }
 0x70b   : > { %v14499_v12 = vpop.eup %14498  ;;  %v2412_v9 = vadd.f32 %v18127_v2, %v18010_v24  ;;  %v18151_v5 = vadd.f32 0.0001, %v2362_v49  ;;  %v4044_v19 = vadd.f32 0.0009, %v4020_v29  ;;  %v2970_v46 = vsub.f32 %v20555_v53, %v17999_v58  ;;  %v20557_v53 = vld [vmem:[#allocation100_spill] sm:$0xff] }
 0x70c   : > { %v14501_v23 = vpop.eup %14500  ;;  %14512 = vrcp.f32 %v4045_v27 }
 0x70d   : > { %v14503_v49 = vpop.eup %14502  ;;  %14514 = vrcp.f32 %v4044_v19 }
 0x70e   : > { %v13104_v6 = vpop.f32.mrf.mxu0 }
 0x70f   : > { %v3945_v54 = vsub.f32 %v13104_v6, %v18014_v57  ;;  %v2410_v57 = vadd.f32 %v18115_v37, %v18003_v10 }
 0x710   : > { %v3825_v4 = vpop.f32.mrf.mxu0 }
 0x711   : > { %v3969_v63 = vmul.f32 2.0, %v3945_v54  ;;  %v3944_v28 = vsub.f32 %v3825_v4, %v18018_v30  ;;  %v2413_v30 = vadd.f32 %v17634_v42, %v17630_v26  ;;  %v18153_v54 = vmul.f32 %v14497_v40, %v2382_v17 }
 0x712   : > { %v2434_v26 = vadd.f32 0.0001, %v2410_v57  ;;  %v2365_v42 = vmul.f32 2.0, %v18136_v39  ;;  %v4022_v17 = vadd.f32 %v3460_v60, %v2970_v46 }
 0x713   : > { %v3993_v11 = vadd.f32 0.0009, %v3969_v63  ;;  %v3968_v34 = vmul.f32 2.0, %v3944_v28  ;;  %v1269_v63 = vld [vmem:[#allocation9] sm:$0xff]  ;;  %v2437_v29 = vadd.f32 0.0001, %v2413_v30 }
 0x714   : > { %v2364_v28 = vmul.f32 2.0, %v18145_v59  ;;  %14516 = vrcp.f32 %v2434_v26  ;;  %v18162_v27 = vadd.f32 0.0001, %v2365_v42 }
 0x715   : > { %v4067_v6 = vmul.f32 %v14499_v12, %v3993_v11  ;;  %v3992_v18 = vadd.f32 0.0009, %v3968_v34  ;;  %v2436_v11 = vadd.f32 0.0001, %v2412_v9  ;;  %v14505_v12 = vpop.eup %14504  ;;  %14518 = vrcp.f32 %v2437_v29 }
 0x716   : > { %v13107_v48 = vpop.f32.mrf.mxu0  ;;  %v14507_v19 = vpop.eup %14506 }
 0x717   : > { %v4113_v4 = vmul.f32 %v4067_v6, %v1270_v25  ;;  %v4065_v32 = vmul.f32 %v14501_v23, %v3992_v18  ;;  %v3947_v44 = vsub.f32 %v13107_v48, %v18038_v50  ;;  %v18166_v50 = vmul.f32 %v20445_v45, %v20443_v41  ;;  %v1272_v23 = vld [vmem:[#allocation9 + $0x18] sm:$0xff]  ;;  %v20558_v48 = vld [vmem:[#allocation105_spill] sm:$0xff] }
 0x718   : > { %v3835_v40 = vpop.f32.mrf.mxu0  ;;  %v4047_v25 = vadd.f32 0.0009, %v17609_v16  ;;  %v18169_v6 = vmul.f32 %v14503_v49, %v2385_v20  ;;  %v3462_v18 = vsub.f32 %v17626_v62, %v18115_v37  ;;  %14520 = vrcp.f32 %v2436_v11  ;;  %v14509_v16 = vpop.eup %14508  ;;  %v20556_v20 = vld [vmem:[#allocation56_spill] sm:$0xff] }
 0x719   : > { %v4137_v57 = vmul.f32 %v4113_v4, %v18097_v22  ;;  %v3971_v34 = vmul.f32 2.0, %v3947_v44  ;;  %v3946_v58 = vsub.f32 %v3835_v40, %v18042_v56  ;;  %v4112_v30 = vmul.f32 %v4065_v32, %v1269_v63  ;;  %v1271_v44 = vld [vmem:[#allocation9 + $0x10] sm:$0xff]  ;;  %v14511_v37 = vpop.eup %14510 }
 0x71a   : > { %v18171_v22 = vadd.f32 0.0001, %v2364_v28  ;;  %v4046_v56 = vadd.f32 0.0009, %v4022_v17  ;;  %v18176_v45 = vmul.f32 %v14505_v12, %v18122_v1  ;;  %v2367_v42 = vmul.f32 2.0, %v18166_v50  ;;  %v20559_v28 = vld [vmem:[#allocation86_spill] sm:$0xff] }
 0x71b   : > { %v3995_v9 = vadd.f32 0.0009, %v3971_v34  ;;  %v3970_v60 = vmul.f32 2.0, %v3946_v58  ;;  %v2415_v46 = vadd.f32 %v20557_v53, %v20556_v20  ;;  %v2972_v63 = vsub.f32 %v20558_v48, %v18003_v10 }
 0x71c   : > { %v4136_v32 = vmul.f32 %v4112_v30, %v18101_v52  ;;  %14522 = vrcp.f32 %v4047_v25  ;;  %v18187_v11 = vmul.f32 %v20559_v28, %v20559_v28  ;;  %v4177_v40 = vadd.f32 %v4113_v4, %v4112_v30 }
 0x71d   : > { %v4071_v26 = vmul.f32 %v14507_v19, %v3995_v9  ;;  %v3994_v41 = vadd.f32 0.0009, %v3970_v60  ;;  %14524 = vrcp.f32 %v4046_v56  ;;  %v4024_v17 = vadd.f32 %v3462_v18, %v2972_v63  ;;  %v20560_v9 = vld [vmem:[#allocation54_spill] sm:$0xff] }
 0x71e   : > { %v13110_v62 = vpop.f32.mrf.mxu0  ;;  %v18192_v25 = vmul.f32 %v14511_v37, %v18130_v31  ;;  %v4049_v60 = vadd.f32 0.0009, %v20560_v9  ;;  %v4160_v19 = vadd.f32 %v4137_v57, %v4136_v32  ;;  %v20562_v32 = vld [vmem:[#allocation107_spill] sm:$0xff] }
 0x71f   : > { %v4115_v49 = vmul.f32 %v4071_v26, %v1272_v23  ;;  %v4069_v29 = vmul.f32 %v14509_v16, %v3994_v41  ;;  %v3949_v1 = vsub.f32 %v13110_v62, %v18062_v61  ;;  %v18196_v61 = vmul.f32 %v20559_v28, %v20543_v38  ;;  %v20561_v26 = vld [vmem:[#allocation59_spill] sm:$0xff]  ;;  %v1274_v38 = vld [vmem:[#allocation9 + $0x28] sm:$0xff] }
 0x720   : > { %v3845_v34 = vpop.f32.mrf.mxu0  ;;  %v18200_v23 = vadd.f32 0.0001, %v2367_v42  ;;  %v4048_v31 = vadd.f32 0.0009, %v4024_v17  ;;  %v3464_v41 = vsub.f32 %v20561_v26, %v18127_v2  ;;  %v2974_v42 = vsub.f32 %v20562_v32, %v18010_v24  ;;  %v20569_v32 = vld [vmem:[#allocation88_spill] sm:$0xff] }
 0x721   : > { %v4139_v10 = vmul.f32 %v4115_v49, %v18110_v55  ;;  %v4114_v58 = vmul.f32 %v4069_v29, %v1271_v44  ;;  %v3973_v52 = vmul.f32 2.0, %v3949_v1  ;;  %v3948_v12 = vsub.f32 %v3845_v34, %v18066_v3  ;;  %v14513_v55 = vpop.eup %14512  ;;  %v1273_v44 = vld [vmem:[#allocation9 + $0x20] sm:$0xff]  ;;  %v20564_v34 = vld [vmem:[#allocation87_spill] sm:$0xff] }
 0x722   : > { %v2414_v3 = vadd.f32 %v18187_v11, %v18022_v36  ;;  %v14515_v48 = vpop.eup %14514  ;;  %v2366_v63 = vmul.f32 2.0, %v18196_v61  ;;  %14526 = vrcp.f32 %v4049_v60 }
 0x723   : > { %v4138_v56 = vmul.f32 %v4114_v58, %v18120_v47  ;;  %v4178_v4 = vadd.f32 %v4177_v40, %v4114_v58  ;;  %v3997_v30 = vadd.f32 0.0009, %v3973_v52  ;;  %v3972_v18 = vmul.f32 2.0, %v3948_v12  ;;  %v14517_v37 = vpop.eup %14516  ;;  %v20563_v40 = vld [vmem:[#allocation71_spill] sm:$0xff] }
 0x724   : > { %v2439_v47 = vadd.f32 0.0001, %v2415_v46  ;;  %v2438_v17 = vadd.f32 0.0001, %v2414_v3  ;;  %14528 = vrcp.f32 %v4048_v31  ;;  %v4026_v46 = vadd.f32 %v3464_v41, %v2974_v42  ;;  %v14519_v52 = vpop.eup %14518  ;;  %v20570_v42 = vld [vmem:[#allocation109_spill] sm:$0xff] }
 0x725   : > { %v4161_v16 = vadd.f32 %v4160_v19, %v4138_v56  ;;  %v4075_v20 = vmul.f32 %v14513_v55, %v3997_v30  ;;  %v3996_v53 = vadd.f32 0.0009, %v3972_v18  ;;  %v4179_v57 = vadd.f32 %v4178_v4, %v4115_v49  ;;  %v14521_v19 = vpop.eup %14520 }
 0x726   : > { %v13113_v62 = vpop.f32.mrf.mxu0  ;;  %v18212_v49 = vmul.f32 %v20564_v34, %v20563_v40  ;;  %v18217_v56 = vmul.f32 %v14517_v37, %v18151_v5  ;;  %14530 = vrcp.f32 %v2439_v47  ;;  %v4050_v26 = vadd.f32 0.0009, %v4026_v46  ;;  %v1276_v5 = vld [vmem:[#allocation9 + $0x38] sm:$0xff]  ;;  %v20567_v47 = vld [vmem:[#allocation102_spill] sm:$0xff] }
 0x727   : > { %v4117_v29 = vmul.f32 %v4075_v20, %v1274_v38  ;;  %v4073_v1 = vmul.f32 %v14515_v48, %v3996_v53  ;;  %v3951_v2 = vsub.f32 %v13113_v62, %v18081_v15  ;;  %v4162_v28 = vadd.f32 %v4161_v16, %v4139_v10  ;;  %v20565_v10 = vld [vmem:[#allocation98_spill] sm:$0xff] }
 0x728   : > { %v3855_v58 = vpop.f32.mrf.mxu0  ;;  %v18219_v15 = vadd.f32 0.0001, %v2366_v63  ;;  %v4051_v4 = vadd.f32 0.0009, %v20565_v10  ;;  %14532 = vrcp.f32 %v2438_v17  ;;  %v20568_v63 = vld [vmem:[#allocation63_spill] sm:$0xff] }
 0x729   : > { %v4116_v12 = vmul.f32 %v4073_v1, %v1273_v44  ;;  %v3975_v24 = vmul.f32 2.0, %v3951_v2  ;;  %v3950_v9 = vsub.f32 %v3855_v58, %v18088_v7  ;;  %v4141_v60 = vmul.f32 %v4117_v29, %v18138_v0  ;;  %v14523_v31 = vpop.eup %14522  ;;  %v20566_v0 = vld [vmem:[#allocation68_spill] sm:$0xff]  ;;  %v1275_v37 = vld [vmem:[#allocation9 + $0x30] sm:$0xff] }
 0x72a   : > { %v2369_v7 = vmul.f32 2.0, %v18212_v49  ;;  %v3466_v41 = vsub.f32 %v20566_v0, %v18187_v11  ;;  %v14525_v38 = vpop.eup %14524  ;;  %v2976_v44 = vsub.f32 %v20570_v42, %v18022_v36  ;;  %14534 = vrcp.f32 %v4051_v4  ;;  %v1277_v42 = vld [vmem:[#allocation9 + $0x40] sm:$0xff] }
 0x72b   : > { %v4140_v30 = vmul.f32 %v4116_v12, %v18153_v54  ;;  %v3999_v18 = vadd.f32 0.0009, %v3975_v24  ;;  %v3974_v55 = vmul.f32 2.0, %v3950_v9  ;;  %v4180_v3 = vadd.f32 %v4179_v57, %v4116_v12  ;;  %v20571_v9 = vld [vmem:[#allocation61_spill] sm:$0xff] }
 0x72c   : > { %v2417_v54 = vadd.f32 %v20568_v63, %v20567_v47  ;;  %v18230_v57 = vmul.f32 %v20569_v32, %v20544_v14  ;;  %14536 = vrcp.f32 %v4050_v26  ;;  %v4028_v40 = vadd.f32 %v3466_v41, %v2976_v44  ;;  %v1278_v26 = vld [vmem:[#allocation9 + $0x48] sm:$0xff] }
 0x72d   : > { %v4079_v16 = vmul.f32 %v14523_v31, %v3999_v18  ;;  %v3998_v20 = vadd.f32 0.0009, %v3974_v55  ;;  %v4181_v53 = vadd.f32 %v4180_v3, %v4117_v29  ;;  %v4163_v48 = vadd.f32 %v4162_v28, %v4140_v30  ;;  %v20573_v31 = vld [vmem:[#allocation89_spill] sm:$0xff] }
 0x72e   : > { %v13116_v62 = vpop.f32.mrf.mxu0  ;;  %v18235_v29 = vadd.f32 0.0001, %v2369_v7  ;;  %v2320_v28 = vmul.f32 %v20569_v32, %v20569_v32  ;;  %v18242_v12 = vmul.f32 %v14519_v52, %v18162_v27  ;;  %v2368_v24 = vmul.f32 2.0, %v18230_v57  ;;  %v20574_v27 = vld [vmem:[#allocation104_spill] sm:$0xff] }
 0x72f   : > { %v4077_v11 = vmul.f32 %v14525_v38, %v3998_v20  ;;  %v3953_v1 = vsub.f32 %v13116_v62, %v18093_v43  ;;  %v4119_v2 = vmul.f32 %v4079_v16, %v1276_v5  ;;  %v4164_v17 = vadd.f32 %v4163_v48, %v4141_v60  ;;  %v14527_v10 = vpop.eup %14526  ;;  %v20576_v48 = vld [vmem:[#allocation111_spill] sm:$0xff] }
 0x730   : > { %v3865_v14 = vpop.f32.mrf.mxu0  ;;  %v2441_v43 = vadd.f32 0.0001, %v2417_v54  ;;  %v4053_v60 = vadd.f32 0.0009, %v20571_v9  ;;  %v2416_v3 = vadd.f32 %v2320_v28, %v18026_v21  ;;  %v3468_v52 = vsub.f32 %v20574_v27, %v2320_v28 }
 0x731   : > { %v3977_v34 = vmul.f32 2.0, %v3953_v1  ;;  %v3952_v46 = vsub.f32 %v3865_v14, %v18106_v33  ;;  %v4118_v36 = vmul.f32 %v4077_v11, %v1275_v37  ;;  %v4143_v58 = vmul.f32 %v4119_v2, %v18169_v6  ;;  %v20572_v33 = vld [vmem:[#allocation73_spill] sm:$0xff]  ;;  %v14529_v0 = vpop.eup %14528  ;;  %v20578_v1 = vld [vmem:[#allocation83_spill] sm:$0xff] }
 0x732   : > { %v18250_v7 = vmul.f32 %v20573_v31, %v20572_v33  ;;  %v4052_v6 = vadd.f32 0.0009, %v4028_v40  ;;  %v18254_v20 = vmul.f32 %v14521_v19, %v18171_v22  ;;  %v2978_v47 = vsub.f32 %v20576_v48, %v18026_v21  ;;  %v20577_v19 = vld [vmem:[#allocation66_spill] sm:$0xff] }
 0x733   : > { %v4001_v4 = vadd.f32 0.0009, %v3977_v34  ;;  %v3976_v30 = vmul.f32 2.0, %v3952_v46  ;;  %v4182_v18 = vadd.f32 %v4181_v53, %v4118_v36  ;;  %v4142_v55 = vmul.f32 %v4118_v36, %v18176_v45  ;;  %v20575_v53 = vld [vmem:[#allocation90_spill] sm:$0xff]  ;;  %v14531_v54 = vpop.eup %14530 }
 0x734   : > { %v2322_v45 = vmul.f32 %v20575_v53, %v20575_v53  ;;  %14538 = vrcp.f32 %v4053_v60  ;;  %v2440_v11 = vadd.f32 0.0001, %v2416_v3  ;;  %v2371_v22 = vmul.f32 2.0, %v18250_v7  ;;  %v20579_v60 = vld [vmem:[#allocation81_spill] sm:$0xff] }
 0x735   : > { %v4083_v41 = vmul.f32 %v14527_v10, %v4001_v4  ;;  %v4000_v5 = vadd.f32 0.0009, %v3976_v30  ;;  %v4183_v38 = vadd.f32 %v4182_v18, %v4119_v2  ;;  %v4165_v16 = vadd.f32 %v4164_v17, %v4142_v55  ;;  %v18264_v40 = vpop.eup %14532  ;;  %v1280_v55 = vld [vmem:[#allocation9 + $0x58] sm:$0xff] }
 0x736   : > { %v13119_v63 = vpop.f32.mrf.mxu0  ;;  %v2419_v2 = vadd.f32 %v20578_v1, %v20577_v19  ;;  %v4030_v17 = vadd.f32 %v3468_v52, %v2978_v47  ;;  %14540 = vrcp.f32 %v4052_v6  ;;  %v18268_v46 = vadd.f32 0.0001, %v2368_v24  ;;  %v20580_v24 = vld [vmem:[#allocation69_spill] sm:$0xff] }
 0x737   : > { %v4121_v32 = vmul.f32 %v4083_v41, %v1278_v26  ;;  %v4081_v44 = vmul.f32 %v14529_v0, %v4000_v5  ;;  %v3955_v62 = vsub.f32 %v13119_v63, %v18136_v39  ;;  %4184 = vadd.xlane.f32.xlu0 %v4183_v38  ;;  %v4166_v37 = vadd.f32 %v4165_v16, %v4143_v58  ;;  %v14535_v9 = vpop.eup %14534  ;;  %v20581_v52 = vld [vmem:[#allocation113_spill] sm:$0xff]  ;;  %v1279_v0 = vld [vmem:[#allocation9 + $0x50] sm:$0xff] }
 0x738   : > { %v3875_v28 = vpop.f32.mrf.mxu0  ;;  %v18272_v39 = vmul.f32 %v20575_v53, %v20546_v35  ;;  %v2418_v36 = vadd.f32 %v2322_v45, %v18034_v13  ;;  %14542 = vrcp.f32 %v2441_v43  ;;  %v4055_v10 = vadd.f32 0.0009, %v20579_v60  ;;  %v20582_v53 = vld [vmem:[#allocation92_spill] sm:$0xff] }
 0x739   : > { %v4145_v21 = vmul.f32 %v4121_v32, %v18192_v25  ;;  %v3979_v14 = vmul.f32 2.0, %v3955_v62  ;;  %v3954_v34 = vsub.f32 %v3875_v28, %v18145_v59  ;;  %v4120_v58 = vmul.f32 %v4081_v44, %v1277_v42  ;;  %v14537_v35 = vpop.eup %14536  ;;  %v20583_v44 = vld [vmem:[#allocation85_spill] sm:$0xff]  ;;  %v20584_v62 = vld [vmem:[#allocation108_spill] sm:$0xff] }
 0x73a   : > { %v18277_v25 = vmul.f32 %v14531_v54, %v18200_v23  ;;  %14544 = vrcp.f32 %v2440_v11  ;;  %v4054_v59 = vadd.f32 0.0009, %v4030_v17  ;;  %v3470_v18 = vsub.f32 %v20580_v24, %v2322_v45  ;;  %v20585_v11 = vld [vmem:[#allocation106_spill] sm:$0xff] }
 0x73b   : > { %v4003_v4 = vadd.f32 0.0009, %v3979_v14  ;;  %v3978_v30 = vmul.f32 2.0, %v3954_v34  ;;  %4167 = vadd.xlane.f32.xlu0 %v4166_v37  ;;  %v18280_v3 = vadd.f32 0.0001, %v2371_v22  ;;  %v18283_v43 = vmul.f32 2.0, %v18272_v39 }
 0x73c   : > { %v2443_v33 = vadd.f32 0.0001, %v2419_v2  ;;  %v2442_v27 = vadd.f32 0.0001, %v2418_v36  ;;  %v2980_v26 = vsub.f32 %v20581_v52, %v18034_v13  ;;  %v4144_v23 = vmul.f32 %v4120_v58, %v18217_v56  ;;  %v20586_v14 = vld [vmem:[#allocation112_spill] sm:$0xff] }
 0x73d   : > { %v4087_v31 = vmul.f32 %v14535_v9, %v4003_v4  ;;  %v4002_v6 = vadd.f32 0.0009, %v3978_v30  ;;  %14546 = vrcp.f32 %v4055_v10  ;;  %v2324_v45 = vmul.f32 %v20582_v53, %v20582_v53 }
 0x73e   : > { %v13122_v41 = vpop.f32.mrf.mxu0  ;;  %14548 = vrcp.f32 %v4054_v59  ;;  %v4032_v48 = vadd.f32 %v3470_v18, %v2980_v26  ;;  %v4215_v47 = vadd.f32 %v4121_v32, %v4120_v58  ;;  %v2421_v37 = vadd.f32 %v20584_v62, %v20583_v44  ;;  %v1281_v59 = vld [vmem:[#allocation9 + $0x60] sm:$0xff] }
 0x73f   : > { %v4123_v5 = vmul.f32 %v4087_v31, %v1280_v55  ;;  %v4085_v38 = vmul.f32 %v14537_v35, %v4002_v6  ;;  %v3957_v16 = vsub.f32 %v13122_v41, %v18166_v50  ;;  %14550 = vrcp.f32 %v2443_v33  ;;  %v20588_v6 = vld [vmem:[#allocation75_spill] sm:$0xff] }
 0x740   : > { %v3885_v63 = vpop.f32.mrf.mxu0  ;;  %v4057_v22 = vadd.f32 0.0009, %v20585_v11  ;;  %v4198_v50 = vadd.f32 %v4145_v21, %v4144_v23  ;;  %14552 = vrcp.f32 %v2442_v27  ;;  %v4056_v28 = vadd.f32 0.0009, %v4032_v48  ;;  %v20589_v27 = vld [vmem:[#allocation91_spill] sm:$0xff] }
 0x741   : > { %v4147_v54 = vmul.f32 %v4123_v5, %v18242_v12  ;;  %v4122_v42 = vmul.f32 %v4085_v38, %v1279_v0  ;;  %v3981_v13 = vmul.f32 2.0, %v3957_v16  ;;  %v3956_v56 = vsub.f32 %v3885_v63, %v18196_v61  ;;  %v14539_v19 = vpop.eup %14538  ;;  %v1282_v61 = vld [vmem:[#allocation9 + $0x68] sm:$0xff]  ;;  %v1284_v11 = vld [vmem:[#allocation9 + $0x78] sm:$0xff] }
 0x742   : > { %v2420_v12 = vadd.f32 %v2324_v45, %v18047_v8  ;;  %v3472_v34 = vsub.f32 %v20586_v14, %v2324_v45  ;;  %v2475_v21 = vmul.f32 %v18264_v40, %v18219_v15  ;;  %v2445_v4 = vadd.f32 0.0001, %v2421_v37  ;;  %v20590_v38 = vld [vmem:[#allocation114_spill] sm:$0xff] }
 0x743   : > { %v4146_v1 = vmul.f32 %v4122_v42, %v18254_v20  ;;  %v4216_v2 = vadd.f32 %v4215_v47, %v4122_v42  ;;  %v4005_v17 = vadd.f32 0.0009, %v3981_v13  ;;  %v3980_v32 = vmul.f32 2.0, %v3956_v56  ;;  %v14541_v10 = vpop.eup %14540  ;;  %v20587_v20 = vld [vmem:[#allocation115_spill] sm:$0xff]  ;;  %v20592_v45 = vld [vmem:[#allocation94_spill] sm:$0xff] }
 0x744   : > { %v2982_v30 = vsub.f32 %v20587_v20, %v18047_v8  ;;  %14554 = vrcp.f32 %v4057_v22  ;;  %v18306_v52 = vmul.f32 %v20589_v27, %v20588_v6  ;;  %v2444_v26 = vadd.f32 0.0001, %v2420_v12  ;;  %v20593_v47 = vld [vmem:[#allocation110_spill] sm:$0xff] }
 0x745   : > { %v4199_v36 = vadd.f32 %v4198_v50, %v4146_v1  ;;  %v4091_v58 = vmul.f32 %v14539_v19, %v4005_v17  ;;  %v4004_v9 = vadd.f32 0.0009, %v3980_v32  ;;  %v4217_v60 = vadd.f32 %v4216_v2, %v4123_v5  ;;  %v14543_v31 = vpop.eup %14542  ;;  %v20595_v32 = vld [vmem:[#allocation117_spill] sm:$0xff]  ;;  %v1283_v14 = vld [vmem:[#allocation9 + $0x70] sm:$0xff] }
 0x746   : > { %v13125_v24 = vpop.f32.mrf.mxu0  ;;  %14556 = vrcp.f32 %v4056_v28  ;;  %v4034_v15 = vadd.f32 %v3472_v34, %v2982_v30  ;;  %v2326_v48 = vmul.f32 %v20592_v45, %v20592_v45  ;;  %v4059_v63 = vadd.f32 0.0009, %v20593_v47 }
 0x747   : > { %v4125_v18 = vmul.f32 %v4091_v58, %v1282_v61  ;;  %v4089_v55 = vmul.f32 %v14541_v10, %v4004_v9  ;;  %v3959_v35 = vsub.f32 %v13125_v24, %v18212_v49  ;;  %v4200_v33 = vadd.f32 %v4199_v36, %v4147_v54  ;;  %v14545_v23 = vpop.eup %14544  ;;  %v20591_v49 = vld [vmem:[#allocation168_spill] sm:$0xff] }
 0x748   : > { %v3895_v40 = vpop.f32.mrf.mxu0  ;;  %14558 = vrcp.f32 %v2445_v4  ;;  %v2423_v16 = vadd.f32 %v20591_v49, %v20590_v38  ;;  %v18316_v62 = vmul.f32 2.0, %v18306_v52  ;;  %v2984_v12 = vsub.f32 %v20595_v32, %v18056_v51  ;;  %v1286_v38 = vld [vmem:[#allocation9 + $0x88] sm:$0xff] }
 0x749   : > { %v4124_v0 = vmul.f32 %v4089_v55, %v1281_v59  ;;  %v3983_v8 = vmul.f32 2.0, %v3959_v35  ;;  %v3958_v41 = vsub.f32 %v3895_v40, %v18230_v57  ;;  %v4149_v5 = vmul.f32 %v4125_v18, %v18277_v25  ;;  %v20594_v25 = vld [vmem:[#allocation169_spill] sm:$0xff] }
 0x74a   : > { %v14547_v44 = vpop.eup %14546  ;;  %14560 = vrcp.f32 %v2444_v26  ;;  %v4058_v57 = vadd.f32 0.0009, %v4034_v15  ;;  %v3474_v37 = vsub.f32 %v20594_v25, %v2326_v48  ;;  %v2447_v17 = vadd.f32 0.0001, %v2423_v16 }
 0x74b   : > { %v4148_v54 = vmul.f32 %v4124_v0, %v2475_v21  ;;  %v4007_v42 = vadd.f32 0.0009, %v3983_v8  ;;  %v3982_v13 = vmul.f32 2.0, %v3958_v41  ;;  %v4218_v56 = vadd.f32 %v4217_v60, %v4124_v0  ;;  %v14549_v22 = vpop.eup %14548  ;;  %v20600_v0 = vld [vmem:[#allocation171_spill] sm:$0xff]  ;;  %v20601_v41 = vld [vmem:[#allocation118_spill] sm:$0xff] }
 0x74c   : > { %14562 = vrcp.f32 %v4059_v63  ;;  %v2481_v34 = vmul.f32 %v14543_v31, %v18235_v29  ;;  %v14551_v61 = vpop.eup %14550  ;;  %v2422_v10 = vadd.f32 %v2326_v48, %v18056_v51  ;;  %v4036_v21 = vadd.f32 %v3474_v37, %v2984_v12  ;;  %v20596_v29 = vld [vmem:[#allocation76_spill] sm:$0xff] }
 0x74d   : > { %v4095_v50 = vmul.f32 %v14547_v44, %v4007_v42  ;;  %v4006_v19 = vadd.f32 0.0009, %v3982_v13  ;;  %v4219_v1 = vadd.f32 %v4218_v56, %v4125_v18  ;;  %v4201_v2 = vadd.f32 %v4200_v33, %v4148_v54  ;;  %v14553_v30 = vpop.eup %14552  ;;  %v20598_v31 = vld [vmem:[#allocation116_spill] sm:$0xff]  ;;  %v20603_v13 = vld [vmem:[#allocation119_spill] sm:$0xff] }
 0x74e   : > { %v13128_v28 = vpop.f32.mrf.mxu0  ;;  %14564 = vrcp.f32 %v4058_v57  ;;  %v2479_v20 = vmul.f32 %v14545_v23, %v18268_v46  ;;  %v2348_v35 = vmul.f32 %v20582_v53, %v20596_v29  ;;  %v4061_v51 = vadd.f32 0.0009, %v20598_v31  ;;  %v20599_v23 = vld [vmem:[#allocation170_spill] sm:$0xff]  ;;  %v20602_v54 = vld [vmem:[#allocation120_spill] sm:$0xff] }
 0x74f   : > { %v4093_v36 = vmul.f32 %v14549_v22, %v4006_v19  ;;  %v3961_v58 = vsub.f32 %v13128_v28, %v18250_v7  ;;  %v4127_v9 = vmul.f32 %v4095_v50, %v1284_v11  ;;  %v4202_v60 = vadd.f32 %v4201_v2, %v4149_v5  ;;  %v20597_v7 = vld [vmem:[#allocation96_spill] sm:$0xff]  ;;  %v20607_v31 = vld [vmem:[#allocation78_spill] sm:$0xff] }
 0x750   : > { %v3905_v4 = vpop.f32.mrf.mxu0  ;;  %14566 = vrcp.f32 %v2447_v17  ;;  %v2328_v33 = vmul.f32 %v20597_v7, %v20597_v7  ;;  %v2446_v40 = vadd.f32 0.0001, %v2422_v10  ;;  %v4060_v8 = vadd.f32 0.0009, %v4036_v21  ;;  %v1285_v37 = vld [vmem:[#allocation9 + $0x80] sm:$0xff] }
 0x751   : > { %v3985_v59 = vmul.f32 2.0, %v3961_v58  ;;  %v3960_v24 = vsub.f32 %v3905_v4, %v18272_v39  ;;  %v4126_v18 = vmul.f32 %v4093_v36, %v1283_v14  ;;  %v4151_v55 = vmul.f32 %v4127_v9, %v2481_v34  ;;  %v14555_v6 = vpop.eup %14554  ;;  %v20604_v58 = vld [vmem:[#allocation172_spill] sm:$0xff]  ;;  %v20605_v4 = vld [vmem:[#allocation77_spill] sm:$0xff] }
 0x752   : > { %v2425_v39 = vadd.f32 %v20600_v0, %v20599_v23  ;;  %v3476_v5 = vsub.f32 %v20601_v41, %v2328_v33  ;;  %v2485_v63 = vmul.f32 %v14551_v61, %v18280_v3  ;;  %v2424_v42 = vadd.f32 %v2328_v33, %v20602_v54 }
 0x753   : > { %v4009_v27 = vadd.f32 0.0009, %v3985_v59  ;;  %v3984_v26 = vmul.f32 2.0, %v3960_v24  ;;  %v4220_v15 = vadd.f32 %v4219_v1, %v4126_v18  ;;  %v4150_v46 = vmul.f32 %v4126_v18, %v2479_v20  ;;  %v14557_v53 = vpop.eup %14556  ;;  %v20606_v20 = vld [vmem:[#allocation93_spill] sm:$0xff]  ;;  %v1288_v18 = vld [vmem:[#allocation9 + $0x98] sm:$0xff] }
 0x754   : > { %v2986_v56 = vsub.f32 %v20603_v13, %v20602_v54  ;;  %14568 = vrcp.f32 %v4061_v51  ;;  %v2372_v19 = vmul.f32 2.0, %v2348_v35  ;;  %v2449_v1 = vadd.f32 0.0001, %v2425_v39  ;;  %v20609_v13 = vld [vmem:[#allocation95_spill] sm:$0xff] }
 0x755   : > { %v4099_v49 = vmul.f32 %v14555_v6, %v4009_v27  ;;  %v4008_v16 = vadd.f32 0.0009, %v3984_v26  ;;  %v4221_v48 = vadd.f32 %v4220_v15, %v4127_v9  ;;  %v4203_v47 = vadd.f32 %v4202_v60, %v4150_v46  ;;  %v14559_v57 = vpop.eup %14558  ;;  %v1287_v27 = vld [vmem:[#allocation9 + $0x90] sm:$0xff] }
 0x756   : > { %v13131_v44 = vpop.f32.mrf.mxu0  ;;  %14570 = vrcp.f32 %v2446_v40  ;;  %v4038_v2 = vadd.f32 %v3476_v5, %v2986_v56  ;;  %v2394_v14 = vadd.f32 0.0001, %v18283_v43  ;;  %v2448_v34 = vadd.f32 0.0001, %v2424_v42  ;;  %v20608_v42 = vld [vmem:[#allocation79_spill] sm:$0xff] }
 0x757   : > { %v4129_v25 = vmul.f32 %v4099_v49, %v1286_v38  ;;  %v4097_v11 = vmul.f32 %v14557_v53, %v4008_v16  ;;  %v3963_v22 = vsub.f32 %v13131_v44, %v18306_v52  ;;  %4222 = vadd.xlane.f32.xlu1 %v4221_v48  ;;  %v4204_v50 = vadd.f32 %v4203_v47, %v4151_v55  ;;  %v14561_v17 = vpop.eup %14560  ;;  %v1290_v44 = vld [vmem:[#allocation9 + $0xa8] sm:$0xff] }
 0x758   : > { %v3915_v3 = vpop.f32.mrf.mxu0  ;;  %14572 = vrcp.f32 %v4060_v8  ;;  %v4063_v9 = vadd.f32 0.0009, %v20604_v58  ;;  %v2483_v10 = vmul.f32 %v14553_v30, %v2394_v14  ;;  %v2397_v21 = vadd.f32 0.0001, %v18316_v62 }
 0x759   : > { %v4153_v32 = vmul.f32 %v4129_v25, %v2485_v63  ;;  %v3987_v12 = vmul.f32 2.0, %v3963_v22  ;;  %v3962_v28 = vsub.f32 %v3915_v3, %v2348_v35  ;;  %v4128_v61 = vmul.f32 %v4097_v11, %v1285_v37  ;;  %v14563_v36 = vpop.eup %14562 }
 0x75a   : > { %v2351_v59 = vmul.f32 %v20606_v20, %v20605_v4  ;;  %v4062_v24 = vadd.f32 0.0009, %v4038_v2  ;;  %v2396_v29 = vadd.f32 0.0001, %v2372_v19  ;;  %14574 = vrcp.f32 %v2449_v1  ;;  %v20610_v2 = vld [vmem:[#allocation52_spill] sm:$0xff] }
 0x75b   : > { %v4011_v52 = vadd.f32 0.0009, %v3987_v12  ;;  %v3986_v60 = vmul.f32 2.0, %v3962_v28  ;;  %4205 = vadd.xlane.f32.xlu1 %v4204_v50  ;;  %v14565_v55 = vpop.eup %14564  ;;  %v2489_v33 = vmul.f32 %v14559_v57, %v2397_v21  ;;  %v2350_v51 = vmul.f32 %v20592_v45, %v20607_v31 }
 0x75c   : > { %14576 = vrcp.f32 %v2448_v34  ;;  %v4152_v6 = vmul.f32 %v4128_v61, %v2483_v10  ;;  %v2487_v40 = vmul.f32 %v14561_v17, %v2396_v29  ;;  %v2375_v23 = vmul.f32 2.0, %v2351_v59  ;;  %v1289_v17 = vld [vmem:[#allocation9 + $0xa0] sm:$0xff] }
 0x75d   : > { %v4103_v43 = vmul.f32 %v14563_v36, %v4011_v52  ;;  %v4010_v35 = vadd.f32 0.0009, %v3986_v60  ;;  %v14567_v26 = vpop.eup %14566  ;;  %14578 = vrcp.f32 %v4063_v9  ;;  %v4253_v0 = vadd.f32 %v4129_v25, %v4128_v61 }
 0x75e   : > { %v13134_v30 = vpop.f32.mrf.mxu0  ;;  %14580 = vrcp.f32 %v4062_v24  ;;  %v2374_v53 = vmul.f32 2.0, %v2350_v51  ;;  %v4236_v45 = vadd.f32 %v4153_v32, %v4152_v6  ;;  %v2399_v54 = vadd.f32 0.0001, %v2375_v23 }
 0x75f   : > { %v4131_v62 = vmul.f32 %v4103_v43, %v1288_v18  ;;  %v4101_v15 = vmul.f32 %v14565_v55, %v4010_v35  ;;  %v3965_v46 = vsub.f32 %v13134_v30, %v2351_v59  ;;  %v2353_v56 = vmul.f32 %v20609_v13, %v20608_v42  ;;  %v14785_v42 = vld [vmem:[#allocation12 + $0x20] sm:$0xff] }
 0x760   : > { %v3925_v39 = vpop.f32.mrf.mxu0  ;;  %v2493_v19 = vmul.f32 %v14567_v26, %v2399_v54  ;;  %v2398_v1 = vadd.f32 0.0001, %v2374_v53  ;;  %v2352_v3 = vmul.f32 %v20597_v7, %v20610_v2  ;;  %v14783_v53 = vld [vmem:[#allocation12 + $0x30] sm:$0xff] }
 0x761   : > { %v4155_v8 = vmul.f32 %v4131_v62, %v2489_v33  ;;  %v4130_v41 = vmul.f32 %v4101_v15, %v1287_v27  ;;  %v3989_v5 = vmul.f32 2.0, %v3965_v46  ;;  %v3964_v38 = vsub.f32 %v3925_v39, %v2350_v51  ;;  %v14569_v49 = vpop.eup %14568  ;;  %v1292_v33 = vld [vmem:[#allocation9 + $0xb8] sm:$0xff]  ;;  %v1291_v15 = vld [vmem:[#allocation9 + $0xb0] sm:$0xff] }
 0x762   : > { %v2377_v36 = vmul.f32 2.0, %v2353_v56  ;;  %v2376_v4 = vmul.f32 2.0, %v2352_v3 }
 0x763   : > { %v4154_v16 = vmul.f32 %v4130_v41, %v2487_v40  ;;  %v4254_v48 = vadd.f32 %v4253_v0, %v4130_v41  ;;  %v4013_v47 = vadd.f32 0.0009, %v3989_v5  ;;  %v3988_v63 = vmul.f32 2.0, %v3964_v38  ;;  %v14571_v57 = vpop.eup %14570 }
 0x764   : > { %v2491_v61 = vmul.f32 %v14571_v57, %v2398_v1  ;;  %v2401_v43 = vadd.f32 0.0001, %v2377_v36  ;;  %v2400_v26 = vadd.f32 0.0001, %v2376_v4  ;;  %v14786_v57 = vld [vmem:[#allocation12 + $0x18] sm:$0xff] }
 0x765   : > { %v4237_v37 = vadd.f32 %v4236_v45, %v4154_v16  ;;  %v4107_v25 = vmul.f32 %v14569_v49, %v4013_v47  ;;  %v4012_v11 = vadd.f32 0.0009, %v3988_v63  ;;  %v4255_v22 = vadd.f32 %v4254_v48, %v4131_v62  ;;  %v14573_v50 = vpop.eup %14572  ;;  %v14784_v48 = vld [vmem:[#allocation12 + $0x28] sm:$0xff] }
 0x766   : > { %v13137_v32 = vpop.f32.mrf.mxu0 }
 0x767   : > { %v4133_v12 = vmul.f32 %v4107_v25, %v1290_v44  ;;  %v4105_v28 = vmul.f32 %v14573_v50, %v4012_v11  ;;  %v3967_v14 = vsub.f32 %v13137_v32, %v2353_v56  ;;  %v4238_v34 = vadd.f32 %v4237_v37, %v4155_v8  ;;  %v14575_v21 = vpop.eup %14574  ;;  %v14782_v8 = vld [vmem:[#allocation12 + $0x38] sm:$0xff]  ;;  %v14787_v25 = vld [vmem:[#allocation12 + $0x10] sm:$0xff] }
 0x768   : > { %v3935_v58 = vpop.f32.mrf.mxu0  ;;  %v2497_v23 = vmul.f32 %v14575_v21, %v2401_v43 }
 0x769   : > { %v4132_v9 = vmul.f32 %v4105_v28, %v1289_v17  ;;  %v3991_v52 = vmul.f32 2.0, %v3967_v14  ;;  %v3966_v60 = vsub.f32 %v3935_v58, %v2352_v3  ;;  %v4157_v10 = vmul.f32 %v4133_v12, %v2493_v19  ;;  %v14577_v59 = vpop.eup %14576  ;;  %v14789_v19 = vld [vmem:[#allocation12] sm:$0xff] }
 0x76a   : > { %v4376_v20 = vpop.f32.mrf.mxu0  ;;  %v14579_v29 = vpop.eup %14578  ;;  %v2495_v5 = vmul.f32 %v14577_v59, %v2400_v26 }
 0x76b   : > { %v4156_v24 = vmul.f32 %v4132_v9, %v2491_v61  ;;  %v4015_v18 = vadd.f32 0.0009, %v3991_v52  ;;  %v3990_v7 = vmul.f32 2.0, %v3966_v60  ;;  %13154 = vmatprep.mubr.msk.f32.mxu1 %vm1325_vm0, %v4376_v20  ;;  %v4256_v55 = vadd.f32 %v4255_v22, %v4132_v9  ;;  %v14581_v31 = vpop.eup %14580  ;;  %v14788_v22 = vld [vmem:[#allocation12 + $0x8] sm:$0xff] }
 0x76c   : > { %v4378_v35 = vpop.f32.mrf.mxu0 }
 0x76d   : > { %v4111_v51 = vmul.f32 %v14579_v29, %v4015_v18  ;;  %v4014_v6 = vadd.f32 0.0009, %v3990_v7  ;;  %v4257_v27 = vadd.f32 %v4256_v55, %v4133_v12  ;;  %v4239_v30 = vadd.f32 %v4238_v34, %v4156_v24 }
 0x76e   : > { %v4381_v62 = vpop.f32.mrf.mxu0 }
 0x76f   : > { %v4109_v46 = vmul.f32 %v14581_v31, %v4014_v6  ;;  %13155 = vmatmul.mubr.msk.f32.vlgmr.msra.gmra.mxu1 %vm1325_vm0, %v4381_v62  ;;  %v4135_v40 = vmul.f32 %v4111_v51, %v1292_v33  ;;  %v4240_v0 = vadd.f32 %v4239_v30, %v4157_v10 }
 0x770   : > { %v4383_v39 = vpop.f32.mrf.mxu0  ;;  %13173 = vmatpush3.msra.mxu1 %v14782_v8 }
 0x771   : > { %v4134_v41 = vmul.f32 %v4109_v46, %v1291_v15  ;;  %v4159_v38 = vmul.f32 %v4135_v40, %v2497_v23  ;;  %13174 = vmatprep.subr.mxu1 %v14783_v53 }
 0x772   : > { %v4386_v45 = vpop.f32.mrf.mxu0  ;;  %13175 = vmatpush3.msra.mxu1 %v14783_v53 }
 0x773   : > { %13157 = vmatprep.mubr.msk.f32.mxu1 %vm1325_vm0, %v4386_v45  ;;  %v4258_v49 = vadd.f32 %v4257_v27, %v4134_v41  ;;  %v4158_v16 = vmul.f32 %v4134_v41, %v2495_v5  ;;  %13176 = vmatprep.subr.mxu1 %v14784_v48 }
 0x774   : > { %v4388_v47 = vpop.f32.mrf.mxu0  ;;  %13177 = vmatpush3.msra.mxu1 %v14784_v48 }
 0x775   : > { %v4259_v63 = vadd.f32 %v4258_v49, %v4135_v40  ;;  %v4241_v54 = vadd.f32 %v4240_v0, %v4158_v16  ;;  %13178 = vmatprep.subr.mxu1 %v14785_v42 }
 0x776   : > { %v4391_v13 = vpop.f32.mrf.mxu0  ;;  %13179 = vmatpush3.msra.mxu1 %v14785_v42 }
 0x777   : > { %13158 = vmatmul.mubr.msk.f32.gmra.mxu1 %vm1325_vm0, %v4391_v13  ;;  %4260 = vadd.xlane.f32.xlu1 %v4259_v63  ;;  %v4242_v56 = vadd.f32 %v4241_v54, %v4159_v38 }
 0x778   : > { %v4393_v44 = vpop.f32.mrf.mxu0  ;;  %13180 = vmatprep.subr.mxu1 %v14786_v57 }
 0x779   : > { %4243 = vadd.xlane.f32.xlu0 %v4242_v56  ;;  %13181 = vmatpush3.msra.mxu1 %v14786_v57 }
 0x77a   : > { %v4396_v37 = vpop.f32.mrf.mxu0  ;;  %13182 = vmatprep.subr.mxu1 %v14787_v25 }
 0x77b   : > { %13160 = vmatprep.mubr.msk.f32.mxu1 %vm1325_vm0, %v4396_v37  ;;  %13183 = vmatpush3.msra.mxu1 %v14787_v25 }
 0x77c   : > { %v4398_v11 = vpop.f32.mrf.mxu0  ;;  %13184 = vmatprep.subr.mxu1 %v14788_v22 }
 0x77d   : > { %13185 = vmatpush3.msra.mxu1 %v14788_v22 }
 0x77e   : > { %v4401_v50 = vpop.f32.mrf.mxu0  ;;  %13186 = vmatprep.subr.mxu1 %v14789_v19 }
 0x77f   : > { %13161 = vmatmul.mubr.msk.f32.gmra.mxu1 %vm1325_vm0, %v4401_v50 }
 0x780   : > { %v4403_v1 = vpop.f32.mrf.mxu0  ;;  %13187 = vmatpush3.msra.mxu1 %v14789_v19 }
 0x782   : > { %v4406_v2 = vpop.f32.mrf.mxu0 }
 0x783   : > { %13163 = vmatprep.mubr.msk.f32.mxu1 %vm1325_vm0, %v4406_v2 }
 0x784   : > { %v4408_v3 = vpop.f32.mrf.mxu0 }
 0x786   : > { %v4411_v17 = vpop.f32.mrf.mxu0 }
 0x787   : > { %13164 = vmatmul.mubr.msk.f32.gmra.mxu1 %vm1325_vm0, %v4411_v17 }
 0x788   : > { %v4413_v32 = vpop.f32.mrf.mxu0 }
 0x78a   : > { %v4416_v12 = vpop.f32.mrf.mxu0 }
 0x78b   : > { %13166 = vmatprep.mubr.msk.f32.mxu1 %vm1325_vm0, %v4416_v12 }
 0x78c   : > { %v4418_v28 = vpop.f32.mrf.mxu0 }
 0x78d   : > { %v18386_v28 = vld [vmem:[#allocation13] sm:$0xff] }
 0x78e   : > { %v4421_v14 = vpop.f32.mrf.mxu0  ;;  %13298 = vmatprep.mubr.msk.f32.mxu0 %vm4944_vm1, %v18386_v28 }
 0x78f   : > { %13167 = vmatmul.mubr.msk.f32.gmra.mxu1 %vm1325_vm0, %v4421_v14 }
 0x790   : > { %v4423_v34 = vpop.f32.mrf.mxu0 }
 0x792   : > { %v4426_v61 = vpop.f32.mrf.mxu0 }
 0x793   : > { %13169 = vmatprep.mubr.msk.f32.mxu1 %vm1325_vm0, %v4426_v61 }
 0x794   : > { %v4428_v36 = vpop.f32.mrf.mxu0 }
 0x796   : > { %v4431_v58 = vpop.f32.mrf.mxu0 }
 0x797   : > { %13170 = vmatmul.mubr.msk.f32.gmra.mxu1 %vm1325_vm0, %v4431_v58 }
 0x798   : > { %v4433_v9 = vpop.f32.mrf.mxu0 }
 0x79a   : > { %v4674_v52 = vpop.f32.mrf.mxu0 }
 0x79b   : > { %13188 = vmatprep.mubr.msk.f32.mxu1 %vm1325_vm0, %v4674_v52 }
 0x79c   : > { %v4676_v60 = vpop.f32.mrf.mxu0 }
 0x79e   : > { %v4679_v10 = vpop.f32.mrf.mxu0 }
 0x79f   : > { %13189 = vmatmul.mubr.msk.f32.vlgmr.msra.gmra.mxu1 %vm1325_vm0, %v4679_v10 }
 0x7a0   : > { %v4681_v21 = vpop.f32.mrf.mxu0 }
 0x7a2   : > { %v4684_v4 = vpop.f32.mrf.mxu0 }
 0x7a3   : > { %13191 = vmatprep.mubr.msk.f32.mxu1 %vm1325_vm0, %v4684_v4 }
 0x7a4   : > { %v4686_v20 = vpop.f32.mrf.mxu0 }
 0x7a6   : > { %v4689_v59 = vpop.f32.mrf.mxu0 }
 0x7a7   : > { %13192 = vmatmul.mubr.msk.f32.gmra.mxu1 %vm1325_vm0, %v4689_v59 }
 0x7a8   : > { %v4691_v24 = vpop.f32.mrf.mxu0 }
 0x7aa   : > { %v4694_v18 = vpop.f32.mrf.mxu0 }
 0x7ab   : > { %13194 = vmatprep.mubr.msk.f32.mxu1 %vm1325_vm0, %v4694_v18 }
 0x7ac   : > { %v4696_v7 = vpop.f32.mrf.mxu0 }
 0x7ae   : > { %v4699_v55 = vpop.f32.mrf.mxu0 }
 0x7af   : > { %13195 = vmatmul.mubr.msk.f32.gmra.mxu1 %vm1325_vm0, %v4699_v55 }
 0x7b0   : > { %v4701_v29 = vpop.f32.mrf.mxu0 }
 0x7b2   : > { %v4704_v43 = vpop.f32.mrf.mxu0 }
 0x7b3   : > { %13197 = vmatprep.mubr.msk.f32.mxu1 %vm1325_vm0, %v4704_v43 }
 0x7b4   : > { %v4706_v35 = vpop.f32.mrf.mxu0 }
 0x7b6   : > { %v4709_v33 = vpop.f32.mrf.mxu0 }
 0x7b7   : > { %13198 = vmatmul.mubr.msk.f32.gmra.mxu1 %vm1325_vm0, %v4709_v33 }
 0x7b8   : > { %v4711_v31 = vpop.f32.mrf.mxu0 }
 0x7ba   : > { %v4714_v51 = vpop.f32.mrf.mxu0 }
 0x7bb   : > { %13200 = vmatprep.mubr.msk.f32.mxu1 %vm1325_vm0, %v4714_v51 }
 0x7bc   : > { %v4716_v6 = vpop.f32.mrf.mxu0 }
 0x7be   : > { %v4719_v27 = vpop.f32.mrf.mxu0 }
 0x7bf   : > { %13201 = vmatmul.mubr.msk.f32.gmra.mxu1 %vm1325_vm0, %v4719_v27 }
 0x7c0   : > { %v4185_v30 = vpop.xlane.xlu0 %4184  ;;  %v4721_v26 = vpop.f32.mrf.mxu0 }
 0x7c1   : > { %v4186_v62 = vrot.slane %v4185_v30, 4 }
 0x7c2   : > { %v4724_v15 = vpop.f32.mrf.mxu0 }
 0x7c3   : > { %v4187_v46 = vadd.f32 %v4186_v62, %v4185_v30  ;;  %13203 = vmatprep.mubr.msk.f32.mxu1 %vm1325_vm0, %v4724_v15 }
 0x7c4   : > { %v4168_v40 = vpop.xlane.xlu0 %4167  ;;  %v4726_v23 = vpop.f32.mrf.mxu0 }
 0x7c5   : > { %v4188_v0 = vrot.slane %v4187_v46, 2  ;;  %v4169_v39 = vrot.slane %v4168_v40, 4 }
 0x7c6   : > { %v4729_v8 = vpop.f32.mrf.mxu0 }
 0x7c7   : > { %v4170_v41 = vadd.f32 %v4169_v39, %v4168_v40  ;;  %13204 = vmatmul.mubr.msk.f32.gmra.mxu1 %vm1325_vm0, %v4729_v8  ;;  %v4189_v38 = vadd.f32 %v4188_v0, %v4187_v46 }
 0x7c8   : > { %v4731_v5 = vpop.f32.mrf.mxu0  ;;  %13230 = vmatprep.mubr.msk.f32.mxu1 %vm4944_vm1, %v18386_v28 }
 0x7c9   : > { %v4171_v53 = vrot.slane %v4170_v41, 2  ;;  %v4190_v49 = vrot.slane %v4189_v38, 1 }
 0x7cb   : > { %v4172_v45 = vadd.f32 %v4171_v53, %v4170_v41  ;;  %v4191_v47 = vadd.f32 %v4190_v49, %v4189_v38 }
 0x7cd   : > { %v4173_v16 = vrot.slane %v4172_v45, 1 }
 0x7cf   : > { %v4174_v48 = vadd.f32 %v4173_v16, %v4172_v45 }
 0x7d1   : > { %14165 = vpush %v4174_v48  ;;  %v18448_v48 = vld [vmem:[#allocation13 + $0x8] sm:$0xff] }
 0x7d2   : > { %14167 = vpush %v4191_v47  ;;  %v18451_v47 = vld [vmem:[#allocation13 + $0x10] sm:$0xff] }
 0x7e0   : > { %v4223_v63 = vpop.xlane.xlu1 %4222 }
 0x7e1   : > { %v4224_v54 = vrot.slane %v4223_v63, 4 }
 0x7e3   : > { %v4225_v42 = vadd.f32 %v4224_v54, %v4223_v63  ;;  %v18458_v54 = vld [vmem:[#allocation13 + $0x18] sm:$0xff] }
 0x7e4   : > { %v4206_v13 = vpop.xlane.xlu1 %4205 }
 0x7e5   : > { %v4226_v56 = vrot.slane %v4225_v42, 2  ;;  %v4207_v44 = vrot.slane %v4206_v13, 4 }
 0x7e7   : > { %v4208_v57 = vadd.f32 %v4207_v44, %v4206_v13  ;;  %v4227_v37 = vadd.f32 %v4226_v56, %v4225_v42  ;;  %v18460_v42 = vld [vmem:[#allocation13 + $0x20] sm:$0xff]  ;;  %v18466_v56 = vld [vmem:[#allocation13 + $0x28] sm:$0xff]  ;;  %v18468_v44 = vld [vmem:[#allocation13 + $0x30] sm:$0xff] }
 0x7e9   : > { %v4209_v25 = vrot.slane %v4208_v57, 2  ;;  %v4228_v22 = vrot.slane %v4227_v37, 1 }
 0x7eb   : > { %v4210_v11 = vadd.f32 %v4209_v25, %v4208_v57  ;;  %v4229_v1 = vadd.f32 %v4228_v22, %v4227_v37  ;;  %v18474_v25 = vld [vmem:[#allocation13 + $0x38] sm:$0xff] }
 0x7ed   : > { %v4211_v50 = vrot.slane %v4210_v11, 1 }
 0x7ef   : > { %v4212_v19 = vadd.f32 %v4211_v50, %v4210_v11  ;;  %v18476_v11 = vld [vmem:[#allocation13 + $0x40] sm:$0xff]  ;;  %v18482_v50 = vld [vmem:[#allocation13 + $0x48] sm:$0xff] }
 0x7f1   : > { %14169 = vpush %v4212_v19  ;;  %v18484_v19 = vld [vmem:[#allocation13 + $0x50] sm:$0xff] }
 0x7f2   : > { %14171 = vpush %v4229_v1 }
 0x800   : > { %v4261_v2 = vpop.xlane.xlu1 %4260 }
 0x801   : > { %v4262_v3 = vrot.slane %v4261_v2, 4 }
 0x802   : > { %s14166_s28 = spop %14165  ;;  %v4244_v17 = vpop.xlane.xlu0 %4243 }
 0x803   : > { %v4263_v32 = vadd.f32 %v4262_v3, %v4261_v2  ;;  %s4176_s29 = smul.f32 0.0002601457, %s14166_s28  ;;  %s14168_s8 = spop %14167  ;;  %v4245_v12 = vrot.slane %v4244_v17, 4  ;;  %v18486_v2 = vld [vmem:[#allocation15 + $0x18] sm:$0xff]  ;;  %v18488_v3 = vld [vmem:[#allocation15 + $0x10] sm:$0xff] }
 0x804   : > { %s4193_s6 = smul.f32 0.0002601457, %s14168_s8 }
 0x805   : > { %v4264_v14 = vrot.slane %v4263_v32, 2  ;;  %v4194_v34 = vstv %s4176_s29  ;;  %v4246_v61 = vadd.f32 %v4245_v12, %v4244_v17  ;;  %v18495_v17 = vld [vmem:[#allocation13 + $0x58] sm:$0xff] }
 0x806   : > { %4195 = vst [vmem:[%s18379_s4] sm:$0x1] %v4194_v34  ;;  %v4196_v36 = vstv %s4193_s6 }
 0x807   : > { %4197 = vst [vmem:[%s18384_s25] sm:$0x1] %v4196_v36  ;;  %v4247_v58 = vrot.slane %v4246_v61, 2  ;;  %v4265_v9 = vadd.f32 %v4264_v14, %v4263_v32 }
 0x809   : > { %v4248_v52 = vadd.f32 %v4247_v58, %v4246_v61  ;;  %v4266_v60 = vrot.slane %v4265_v9, 1 }
 0x80b   : > { %v4249_v10 = vrot.slane %v4248_v52, 1  ;;  %v4267_v4 = vadd.f32 %v4266_v60, %v4265_v9 }
 0x80d   : > { %v4250_v21 = vadd.f32 %v4249_v10, %v4248_v52 }
 0x80f   : > { %14173 = vpush %v4250_v21 }
 0x810   : > { %14175 = vpush %v4267_v4 }
 0x822   : > { %s14170_s1 = spop %14169 }
 0x823   : > { %s4214_s22 = smul.f32 0.0002601457, %s14170_s1  ;;  %s14172_s12 = spop %14171 }
 0x824   : > { %s4231_s24 = smul.f32 0.0002601457, %s14172_s12 }
 0x825   : > { %v4232_v20 = vstv %s4214_s22 }
 0x826   : > { %4233 = vst [vmem:[%s18379_s4 + $0x1] sm:$0x1] %v4232_v20  ;;  %v4234_v59 = vstv %s4231_s24 }
 0x827   : > { %4235 = vst [vmem:[%s18384_s25 + $0x1] sm:$0x1] %v4234_v59 }
 0x82f   : > { %v13156_v24 = vpop.f32.mrf.mxu1 }
 0x830   : > { %v18438_v53 = vmul.f32 0.25, %v13156_v24 }
 0x831   : > { %v4537_v18 = vpop.f32.mrf.mxu1 }
 0x832   : > { %v18444_v49 = vmul.f32 0.25, %v4537_v18 }
 0x837   : > { %v13159_v7 = vpop.f32.mrf.mxu1 }
 0x838   : > { %v18428_v41 = vmul.f32 0.25, %v13159_v7 }
 0x839   : > { %v4547_v55 = vpop.f32.mrf.mxu1 }
 0x83a   : > { %v18434_v38 = vmul.f32 0.25, %v4547_v55 }
 0x83f   : > { %v13162_v35 = vpop.f32.mrf.mxu1 }
 0x840   : > { %s14174_s13 = spop %14173  ;;  %v18420_v39 = vmul.f32 0.25, %v13162_v35 }
 0x841   : > { %s4252_s0 = smul.f32 0.0002601457, %s14174_s13  ;;  %s14176_s26 = spop %14175  ;;  %v4557_v33 = vpop.f32.mrf.mxu1 }
 0x842   : > { %s4269_s11 = smul.f32 0.0002601457, %s14176_s26  ;;  %v18424_v8 = vmul.f32 0.25, %v4557_v33  ;;  %v5667_v35 = vmul.f32 %v18420_v39, %v18420_v39 }
 0x843   : > { %v4270_v29 = vstv %s4252_s0 }
 0x844   : > { %4271 = vst [vmem:[%s18379_s4 + $0x2] sm:$0x1] %v4270_v29  ;;  %v4272_v43 = vstv %s4269_s11  ;;  %v5666_v33 = vmul.f32 %v18424_v8, %v18424_v8 }
 0x845   : > { %4273 = vst [vmem:[%s18384_s25 + $0x2] sm:$0x1] %v4272_v43 }
 0x847   : > { %v13165_v31 = vpop.f32.mrf.mxu1 }
 0x848   : > { %v18412_v23 = vmul.f32 0.25, %v13165_v31  ;;  %v5665_v31 = vmul.f32 %v18428_v41, %v18428_v41 }
 0x849   : > { %v4567_v51 = vpop.f32.mrf.mxu1 }
 0x84a   : > { %v18416_v0 = vmul.f32 0.25, %v4567_v51  ;;  %v5669_v29 = vmul.f32 %v18412_v23, %v18412_v23  ;;  %v5664_v51 = vmul.f32 %v18434_v38, %v18434_v38 }
 0x84c   : > { %v5668_v43 = vmul.f32 %v18416_v0, %v18416_v0 }
 0x84f   : > { %v13168_v6 = vpop.f32.mrf.mxu1 }
 0x850   : > { %v18404_v46 = vmul.f32 0.25, %v13168_v6  ;;  %v18590_v6 = vld [vmem:[#allocation15 + $0x8] sm:$0xff] }
 0x851   : > { %v4577_v27 = vpop.f32.mrf.mxu1 }
 0x852   : > { %v18408_v40 = vmul.f32 0.25, %v4577_v27  ;;  %v5671_v7 = vmul.f32 %v18404_v46, %v18404_v46  ;;  %v5663_v27 = vmul.f32 %v18438_v53, %v18438_v53 }
 0x854   : > { %v5670_v55 = vmul.f32 %v18408_v40, %v18408_v40 }
 0x857   : > { %v13171_v30 = vpop.f32.mrf.mxu1 }
 0x858   : > { %v18398_v26 = vmul.f32 0.25, %v13171_v30  ;;  %v18598_v30 = vld [vmem:[#allocation15] sm:$0xff] }
 0x859   : > { %v4587_v62 = vpop.f32.mrf.mxu1 }
 0x85a   : > { %v18400_v15 = vmul.f32 0.25, %v4587_v62  ;;  %13206 = vmatprep.subr.mxu1 %v18398_v26  ;;  %v5673_v24 = vmul.f32 %v18398_v26, %v18398_v26  ;;  %v5662_v62 = vmul.f32 %v18444_v49, %v18444_v49 }
 0x85b   : > { %13207 = vmatpush3.msra.mxu1 %v18398_v26 }
 0x85c   : > { %13208 = vmatprep.subr.mxu1 %v18400_v15  ;;  %v5672_v18 = vmul.f32 %v18400_v15, %v18400_v15 }
 0x85d   : > { %13209 = vmatpush3.msra.mxu1 %v18400_v15 }
 0x85e   : > { %13210 = vmatprep.subr.mxu1 %v18404_v46 }
 0x85f   : > { %13211 = vmatpush3.msra.mxu1 %v18404_v46  ;;  %v18431_v5 = vpop.f32.mrf.mxu1 }
 0x860   : > { %13212 = vmatprep.subr.mxu1 %v18408_v40  ;;  %v18541_v20 = vmul.f32 0.25, %v18431_v5 }
 0x861   : > { %13213 = vmatpush3.msra.mxu1 %v18408_v40  ;;  %v18441_v45 = vpop.f32.mrf.mxu1 }
 0x862   : > { %13214 = vmatprep.subr.mxu1 %v18412_v23  ;;  %v18546_v59 = vmul.f32 0.25, %v18441_v45 }
 0x863   : > { %13215 = vmatpush3.msra.mxu1 %v18412_v23 }
 0x864   : > { %13216 = vmatprep.subr.mxu1 %v18416_v0 }
 0x865   : > { %13217 = vmatpush3.msra.mxu1 %v18416_v0 }
 0x866   : > { %13218 = vmatprep.subr.mxu1 %v18420_v39 }
 0x867   : > { %13219 = vmatpush3.msra.mxu1 %v18420_v39  ;;  %v13193_v16 = vpop.f32.mrf.mxu1 }
 0x868   : > { %13220 = vmatprep.subr.mxu1 %v18424_v8  ;;  %v18532_v21 = vmul.f32 0.25, %v13193_v16 }
 0x869   : > { %13221 = vmatpush3.msra.mxu1 %v18424_v8  ;;  %v4845_v63 = vpop.f32.mrf.mxu1 }
 0x86a   : > { %13222 = vmatprep.subr.mxu1 %v18428_v41  ;;  %v18536_v4 = vmul.f32 0.25, %v4845_v63 }
 0x86b   : > { %13223 = vmatpush3.msra.mxu1 %v18428_v41 }
 0x86c   : > { %13224 = vmatprep.subr.mxu1 %v18434_v38 }
 0x86d   : > { %13225 = vmatpush3.msra.mxu1 %v18434_v38 }
 0x86e   : > { %13226 = vmatprep.subr.mxu1 %v18438_v53 }
 0x86f   : > { %13227 = vmatpush3.msra.mxu1 %v18438_v53  ;;  %v13196_v13 = vpop.f32.mrf.mxu1 }
 0x870   : > { %13228 = vmatprep.subr.mxu1 %v18444_v49  ;;  %v18524_v60 = vmul.f32 0.25, %v13196_v13 }
 0x871   : > { %13229 = vmatpush3.msra.mxu1 %v18444_v49  ;;  %v4855_v57 = vpop.f32.mrf.mxu1 }
 0x872   : > { %13231 = vmatmul.mubr.msk.f32.vlgmr.msra.gmra.mxu1 %vm4944_vm1, %v18448_v48  ;;  %13248 = vmatprep.subr.mxu1 %v18486_v2  ;;  %v18528_v10 = vmul.f32 0.25, %v4855_v57 }
 0x873   : > { %13233 = vmatprep.mubr.msk.f32.mxu1 %vm4944_vm1, %v18451_v47  ;;  %13249 = vmatpush3.msra.mxu1 %v18486_v2 }
 0x874   : > { %13250 = vmatprep.subr.mxu1 %v18488_v3 }
 0x875   : > { %13251 = vmatpush3.msra.mxu1 %v18488_v3 }
 0x876   : > { %13234 = vmatmul.mubr.msk.f32.gmra.mxu1 %vm4944_vm1, %v18458_v54  ;;  %13252 = vmatprep.subr.mxu1 %v18590_v6 }
 0x877   : > { %13236 = vmatprep.mubr.msk.f32.mxu1 %vm4944_vm1, %v18460_v42  ;;  %v13199_v37 = vpop.f32.mrf.mxu1  ;;  %13253 = vmatpush3.msra.mxu1 %v18590_v6 }
 0x878   : > { %v18516_v9 = vmul.f32 0.25, %v13199_v37  ;;  %13254 = vmatprep.subr.mxu1 %v18598_v30  ;;  %v5977_v37 = vmul.f32 %v18524_v60, %v18524_v60 }
 0x879   : > { %v4865_v22 = vpop.f32.mrf.mxu1  ;;  %13255 = vmatpush3.msra.mxu1 %v18598_v30 }
 0x87a   : > { %13237 = vmatmul.mubr.msk.f32.gmra.mxu1 %vm4944_vm1, %v18466_v56  ;;  %v18520_v52 = vmul.f32 0.25, %v4865_v22  ;;  %13316 = vmatprep.subr.mxu1 %v18486_v2  ;;  %v5979_v13 = vmul.f32 %v18516_v9, %v18516_v9  ;;  %v5976_v22 = vmul.f32 %v18528_v10, %v18528_v10 }
 0x87b   : > { %13239 = vmatprep.mubr.msk.f32.mxu1 %vm4944_vm1, %v18468_v44 }
 0x87c   : > { %v5978_v57 = vmul.f32 %v18520_v52, %v18520_v52 }
 0x87e   : > { %13240 = vmatmul.mubr.msk.f32.gmra.mxu1 %vm4944_vm1, %v18474_v25 }
 0x87f   : > { %13242 = vmatprep.mubr.msk.f32.mxu1 %vm4944_vm1, %v18476_v11  ;;  %v13202_v1 = vpop.f32.mrf.mxu1 }
 0x880   : > { %v18508_v36 = vmul.f32 0.25, %v13202_v1  ;;  %v5975_v1 = vmul.f32 %v18532_v21, %v18532_v21 }
 0x881   : > { %v4875_v32 = vpop.f32.mrf.mxu1 }
 0x882   : > { %13243 = vmatmul.mubr.msk.f32.gmra.mxu1 %vm4944_vm1, %v18482_v50  ;;  %v18512_v58 = vmul.f32 0.25, %v4875_v32  ;;  %v5981_v16 = vmul.f32 %v18508_v36, %v18508_v36  ;;  %v5974_v32 = vmul.f32 %v18536_v4, %v18536_v4 }
 0x883   : > { %13245 = vmatprep.mubr.msk.f32.mxu1 %vm4944_vm1, %v18484_v19 }
 0x884   : > { %v5980_v63 = vmul.f32 %v18512_v58, %v18512_v58 }
 0x886   : > { %13246 = vmatmul.mubr.msk.f32.gmra.mxu1 %vm4944_vm1, %v18495_v17 }
 0x887   : > { %v13205_v12 = vpop.f32.mrf.mxu1 }
 0x888   : > { %v18502_v14 = vmul.f32 0.25, %v13205_v12  ;;  %v5973_v12 = vmul.f32 %v18541_v20, %v18541_v20 }
 0x889   : > { %v4885_v34 = vpop.f32.mrf.mxu1 }
 0x88a   : > { %v18504_v61 = vmul.f32 0.25, %v4885_v34  ;;  %13274 = vmatprep.subr.mxu0 %v18502_v14  ;;  %v5983_v5 = vmul.f32 %v18502_v14, %v18502_v14  ;;  %v5972_v34 = vmul.f32 %v18546_v59, %v18546_v59 }
 0x88b   : > { %13275 = vmatpush3.msra.mxu0 %v18502_v14 }
 0x88c   : > { %13276 = vmatprep.subr.mxu0 %v18504_v61  ;;  %v5982_v45 = vmul.f32 %v18504_v61, %v18504_v61 }
 0x88d   : > { %13277 = vmatpush3.msra.mxu0 %v18504_v61 }
 0x88e   : > { %13278 = vmatprep.subr.mxu0 %v18508_v36 }
 0x88f   : > { %13279 = vmatpush3.msra.mxu0 %v18508_v36 }
 0x890   : > { %13280 = vmatprep.subr.mxu0 %v18512_v58 }
 0x891   : > { %13281 = vmatpush3.msra.mxu0 %v18512_v58 }
 0x892   : > { %13282 = vmatprep.subr.mxu0 %v18516_v9 }
 0x893   : > { %13283 = vmatpush3.msra.mxu0 %v18516_v9 }
 0x894   : > { %13284 = vmatprep.subr.mxu0 %v18520_v52 }
 0x895   : > { %13285 = vmatpush3.msra.mxu0 %v18520_v52 }
 0x896   : > { %13286 = vmatprep.subr.mxu0 %v18524_v60 }
 0x897   : > { %13287 = vmatpush3.msra.mxu0 %v18524_v60 }
 0x898   : > { %13288 = vmatprep.subr.mxu0 %v18528_v10 }
 0x899   : > { %13289 = vmatpush3.msra.mxu0 %v18528_v10 }
 0x89a   : > { %13290 = vmatprep.subr.mxu0 %v18532_v21 }
 0x89b   : > { %13291 = vmatpush3.msra.mxu0 %v18532_v21 }
 0x89c   : > { %13292 = vmatprep.subr.mxu0 %v18536_v4 }
 0x89d   : > { %13293 = vmatpush3.msra.mxu0 %v18536_v4 }
 0x89e   : > { %13294 = vmatprep.subr.mxu0 %v18541_v20 }
 0x89f   : > { %13295 = vmatpush3.msra.mxu0 %v18541_v20 }
 0x8a0   : > { %13296 = vmatprep.subr.mxu0 %v18546_v59 }
 0x8a1   : > { %13297 = vmatpush3.msra.mxu0 %v18546_v59 }
 0x8a2   : > { %13299 = vmatmul.mubr.msk.f32.vlgmr.msra.gmra.mxu0 %vm4944_vm1, %v18448_v48  ;;  %13342 = vmatprep.subr.mxu0 %v5673_v24 }
 0x8a3   : > { %13343 = vmatpush3.msra.mxu0 %v5673_v24  ;;  %13301 = vmatprep.mubr.msk.f32.mxu0 %vm4944_vm1, %v18451_v47  ;;  %v6293_v24 = vmul.f32 %v18502_v14, %v18398_v26 }
 0x8a4   : > { %13344 = vmatprep.subr.mxu0 %v5672_v18 }
 0x8a5   : > { %13345 = vmatpush3.msra.mxu0 %v5672_v18  ;;  %v6292_v18 = vmul.f32 %v18504_v61, %v18400_v15 }
 0x8a6   : > { %13302 = vmatmul.mubr.msk.f32.gmra.mxu0 %vm4944_vm1, %v18458_v54  ;;  %13346 = vmatprep.subr.mxu0 %v5671_v7 }
 0x8a7   : > { %13347 = vmatpush3.msra.mxu0 %v5671_v7  ;;  %13304 = vmatprep.mubr.msk.f32.mxu0 %vm4944_vm1, %v18460_v42  ;;  %v6291_v7 = vmul.f32 %v18508_v36, %v18404_v46 }
 0x8a8   : > { %13348 = vmatprep.subr.mxu0 %v5670_v55 }
 0x8a9   : > { %13349 = vmatpush3.msra.mxu0 %v5670_v55  ;;  %v6290_v55 = vmul.f32 %v18512_v58, %v18408_v40 }
 0x8aa   : > { %13305 = vmatmul.mubr.msk.f32.gmra.mxu0 %vm4944_vm1, %v18466_v56  ;;  %13350 = vmatprep.subr.mxu0 %v5669_v29 }
 0x8ab   : > { %13351 = vmatpush3.msra.mxu0 %v5669_v29  ;;  %13307 = vmatprep.mubr.msk.f32.mxu0 %vm4944_vm1, %v18468_v44  ;;  %v6289_v29 = vmul.f32 %v18516_v9, %v18412_v23 }
 0x8ac   : > { %13352 = vmatprep.subr.mxu0 %v5668_v43 }
 0x8ad   : > { %13353 = vmatpush3.msra.mxu0 %v5668_v43  ;;  %v6288_v43 = vmul.f32 %v18520_v52, %v18416_v0 }
 0x8ae   : > { %13308 = vmatmul.mubr.msk.f32.gmra.mxu0 %vm4944_vm1, %v18474_v25  ;;  %13354 = vmatprep.subr.mxu0 %v5667_v35 }
 0x8af   : > { %13355 = vmatpush3.msra.mxu0 %v5667_v35  ;;  %13310 = vmatprep.mubr.msk.f32.mxu0 %vm4944_vm1, %v18476_v11  ;;  %v6287_v35 = vmul.f32 %v18524_v60, %v18420_v39 }
 0x8b0   : > { %13356 = vmatprep.subr.mxu0 %v5666_v33 }
 0x8b1   : > { %13357 = vmatpush3.msra.mxu0 %v5666_v33  ;;  %v6286_v33 = vmul.f32 %v18528_v10, %v18424_v8 }
 0x8b2   : > { %13311 = vmatmul.mubr.msk.f32.gmra.mxu0 %vm4944_vm1, %v18482_v50  ;;  %13358 = vmatprep.subr.mxu0 %v5665_v31 }
 0x8b3   : > { %13359 = vmatpush3.msra.mxu0 %v5665_v31  ;;  %13313 = vmatprep.mubr.msk.f32.mxu0 %vm4944_vm1, %v18484_v19  ;;  %v6285_v31 = vmul.f32 %v18532_v21, %v18428_v41 }
 0x8b4   : > { %13360 = vmatprep.subr.mxu0 %v5664_v51 }
 0x8b5   : > { %13361 = vmatpush3.msra.mxu0 %v5664_v51  ;;  %v6284_v51 = vmul.f32 %v18536_v4, %v18434_v38 }
 0x8b6   : > { %13314 = vmatmul.mubr.msk.f32.gmra.mxu0 %vm4944_vm1, %v18495_v17  ;;  %13362 = vmatprep.subr.mxu0 %v5663_v27 }
 0x8b7   : > { %13363 = vmatpush3.msra.mxu0 %v5663_v27  ;;  %13366 = vmatprep.mubr.msk.f32.mxu0 %vm4944_vm1, %v18386_v28  ;;  %v6283_v27 = vmul.f32 %v18541_v20, %v18438_v53 }
 0x8b8   : > { %13364 = vmatprep.subr.mxu0 %v5662_v62 }
 0x8b9   : > { %13365 = vmatpush3.msra.mxu0 %v5662_v62  ;;  %v6282_v62 = vmul.f32 %v18546_v59, %v18444_v49 }
 0x8ba   : > { %13367 = vmatmul.mubr.msk.f32.vlgmr.msra.gmra.mxu0 %vm4944_vm1, %v18448_v48  ;;  %13410 = vmatprep.subr.mxu0 %v5983_v5 }
 0x8bb   : > { %13411 = vmatpush3.msra.mxu0 %v5983_v5  ;;  %13369 = vmatprep.mubr.msk.f32.mxu0 %vm4944_vm1, %v18451_v47 }
 0x8bc   : > { %13412 = vmatprep.subr.mxu0 %v5982_v45 }
 0x8bd   : > { %13413 = vmatpush3.msra.mxu0 %v5982_v45 }
 0x8be   : > { %13370 = vmatmul.mubr.msk.f32.gmra.mxu0 %vm4944_vm1, %v18458_v54  ;;  %13414 = vmatprep.subr.mxu0 %v5981_v16 }
 0x8bf   : > { %13415 = vmatpush3.msra.mxu0 %v5981_v16  ;;  %13372 = vmatprep.mubr.msk.f32.mxu0 %vm4944_vm1, %v18460_v42 }
 0x8c0   : > { %13416 = vmatprep.subr.mxu0 %v5980_v63 }
 0x8c1   : > { %13417 = vmatpush3.msra.mxu0 %v5980_v63 }
 0x8c2   : > { %13373 = vmatmul.mubr.msk.f32.gmra.mxu0 %vm4944_vm1, %v18466_v56  ;;  %13418 = vmatprep.subr.mxu0 %v5979_v13 }
 0x8c3   : > { %13419 = vmatpush3.msra.mxu0 %v5979_v13  ;;  %13375 = vmatprep.mubr.msk.f32.mxu0 %vm4944_vm1, %v18468_v44 }
 0x8c4   : > { %13420 = vmatprep.subr.mxu0 %v5978_v57 }
 0x8c5   : > { %13421 = vmatpush3.msra.mxu0 %v5978_v57 }
 0x8c6   : > { %13376 = vmatmul.mubr.msk.f32.gmra.mxu0 %vm4944_vm1, %v18474_v25  ;;  %13422 = vmatprep.subr.mxu0 %v5977_v37 }
 0x8c7   : > { %13423 = vmatpush3.msra.mxu0 %v5977_v37  ;;  %13378 = vmatprep.mubr.msk.f32.mxu0 %vm4944_vm1, %v18476_v11 }
 0x8c8   : > { %13424 = vmatprep.subr.mxu0 %v5976_v22 }
 0x8c9   : > { %13425 = vmatpush3.msra.mxu0 %v5976_v22 }
 0x8ca   : > { %13379 = vmatmul.mubr.msk.f32.gmra.mxu0 %vm4944_vm1, %v18482_v50  ;;  %13426 = vmatprep.subr.mxu0 %v5975_v1 }
 0x8cb   : > { %13427 = vmatpush3.msra.mxu0 %v5975_v1  ;;  %13381 = vmatprep.mubr.msk.f32.mxu0 %vm4944_vm1, %v18484_v19 }
 0x8cc   : > { %13428 = vmatprep.subr.mxu0 %v5974_v32 }
 0x8cd   : > { %13429 = vmatpush3.msra.mxu0 %v5974_v32 }
 0x8ce   : > { %13382 = vmatmul.mubr.msk.f32.gmra.mxu0 %vm4944_vm1, %v18495_v17  ;;  %13430 = vmatprep.subr.mxu0 %v5973_v12 }
 0x8cf   : > { %13431 = vmatpush3.msra.mxu0 %v5973_v12  ;;  %13434 = vmatprep.mubr.msk.f32.mxu0 %vm4944_vm1, %v18386_v28 }
 0x8d0   : > { %13432 = vmatprep.subr.mxu0 %v5972_v34 }
 0x8d1   : > { %13433 = vmatpush3.msra.mxu0 %v5972_v34 }
 0x8d2   : > { %13435 = vmatmul.mubr.msk.f32.vlgmr.msra.gmra.mxu0 %vm4944_vm1, %v18448_v48  ;;  %13478 = vmatprep.subr.mxu0 %v6293_v24 }
 0x8d3   : > { %13479 = vmatpush3.msra.mxu0 %v6293_v24  ;;  %13437 = vmatprep.mubr.msk.f32.mxu0 %vm4944_vm1, %v18451_v47 }
 0x8d4   : > { %13480 = vmatprep.subr.mxu0 %v6292_v18 }
 0x8d5   : > { %13481 = vmatpush3.msra.mxu0 %v6292_v18 }
 0x8d6   : > { %13438 = vmatmul.mubr.msk.f32.gmra.mxu0 %vm4944_vm1, %v18458_v54  ;;  %13482 = vmatprep.subr.mxu0 %v6291_v7 }
 0x8d7   : > { %13483 = vmatpush3.msra.mxu0 %v6291_v7  ;;  %13440 = vmatprep.mubr.msk.f32.mxu0 %vm4944_vm1, %v18460_v42 }
 0x8d8   : > { %13484 = vmatprep.subr.mxu0 %v6290_v55 }
 0x8d9   : > { %13485 = vmatpush3.msra.mxu0 %v6290_v55 }
 0x8da   : > { %13441 = vmatmul.mubr.msk.f32.gmra.mxu0 %vm4944_vm1, %v18466_v56  ;;  %13486 = vmatprep.subr.mxu0 %v6289_v29 }
 0x8db   : > { %13487 = vmatpush3.msra.mxu0 %v6289_v29  ;;  %13443 = vmatprep.mubr.msk.f32.mxu0 %vm4944_vm1, %v18468_v44 }
 0x8dc   : > { %13488 = vmatprep.subr.mxu0 %v6288_v43 }
 0x8dd   : > { %13489 = vmatpush3.msra.mxu0 %v6288_v43 }
 0x8de   : > { %13444 = vmatmul.mubr.msk.f32.gmra.mxu0 %vm4944_vm1, %v18474_v25  ;;  %13490 = vmatprep.subr.mxu0 %v6287_v35 }
 0x8df   : > { %13491 = vmatpush3.msra.mxu0 %v6287_v35  ;;  %13446 = vmatprep.mubr.msk.f32.mxu0 %vm4944_vm1, %v18476_v11 }
 0x8e0   : > { %13492 = vmatprep.subr.mxu0 %v6286_v33 }
 0x8e1   : > { %13493 = vmatpush3.msra.mxu0 %v6286_v33 }
 0x8e2   : > { %13447 = vmatmul.mubr.msk.f32.gmra.mxu0 %vm4944_vm1, %v18482_v50  ;;  %13494 = vmatprep.subr.mxu0 %v6285_v31 }
 0x8e3   : > { %13495 = vmatpush3.msra.mxu0 %v6285_v31  ;;  %13449 = vmatprep.mubr.msk.f32.mxu0 %vm4944_vm1, %v18484_v19 }
 0x8e4   : > { %13496 = vmatprep.subr.mxu0 %v6284_v51 }
 0x8e5   : > { %13497 = vmatpush3.msra.mxu0 %v6284_v51 }
 0x8e6   : > { %13450 = vmatmul.mubr.msk.f32.gmra.mxu0 %vm4944_vm1, %v18495_v17  ;;  %13498 = vmatprep.subr.mxu0 %v6283_v27 }
 0x8e7   : > { %13499 = vmatpush3.msra.mxu0 %v6283_v27  ;;  %13502 = vmatprep.mubr.msk.f32.mxu0 %vm4944_vm1, %v18386_v28  ;;  %v18751_v28 = vld [vmem:[#allocation18] sm:$0xff] }
 0x8e8   : > { %13500 = vmatprep.subr.mxu0 %v6282_v62 }
 0x8e9   : > { %13501 = vmatpush3.msra.mxu0 %v6282_v62 }
 0x8ea   : > { %13503 = vmatmul.mubr.msk.f32.vlgmr.msra.gmra.mxu0 %vm4944_vm1, %v18448_v48  ;;  %13546 = vmatprep.subr.mxu0 %v18398_v26 }
 0x8eb   : > { %13547 = vmatpush3.msra.mxu0 %v18398_v26  ;;  %13505 = vmatprep.mubr.msk.f32.mxu0 %vm4944_vm1, %v18451_v47  ;;  %v18755_v26 = vld [vmem:[#allocation18 + $0x8] sm:$0xff] }
 0x8ec   : > { %13548 = vmatprep.subr.mxu0 %v18400_v15 }
 0x8ed   : > { %13549 = vmatpush3.msra.mxu0 %v18400_v15  ;;  %v18759_v15 = vld [vmem:[#allocation18 + $0x10] sm:$0xff] }
 0x8ee   : > { %13506 = vmatmul.mubr.msk.f32.gmra.mxu0 %vm4944_vm1, %v18458_v54  ;;  %13550 = vmatprep.subr.mxu0 %v18404_v46 }
 0x8ef   : > { %13551 = vmatpush3.msra.mxu0 %v18404_v46  ;;  %13508 = vmatprep.mubr.msk.f32.mxu0 %vm4944_vm1, %v18460_v42  ;;  %v18763_v46 = vld [vmem:[#allocation18 + $0x18] sm:$0xff] }
 0x8f0   : > { %13552 = vmatprep.subr.mxu0 %v18408_v40 }
 0x8f1   : > { %13553 = vmatpush3.msra.mxu0 %v18408_v40  ;;  %v18767_v40 = vld [vmem:[#allocation18 + $0x20] sm:$0xff] }
 0x8f2   : > { %13509 = vmatmul.mubr.msk.f32.gmra.mxu0 %vm4944_vm1, %v18466_v56  ;;  %13554 = vmatprep.subr.mxu0 %v18412_v23 }
 0x8f3   : > { %13555 = vmatpush3.msra.mxu0 %v18412_v23  ;;  %13511 = vmatprep.mubr.msk.f32.mxu0 %vm4944_vm1, %v18468_v44  ;;  %v18771_v23 = vld [vmem:[#allocation18 + $0x28] sm:$0xff] }
 0x8f4   : > { %13556 = vmatprep.subr.mxu0 %v18416_v0 }
 0x8f5   : > { %13557 = vmatpush3.msra.mxu0 %v18416_v0 }
 0x8f6   : > { %13512 = vmatmul.mubr.msk.f32.gmra.mxu0 %vm4944_vm1, %v18474_v25  ;;  %13558 = vmatprep.subr.mxu0 %v18420_v39 }
 0x8f7   : > { %13559 = vmatpush3.msra.mxu0 %v18420_v39  ;;  %13514 = vmatprep.mubr.msk.f32.mxu0 %vm4944_vm1, %v18476_v11 }
 0x8f8   : > { %13560 = vmatprep.subr.mxu0 %v18424_v8 }
 0x8f9   : > { %13561 = vmatpush3.msra.mxu0 %v18424_v8 }
 0x8fa   : > { %13515 = vmatmul.mubr.msk.f32.gmra.mxu0 %vm4944_vm1, %v18482_v50  ;;  %13562 = vmatprep.subr.mxu0 %v18428_v41 }
 0x8fb   : > { %13563 = vmatpush3.msra.mxu0 %v18428_v41  ;;  %13517 = vmatprep.mubr.msk.f32.mxu0 %vm4944_vm1, %v18484_v19 }
 0x8fc   : > { %13564 = vmatprep.subr.mxu0 %v18434_v38 }
 0x8fd   : > { %13565 = vmatpush3.msra.mxu0 %v18434_v38 }
 0x8fe   : > { %13518 = vmatmul.mubr.msk.f32.gmra.mxu0 %vm4944_vm1, %v18495_v17  ;;  %13566 = vmatprep.subr.mxu0 %v18438_v53 }
 0x8ff   : > { %13567 = vmatpush3.msra.mxu0 %v18438_v53  ;;  %13570 = vmatprep.mubr.msk.f32.mxu0 %vm4944_vm1, %v18751_v28 }
 0x900   : > { %13568 = vmatprep.subr.mxu0 %v18444_v49 }
 0x901   : > { %13569 = vmatpush3.msra.mxu0 %v18444_v49 }
 0x902   : > { %13571 = vmatmul.mubr.msk.f32.vlgmr.msra.gmra.mxu0 %vm4944_vm1, %v18755_v26 }
 0x903   : > { %13573 = vmatprep.mubr.msk.f32.mxu0 %vm4944_vm1, %v18759_v15 }
 0x906   : > { %13574 = vmatmul.mubr.msk.f32.gmra.mxu0 %vm4944_vm1, %v18763_v46 }
 0x907   : > { %13576 = vmatprep.mubr.msk.f32.mxu0 %vm4944_vm1, %v18767_v40 }
 0x90a   : > { %13577 = vmatmul.mubr.msk.f32.gmra.mxu0 %vm4944_vm1, %v18771_v23 }
 0x932   : > { %v13232_v0 = vpop.f32.mrf.mxu1 }
 0x934   : > { %v5047_v39 = vpop.f32.mrf.mxu1 }
 0x935   : > { %13256 = vmatprep.mubr.msk.f32.mxu1 %vm5106_vm2, %v5047_v39 }
 0x936   : > { %v13235_v8 = vpop.f32.mrf.mxu1  ;;  %13257 = vmatmul.mubr.msk.f32.vlgmr.msra.gmra.mxu1 %vm5106_vm2, %v13232_v0 }
 0x937   : > { %13317 = vmatpush3.msra.mxu1 %v18486_v2 }
 0x938   : > { %v5057_v41 = vpop.f32.mrf.mxu1  ;;  %13318 = vmatprep.subr.mxu1 %v18488_v3 }
 0x939   : > { %13259 = vmatprep.mubr.msk.f32.mxu1 %vm5106_vm2, %v5057_v41  ;;  %13319 = vmatpush3.msra.mxu1 %v18488_v3 }
 0x93a   : > { %v13238_v38 = vpop.f32.mrf.mxu1  ;;  %13260 = vmatmul.mubr.msk.f32.gmra.mxu1 %vm5106_vm2, %v13235_v8  ;;  %13320 = vmatprep.subr.mxu1 %v18590_v6 }
 0x93b   : > { %13321 = vmatpush3.msra.mxu1 %v18590_v6 }
 0x93c   : > { %v5067_v53 = vpop.f32.mrf.mxu1  ;;  %13322 = vmatprep.subr.mxu1 %v18598_v30 }
 0x93d   : > { %13262 = vmatprep.mubr.msk.f32.mxu1 %vm5106_vm2, %v5067_v53  ;;  %13323 = vmatpush3.msra.mxu1 %v18598_v30 }
 0x93e   : > { %v13241_v49 = vpop.f32.mrf.mxu1  ;;  %13263 = vmatmul.mubr.msk.f32.gmra.mxu1 %vm5106_vm2, %v13238_v38  ;;  %13384 = vmatprep.subr.mxu1 %v18486_v2 }
 0x940   : > { %v5077_v48 = vpop.f32.mrf.mxu1 }
 0x941   : > { %13265 = vmatprep.mubr.msk.f32.mxu1 %vm5106_vm2, %v5077_v48 }
 0x942   : > { %v13244_v47 = vpop.f32.mrf.mxu1  ;;  %13266 = vmatmul.mubr.msk.f32.gmra.mxu1 %vm5106_vm2, %v13241_v49 }
 0x944   : > { %v5087_v54 = vpop.f32.mrf.mxu1 }
 0x945   : > { %13268 = vmatprep.mubr.msk.f32.mxu1 %vm5106_vm2, %v5087_v54 }
 0x946   : > { %v13247_v42 = vpop.f32.mrf.mxu1  ;;  %13269 = vmatmul.mubr.msk.f32.gmra.mxu1 %vm5106_vm2, %v13244_v47 }
 0x948   : > { %v5097_v56 = vpop.f32.mrf.mxu1 }
 0x949   : > { %13271 = vmatprep.mubr.msk.f32.mxu1 %vm5106_vm2, %v5097_v56 }
 0x94a   : > { %13272 = vmatmul.mubr.msk.f32.gmra.mxu1 %vm5106_vm2, %v13247_v42 }
 0x962   : > { %v13300_v44 = vpop.f32.mrf.mxu0 }
 0x964   : > { %v5334_v25 = vpop.f32.mrf.mxu0 }
 0x965   : > { %13324 = vmatprep.mubr.msk.f32.mxu1 %vm5106_vm2, %v5334_v25 }
 0x966   : > { %v13303_v11 = vpop.f32.mrf.mxu0  ;;  %13325 = vmatmul.mubr.msk.f32.vlgmr.msra.gmra.mxu1 %vm5106_vm2, %v13300_v44 }
 0x967   : > { %13385 = vmatpush3.msra.mxu1 %v18486_v2 }
 0x968   : > { %v5344_v50 = vpop.f32.mrf.mxu0  ;;  %13386 = vmatprep.subr.mxu1 %v18488_v3 }
 0x969   : > { %13327 = vmatprep.mubr.msk.f32.mxu1 %vm5106_vm2, %v5344_v50  ;;  %13387 = vmatpush3.msra.mxu1 %v18488_v3 }
 0x96a   : > { %v13306_v19 = vpop.f32.mrf.mxu0  ;;  %13328 = vmatmul.mubr.msk.f32.gmra.mxu1 %vm5106_vm2, %v13303_v11  ;;  %13388 = vmatprep.subr.mxu1 %v18590_v6 }
 0x96b   : > { %13389 = vmatpush3.msra.mxu1 %v18590_v6 }
 0x96c   : > { %v5354_v17 = vpop.f32.mrf.mxu0  ;;  %13390 = vmatprep.subr.mxu1 %v18598_v30 }
 0x96d   : > { %13330 = vmatprep.mubr.msk.f32.mxu1 %vm5106_vm2, %v5354_v17  ;;  %13391 = vmatpush3.msra.mxu1 %v18598_v30 }
 0x96e   : > { %v13309_v5 = vpop.f32.mrf.mxu0  ;;  %13331 = vmatmul.mubr.msk.f32.gmra.mxu1 %vm5106_vm2, %v13306_v19  ;;  %13452 = vmatprep.subr.mxu1 %v18486_v2 }
 0x970   : > { %v5364_v45 = vpop.f32.mrf.mxu0 }
 0x971   : > { %13333 = vmatprep.mubr.msk.f32.mxu1 %vm5106_vm2, %v5364_v45 }
 0x972   : > { %v13312_v16 = vpop.f32.mrf.mxu0  ;;  %13334 = vmatmul.mubr.msk.f32.gmra.mxu1 %vm5106_vm2, %v13309_v5 }
 0x974   : > { %v5374_v63 = vpop.f32.mrf.mxu0 }
 0x975   : > { %13336 = vmatprep.mubr.msk.f32.mxu1 %vm5106_vm2, %v5374_v63 }
 0x976   : > { %v13315_v13 = vpop.f32.mrf.mxu0  ;;  %13337 = vmatmul.mubr.msk.f32.gmra.mxu1 %vm5106_vm2, %v13312_v16 }
 0x978   : > { %v5384_v57 = vpop.f32.mrf.mxu0 }
 0x979   : > { %13339 = vmatprep.mubr.msk.f32.mxu1 %vm5106_vm2, %v5384_v57 }
 0x97a   : > { %13340 = vmatmul.mubr.msk.f32.gmra.mxu1 %vm5106_vm2, %v13315_v13  ;;  %v13368_v37 = vpop.f32.mrf.mxu0 }
 0x97c   : > { %v5740_v22 = vpop.f32.mrf.mxu0 }
 0x97d   : > { %13392 = vmatprep.mubr.msk.f32.mxu1 %vm5106_vm2, %v5740_v22 }
 0x97e   : > { %v13371_v1 = vpop.f32.mrf.mxu0  ;;  %13393 = vmatmul.mubr.msk.f32.vlgmr.msra.gmra.mxu1 %vm5106_vm2, %v13368_v37 }
 0x97f   : > { %13453 = vmatpush3.msra.mxu1 %v18486_v2 }
 0x980   : > { %v5750_v32 = vpop.f32.mrf.mxu0  ;;  %13454 = vmatprep.subr.mxu1 %v18488_v3 }
 0x981   : > { %13395 = vmatprep.mubr.msk.f32.mxu1 %vm5106_vm2, %v5750_v32  ;;  %13455 = vmatpush3.msra.mxu1 %v18488_v3 }
 0x982   : > { %v13374_v12 = vpop.f32.mrf.mxu0  ;;  %13396 = vmatmul.mubr.msk.f32.gmra.mxu1 %vm5106_vm2, %v13371_v1  ;;  %13456 = vmatprep.subr.mxu1 %v18590_v6 }
 0x983   : > { %13457 = vmatpush3.msra.mxu1 %v18590_v6 }
 0x984   : > { %v5760_v34 = vpop.f32.mrf.mxu0  ;;  %13458 = vmatprep.subr.mxu1 %v18598_v30 }
 0x985   : > { %13398 = vmatprep.mubr.msk.f32.mxu1 %vm5106_vm2, %v5760_v34  ;;  %13459 = vmatpush3.msra.mxu1 %v18598_v30 }
 0x986   : > { %v13377_v24 = vpop.f32.mrf.mxu0  ;;  %13399 = vmatmul.mubr.msk.f32.gmra.mxu1 %vm5106_vm2, %v13374_v12  ;;  %13520 = vmatprep.subr.mxu1 %v18486_v2 }
 0x988   : > { %v5770_v18 = vpop.f32.mrf.mxu0 }
 0x989   : > { %13401 = vmatprep.mubr.msk.f32.mxu1 %vm5106_vm2, %v5770_v18 }
 0x98a   : > { %v13380_v7 = vpop.f32.mrf.mxu0  ;;  %13402 = vmatmul.mubr.msk.f32.gmra.mxu1 %vm5106_vm2, %v13377_v24 }
 0x98c   : > { %v5780_v55 = vpop.f32.mrf.mxu0 }
 0x98d   : > { %13404 = vmatprep.mubr.msk.f32.mxu1 %vm5106_vm2, %v5780_v55 }
 0x98e   : > { %v13383_v29 = vpop.f32.mrf.mxu0  ;;  %13405 = vmatmul.mubr.msk.f32.gmra.mxu1 %vm5106_vm2, %v13380_v7 }
 0x990   : > { %v5790_v43 = vpop.f32.mrf.mxu0 }
 0x991   : > { %13407 = vmatprep.mubr.msk.f32.mxu1 %vm5106_vm2, %v5790_v43 }
 0x992   : > { %13408 = vmatmul.mubr.msk.f32.gmra.mxu1 %vm5106_vm2, %v13383_v29  ;;  %v13436_v35 = vpop.f32.mrf.mxu0 }
 0x994   : > { %v6050_v33 = vpop.f32.mrf.mxu0 }
 0x995   : > { %13460 = vmatprep.mubr.msk.f32.mxu1 %vm5106_vm2, %v6050_v33 }
 0x996   : > { %v13439_v31 = vpop.f32.mrf.mxu0  ;;  %13461 = vmatmul.mubr.msk.f32.vlgmr.msra.gmra.mxu1 %vm5106_vm2, %v13436_v35 }
 0x997   : > { %13521 = vmatpush3.msra.mxu1 %v18486_v2 }
 0x998   : > { %13522 = vmatprep.subr.mxu1 %v18488_v3  ;;  %v6060_v51 = vpop.f32.mrf.mxu0 }
 0x999   : > { %13523 = vmatpush3.msra.mxu1 %v18488_v3  ;;  %13463 = vmatprep.mubr.msk.f32.mxu1 %vm5106_vm2, %v6060_v51 }
 0x99a   : > { %13524 = vmatprep.subr.mxu1 %v18590_v6  ;;  %v13442_v27 = vpop.f32.mrf.mxu0  ;;  %13464 = vmatmul.mubr.msk.f32.gmra.mxu1 %vm5106_vm2, %v13439_v31 }
 0x99b   : > { %13525 = vmatpush3.msra.mxu1 %v18590_v6 }
 0x99c   : > { %13526 = vmatprep.subr.mxu1 %v18598_v30  ;;  %v6070_v62 = vpop.f32.mrf.mxu0 }
 0x99d   : > { %13527 = vmatpush3.msra.mxu1 %v18598_v30  ;;  %13466 = vmatprep.mubr.msk.f32.mxu1 %vm5106_vm2, %v6070_v62 }
 0x99e   : > { %13596 = vmatprep.subr.mxu1 %v18502_v14  ;;  %v13445_v2 = vpop.f32.mrf.mxu0  ;;  %13467 = vmatmul.mubr.msk.f32.gmra.mxu1 %vm5106_vm2, %v13442_v27 }
 0x9a0   : > { %v6080_v3 = vpop.f32.mrf.mxu0 }
 0x9a1   : > { %13469 = vmatprep.mubr.msk.f32.mxu1 %vm5106_vm2, %v6080_v3 }
 0x9a2   : > { %v13448_v0 = vpop.f32.mrf.mxu0  ;;  %13470 = vmatmul.mubr.msk.f32.gmra.mxu1 %vm5106_vm2, %v13445_v2 }
 0x9a4   : > { %v6090_v39 = vpop.f32.mrf.mxu0 }
 0x9a5   : > { %13472 = vmatprep.mubr.msk.f32.mxu1 %vm5106_vm2, %v6090_v39 }
 0x9a6   : > { %v13451_v6 = vpop.f32.mrf.mxu0  ;;  %13473 = vmatmul.mubr.msk.f32.gmra.mxu1 %vm5106_vm2, %v13448_v0 }
 0x9a8   : > { %v6100_v30 = vpop.f32.mrf.mxu0 }
 0x9a9   : > { %13475 = vmatprep.mubr.msk.f32.mxu1 %vm5106_vm2, %v6100_v30 }
 0x9aa   : > { %13476 = vmatmul.mubr.msk.f32.gmra.mxu1 %vm5106_vm2, %v13451_v6  ;;  %v13504_v8 = vpop.f32.mrf.mxu0 }
 0x9ac   : > { %v6360_v41 = vpop.f32.mrf.mxu0 }
 0x9ad   : > { %13528 = vmatprep.mubr.msk.f32.mxu1 %vm5106_vm2, %v6360_v41 }
 0x9ae   : > { %v13507_v38 = vpop.f32.mrf.mxu0  ;;  %13529 = vmatmul.mubr.msk.f32.vlgmr.msra.gmra.mxu1 %vm5106_vm2, %v13504_v8 }
 0x9af   : > { %13597 = vmatpush3.msra.mxu1 %v18502_v14 }
 0x9b0   : > { %13598 = vmatprep.subr.mxu1 %v18504_v61  ;;  %v6370_v53 = vpop.f32.mrf.mxu0 }
 0x9b1   : > { %13599 = vmatpush3.msra.mxu1 %v18504_v61  ;;  %13531 = vmatprep.mubr.msk.f32.mxu1 %vm5106_vm2, %v6370_v53 }
 0x9b2   : > { %13600 = vmatprep.subr.mxu1 %v18508_v36  ;;  %v13510_v49 = vpop.f32.mrf.mxu0  ;;  %13532 = vmatmul.mubr.msk.f32.gmra.mxu1 %vm5106_vm2, %v13507_v38 }
 0x9b3   : > { %13601 = vmatpush3.msra.mxu1 %v18508_v36 }
 0x9b4   : > { %13602 = vmatprep.subr.mxu1 %v18512_v58  ;;  %v6380_v48 = vpop.f32.mrf.mxu0 }
 0x9b5   : > { %13603 = vmatpush3.msra.mxu1 %v18512_v58  ;;  %13534 = vmatprep.mubr.msk.f32.mxu1 %vm5106_vm2, %v6380_v48 }
 0x9b6   : > { %13604 = vmatprep.subr.mxu1 %v18516_v9  ;;  %v13513_v14 = vpop.f32.mrf.mxu0  ;;  %13535 = vmatmul.mubr.msk.f32.gmra.mxu1 %vm5106_vm2, %v13510_v49 }
 0x9b7   : > { %13605 = vmatpush3.msra.mxu1 %v18516_v9 }
 0x9b8   : > { %13606 = vmatprep.subr.mxu1 %v18520_v52  ;;  %v6390_v61 = vpop.f32.mrf.mxu0 }
 0x9b9   : > { %13607 = vmatpush3.msra.mxu1 %v18520_v52  ;;  %13537 = vmatprep.mubr.msk.f32.mxu1 %vm5106_vm2, %v6390_v61 }
 0x9ba   : > { %13608 = vmatprep.subr.mxu1 %v18524_v60  ;;  %v13516_v36 = vpop.f32.mrf.mxu0  ;;  %13538 = vmatmul.mubr.msk.f32.gmra.mxu1 %vm5106_vm2, %v13513_v14 }
 0x9bb   : > { %13609 = vmatpush3.msra.mxu1 %v18524_v60  ;;  %v4943_v60 = vld [vmem:[#allocation19 + $0x18] sm:$0xff] }
 0x9bc   : > { %13610 = vmatprep.subr.mxu1 %v18528_v10  ;;  %v6400_v58 = vpop.f32.mrf.mxu0  ;;  %13579 = vmatprep.subr.mxu0 %v4943_v60 }
 0x9bd   : > { %13611 = vmatpush3.msra.mxu1 %v18528_v10  ;;  %13540 = vmatprep.mubr.msk.f32.mxu1 %vm5106_vm2, %v6400_v58  ;;  %v4942_v10 = vld [vmem:[#allocation19 + $0x10] sm:$0xff] }
 0x9be   : > { %13612 = vmatprep.subr.mxu1 %v18532_v21  ;;  %v13519_v9 = vpop.f32.mrf.mxu0  ;;  %13541 = vmatmul.mubr.msk.f32.gmra.mxu1 %vm5106_vm2, %v13516_v36 }
 0x9bf   : > { %13613 = vmatpush3.msra.mxu1 %v18532_v21  ;;  %13580 = vmatpush3.msra.mxu0 %v4943_v60  ;;  %v4941_v21 = vld [vmem:[#allocation19 + $0x8] sm:$0xff] }
 0x9c0   : > { %13614 = vmatprep.subr.mxu1 %v18536_v4  ;;  %v6410_v52 = vpop.f32.mrf.mxu0  ;;  %13581 = vmatprep.subr.mxu0 %v4942_v10 }
 0x9c1   : > { %13615 = vmatpush3.msra.mxu1 %v18536_v4  ;;  %13543 = vmatprep.mubr.msk.f32.mxu1 %vm5106_vm2, %v6410_v52 }
 0x9c2   : > { %13616 = vmatprep.subr.mxu1 %v18541_v20  ;;  %13544 = vmatmul.mubr.msk.f32.gmra.mxu1 %vm5106_vm2, %v13519_v9  ;;  %v13572_v4 = vpop.f32.mrf.mxu0 }
 0x9c3   : > { %13617 = vmatpush3.msra.mxu1 %v18541_v20  ;;  %13620 = vmatprep.mubr.msk.f32.mxu1 %vm4944_vm1, %v18751_v28  ;;  %v4940_v20 = vld [vmem:[#allocation19] sm:$0xff] }
 0x9c4   : > { %13618 = vmatprep.subr.mxu1 %v18546_v59  ;;  %13582 = vmatpush3.msra.mxu0 %v4942_v10 }
 0x9c5   : > { %13619 = vmatpush3.msra.mxu1 %v18546_v59  ;;  %13583 = vmatprep.subr.mxu0 %v4941_v21  ;;  %v6862_v59 = vpop.f32.mrf.mxu0 }
 0x9c6   : > { %13621 = vmatmul.mubr.msk.f32.vlgmr.msra.gmra.mxu1 %vm4944_vm1, %v18755_v26  ;;  %13584 = vmatpush3.msra.mxu0 %v4941_v21 }
 0x9c7   : > { %13623 = vmatprep.mubr.msk.f32.mxu1 %vm4944_vm1, %v18759_v15  ;;  %13585 = vmatprep.subr.mxu0 %v4940_v20  ;;  %v13575_v28 = vpop.f32.mrf.mxu0 }
 0x9c8   : > { %13586 = vmatpush3.msra.mxu0 %v4940_v20  ;;  %13587 = vmatprep.mubr.msk.f32.mxu0 %vm5106_vm2, %v6862_v59 }
 0x9c9   : > { %13588 = vmatmul.mubr.msk.f32.vlgmr.msra.gmra.mxu0 %vm5106_vm2, %v13572_v4  ;;  %13629 = vmatprep.subr.mxu0 %v4943_v60  ;;  %v6872_v26 = vpop.f32.mrf.mxu0 }
 0x9ca   : > { %13624 = vmatmul.mubr.msk.f32.gmra.mxu1 %vm4944_vm1, %v18763_v46  ;;  %13630 = vmatpush3.msra.mxu0 %v4943_v60 }
 0x9cb   : > { %13626 = vmatprep.mubr.msk.f32.mxu1 %vm4944_vm1, %v18767_v40  ;;  %13631 = vmatprep.subr.mxu0 %v4942_v10  ;;  %v13578_v15 = vpop.f32.mrf.mxu0 }
 0x9cc   : > { %13590 = vmatprep.mubr.msk.f32.mxu0 %vm5106_vm2, %v6872_v26  ;;  %13632 = vmatpush3.msra.mxu0 %v4942_v10 }
 0x9cd   : > { %13591 = vmatmul.mubr.msk.f32.gmra.mxu0 %vm5106_vm2, %v13575_v28  ;;  %13633 = vmatprep.subr.mxu0 %v4941_v21  ;;  %v6882_v46 = vpop.f32.mrf.mxu0 }
 0x9ce   : > { %13627 = vmatmul.mubr.msk.f32.gmra.mxu1 %vm4944_vm1, %v18771_v23  ;;  %13634 = vmatpush3.msra.mxu0 %v4941_v21 }
 0x9cf   : > { %13635 = vmatprep.subr.mxu0 %v4940_v20  ;;  %13593 = vmatprep.mubr.msk.f32.mxu0 %vm5106_vm2, %v6882_v46 }
 0x9d0   : > { %13636 = vmatpush3.msra.mxu0 %v4940_v20 }
 0x9d1   : > { %13594 = vmatmul.mubr.msk.f32.gmra.mxu0 %vm5106_vm2, %v13578_v15 }
 0x9f6   : > { %v13258_v40 = vpop.f32.mrf.mxu1 }
 0x9f7   : > { %v18920_v45 = vmul.f32 %v13258_v40, %v13258_v40 }
 0x9f8   : > { %v18908_v23 = vpop.f32.mrf.mxu1 }
 0x9fa   : > { %v13261_v47 = vpop.f32.mrf.mxu1 }
 0x9fb   : > { %v18930_v1 = vmul.f32 %v13261_v47, %v13261_v47 }
 0x9fc   : > { %v18910_v54 = vpop.f32.mrf.mxu1 }
 0x9fe   : > { %v13264_v42 = vpop.f32.mrf.mxu1 }
 0x9ff   : > { %v18940_v7 = vmul.f32 %v13264_v42, %v13264_v42 }
 0xa00   : > { %v18912_v56 = vpop.f32.mrf.mxu1 }
 0xa02   : > { %v13267_v44 = vpop.f32.mrf.mxu1 }
 0xa03   : > { %v18950_v27 = vmul.f32 %v13267_v44, %v13267_v44 }
 0xa04   : > { %v18914_v25 = vpop.f32.mrf.mxu1 }
 0xa06   : > { %v13270_v11 = vpop.f32.mrf.mxu1 }
 0xa07   : > { %v18961_v30 = vmul.f32 %v13270_v11, %v13270_v11 }
 0xa08   : > { %v18916_v50 = vpop.f32.mrf.mxu1 }
 0xa0a   : > { %v13273_v19 = vpop.f32.mrf.mxu1 }
 0xa0b   : > { %v18974_v52 = vmul.f32 %v13273_v19, %v13273_v19 }
 0xa0c   : > { %v18918_v17 = vpop.f32.mrf.mxu1 }
 0xa26   : > { %v13326_v5 = vpop.f32.mrf.mxu1 }
 0xa27   : > { %v18922_v16 = vmul.f32 %v13326_v5, %v13326_v5  ;;  %v18924_v63 = vmul.f32 %v13326_v5, %v13258_v40 }
 0xa28   : > { %v18926_v13 = vpop.f32.mrf.mxu1 }
 0xa29   : > { %v5615_v57 = vadd.f32 %v18922_v16, %v18920_v45  ;;  %v5591_v0 = vmul.f32 2.0, %v18924_v63 }
 0xa2a   : > { %v13329_v37 = vpop.f32.mrf.mxu1 }
 0xa2b   : > { %v5627_v22 = vadd.f32 0.0001, %v5615_v57  ;;  %v18932_v32 = vmul.f32 %v13329_v37, %v13329_v37  ;;  %v18934_v12 = vmul.f32 %v13329_v37, %v13261_v47  ;;  %v5603_v49 = vadd.f32 0.0001, %v5591_v0 }
 0xa2c   : > { %v18936_v34 = vpop.f32.mrf.mxu1 }
 0xa2d   : > { %14582 = vrcp.f32 %v5627_v22  ;;  %v5617_v24 = vadd.f32 %v18932_v32, %v18930_v1  ;;  %v5593_v61 = vmul.f32 2.0, %v18934_v12 }
 0xa2e   : > { %v13332_v18 = vpop.f32.mrf.mxu1 }
 0xa2f   : > { %v18942_v55 = vmul.f32 %v13332_v18, %v13332_v18  ;;  %v18944_v29 = vmul.f32 %v13332_v18, %v13264_v42  ;;  %v5629_v43 = vadd.f32 0.0001, %v5617_v24  ;;  %v5605_v20 = vadd.f32 0.0001, %v5593_v61 }
 0xa30   : > { %v18946_v35 = vpop.f32.mrf.mxu1 }
 0xa31   : > { %v5619_v33 = vadd.f32 %v18942_v55, %v18940_v7  ;;  %14584 = vrcp.f32 %v5629_v43  ;;  %v5595_v4 = vmul.f32 2.0, %v18944_v29 }
 0xa32   : > { %v13335_v31 = vpop.f32.mrf.mxu1 }
 0xa33   : > { %v5631_v51 = vadd.f32 0.0001, %v5619_v33  ;;  %v18952_v62 = vmul.f32 %v13335_v31, %v13335_v31  ;;  %v18954_v2 = vmul.f32 %v13335_v31, %v13267_v44  ;;  %v5607_v47 = vadd.f32 0.0001, %v5595_v4 }
 0xa34   : > { %v18956_v3 = vpop.f32.mrf.mxu1 }
 0xa35   : > { %20613 = vst [vmem:[#allocation122_spill] sm:$0xff] %v18954_v2  ;;  %14586 = vrcp.f32 %v5631_v51  ;;  %v5621_v39 = vadd.f32 %v18952_v62, %v18950_v27  ;;  %v5597_v44 = vmul.f32 2.0, %v18954_v2 }
 0xa36   : > { %v13338_v6 = vpop.f32.mrf.mxu1 }
 0xa37   : > { %v18963_v8 = vmul.f32 %v13338_v6, %v13338_v6  ;;  %v5633_v41 = vadd.f32 0.0001, %v5621_v39  ;;  %v18965_v38 = vmul.f32 %v13338_v6, %v13270_v11  ;;  %v5609_v37 = vadd.f32 0.0001, %v5597_v44 }
 0xa38   : > { %v18967_v53 = vpop.f32.mrf.mxu1  ;;  %v5556_v44 = vmul.f32 %v18910_v54, %v18910_v54 }
 0xa39   : > { %20614 = vst [vmem:[#allocation124_spill] sm:$0xff] %v18965_v38  ;;  %v5623_v48 = vadd.f32 %v18963_v8, %v18961_v30  ;;  %14588 = vrcp.f32 %v5633_v41  ;;  %v5599_v57 = vmul.f32 2.0, %v18965_v38 }
 0xa3a   : > { %v14583_v14 = vpop.eup %14582  ;;  %v13341_v36 = vpop.f32.mrf.mxu1 }
 0xa3b   : > { %v18972_v58 = vmul.f32 %v14583_v14, %v5603_v49  ;;  %v5635_v9 = vadd.f32 0.0001, %v5623_v48  ;;  %v18976_v60 = vmul.f32 %v13341_v36, %v13341_v36  ;;  %v18978_v10 = vmul.f32 %v13341_v36, %v13273_v19 }
 0xa3c   : > { %v18980_v21 = vpop.f32.mrf.mxu1  ;;  %v5611_v33 = vadd.f32 0.0001, %v5599_v57 }
 0xa3d   : > { %20615 = vst [vmem:[#allocation126_spill] sm:$0xff] %v18978_v10  ;;  %14590 = vrcp.f32 %v5635_v9  ;;  %v5625_v59 = vadd.f32 %v18976_v60, %v18974_v52  ;;  %v5601_v51 = vmul.f32 2.0, %v18978_v10  ;;  %v5560_v10 = vmul.f32 %v18914_v25, %v18914_v25 }
 0xa3e   : > { %v13394_v28 = vpop.f32.mrf.mxu1  ;;  %v14585_v26 = vpop.eup %14584 }
 0xa3f   : > { %v5637_v15 = vadd.f32 0.0001, %v5625_v59  ;;  %v18985_v40 = vmul.f32 %v14585_v26, %v5605_v20  ;;  %v5613_v41 = vadd.f32 0.0001, %v5601_v51  ;;  %v5566_v20 = vmul.f32 %v18926_v13, %v18926_v13 }
 0xa40   : > { %v5901_v46 = vpop.f32.mrf.mxu1  ;;  %v5554_v26 = vmul.f32 %v18908_v23, %v18908_v23  ;;  %v5961_v51 = vsub.f32 %v13394_v28, %v18920_v45  ;;  %v19046_v45 = vmul.f32 %v18916_v50, %v18916_v50  ;;  %v19050_v28 = vmul.f32 %v18936_v34, %v18910_v54 }
 0xa41   : > { %20616 = vst [vmem:[#allocation128_spill] sm:$0xff] %v18985_v40  ;;  %14592 = vrcp.f32 %v5637_v15  ;;  %v5568_v15 = vmul.f32 %v18936_v34, %v18936_v34  ;;  %v19063_v54 = vmul.f32 %v18967_v53, %v18967_v53 }
 0xa42   : > { %v14587_v42 = vpop.eup %14586  ;;  %v18988_v11 = vpop.f32.mrf.mxu1  ;;  %v5614_v57 = vadd.f32 %v5566_v20, %v5554_v26 }
 0xa43   : > { %v18990_v19 = vmul.f32 %v14587_v42, %v5607_v47  ;;  %v19026_v47 = vmul.f32 %v18926_v13, %v18908_v23  ;;  %v19039_v13 = vmul.f32 %v18956_v3, %v18956_v3 }
 0xa44   : > { %v18992_v5 = vpop.f32.mrf.mxu1 }
 0xa45   : > { %20617 = vst [vmem:[#allocation130_spill] sm:$0xff] %v18990_v19  ;;  %v5590_v23 = vmul.f32 2.0, %v19026_v47 }
 0xa46   : > { %v18995_v22 = vpop.f32.mrf.mxu1  ;;  %v14589_v24 = vpop.eup %14588 }
 0xa47   : > { %v18999_v43 = vmul.f32 %v14589_v24, %v5609_v37  ;;  %v5570_v24 = vmul.f32 %v18946_v35, %v18946_v35 }
 0xa48   : > { %v18997_v18 = vpop.f32.mrf.mxu1 }
 0xa49   : > { %20618 = vst [vmem:[#allocation132_spill] sm:$0xff] %v18999_v43 }
 0xa4a   : > { %v14591_v31 = vpop.eup %14590  ;;  %v19002_v0 = vpop.f32.mrf.mxu1 }
 0xa4b   : > { %v19004_v39 = vmul.f32 %v14591_v31, %v5611_v33  ;;  %v5616_v31 = vadd.f32 %v5568_v15, %v5556_v44 }
 0xa4c   : > { %v19006_v6 = vpop.f32.mrf.mxu1 }
 0xa4d   : > { %20619 = vst [vmem:[#allocation134_spill] sm:$0xff] %v19004_v39  ;;  %v5626_v39 = vadd.f32 0.0001, %v5614_v57  ;;  %v5628_v19 = vadd.f32 0.0001, %v5616_v31  ;;  %v5962_v31 = vsub.f32 %v18992_v5, %v5556_v44  ;;  %v5622_v5 = vadd.f32 %v19063_v54, %v19046_v45 }
 0xa4e   : > { %v19008_v49 = vpop.f32.mrf.mxu1  ;;  %v14593_v48 = vpop.eup %14592 }
 0xa4f   : > { %v19012_v61 = vmul.f32 %v14593_v48, %v5613_v41  ;;  %v5558_v48 = vmul.f32 %v18912_v56, %v18912_v56  ;;  %14594 = vrcp.f32 %v5626_v39 }
 0xa50   : > { %v19010_v14 = vpop.f32.mrf.mxu1  ;;  %14596 = vrcp.f32 %v5628_v19 }
 0xa51   : > { %20620 = vst [vmem:[#allocation136_spill] sm:$0xff] %v19012_v61  ;;  %v5964_v39 = vsub.f32 %v18997_v18, %v5558_v48 }
 0xa52   : > { %v19014_v36 = vpop.f32.mrf.mxu1 }
 0xa54   : > { %v19016_v9 = vpop.f32.mrf.mxu1 }
 0xa56   : > { %v13462_v4 = vpop.f32.mrf.mxu1 }
 0xa57   : > { %v6271_v37 = vsub.f32 %v13462_v4, %v18922_v16  ;;  %v5960_v16 = vsub.f32 %v5901_v46, %v5554_v26  ;;  %v5963_v46 = vsub.f32 %v18988_v11, %v18930_v1  ;;  %v5592_v11 = vmul.f32 2.0, %v19050_v28 }
 0xa58   : > { %v6211_v59 = vpop.f32.mrf.mxu1 }
 0xa59   : > { %v6270_v41 = vsub.f32 %v6211_v59, %v5566_v20  ;;  %v6617_v4 = vadd.f32 %v6271_v37, %v5961_v51  ;;  %v5618_v20 = vadd.f32 %v5570_v24, %v5558_v48  ;;  %v5620_v37 = vadd.f32 %v19039_v13, %v5560_v10 }
 0xa5a   : > { %v13465_v42 = vpop.f32.mrf.mxu1 }
 0xa5b   : > { %v6273_v43 = vsub.f32 %v13465_v42, %v18932_v32  ;;  %v6616_v26 = vadd.f32 %v6270_v41, %v5960_v16  ;;  %v19056_v32 = vmul.f32 %v18918_v17, %v18918_v17  ;;  %v19058_v42 = vadd.f32 0.0001, %v5590_v23 }
 0xa5c   : > { %v6221_v33 = vpop.f32.mrf.mxu1  ;;  %v6629_v51 = vadd.f32 0.0009, %v6617_v4  ;;  %v5632_v2 = vadd.f32 0.0001, %v5620_v37 }
 0xa5d   : > { %v6272_v57 = vsub.f32 %v6221_v33, %v5568_v15  ;;  %v6619_v1 = vadd.f32 %v6273_v43, %v5963_v46  ;;  %v19069_v15 = vmul.f32 %v18946_v35, %v18912_v56  ;;  %v5630_v33 = vadd.f32 0.0001, %v5618_v20 }
 0xa5e   : > { %v13468_v61 = vpop.f32.mrf.mxu1  ;;  %v6628_v16 = vadd.f32 0.0009, %v6616_v26  ;;  %v19076_v43 = vmul.f32 %v18980_v21, %v18980_v21  ;;  %v5965_v56 = vsub.f32 %v18995_v22, %v18940_v7  ;;  %14598 = vrcp.f32 %v6629_v51 }
 0xa5f   : > { %v6275_v41 = vsub.f32 %v13468_v61, %v18942_v55  ;;  %v6618_v38 = vadd.f32 %v6272_v57, %v5962_v31  ;;  %v6631_v55 = vadd.f32 0.0009, %v6619_v1  ;;  %14600 = vrcp.f32 %v5630_v33  ;;  %v14595_v31 = vpop.eup %14594 }
 0xa60   : > { %v6231_v59 = vpop.f32.mrf.mxu1  ;;  %v19084_v61 = vmul.f32 %v18956_v3, %v18914_v25  ;;  %v5967_v20 = vsub.f32 %v19002_v0, %v18950_v27  ;;  %14602 = vrcp.f32 %v6628_v16  ;;  %v5624_v18 = vadd.f32 %v19076_v43, %v19056_v32 }
 0xa61   : > { %v6274_v40 = vsub.f32 %v6231_v59, %v5570_v24  ;;  %v6621_v44 = vadd.f32 %v6275_v41, %v5965_v56  ;;  %v6630_v7 = vadd.f32 0.0009, %v6618_v38  ;;  %14604 = vrcp.f32 %v5632_v2  ;;  %v14597_v41 = vpop.eup %14596 }
 0xa62   : > { %v13471_v34 = vpop.f32.mrf.mxu1  ;;  %v19093_v3 = vadd.f32 0.0001, %v5592_v11  ;;  %v5634_v59 = vadd.f32 0.0001, %v5622_v5  ;;  %14606 = vrcp.f32 %v6631_v55  ;;  %v5969_v27 = vsub.f32 %v19008_v49, %v18961_v30 }
 0xa63   : > { %v6277_v19 = vsub.f32 %v13471_v34, %v18952_v62  ;;  %v6620_v22 = vadd.f32 %v6274_v40, %v5964_v39  ;;  %v5966_v62 = vsub.f32 %v19006_v6, %v5560_v10  ;;  %v6633_v0 = vadd.f32 0.0009, %v6621_v44  ;;  %v4923_v39 = vld [vmem:[#allocation16 + $0x8] sm:$0xff] }
 0xa64   : > { %v6241_v23 = vpop.f32.mrf.mxu1  ;;  %v5594_v46 = vmul.f32 2.0, %v19069_v15  ;;  %v5596_v10 = vmul.f32 2.0, %v19084_v61  ;;  %14608 = vrcp.f32 %v6630_v7  ;;  %v5636_v6 = vadd.f32 0.0001, %v5624_v18  ;;  %v4922_v7 = vld [vmem:[#allocation16] sm:$0xff] }
 0xa65   : > { %v6276_v24 = vsub.f32 %v6241_v23, %v19039_v13  ;;  %v6623_v13 = vadd.f32 %v6277_v19, %v5967_v20  ;;  %v5968_v26 = vsub.f32 %v19010_v14, %v19046_v45  ;;  %14610 = vrcp.f32 %v5634_v59 }
 0xa66   : > { %v13474_v35 = vpop.f32.mrf.mxu1  ;;  %v5971_v30 = vsub.f32 %v19014_v36, %v18974_v52  ;;  %14612 = vrcp.f32 %v6633_v0  ;;  %v19109_v14 = vmul.f32 %v18967_v53, %v18916_v50  ;;  %v5606_v50 = vadd.f32 0.0001, %v5594_v46 }
 0xa67   : > { %v6279_v48 = vsub.f32 %v13474_v35, %v18963_v8  ;;  %v6622_v38 = vadd.f32 %v6276_v24, %v5966_v62  ;;  %v6632_v8 = vadd.f32 0.0009, %v6620_v22  ;;  %v6635_v49 = vadd.f32 0.0009, %v6623_v13 }
 0xa68   : > { %v6251_v4 = vpop.f32.mrf.mxu1  ;;  %v19119_v20 = vmul.f32 2.0, %v19109_v14 }
 0xa69   : > { %v6278_v2 = vsub.f32 %v6251_v4, %v19063_v54  ;;  %v6625_v57 = vadd.f32 %v6279_v48, %v5969_v27  ;;  %v6634_v51 = vadd.f32 0.0009, %v6622_v38  ;;  %14614 = vrcp.f32 %v6632_v8 }
 0xa6a   : > { %v13477_v25 = vpop.f32.mrf.mxu1  ;;  %14616 = vrcp.f32 %v5636_v6  ;;  %v19116_v4 = vadd.f32 0.0001, %v5596_v10  ;;  %v5639_v27 = vmul.f32 %v14595_v31, %v19058_v42  ;;  %v4924_v42 = vld [vmem:[#allocation16 + $0x10] sm:$0xff] }
 0xa6b   : > { %v6281_v37 = vsub.f32 %v13477_v25, %v18976_v60  ;;  %v6624_v1 = vadd.f32 %v6278_v2, %v5968_v26  ;;  %v6637_v52 = vadd.f32 0.0009, %v6625_v57  ;;  %14618 = vrcp.f32 %v6635_v49  ;;  %v14599_v56 = vpop.eup %14598  ;;  %v4925_v2 = vld [vmem:[#allocation16 + $0x18] sm:$0xff]  ;;  %v20621_v49 = vld [vmem:[#allocation122_spill] sm:$0xff] }
 0xa6c   : > { %v6261_v40 = vpop.f32.mrf.mxu1  ;;  %14620 = vrcp.f32 %v6634_v51  ;;  %v14601_v55 = vpop.eup %14600  ;;  %v19128_v26 = vmul.f32 %v18980_v21, %v18918_v17 }
 0xa6d   : > { %v6280_v11 = vsub.f32 %v6261_v40, %v19076_v43  ;;  %v6627_v36 = vadd.f32 %v6281_v37, %v5971_v30  ;;  %v6636_v53 = vadd.f32 0.0009, %v6624_v1  ;;  %14622 = vrcp.f32 %v6637_v52 }
 0xa6e   : > { %v13530_v34 = vpop.f32.mrf.mxu1 }
 0xa6f   : > { %v6581_v54 = vsub.f32 %v13530_v34, %v18924_v63  ;;  %v5970_v63 = vsub.f32 %v19016_v9, %v19056_v32  ;;  %v14603_v32 = vpop.eup %14602  ;;  %14624 = vrcp.f32 %v6636_v53 }
 0xa70   : > { %v6521_v33 = vpop.f32.mrf.mxu1  ;;  %v19121_v18 = vpop.eup %14604 }
 0xa71   : > { %v6593_v60 = vmul.f32 2.0, %v6581_v54  ;;  %v6580_v45 = vsub.f32 %v6521_v33, %v19026_v47  ;;  %v6626_v35 = vadd.f32 %v6280_v11, %v5970_v63  ;;  %v14607_v13 = vpop.eup %14606  ;;  %v5643_v11 = vmul.f32 %v14597_v41, %v19093_v3  ;;  %v4927_v33 = vld [vmem:[#allocation16 + $0x28] sm:$0xff] }
 0xa72   : > { %v13533_v23 = vpop.f32.mrf.mxu1  ;;  %v14609_v6 = vpop.eup %14608 }
 0xa73   : > { %v6605_v16 = vadd.f32 0.0009, %v6593_v60  ;;  %v6592_v5 = vmul.f32 2.0, %v6580_v45  ;;  %v6583_v43 = vsub.f32 %v13533_v23, %v18934_v12  ;;  %v6639_v12 = vadd.f32 0.0009, %v6627_v36  ;;  %v19132_v51 = vpop.eup %14610 }
 0xa74   : > { %v6531_v47 = vpop.f32.mrf.mxu1  ;;  %v14613_v21 = vpop.eup %14612  ;;  %v5647_v36 = vmul.f32 %v14601_v55, %v5606_v50  ;;  %v4929_v50 = vld [vmem:[#allocation16 + $0x38] sm:$0xff] }
 0xa75   : > { %v6643_v19 = vmul.f32 %v14599_v56, %v6605_v16  ;;  %v6604_v44 = vadd.f32 0.0009, %v6592_v5  ;;  %v6595_v24 = vmul.f32 2.0, %v6583_v43  ;;  %v6582_v9 = vsub.f32 %v6531_v47, %v19050_v28  ;;  %v4926_v16 = vld [vmem:[#allocation16 + $0x20] sm:$0xff] }
 0xa76   : > { %v13536_v22 = vpop.f32.mrf.mxu1  ;;  %v6638_v28 = vadd.f32 0.0009, %v6626_v35  ;;  %14626 = vrcp.f32 %v6639_v12  ;;  %v14615_v52 = vpop.eup %14614  ;;  %v20622_v56 = vld [vmem:[#allocation128_spill] sm:$0xff] }
 0xa77   : > { %v6665_v62 = vmul.f32 %v6643_v19, %v4923_v39  ;;  %v6641_v48 = vmul.f32 %v14603_v32, %v6604_v44  ;;  %v6607_v25 = vadd.f32 0.0009, %v6595_v24  ;;  %v6594_v59 = vmul.f32 2.0, %v6582_v9  ;;  %v19137_v35 = vpop.eup %14616  ;;  %v20623_v47 = vld [vmem:[#allocation124_spill] sm:$0xff] }
 0xa78   : > { %v6585_v0 = vsub.f32 %v13536_v22, %v18944_v29  ;;  %v6541_v38 = vpop.f32.mrf.mxu1  ;;  %14628 = vrcp.f32 %v6638_v28  ;;  %v14619_v44 = vpop.eup %14618  ;;  %v4928_v28 = vld [vmem:[#allocation16 + $0x30] sm:$0xff] }
 0xa79   : > { %v6664_v40 = vmul.f32 %v6641_v48, %v4922_v7  ;;  %v6647_v46 = vmul.f32 %v14607_v13, %v6607_v25  ;;  %v6606_v10 = vadd.f32 0.0009, %v6594_v59  ;;  %v6584_v8 = vsub.f32 %v6541_v38, %v19069_v15  ;;  %v14621_v55 = vpop.eup %14620 }
 0xa7a   : > { %v6597_v57 = vmul.f32 2.0, %v6585_v0  ;;  %v13539_v37 = vpop.f32.mrf.mxu1  ;;  %v6677_v34 = vmul.f32 %v6665_v62, %v18972_v58  ;;  %v20624_v0 = vld [vmem:[#allocation130_spill] sm:$0xff] }
 0xa7b   : > { %v6645_v30 = vmul.f32 %v14609_v6, %v6606_v10  ;;  %v6596_v29 = vmul.f32 2.0, %v6584_v8  ;;  %v6587_v54 = vsub.f32 %v13539_v37, %v20621_v49  ;;  %v6667_v31 = vmul.f32 %v6647_v46, %v4925_v2  ;;  %v14623_v2 = vpop.eup %14622  ;;  %v20625_v10 = vld [vmem:[#allocation126_spill] sm:$0xff] }
 0xa7c   : > { %v6609_v15 = vadd.f32 0.0009, %v6597_v57  ;;  %v6551_v1 = vpop.f32.mrf.mxu1  ;;  %v6676_v17 = vmul.f32 %v6664_v40, %v5639_v27  ;;  %v6701_v43 = vadd.f32 %v6665_v62, %v6664_v40  ;;  %v4931_v57 = vld [vmem:[#allocation16 + $0x48] sm:$0xff] }
 0xa7d   : > { %v6608_v60 = vadd.f32 0.0009, %v6596_v29  ;;  %v6599_v45 = vmul.f32 2.0, %v6587_v54  ;;  %v6586_v63 = vsub.f32 %v6551_v1, %v19084_v61  ;;  %v6666_v58 = vmul.f32 %v6645_v30, %v4924_v42 }
 0xa7e   : > { %v6651_v23 = vmul.f32 %v14613_v21, %v6609_v15  ;;  %v13542_v5 = vpop.f32.mrf.mxu1  ;;  %v6679_v53 = vmul.f32 %v6667_v31, %v20622_v56  ;;  %v6688_v12 = vadd.f32 %v6677_v34, %v6676_v17  ;;  %v5600_v1 = vmul.f32 2.0, %v19128_v26 }
 0xa7f   : > { %v6649_v39 = vmul.f32 %v14615_v52, %v6608_v60  ;;  %v6611_v3 = vadd.f32 0.0009, %v6599_v45  ;;  %v6598_v41 = vmul.f32 2.0, %v6586_v63  ;;  %v6589_v19 = vsub.f32 %v13542_v5, %v20623_v47 }
 0xa80   : > { %v6669_v24 = vmul.f32 %v6651_v23, %v4927_v33  ;;  %v6561_v9 = vpop.f32.mrf.mxu1  ;;  %v6702_v61 = vadd.f32 %v6701_v43, %v6666_v58  ;;  %v6678_v32 = vmul.f32 %v6666_v58, %v5643_v11  ;;  %v5651_v21 = vmul.f32 %v19121_v18, %v19116_v4  ;;  %v20626_v33 = vld [vmem:[#allocation132_spill] sm:$0xff]  ;;  %v20627_v18 = vld [vmem:[#allocation134_spill] sm:$0xff] }
 0xa81   : > { %v6668_v7 = vmul.f32 %v6649_v39, %v4926_v16  ;;  %v6655_v22 = vmul.f32 %v14619_v44, %v6611_v3  ;;  %v6610_v62 = vadd.f32 0.0009, %v6598_v41  ;;  %v6601_v48 = vmul.f32 2.0, %v6589_v19  ;;  %v4930_v58 = vld [vmem:[#allocation16 + $0x40] sm:$0xff] }
 0xa82   : > { %v6588_v25 = vsub.f32 %v6561_v9, %v19109_v14  ;;  %v13545_v59 = vpop.f32.mrf.mxu1  ;;  %v6703_v13 = vadd.f32 %v6702_v61, %v6667_v31  ;;  %v6689_v27 = vadd.f32 %v6688_v12, %v6678_v32  ;;  %v6681_v38 = vmul.f32 %v6669_v24, %v20624_v0  ;;  %v14625_v14 = vpop.eup %14624  ;;  %v4932_v9 = vld [vmem:[#allocation16 + $0x50] sm:$0xff] }
 0xa83   : > { %v6653_v40 = vmul.f32 %v14621_v55, %v6610_v62  ;;  %v6613_v46 = vadd.f32 0.0009, %v6601_v48  ;;  %v6591_v8 = vsub.f32 %v13545_v59, %v20625_v10  ;;  %v6671_v6 = vmul.f32 %v6655_v22, %v4929_v50  ;;  %v14627_v45 = vpop.eup %14626 }
 0xa84   : > { %v6600_v37 = vmul.f32 2.0, %v6588_v25  ;;  %6704 = vadd.xlane.f32.xlu1 %v6703_v13  ;;  %v6571_v42 = vpop.f32.mrf.mxu1  ;;  %v6690_v34 = vadd.f32 %v6689_v27, %v6679_v53  ;;  %v6731_v30 = vadd.f32 %v6669_v24, %v6668_v7  ;;  %v6680_v29 = vmul.f32 %v6668_v7, %v5647_v36  ;;  %v4933_v53 = vld [vmem:[#allocation16 + $0x58] sm:$0xff] }
 0xa85   : > { %v6659_v49 = vmul.f32 %v14623_v2, %v6613_v46  ;;  %v6603_v54 = vmul.f32 2.0, %v6591_v8  ;;  %v6590_v31 = vsub.f32 %v6571_v42, %v19128_v26  ;;  %v6670_v15 = vmul.f32 %v6653_v40, %v4928_v28  ;;  %v14629_v39 = vpop.eup %14628 }
 0xa86   : > { %v6612_v11 = vadd.f32 0.0009, %v6600_v37  ;;  %6691 = vadd.xlane.f32.xlu0 %v6690_v34  ;;  %v13622_v17 = vpop.f32.mrf.mxu1  ;;  %v6683_v60 = vmul.f32 %v6671_v6, %v20626_v33  ;;  %v5610_v16 = vadd.f32 0.0001, %v19119_v20  ;;  %v6718_v26 = vadd.f32 %v6681_v38, %v6680_v29 }
 0xa87   : > { %v6673_v63 = vmul.f32 %v6659_v49, %v4931_v57  ;;  %v6615_v52 = vadd.f32 0.0009, %v6603_v54  ;;  %v6602_v36 = vmul.f32 2.0, %v6590_v31  ;;  %v6732_v23 = vadd.f32 %v6731_v30, %v6670_v15  ;;  %v19183_v49 = vld [vmem:[#allocation21] sm:$0xff]  ;;  %v19187_v54 = vld [vmem:[#allocation21 + $0x8] sm:$0xff]  ;;  %v19191_v31 = vld [vmem:[#allocation21 + $0x10] sm:$0xff] }
 0xa88   : > { %v6657_v5 = vmul.f32 %v14625_v14, %v6612_v11  ;;  %v7076_v43 = vpop.f32.mrf.mxu1  ;;  %v6682_v56 = vmul.f32 %v6670_v15, %v5651_v21  ;;  %v5655_v19 = vmul.f32 %v19132_v51, %v5610_v16  ;;  %v5612_v61 = vadd.f32 0.0001, %v5600_v1  ;;  %v20628_v51 = vld [vmem:[#allocation136_spill] sm:$0xff]  ;;  %13658 = vmatprep.mubr.msk.f32.mxu1 %vm7243_vm3, %v19183_v49  ;;  %v19195_v15 = vld [vmem:[#allocation21 + $0x18] sm:$0xff]  ;;  %v19199_v1 = vld [vmem:[#allocation21 + $0x20] sm:$0xff] }
 0xa89   : > { %v6663_v3 = vmul.f32 %v14627_v45, %v6615_v52  ;;  %v6614_v41 = vadd.f32 0.0009, %v6602_v36  ;;  %13637 = vmatprep.mubr.msk.f32.mxu0 %vm5106_vm2, %v7076_v43  ;;  %v6733_v4 = vadd.f32 %v6732_v23, %v6671_v6  ;;  %v6685_v47 = vmul.f32 %v6673_v63, %v20627_v18  ;;  %v19203_v11 = vld [vmem:[#allocation21 + $0x28] sm:$0xff] }
 0xa8a   : > { %v6672_v44 = vmul.f32 %v6657_v5, %v4930_v58  ;;  %v13625_v24 = vpop.f32.mrf.mxu1  ;;  %13638 = vmatmul.mubr.msk.f32.vlgmr.msra.gmra.mxu0 %vm5106_vm2, %v13622_v17  ;;  %v6719_v20 = vadd.f32 %v6718_v26, %v6682_v56  ;;  %v5659_v48 = vmul.f32 %v19137_v35, %v5612_v61  ;;  %v13589_v35 = vpop.f32.mrf.mxu0 }
 0xa8b   : > { %v6661_v32 = vmul.f32 %v14629_v39, %v6614_v41  ;;  %6734 = vadd.xlane.f32.xlu1 %v6733_v4  ;;  %v6675_v12 = vmul.f32 %v6663_v3, %v4933_v53  ;;  %v19171_v29 = vmul.f32 0.25, %v13589_v35 }
 0xa8c   : > { %v7086_v50 = vpop.f32.mrf.mxu1  ;;  %v6720_v55 = vadd.f32 %v6719_v20, %v6683_v60  ;;  %v6684_v7 = vmul.f32 %v6672_v44, %v5655_v19  ;;  %v6761_v62 = vadd.f32 %v6673_v63, %v6672_v44  ;;  %v6975_v46 = vpop.f32.mrf.mxu0 }
 0xa8d   : > { %13640 = vmatprep.mubr.msk.f32.mxu0 %vm5106_vm2, %v7086_v50  ;;  %v6674_v22 = vmul.f32 %v6661_v32, %v4932_v9  ;;  %v6687_v25 = vmul.f32 %v6675_v12, %v20628_v51  ;;  %v19175_v14 = vmul.f32 0.25, %v6975_v46 }
 0xa8e   : > { %6721 = vadd.xlane.f32.xlu0 %v6720_v55  ;;  %v13628_v59 = vpop.f32.mrf.mxu1  ;;  %13641 = vmatmul.mubr.msk.f32.gmra.mxu0 %vm5106_vm2, %v13625_v24  ;;  %v6748_v28 = vadd.f32 %v6685_v47, %v6684_v7  ;;  %v13592_v10 = vpop.f32.mrf.mxu0 }
 0xa8f   : > { %v6762_v13 = vadd.f32 %v6761_v62, %v6674_v22  ;;  %v6686_v27 = vmul.f32 %v6674_v22, %v5659_v48  ;;  %v19161_v42 = vmul.f32 0.25, %v13592_v10 }
 0xa90   : > { %v7096_v0 = vpop.f32.mrf.mxu1  ;;  %v6985_v8 = vpop.f32.mrf.mxu0 }
 0xa91   : > { %13643 = vmatprep.mubr.msk.f32.mxu0 %vm5106_vm2, %v7096_v0  ;;  %v6763_v38 = vadd.f32 %v6762_v13, %v6675_v12  ;;  %v6749_v2 = vadd.f32 %v6748_v28, %v6686_v27  ;;  %v19167_v30 = vmul.f32 0.25, %v6985_v8  ;;  %v19211_v13 = vld [vmem:[#allocation22] sm:$0xff] }
 0xa92   : > { %13644 = vmatmul.mubr.msk.f32.gmra.mxu0 %vm5106_vm2, %v13628_v59  ;;  %v13595_v6 = vpop.f32.mrf.mxu0  ;;  %v19209_v59 = vld [vmem:[#allocation22 + $0x8] sm:$0xff] }
 0xa93   : > { %6764 = vadd.xlane.f32.xlu1 %v6763_v38  ;;  %v6750_v40 = vadd.f32 %v6749_v2, %v6687_v25  ;;  %v19159_v57 = vmul.f32 0.25, %v13595_v6  ;;  %13667 = vmatprep.subr.mxu0 %v19209_v59 }
 0xa94   : > { %v6995_v37 = vpop.f32.mrf.mxu0  ;;  %13668 = vmatpush3.msra.mxu0 %v19209_v59 }
 0xa95   : > { %6751 = vadd.xlane.f32.xlu0 %v6750_v40  ;;  %v19163_v34 = vmul.f32 0.25, %v6995_v37  ;;  %13646 = vmatprep.subr.mxu1 %v19159_v57 }
 0xa96   : > { %13647 = vmatpush3.msra.mxu1 %v19159_v57  ;;  %13669 = vmatprep.subr.mxu0 %v19211_v13 }
 0xa97   : > { %13648 = vmatprep.subr.mxu1 %v19163_v34  ;;  %13670 = vmatpush3.msra.mxu0 %v19211_v13 }
 0xa98   : > { %13649 = vmatpush3.msra.mxu1 %v19163_v34  ;;  %13701 = vmatprep.subr.mxu0 %v19209_v59 }
 0xa99   : > { %13650 = vmatprep.subr.mxu1 %v19161_v42 }
 0xa9a   : > { %13651 = vmatpush3.msra.mxu1 %v19161_v42 }
 0xa9b   : > { %13652 = vmatprep.subr.mxu1 %v19167_v30 }
 0xa9c   : > { %13653 = vmatpush3.msra.mxu1 %v19167_v30 }
 0xa9d   : > { %13654 = vmatprep.subr.mxu1 %v19171_v29 }
 0xa9e   : > { %13655 = vmatpush3.msra.mxu1 %v19171_v29 }
 0xa9f   : > { %13656 = vmatprep.subr.mxu1 %v19175_v14 }
 0xaa0   : > { %13657 = vmatpush3.msra.mxu1 %v19175_v14 }
 0xaa1   : > { %13659 = vmatmul.mubr.msk.f32.vlgmr.msra.gmra.mxu1 %vm7243_vm3, %v19187_v54 }
 0xaa2   : > { %13661 = vmatprep.mubr.msk.f32.mxu1 %vm7243_vm3, %v19191_v31 }
 0xaa5   : > { %13662 = vmatmul.mubr.msk.f32.gmra.mxu1 %vm7243_vm3, %v19195_v15 }
 0xaa6   : > { %13664 = vmatprep.mubr.msk.f32.mxu1 %vm7243_vm3, %v19199_v1 }
 0xaa9   : > { %13665 = vmatmul.mubr.msk.f32.gmra.mxu1 %vm7243_vm3, %v19203_v11 }
 0xaaa   : > { %13692 = vmatprep.mubr.msk.f32.mxu1 %vm7243_vm3, %v19183_v49 }
 0xb0d   : > { %v6705_v17 = vpop.xlane.xlu1 %6704 }
 0xb0e   : > { %v6706_v21 = vrot.slane %v6705_v17, 4 }
 0xb0f   : > { %v6692_v33 = vpop.xlane.xlu0 %6691 }
 0xb10   : > { %v6707_v60 = vadd.f32 %v6706_v21, %v6705_v17  ;;  %v6693_v45 = vrot.slane %v6692_v33, 4 }
 0xb12   : > { %v6708_v63 = vrot.slane %v6707_v60, 2  ;;  %v6694_v58 = vadd.f32 %v6693_v45, %v6692_v33 }
 0xb14   : > { %v6695_v52 = vrot.slane %v6694_v58, 2  ;;  %v6735_v36 = vpop.xlane.xlu1 %6734  ;;  %v6709_v23 = vadd.f32 %v6708_v63, %v6707_v60 }
 0xb15   : > { %v6736_v16 = vrot.slane %v6735_v36, 4 }
 0xb16   : > { %v6696_v5 = vadd.f32 %v6695_v52, %v6694_v58  ;;  %v6710_v26 = vrot.slane %v6709_v23, 1 }
 0xb17   : > { %v6737_v43 = vadd.f32 %v6736_v16, %v6735_v36  ;;  %v6722_v56 = vpop.xlane.xlu0 %6721 }
 0xb18   : > { %v6723_v53 = vrot.slane %v6722_v56, 4  ;;  %v6697_v39 = vrot.slane %v6696_v5, 1  ;;  %v6711_v18 = vadd.f32 %v6710_v26, %v6709_v23  ;;  %v7738_v23 = vmul.f32 %v19159_v57, %v19159_v57 }
 0xb19   : > { %v6738_v3 = vrot.slane %v6737_v43, 2  ;;  %v7734_v26 = vmul.f32 %v19171_v29, %v19171_v29 }
 0xb1a   : > { %v6724_v41 = vadd.f32 %v6723_v53, %v6722_v56  ;;  %v6698_v4 = vadd.f32 %v6697_v39, %v6696_v5  ;;  %v7737_v5 = vmul.f32 %v19163_v34, %v19163_v34  ;;  %v7735_v56 = vmul.f32 %v19167_v30, %v19167_v30 }
 0xb1b   : > { %v6739_v47 = vadd.f32 %v6738_v3, %v6737_v43  ;;  %v7736_v43 = vmul.f32 %v19161_v42, %v19161_v42  ;;  %v7733_v53 = vmul.f32 %v19175_v14, %v19175_v14 }
 0xb1c   : > { %v6725_v19 = vrot.slane %v6724_v41, 2  ;;  %14177 = vpush %v6698_v4  ;;  %v6765_v44 = vpop.xlane.xlu1 %6764 }
 0xb1d   : > { %14179 = vpush %v6711_v18  ;;  %v6766_v24 = vrot.slane %v6765_v44, 4  ;;  %v6740_v12 = vrot.slane %v6739_v47, 1 }
 0xb1e   : > { %v6752_v20 = vpop.xlane.xlu0 %6751  ;;  %v6726_v9 = vadd.f32 %v6725_v19, %v6724_v41 }
 0xb1f   : > { %v6767_v61 = vadd.f32 %v6766_v24, %v6765_v44  ;;  %v6753_v32 = vrot.slane %v6752_v20, 4  ;;  %v6741_v48 = vadd.f32 %v6740_v12, %v6739_v47 }
 0xb20   : > { %v6727_v50 = vrot.slane %v6726_v9, 1 }
 0xb21   : > { %v6768_v55 = vrot.slane %v6767_v61, 2  ;;  %v6754_v7 = vadd.f32 %v6753_v32, %v6752_v20  ;;  %v20629_v32 = vmov 0.0  }
 0xb22   : > { %v6728_v22 = vadd.f32 %v6727_v50, %v6726_v9 }
 0xb23   : > { %v6755_v62 = vrot.slane %v6754_v7, 2  ;;  %v6769_v51 = vadd.f32 %v6768_v55, %v6767_v61 }
 0xb24   : > { %14181 = vpush %v6728_v22 }
 0xb25   : > { %14183 = vpush %v6741_v48  ;;  %v6756_v25 = vadd.f32 %v6755_v62, %v6754_v7  ;;  %v6770_v27 = vrot.slane %v6769_v51, 1 }
 0xb27   : > { %v6757_v28 = vrot.slane %v6756_v25, 1  ;;  %v6771_v38 = vadd.f32 %v6770_v27, %v6769_v51 }
 0xb29   : > { %v6758_v0 = vadd.f32 %v6757_v28, %v6756_v25 }
 0xb2b   : > { %14185 = vpush %v6758_v0 }
 0xb2c   : > { %14187 = vpush %v6771_v38 }
 0xb4a   : > { %v13639_v2 = vpop.f32.mrf.mxu0 }
 0xb4b   : > { %v19236_v58 = vmul.f32 0.25, %v13639_v2 }
 0xb4c   : > { %v7189_v40 = vpop.f32.mrf.mxu0 }
 0xb4d   : > { %s14178_s2 = spop %14177  ;;  %v19240_v52 = vmul.f32 0.25, %v7189_v40  ;;  %v7954_v18 = vmul.f32 %v19236_v58, %v19236_v58  ;;  %v8174_v9 = vmul.f32 %v19236_v58, %v19171_v29 }
 0xb4e   : > { %s6700_s28 = smul.f32 0.0011111111, %s14178_s2  ;;  %s14180_s29 = spop %14179  ;;  %v13642_v35 = vpop.f32.mrf.mxu0 }
 0xb4f   : > { %s6713_s8 = smul.f32 0.0011111111, %s14180_s29  ;;  %v19226_v33 = vmul.f32 0.25, %v13642_v35  ;;  %v7953_v47 = vmul.f32 %v19240_v52, %v19240_v52  ;;  %v8173_v61 = vmul.f32 %v19240_v52, %v19175_v14 }
 0xb50   : > { %v6714_v46 = vstv %s6700_s28  ;;  %v7199_v10 = vpop.f32.mrf.mxu0 }
 0xb51   : > { %6715 = vst [vmem:[%s18379_s4 + $0x3] sm:$0x1] %v6714_v46  ;;  %v6716_v8 = vstv %s6713_s8  ;;  %v19230_v45 = vmul.f32 0.25, %v7199_v10  ;;  %v7956_v41 = vmul.f32 %v19226_v33, %v19226_v33  ;;  %v8176_v24 = vmul.f32 %v19226_v33, %v19161_v42 }
 0xb52   : > { %6717 = vst [vmem:[%s18384_s25 + $0x3] sm:$0x1] %v6716_v8  ;;  %v13645_v6 = vpop.f32.mrf.mxu0  ;;  %v7241_v8 = vld [vmem:[#allocation27] sm:$0xff] }
 0xb53   : > { %v19220_v37 = vmul.f32 0.25, %v13645_v6  ;;  %v7955_v4 = vmul.f32 %v19230_v45, %v19230_v45  ;;  %v8175_v20 = vmul.f32 %v19230_v45, %v19167_v30 }
 0xb54   : > { %v7209_v17 = vpop.f32.mrf.mxu0 }
 0xb55   : > { %s14182_s27 = spop %14181  ;;  %v19222_v21 = vmul.f32 0.25, %v7209_v17  ;;  %13680 = vmatprep.subr.mxu1 %v19220_v37  ;;  %v7958_v39 = vmul.f32 %v19220_v37, %v19220_v37  ;;  %v8178_v19 = vmul.f32 %v19220_v37, %v19159_v57 }
 0xb56   : > { %s6730_s14 = smul.f32 0.0011111111, %s14182_s27  ;;  %s14184_s30 = spop %14183  ;;  %13681 = vmatpush3.msra.mxu1 %v19220_v37 }
 0xb57   : > { %s6743_s6 = smul.f32 0.0011111111, %s14184_s30  ;;  %13682 = vmatprep.subr.mxu1 %v19222_v21  ;;  %v7957_v3 = vmul.f32 %v19222_v21, %v19222_v21  ;;  %v8177_v44 = vmul.f32 %v19222_v21, %v19163_v34 }
 0xb58   : > { %v6744_v60 = vstv %s6730_s14  ;;  %13683 = vmatpush3.msra.mxu1 %v19222_v21 }
 0xb59   : > { %6745 = vst [vmem:[%s18379_s4 + $0x4] sm:$0x1] %v6744_v60  ;;  %v6746_v63 = vstv %s6743_s6  ;;  %13684 = vmatprep.subr.mxu1 %v19226_v33 }
 0xb5a   : > { %6747 = vst [vmem:[%s18384_s25 + $0x4] sm:$0x1] %v6746_v63  ;;  %13685 = vmatpush3.msra.mxu1 %v19226_v33 }
 0xb5b   : > { %13686 = vmatprep.subr.mxu1 %v19230_v45 }
 0xb5c   : > { %s14186_s1 = spop %14185  ;;  %13687 = vmatpush3.msra.mxu1 %v19230_v45 }
 0xb5d   : > { %s6760_s22 = smul.f32 0.0011111111, %s14186_s1  ;;  %s14188_s12 = spop %14187  ;;  %13688 = vmatprep.subr.mxu1 %v19236_v58 }
 0xb5e   : > { %s6773_s24 = smul.f32 0.0011111111, %s14188_s12  ;;  %13689 = vmatpush3.msra.mxu1 %v19236_v58  ;;  %s20630_s12 = sld [smem:[#allocation188_spill]] }
 0xb5f   : > { %v6774_v36 = vstv %s6760_s22  ;;  %13690 = vmatprep.subr.mxu1 %v19240_v52 }
 0xb60   : > { %6775 = vst [vmem:[%s18379_s4 + $0x5] sm:$0x1] %v6774_v36  ;;  %v6776_v16 = vstv %s6773_s24  ;;  %13691 = vmatpush3.msra.mxu1 %v19240_v52 }
 0xb61   : > { %6777 = vst [vmem:[%s18384_s25 + $0x5] sm:$0x1] %v6776_v16  ;;  %13693 = vmatmul.mubr.msk.f32.vlgmr.msra.gmra.mxu1 %vm7243_vm3, %v19187_v54  ;;  %13714 = vmatprep.subr.mxu1 %v7738_v23 }
 0xb62   : > { %13715 = vmatpush3.msra.mxu1 %v7738_v23  ;;  %13695 = vmatprep.mubr.msk.f32.mxu1 %vm7243_vm3, %v19191_v31 }
 0xb63   : > { %13716 = vmatprep.subr.mxu1 %v7737_v5 }
 0xb64   : > { %13717 = vmatpush3.msra.mxu1 %v7737_v5 }
 0xb65   : > { %13696 = vmatmul.mubr.msk.f32.gmra.mxu1 %vm7243_vm3, %v19195_v15  ;;  %13718 = vmatprep.subr.mxu1 %v7736_v43 }
 0xb66   : > { %13719 = vmatpush3.msra.mxu1 %v7736_v43  ;;  %13698 = vmatprep.mubr.msk.f32.mxu1 %vm7243_vm3, %v19199_v1 }
 0xb67   : > { %13720 = vmatprep.subr.mxu1 %v7735_v56 }
 0xb68   : > { %13721 = vmatpush3.msra.mxu1 %v7735_v56 }
 0xb69   : > { %13699 = vmatmul.mubr.msk.f32.gmra.mxu1 %vm7243_vm3, %v19203_v11  ;;  %13722 = vmatprep.subr.mxu1 %v7734_v26 }
 0xb6a   : > { %13723 = vmatpush3.msra.mxu1 %v7734_v26  ;;  %13726 = vmatprep.mubr.msk.f32.mxu1 %vm7243_vm3, %v19183_v49 }
 0xb6b   : > { %13724 = vmatprep.subr.mxu1 %v7733_v53 }
 0xb6c   : > { %13725 = vmatpush3.msra.mxu1 %v7733_v53 }
 0xb6d   : > { %13727 = vmatmul.mubr.msk.f32.vlgmr.msra.gmra.mxu1 %vm7243_vm3, %v19187_v54  ;;  %13748 = vmatprep.subr.mxu1 %v7958_v39 }
 0xb6e   : > { %13749 = vmatpush3.msra.mxu1 %v7958_v39  ;;  %13729 = vmatprep.mubr.msk.f32.mxu1 %vm7243_vm3, %v19191_v31 }
 0xb6f   : > { %13750 = vmatprep.subr.mxu1 %v7957_v3 }
 0xb70   : > { %13751 = vmatpush3.msra.mxu1 %v7957_v3 }
 0xb71   : > { %13730 = vmatmul.mubr.msk.f32.gmra.mxu1 %vm7243_vm3, %v19195_v15  ;;  %13752 = vmatprep.subr.mxu1 %v7956_v41 }
 0xb72   : > { %13753 = vmatpush3.msra.mxu1 %v7956_v41  ;;  %13732 = vmatprep.mubr.msk.f32.mxu1 %vm7243_vm3, %v19199_v1 }
 0xb73   : > { %13754 = vmatprep.subr.mxu1 %v7955_v4 }
 0xb74   : > { %13755 = vmatpush3.msra.mxu1 %v7955_v4 }
 0xb75   : > { %13733 = vmatmul.mubr.msk.f32.gmra.mxu1 %vm7243_vm3, %v19203_v11  ;;  %13756 = vmatprep.subr.mxu1 %v7954_v18 }
 0xb76   : > { %13757 = vmatpush3.msra.mxu1 %v7954_v18  ;;  %13760 = vmatprep.mubr.msk.f32.mxu1 %vm7243_vm3, %v19183_v49 }
 0xb77   : > { %13758 = vmatprep.subr.mxu1 %v7953_v47 }
 0xb78   : > { %13759 = vmatpush3.msra.mxu1 %v7953_v47 }
 0xb79   : > { %13761 = vmatmul.mubr.msk.f32.vlgmr.msra.gmra.mxu1 %vm7243_vm3, %v19187_v54  ;;  %13782 = vmatprep.subr.mxu1 %v8178_v19 }
 0xb7a   : > { %13783 = vmatpush3.msra.mxu1 %v8178_v19  ;;  %13763 = vmatprep.mubr.msk.f32.mxu1 %vm7243_vm3, %v19191_v31 }
 0xb7b   : > { %13784 = vmatprep.subr.mxu1 %v8177_v44 }
 0xb7c   : > { %13785 = vmatpush3.msra.mxu1 %v8177_v44 }
 0xb7d   : > { %13764 = vmatmul.mubr.msk.f32.gmra.mxu1 %vm7243_vm3, %v19195_v15  ;;  %13786 = vmatprep.subr.mxu1 %v8176_v24 }
 0xb7e   : > { %13787 = vmatpush3.msra.mxu1 %v8176_v24  ;;  %13766 = vmatprep.mubr.msk.f32.mxu1 %vm7243_vm3, %v19199_v1 }
 0xb7f   : > { %13788 = vmatprep.subr.mxu1 %v8175_v20 }
 0xb80   : > { %13789 = vmatpush3.msra.mxu1 %v8175_v20 }
 0xb81   : > { %13767 = vmatmul.mubr.msk.f32.gmra.mxu1 %vm7243_vm3, %v19203_v11  ;;  %13790 = vmatprep.subr.mxu1 %v8174_v9 }
 0xb82   : > { %13791 = vmatpush3.msra.mxu1 %v8174_v9  ;;  %13794 = vmatprep.mubr.msk.f32.mxu1 %vm7243_vm3, %v19183_v49 }
 0xb83   : > { %13792 = vmatprep.subr.mxu1 %v8173_v61 }
 0xb84   : > { %13793 = vmatpush3.msra.mxu1 %v8173_v61 }
 0xb85   : > { %13795 = vmatmul.mubr.msk.f32.vlgmr.msra.gmra.mxu1 %vm7243_vm3, %v19187_v54  ;;  %13816 = vmatprep.subr.mxu1 %v20629_v32 }
 0xb86   : > { %13817 = vmatpush3.msra.mxu1 %v19159_v57  ;;  %13797 = vmatprep.mubr.msk.f32.mxu1 %vm7243_vm3, %v19191_v31  ;;  %v7238_v57 = vld [vmem:[#allocation25] sm:$0xff] }
 0xb87   : > { %13818 = vmatprep.subr.mxu1 %v20629_v32 }
 0xb88   : > { %13819 = vmatpush3.msra.mxu1 %v19163_v34  ;;  %v13660_v34 = vpop.f32.mrf.mxu1 }
 0xb89   : > { %13798 = vmatmul.mubr.msk.f32.gmra.mxu1 %vm7243_vm3, %v19195_v15  ;;  %13820 = vmatprep.subr.mxu1 %v20629_v32 }
 0xb8a   : > { %13821 = vmatpush3.msra.mxu1 %v19161_v42  ;;  %13800 = vmatprep.mubr.msk.f32.mxu1 %vm7243_vm3, %v19199_v1  ;;  %v7239_v42 = vld [vmem:[#allocation25 + $0x8] sm:$0xff] }
 0xb8b   : > { %13822 = vmatprep.subr.mxu1 %v20629_v32 }
 0xb8c   : > { %13823 = vmatpush3.msra.mxu1 %v19167_v30  ;;  %v7328_v30 = vpop.f32.mrf.mxu1 }
 0xb8d   : > { %13801 = vmatmul.mubr.msk.f32.gmra.mxu1 %vm7243_vm3, %v19203_v11  ;;  %13824 = vmatprep.subr.mxu1 %v20629_v32 }
 0xb8e   : > { %13825 = vmatpush3.msra.mxu1 %v19171_v29  ;;  %13828 = vmatprep.mubr.msk.f32.mxu1 %vm15504_vm4, %v20629_v32  ;;  %v7240_v29 = vld [vmem:[#allocation25 + $0x10] sm:$0xff] }
 0xb8f   : > { %13826 = vmatprep.subr.mxu1 %v20629_v32  ;;  %13671 = vmatprep.mubr.msk.f32.mxu0 %vm7357_vm5, %v7328_v30 }
 0xb90   : > { %13827 = vmatpush3.msra.mxu1 %v19175_v14  ;;  %v13663_v14 = vpop.f32.mrf.mxu1  ;;  %13672 = vmatmul.mubr.msk.f32.vlgmr.msra.gmra.mxu0 %vm7357_vm5, %v13660_v34 }
 0xb91   : > { %13850 = vmatprep.subr.mxu1 %v20629_v32  ;;  %13829 = vmatmul.mubr.msk.f32.vlgmr.msra.gmra.mxu1 %vm7243_vm3, %v7238_v57 }
 0xb92   : > { %13851 = vmatpush3.msra.mxu1 %v19220_v37  ;;  %13831 = vmatprep.mubr.msk.f32.mxu1 %vm15504_vm4, %v20629_v32  ;;  %v7338_v49 = vpop.f32.mrf.mxu1 }
 0xb93   : > { %13852 = vmatprep.subr.mxu1 %v20629_v32  ;;  %13674 = vmatprep.mubr.msk.f32.mxu0 %vm7357_vm5, %v7338_v49 }
 0xb94   : > { %13853 = vmatpush3.msra.mxu1 %v19222_v21  ;;  %v13666_v54 = vpop.f32.mrf.mxu1  ;;  %13675 = vmatmul.mubr.msk.f32.gmra.mxu0 %vm7357_vm5, %v13663_v14 }
 0xb95   : > { %13854 = vmatprep.subr.mxu1 %v20629_v32  ;;  %13832 = vmatmul.mubr.msk.f32.gmra.mxu1 %vm7243_vm3, %v7239_v42 }
 0xb96   : > { %13855 = vmatpush3.msra.mxu1 %v19226_v33  ;;  %13834 = vmatprep.mubr.msk.f32.mxu1 %vm15504_vm4, %v20629_v32  ;;  %v7348_v31 = vpop.f32.mrf.mxu1 }
 0xb97   : > { %13856 = vmatprep.subr.mxu1 %v20629_v32  ;;  %13677 = vmatprep.mubr.msk.f32.mxu0 %vm7357_vm5, %v7348_v31 }
 0xb98   : > { %13857 = vmatpush3.msra.mxu1 %v19230_v45  ;;  %13702 = vmatpush3.msra.mxu0 %v19209_v59 }
 0xb99   : > { %13858 = vmatprep.subr.mxu1 %v20629_v32  ;;  %13835 = vmatmul.mubr.msk.f32.gmra.mxu1 %vm7243_vm3, %v7240_v29 }
 0xb9a   : > { %13859 = vmatpush3.msra.mxu1 %v19236_v58  ;;  %13862 = vmatprep.mubr.msk.f32.mxu1 %vm15504_vm4, %v20629_v32 }
 0xb9b   : > { %13860 = vmatprep.subr.mxu1 %v20629_v32  ;;  %13703 = vmatprep.subr.mxu0 %v19211_v13 }
 0xb9c   : > { %13861 = vmatpush3.msra.mxu1 %v19240_v52  ;;  %13678 = vmatmul.mubr.msk.f32.gmra.mxu0 %vm7357_vm5, %v13666_v54 }
 0xb9d   : > { %13863 = vmatmul.mubr.msk.f32.vlgmr.msra.gmra.mxu1 %vm7243_vm3, %v7238_v57  ;;  %13884 = vmatprep.subr.mxu1 %v20629_v32 }
 0xb9e   : > { %13865 = vmatprep.mubr.msk.f32.mxu1 %vm15504_vm4, %v20629_v32  ;;  %13704 = vmatpush3.msra.mxu0 %v19211_v13 }
 0xb9f   : > { %13735 = vmatprep.subr.mxu0 %v19209_v59 }
 0xba1   : > { %13866 = vmatmul.mubr.msk.f32.gmra.mxu1 %vm7243_vm3, %v7239_v42 }
 0xba2   : > { %13868 = vmatprep.mubr.msk.f32.mxu1 %vm15504_vm4, %v20629_v32 }
 0xba5   : > { %13869 = vmatmul.mubr.msk.f32.gmra.mxu1 %vm7243_vm3, %v7240_v29 }
 0xba6   : > { %13890 = vmatprep.mubr.msk.f32.mxu1 %vm15504_vm4, %v20629_v32 }
 0xc21   : > { %v13694_v15 = vpop.f32.mrf.mxu1 }
 0xc23   : > { %v7537_v1 = vpop.f32.mrf.mxu1 }
 0xc24   : > { %13705 = vmatprep.mubr.msk.f32.mxu0 %vm7357_vm5, %v7537_v1 }
 0xc25   : > { %v13697_v11 = vpop.f32.mrf.mxu1  ;;  %13706 = vmatmul.mubr.msk.f32.vlgmr.msra.gmra.mxu0 %vm7357_vm5, %v13694_v15 }
 0xc26   : > { %13736 = vmatpush3.msra.mxu0 %v19209_v59 }
 0xc27   : > { %v7547_v12 = vpop.f32.mrf.mxu1  ;;  %13737 = vmatprep.subr.mxu0 %v19211_v13 }
 0xc28   : > { %13708 = vmatprep.mubr.msk.f32.mxu0 %vm7357_vm5, %v7547_v12  ;;  %13738 = vmatpush3.msra.mxu0 %v19211_v13 }
 0xc29   : > { %v13700_v50 = vpop.f32.mrf.mxu1  ;;  %13709 = vmatmul.mubr.msk.f32.gmra.mxu0 %vm7357_vm5, %v13697_v11  ;;  %13769 = vmatprep.subr.mxu0 %v19209_v59 }
 0xc2b   : > { %v7557_v55 = vpop.f32.mrf.mxu1 }
 0xc2c   : > { %13711 = vmatprep.mubr.msk.f32.mxu0 %vm7357_vm5, %v7557_v55 }
 0xc2d   : > { %13712 = vmatmul.mubr.msk.f32.gmra.mxu0 %vm7357_vm5, %v13700_v50  ;;  %v13728_v7 = vpop.f32.mrf.mxu1 }
 0xc2f   : > { %v7805_v22 = vpop.f32.mrf.mxu1 }
 0xc30   : > { %13739 = vmatprep.mubr.msk.f32.mxu0 %vm7357_vm5, %v7805_v22 }
 0xc31   : > { %v13731_v62 = vpop.f32.mrf.mxu1  ;;  %13740 = vmatmul.mubr.msk.f32.vlgmr.msra.gmra.mxu0 %vm7357_vm5, %v13728_v7 }
 0xc32   : > { %13770 = vmatpush3.msra.mxu0 %v19209_v59 }
 0xc33   : > { %v7815_v48 = vpop.f32.mrf.mxu1  ;;  %13771 = vmatprep.subr.mxu0 %v19211_v13 }
 0xc34   : > { %13742 = vmatprep.mubr.msk.f32.mxu0 %vm7357_vm5, %v7815_v48  ;;  %13772 = vmatpush3.msra.mxu0 %v19211_v13 }
 0xc35   : > { %v13734_v51 = vpop.f32.mrf.mxu1  ;;  %13743 = vmatmul.mubr.msk.f32.gmra.mxu0 %vm7357_vm5, %v13731_v62  ;;  %13803 = vmatprep.subr.mxu0 %v19209_v59 }
 0xc37   : > { %v7825_v25 = vpop.f32.mrf.mxu1 }
 0xc38   : > { %13745 = vmatprep.mubr.msk.f32.mxu0 %vm7357_vm5, %v7825_v25 }
 0xc39   : > { %13746 = vmatmul.mubr.msk.f32.gmra.mxu0 %vm7357_vm5, %v13734_v51  ;;  %v13762_v27 = vpop.f32.mrf.mxu1 }
 0xc3b   : > { %v8025_v28 = vpop.f32.mrf.mxu1 }
 0xc3c   : > { %13773 = vmatprep.mubr.msk.f32.mxu0 %vm7357_vm5, %v8025_v28 }
 0xc3d   : > { %v13765_v0 = vpop.f32.mrf.mxu1  ;;  %13774 = vmatmul.mubr.msk.f32.vlgmr.msra.gmra.mxu0 %vm7357_vm5, %v13762_v27 }
 0xc3e   : > { %13804 = vmatpush3.msra.mxu0 %v19209_v59  ;;  %v7242_v59 = vld [vmem:[#allocation27 + $0x8] sm:$0xff] }
 0xc3f   : > { %v8035_v38 = vpop.f32.mrf.mxu1  ;;  %13805 = vmatprep.subr.mxu0 %v19211_v13 }
 0xc40   : > { %13776 = vmatprep.mubr.msk.f32.mxu0 %vm7357_vm5, %v8035_v38  ;;  %13806 = vmatpush3.msra.mxu0 %v19211_v13 }
 0xc41   : > { %v13768_v2 = vpop.f32.mrf.mxu1  ;;  %13777 = vmatmul.mubr.msk.f32.gmra.mxu0 %vm7357_vm5, %v13765_v0  ;;  %13837 = vmatprep.subr.mxu0 %v20629_v32 }
 0xc43   : > { %v8045_v40 = vpop.f32.mrf.mxu1 }
 0xc44   : > { %13779 = vmatprep.mubr.msk.f32.mxu0 %vm7357_vm5, %v8045_v40 }
 0xc45   : > { %13780 = vmatmul.mubr.msk.f32.gmra.mxu0 %vm7357_vm5, %v13768_v2  ;;  %v13796_v35 = vpop.f32.mrf.mxu1 }
 0xc47   : > { %v8245_v46 = vpop.f32.mrf.mxu1 }
 0xc48   : > { %13807 = vmatprep.mubr.msk.f32.mxu0 %vm7357_vm5, %v8245_v46 }
 0xc49   : > { %v13799_v10 = vpop.f32.mrf.mxu1  ;;  %13808 = vmatmul.mubr.msk.f32.vlgmr.msra.gmra.mxu0 %vm7357_vm5, %v13796_v35 }
 0xc4a   : > { %13838 = vmatpush3.msra.mxu0 %v7242_v59 }
 0xc4b   : > { %v8255_v13 = vpop.f32.mrf.mxu1  ;;  %13839 = vmatprep.subr.mxu0 %v20629_v32 }
 0xc4c   : > { %13810 = vmatprep.mubr.msk.f32.mxu0 %vm7357_vm5, %v8255_v13  ;;  %13840 = vmatpush3.msra.mxu0 %v7241_v8 }
 0xc4d   : > { %v13802_v6 = vpop.f32.mrf.mxu1  ;;  %13811 = vmatmul.mubr.msk.f32.gmra.mxu0 %vm7357_vm5, %v13799_v10  ;;  %13871 = vmatprep.subr.mxu0 %v20629_v32 }
 0xc4f   : > { %v8265_v37 = vpop.f32.mrf.mxu1 }
 0xc50   : > { %13813 = vmatprep.mubr.msk.f32.mxu0 %vm7357_vm5, %v8265_v37  ;;  %v19445_v43 = vpop.f32.mrf.mxu0 }
 0xc51   : > { %13814 = vmatmul.mubr.msk.f32.gmra.mxu0 %vm7357_vm5, %v13802_v6  ;;  %v8594_v17 = vpop.f32.mrf.mxu1  ;;  %v7680_v42 = vmul.f32 %v19445_v43, %v19445_v43 }
 0xc52   : > { %13841 = vmatprep.mubr.msk.f32.mxu0 %vm15504_vm4, %v20629_v32  ;;  %v19447_v56 = vpop.f32.mrf.mxu0 }
 0xc53   : > { %v13830_v21 = vpop.f32.mrf.mxu1  ;;  %v7679_v29 = vmul.f32 %v19447_v56, %v19447_v56 }
 0xc54   : > { %v19449_v26 = vpop.f32.mrf.mxu0 }
 0xc55   : > { %13842 = vmatmul.mubr.msk.f32.vlgmr.msra.gmra.mxu0 %vm7357_vm5, %v8594_v17  ;;  %v8599_v33 = vpop.f32.mrf.mxu1  ;;  %v7682_v31 = vmul.f32 %v19449_v26, %v19449_v26 }
 0xc56   : > { %13844 = vmatprep.mubr.msk.f32.mxu0 %vm15504_vm4, %v20629_v32  ;;  %13872 = vmatpush3.msra.mxu0 %v7242_v59  ;;  %v19451_v53 = vpop.f32.mrf.mxu0 }
 0xc57   : > { %v13833_v60 = vpop.f32.mrf.mxu1  ;;  %13873 = vmatprep.subr.mxu0 %v20629_v32  ;;  %v7681_v55 = vmul.f32 %v19451_v53, %v19451_v53 }
 0xc58   : > { %13874 = vmatpush3.msra.mxu0 %v7241_v8 }
 0xc59   : > { %13845 = vmatmul.mubr.msk.f32.gmra.mxu0 %vm7357_vm5, %v8599_v33  ;;  %v8604_v45 = vpop.f32.mrf.mxu1  ;;  %13899 = vmatprep.subr.mxu0 %v20629_v32 }
 0xc5a   : > { %13847 = vmatprep.mubr.msk.f32.mxu0 %vm15504_vm4, %v20629_v32 }
 0xc5b   : > { %v13836_v63 = vpop.f32.mrf.mxu1 }
 0xc5c   : > { %v19453_v39 = vpop.f32.mrf.mxu0 }
 0xc5d   : > { %13848 = vmatmul.mubr.msk.f32.gmra.mxu0 %vm7357_vm5, %v8604_v45  ;;  %v8766_v58 = vpop.f32.mrf.mxu1  ;;  %v7684_v51 = vmul.f32 %v19453_v39, %v19453_v39 }
 0xc5e   : > { %13875 = vmatprep.mubr.msk.f32.mxu0 %vm15504_vm4, %v20629_v32  ;;  %v19455_v3 = vpop.f32.mrf.mxu0 }
 0xc5f   : > { %v13864_v52 = vpop.f32.mrf.mxu1  ;;  %v7683_v0 = vmul.f32 %v19455_v3, %v19455_v3 }
 0xc61   : > { %13876 = vmatmul.mubr.msk.f32.vlgmr.msra.gmra.mxu0 %vm7357_vm5, %v8766_v58  ;;  %v8771_v36 = vpop.f32.mrf.mxu1 }
 0xc62   : > { %13878 = vmatprep.mubr.msk.f32.mxu0 %vm15504_vm4, %v20629_v32 }
 0xc63   : > { %v13867_v23 = vpop.f32.mrf.mxu1 }
 0xc65   : > { %13879 = vmatmul.mubr.msk.f32.gmra.mxu0 %vm7357_vm5, %v8771_v36  ;;  %v8776_v16 = vpop.f32.mrf.mxu1 }
 0xc66   : > { %13881 = vmatprep.mubr.msk.f32.mxu0 %vm15504_vm4, %v20629_v32 }
 0xc67   : > { %v13870_v5 = vpop.f32.mrf.mxu1 }
 0xc69   : > { %13882 = vmatmul.mubr.msk.f32.gmra.mxu0 %vm7357_vm5, %v8776_v16 }
 0xc6a   : > { %13901 = vmatprep.mubr.msk.f32.mxu0 %vm15504_vm4, %v20629_v32 }
 0xce5   : > { %v13707_v41 = vpop.f32.mrf.mxu0 }
 0xce6   : > { %v7686_v61 = vmul.f32 %v13707_v41, %v13707_v41  ;;  %v7692_v5 = vmul.f32 %v13707_v41, %v19445_v43 }
 0xce7   : > { %v19457_v4 = vpop.f32.mrf.mxu0 }
 0xce8   : > { %v7685_v34 = vmul.f32 %v19457_v4, %v19457_v4  ;;  %v7710_v14 = vadd.f32 %v7686_v61, %v7680_v42 }
 0xce9   : > { %v19459_v18 = vpop.f32.mrf.mxu0 }
 0xcea   : > { %v7688_v49 = vmul.f32 %v19459_v18, %v19459_v18  ;;  %v7709_v15 = vadd.f32 %v7685_v34, %v7679_v29  ;;  %v7716_v7 = vadd.f32 0.0001, %v7710_v14  ;;  %v7694_v43 = vmul.f32 %v19459_v18, %v19449_v26 }
 0xceb   : > { %v19461_v47 = vpop.f32.mrf.mxu0 }
 0xcec   : > { %v7687_v1 = vmul.f32 %v19461_v47, %v19461_v47  ;;  %v7712_v22 = vadd.f32 %v7688_v49, %v7682_v31  ;;  %v7715_v38 = vadd.f32 0.0001, %v7709_v15  ;;  %14630 = vrcp.f32 %v7716_v7 }
 0xced   : > { %v19463_v19 = vpop.f32.mrf.mxu0 }
 0xcee   : > { %v7690_v62 = vmul.f32 %v19463_v19, %v19463_v19  ;;  %v7711_v2 = vadd.f32 %v7687_v1, %v7681_v55  ;;  %v7718_v13 = vadd.f32 0.0001, %v7712_v22  ;;  %v7696_v7 = vmul.f32 %v19463_v19, %v19453_v39 }
 0xcef   : > { %v19465_v44 = vpop.f32.mrf.mxu0 }
 0xcf0   : > { %v7689_v40 = vmul.f32 %v19465_v44, %v19465_v44  ;;  %v7714_v6 = vadd.f32 %v7690_v62, %v7684_v51  ;;  %v7717_v45 = vadd.f32 0.0001, %v7711_v2 }
 0xcf1   : > { %v13741_v24 = vpop.f32.mrf.mxu0 }
 0xcf2   : > { %v7948_v12 = vsub.f32 %v13741_v24, %v7680_v42  ;;  %v7713_v63 = vadd.f32 %v7689_v40, %v7683_v0  ;;  %v7720_v24 = vadd.f32 0.0001, %v7714_v6  ;;  %v7232_v6 = vld [vmem:[#allocation24] sm:$0xff] }
 0xcf3   : > { %v7918_v20 = vpop.f32.mrf.mxu0 }
 0xcf4   : > { %v7947_v25 = vsub.f32 %v7918_v20, %v7679_v29 }
 0xcf5   : > { %v13744_v9 = vpop.f32.mrf.mxu0 }
 0xcf6   : > { %v7950_v46 = vsub.f32 %v13744_v9, %v7682_v31 }
 0xcf7   : > { %v7928_v57 = vpop.f32.mrf.mxu0 }
 0xcf8   : > { %v7949_v37 = vsub.f32 %v7928_v57, %v7681_v55 }
 0xcf9   : > { %v13747_v30 = vpop.f32.mrf.mxu0  ;;  %v14631_v55 = vpop.eup %14630 }
 0xcfa   : > { %v7952_v58 = vsub.f32 %v13747_v30, %v7684_v51  ;;  %v7719_v30 = vadd.f32 0.0001, %v7713_v63  ;;  %v7702_v63 = vmul.f32 2.0, %v7696_v7 }
 0xcfb   : > { %v7938_v54 = vpop.f32.mrf.mxu0 }
 0xcfc   : > { %v7951_v20 = vsub.f32 %v7938_v54, %v7683_v0 }
 0xcfd   : > { %v13775_v11 = vpop.f32.mrf.mxu0 }
 0xcfe   : > { %v8168_v50 = vsub.f32 %v13775_v11, %v7686_v61 }
 0xcff   : > { %v8138_v48 = vpop.f32.mrf.mxu0 }
 0xd00   : > { %v8406_v27 = vadd.f32 %v8168_v50, %v7948_v12  ;;  %v8167_v28 = vsub.f32 %v8138_v48, %v7685_v34  ;;  %v7691_v34 = vmul.f32 %v19457_v4, %v19447_v56  ;;  %v7693_v56 = vmul.f32 %v19461_v47, %v19451_v53 }
 0xd01   : > { %v13778_v35 = vpop.f32.mrf.mxu0  ;;  %v7698_v48 = vmul.f32 2.0, %v7692_v5 }
 0xd02   : > { %v8412_v59 = vadd.f32 0.0009, %v8406_v27  ;;  %v8405_v10 = vadd.f32 %v8167_v28, %v7947_v25  ;;  %v8170_v8 = vsub.f32 %v13778_v35, %v7688_v49  ;;  %v7697_v51 = vmul.f32 2.0, %v7691_v34 }
 0xd03   : > { %v8148_v17 = vpop.f32.mrf.mxu0  ;;  %v7700_v25 = vmul.f32 2.0, %v7694_v43  ;;  %v7695_v27 = vmul.f32 %v19465_v44, %v19455_v3 }
 0xd04   : > { %14632 = vrcp.f32 %v8412_v59  ;;  %v8411_v21 = vadd.f32 0.0009, %v8405_v10  ;;  %v8408_v33 = vadd.f32 %v8170_v8, %v7950_v46  ;;  %v8169_v60 = vsub.f32 %v8148_v17, %v7687_v1 }
 0xd05   : > { %14634 = vrcp.f32 %v7715_v38  ;;  %v13781_v52 = vpop.f32.mrf.mxu0  ;;  %v7699_v46 = vmul.f32 2.0, %v7693_v56  ;;  %v7703_v3 = vadd.f32 0.0001, %v7697_v51  ;;  %v7706_v44 = vadd.f32 0.0001, %v7700_v25 }
 0xd06   : > { %14636 = vrcp.f32 %v8411_v21  ;;  %v8414_v36 = vadd.f32 0.0009, %v8408_v33  ;;  %v8407_v23 = vadd.f32 %v8169_v60, %v7949_v37  ;;  %v8172_v16 = vsub.f32 %v13781_v52, %v7690_v62  ;;  %v7235_v37 = vld [vmem:[#allocation24 + $0x18] sm:$0xff] }
 0xd07   : > { %14638 = vrcp.f32 %v7718_v13  ;;  %v8158_v9 = vpop.f32.mrf.mxu0  ;;  %v7704_v21 = vadd.f32 0.0001, %v7698_v48 }
 0xd08   : > { %14640 = vrcp.f32 %v8414_v36  ;;  %v8413_v61 = vadd.f32 0.0009, %v8407_v23  ;;  %v8410_v57 = vadd.f32 %v8172_v16, %v7952_v58  ;;  %v8171_v42 = vsub.f32 %v8158_v9, %v7689_v40  ;;  %v7233_v40 = vld [vmem:[#allocation24 + $0x8] sm:$0xff] }
 0xd09   : > { %14642 = vrcp.f32 %v7717_v45  ;;  %v13809_v29 = vpop.f32.mrf.mxu0  ;;  %v7701_v16 = vmul.f32 2.0, %v7695_v27  ;;  %v7724_v9 = vmul.f32 %v14631_v55, %v7704_v21  ;;  %v7708_v55 = vadd.f32 0.0001, %v7702_v63 }
 0xd0a   : > { %14644 = vrcp.f32 %v8413_v61  ;;  %v8416_v14 = vadd.f32 0.0009, %v8410_v57  ;;  %v8409_v49 = vadd.f32 %v8171_v42, %v7951_v20  ;;  %v8388_v31 = vsub.f32 %v13809_v29, %v7692_v5  ;;  %v7234_v61 = vld [vmem:[#allocation24 + $0x10] sm:$0xff] }
 0xd0b   : > { %14646 = vrcp.f32 %v7720_v24  ;;  %v8358_v41 = vpop.f32.mrf.mxu0  ;;  %v7705_v42 = vadd.f32 0.0001, %v7699_v46 }
 0xd0c   : > { %14648 = vrcp.f32 %v8416_v14  ;;  %v8415_v54 = vadd.f32 0.0009, %v8409_v49  ;;  %v8394_v15 = vmul.f32 2.0, %v8388_v31  ;;  %v8387_v1 = vsub.f32 %v8358_v41, %v7691_v34 }
 0xd0d   : > { %14650 = vrcp.f32 %v7719_v30  ;;  %v13812_v11 = vpop.f32.mrf.mxu0 }
 0xd0e   : > { %14652 = vrcp.f32 %v8415_v54  ;;  %v8393_v4 = vmul.f32 2.0, %v8387_v1  ;;  %v8390_v12 = vsub.f32 %v13812_v11, %v7694_v43  ;;  %v8400_v26 = vadd.f32 0.0009, %v8394_v15  ;;  %v7237_v15 = vld [vmem:[#allocation24 + $0x28] sm:$0xff] }
 0xd0f   : > { %v8368_v50 = vpop.f32.mrf.mxu0 }
 0xd10   : > { %v8396_v18 = vmul.f32 2.0, %v8390_v12  ;;  %v8389_v22 = vsub.f32 %v8368_v50, %v7693_v56  ;;  %v8399_v0 = vadd.f32 0.0009, %v8393_v4 }
 0xd11   : > { %v14633_v62 = vpop.eup %14632  ;;  %v13815_v28 = vpop.f32.mrf.mxu0 }
 0xd12   : > { %v14635_v53 = vpop.eup %14634  ;;  %v8420_v47 = vmul.f32 %v14633_v62, %v8400_v26  ;;  %v8395_v38 = vmul.f32 2.0, %v8389_v22  ;;  %v8392_v2 = vsub.f32 %v13815_v28, %v7696_v7  ;;  %v8402_v10 = vadd.f32 0.0009, %v8396_v18  ;;  %v7236_v62 = vld [vmem:[#allocation24 + $0x20] sm:$0xff] }
 0xd13   : > { %v14637_v35 = vpop.eup %14636  ;;  %v8378_v39 = vpop.f32.mrf.mxu0  ;;  %v7722_v20 = vmul.f32 %v14635_v53, %v7703_v3  ;;  %v7707_v7 = vadd.f32 0.0001, %v7701_v16 }
 0xd14   : > { %v14639_v19 = vpop.eup %14638  ;;  %v8418_v59 = vmul.f32 %v14637_v35, %v8399_v0  ;;  %v8398_v8 = vmul.f32 2.0, %v8392_v2  ;;  %v8391_v13 = vsub.f32 %v8378_v39, %v7695_v27  ;;  %v8430_v60 = vmul.f32 %v8420_v47, %v7233_v40 }
 0xd15   : > { %v14641_v17 = vpop.eup %14640  ;;  %v8683_v33 = vpop.f32.mrf.mxu0  ;;  %v8401_v52 = vadd.f32 0.0009, %v8395_v38  ;;  %v7728_v54 = vmul.f32 %v14639_v19, %v7706_v44 }
 0xd16   : > { %v14643_v45 = vpop.eup %14642  ;;  %v8424_v58 = vmul.f32 %v14641_v17, %v8402_v10  ;;  %v8397_v36 = vmul.f32 2.0, %v8391_v13  ;;  %v8429_v24 = vmul.f32 %v8418_v59, %v7232_v6  ;;  %v8404_v30 = vadd.f32 0.0009, %v8398_v8  ;;  %v19509_v13 = vld [vmem:[#allocation28] sm:$0xff]  ;;  %v19517_v17 = vld [vmem:[#allocation28 + $0x8] sm:$0xff] }
 0xd17   : > { %v14645_v23 = vpop.eup %14644  ;;  %v13843_v5 = vpop.f32.mrf.mxu0  ;;  %v8436_v41 = vmul.f32 %v8430_v60, %v7724_v9  ;;  %v7726_v12 = vmul.f32 %v14643_v45, %v7705_v42  ;;  %v19506_v10 = vmul.f32 0.25, %v8683_v33  ;;  %v19526_v33 = vld [vmem:[#allocation28 + $0x10] sm:$0xff]  ;;  %v19628_v42 = vld [vmem:[#allocation33 + $0x8] sm:$0xf] }
 0xd18   : > { %v14647_v57 = vpop.eup %14646  ;;  %v8422_v34 = vmul.f32 %v14645_v23, %v8401_v52  ;;  %v8432_v29 = vmul.f32 %v8424_v58, %v7235_v37  ;;  %v8452_v31 = vadd.f32 %v8430_v60, %v8429_v24  ;;  %v8435_v43 = vmul.f32 %v8429_v24, %v7722_v20 }
 0xd19   : > { %v14649_v14 = vpop.eup %14648  ;;  %v8688_v49 = vpop.f32.mrf.mxu0  ;;  %v8403_v56 = vadd.f32 0.0009, %v8397_v36  ;;  %v7732_v53 = vmul.f32 %v14647_v57, %v7708_v55  ;;  %v9258_v36 = vmul.f32 %v19506_v10, %v19506_v10  ;;  %v19624_v57 = vld [vmem:[#allocation33] sm:$0xff] }
 0xd1a   : > { %v14651_v1 = vpop.eup %14650  ;;  %v8428_v11 = vmul.f32 %v14649_v14, %v8404_v30  ;;  %v8431_v4 = vmul.f32 %v8422_v34, %v7234_v61  ;;  %8453 = vadd.xlane.f32.xlu1 %v8452_v31  ;;  %v8441_v18 = vadd.f32 %v8436_v41, %v8435_v43  ;;  %v8438_v22 = vmul.f32 %v8432_v29, %v7728_v54  ;;  %v19620_v61 = vld [vmem:[#allocation30] sm:$0xff] }
 0xd1b   : > { %v14653_v50 = vpop.eup %14652  ;;  %v13846_v26 = vpop.f32.mrf.mxu0  ;;  %v7730_v2 = vmul.f32 %v14651_v1, %v7707_v7  ;;  %v19502_v35 = vmul.f32 0.25, %v8688_v49  ;;  %13900 = vmatpush3.msra.mxu0 %v19620_v61 }
 0xd1c   : > { %v8426_v48 = vmul.f32 %v14653_v50, %v8403_v56  ;;  %v8478_v51 = vadd.f32 %v8432_v29, %v8431_v4  ;;  %v8437_v25 = vmul.f32 %v8431_v4, %v7726_v12  ;;  %v8434_v27 = vmul.f32 %v8428_v11, %v7237_v15  ;;  %8442 = vadd.xlane.f32.xlu0 %v8441_v18 }
 0xd1d   : > { %v8693_v28 = vpop.f32.mrf.mxu0  ;;  %v9259_v52 = vmul.f32 %v19502_v35, %v19502_v35  ;;  %13925 = vmatprep.subr.mxu0 %v20629_v32 }
 0xd1e   : > { %v19500_v47 = vmul.f32 0.25, %v8693_v28  ;;  %v8467_v0 = vadd.f32 %v8438_v22, %v8437_v25  ;;  %v8433_v38 = vmul.f32 %v8426_v48, %v7236_v62  ;;  %8479 = vadd.xlane.f32.xlu1 %v8478_v51  ;;  %v8440_v19 = vmul.f32 %v8434_v27, %v7732_v53 }
 0xd1f   : > { %v13849_v40 = vpop.f32.mrf.mxu0 }
 0xd20   : > { %13885 = vmatpush3.msra.mxu1 %v19500_v47  ;;  %v8504_v46 = vadd.f32 %v8434_v27, %v8433_v38  ;;  %v8439_v39 = vmul.f32 %v8433_v38, %v7730_v2  ;;  %8468 = vadd.xlane.f32.xlu0 %v8467_v0  ;;  %v9260_v58 = vmul.f32 %v19500_v47, %v19500_v47 }
 0xd21   : > { %v8855_v59 = vpop.f32.mrf.mxu0  ;;  %13886 = vmatprep.subr.mxu1 %v20629_v32 }
 0xd22   : > { %13887 = vmatpush3.msra.mxu1 %v19502_v35  ;;  %v8493_v8 = vadd.f32 %v8440_v19, %v8439_v39  ;;  %8505 = vadd.xlane.f32.xlu1 %v8504_v46  ;;  %v19534_v63 = vmul.f32 0.25, %v8855_v59 }
 0xd23   : > { %v13877_v6 = vpop.f32.mrf.mxu0  ;;  %13888 = vmatprep.subr.mxu1 %v20629_v32 }
 0xd24   : > { %13889 = vmatpush3.msra.mxu1 %v19506_v10  ;;  %8494 = vadd.xlane.f32.xlu0 %v8493_v8  ;;  %v9433_v5 = vmul.f32 %v19534_v63, %v19534_v63  ;;  %v9608_v9 = vmul.f32 %v19534_v63, %v19506_v10 }
 0xd25   : > { %v8860_v37 = vpop.f32.mrf.mxu0  ;;  %13891 = vmatmul.mubr.msk.f32.vlgmr.msra.gmra.mxu1 %vm8882_vm6, %v19509_v13  ;;  %13910 = vmatprep.subr.mxu1 %v20629_v32 }
 0xd26   : > { %13893 = vmatprep.mubr.msk.f32.mxu1 %vm15504_vm4, %v20629_v32  ;;  %v19528_v45 = vmul.f32 0.25, %v8860_v37 }
 0xd27   : > { %v13880_v21 = vpop.f32.mrf.mxu0 }
 0xd28   : > { %v9434_v16 = vmul.f32 %v19528_v45, %v19528_v45  ;;  %v9609_v20 = vmul.f32 %v19528_v45, %v19502_v35 }
 0xd29   : > { %v8865_v3 = vpop.f32.mrf.mxu0  ;;  %13894 = vmatmul.mubr.msk.f32.gmra.mxu1 %vm8882_vm6, %v19517_v17 }
 0xd2a   : > { %v19522_v44 = vmul.f32 0.25, %v8865_v3  ;;  %13896 = vmatprep.mubr.msk.f32.mxu1 %vm15504_vm4, %v20629_v32 }
 0xd2b   : > { %v13883_v60 = vpop.f32.mrf.mxu0 }
 0xd2c   : > { %13911 = vmatpush3.msra.mxu1 %v19522_v44  ;;  %v9435_v23 = vmul.f32 %v19522_v44, %v19522_v44  ;;  %v9610_v24 = vmul.f32 %v19522_v44, %v19500_v47 }
 0xd2d   : > { %13897 = vmatmul.mubr.msk.f32.gmra.mxu1 %vm8882_vm6, %v19526_v33  ;;  %13912 = vmatprep.subr.mxu1 %v20629_v32 }
 0xd2e   : > { %13913 = vmatpush3.msra.mxu1 %v19528_v45  ;;  %13916 = vmatprep.mubr.msk.f32.mxu1 %vm15504_vm4, %v20629_v32 }
 0xd2f   : > { %13914 = vmatprep.subr.mxu1 %v20629_v32 }
 0xd30   : > { %13915 = vmatpush3.msra.mxu1 %v19534_v63 }
 0xd31   : > { %13917 = vmatmul.mubr.msk.f32.vlgmr.msra.gmra.mxu1 %vm8882_vm6, %v19509_v13  ;;  %13936 = vmatprep.subr.mxu1 %v20629_v32 }
 0xd32   : > { %13937 = vmatpush3.msra.mxu1 %v9260_v58  ;;  %13919 = vmatprep.mubr.msk.f32.mxu1 %vm15504_vm4, %v20629_v32 }
 0xd33   : > { %13938 = vmatprep.subr.mxu1 %v20629_v32 }
 0xd34   : > { %13939 = vmatpush3.msra.mxu1 %v9259_v52 }
 0xd35   : > { %13920 = vmatmul.mubr.msk.f32.gmra.mxu1 %vm8882_vm6, %v19517_v17  ;;  %13940 = vmatprep.subr.mxu1 %v20629_v32 }
 0xd36   : > { %13941 = vmatpush3.msra.mxu1 %v9258_v36  ;;  %13922 = vmatprep.mubr.msk.f32.mxu1 %vm15504_vm4, %v20629_v32 }
 0xd37   : > { %13962 = vmatprep.subr.mxu1 %v20629_v32 }
 0xd39   : > { %13923 = vmatmul.mubr.msk.f32.gmra.mxu1 %vm8882_vm6, %v19526_v33 }
 0xd3a   : > { %13942 = vmatprep.mubr.msk.f32.mxu1 %vm15504_vm4, %v20629_v32 }
 0xd3d   : > { %13943 = vmatmul.mubr.msk.f32.vlgmr.msra.gmra.mxu1 %vm8882_vm6, %v19509_v13 }
 0xd3e   : > { %13963 = vmatpush3.msra.mxu1 %v9435_v23  ;;  %13945 = vmatprep.mubr.msk.f32.mxu1 %vm15504_vm4, %v20629_v32 }
 0xd3f   : > { %13964 = vmatprep.subr.mxu1 %v20629_v32 }
 0xd40   : > { %13965 = vmatpush3.msra.mxu1 %v9434_v16 }
 0xd41   : > { %13966 = vmatprep.subr.mxu1 %v20629_v32  ;;  %13946 = vmatmul.mubr.msk.f32.gmra.mxu1 %vm8882_vm6, %v19517_v17 }
 0xd42   : > { %13967 = vmatpush3.msra.mxu1 %v9433_v5  ;;  %13948 = vmatprep.mubr.msk.f32.mxu1 %vm15504_vm4, %v20629_v32 }
 0xd43   : > { %13988 = vmatprep.subr.mxu1 %v20629_v32 }
 0xd45   : > { %13949 = vmatmul.mubr.msk.f32.gmra.mxu1 %vm8882_vm6, %v19526_v33 }
 0xd46   : > { %13968 = vmatprep.mubr.msk.f32.mxu1 %vm15504_vm4, %v20629_v32 }
 0xd49   : > { %13969 = vmatmul.mubr.msk.f32.vlgmr.msra.gmra.mxu1 %vm8882_vm6, %v19509_v13 }
 0xd4a   : > { %13989 = vmatpush3.msra.mxu1 %v9610_v24  ;;  %13971 = vmatprep.mubr.msk.f32.mxu1 %vm15504_vm4, %v20629_v32 }
 0xd4b   : > { %13990 = vmatprep.subr.mxu1 %v20629_v32 }
 0xd4c   : > { %13991 = vmatpush3.msra.mxu1 %v9609_v20 }
 0xd4d   : > { %13992 = vmatprep.subr.mxu1 %v20629_v32  ;;  %13972 = vmatmul.mubr.msk.f32.gmra.mxu1 %vm8882_vm6, %v19517_v17 }
 0xd4e   : > { %13993 = vmatpush3.msra.mxu1 %v9608_v9  ;;  %13974 = vmatprep.mubr.msk.f32.mxu1 %vm15504_vm4, %v20629_v32 }
 0xd4f   : > { %14014 = vmatprep.subr.mxu1 %v19500_v47 }
 0xd51   : > { %13975 = vmatmul.mubr.msk.f32.gmra.mxu1 %vm8882_vm6, %v19526_v33 }
 0xd52   : > { %13994 = vmatprep.mubr.msk.f32.mxu1 %vm15504_vm4, %v20629_v32 }
 0xd55   : > { %13995 = vmatmul.mubr.msk.f32.vlgmr.msra.gmra.mxu1 %vm8882_vm6, %v19509_v13 }
 0xd56   : > { %14015 = vmatpush3.msra.mxu1 %v19500_v47  ;;  %13997 = vmatprep.mubr.msk.f32.mxu1 %vm15504_vm4, %v20629_v32 }
 0xd57   : > { %14016 = vmatprep.subr.mxu1 %v19502_v35 }
 0xd58   : > { %14017 = vmatpush3.msra.mxu1 %v19502_v35 }
 0xd59   : > { %14018 = vmatprep.subr.mxu1 %v19506_v10  ;;  %13998 = vmatmul.mubr.msk.f32.gmra.mxu1 %vm8882_vm6, %v19517_v17 }
 0xd5a   : > { %14019 = vmatpush3.msra.mxu1 %v19506_v10  ;;  %14000 = vmatprep.mubr.msk.f32.mxu1 %vm15504_vm4, %v20629_v32 }
 0xd5d   : > { %14001 = vmatmul.mubr.msk.f32.gmra.mxu1 %vm8882_vm6, %v19526_v33 }
 0xd5e   : > { %14020 = vmatprep.mubr.msk.f32.mxu1 %vm8882_vm6, %v19624_v57 }
 0xd61   : > { %14021 = vmatmul.mubr.msk.f32.vlgmr.msra.gmra.mxu1 %vm8882_vm6, %v19628_v42 }
 0xda3   : > { %v8454_v34 = vpop.xlane.xlu1 %8453 }
 0xda4   : > { %v8455_v30 = vrot.slane %v8454_v34, 4 }
 0xda5   : > { %v8443_v29 = vpop.xlane.xlu0 %8442 }
 0xda6   : > { %v8456_v14 = vadd.f32 %v8455_v30, %v8454_v34  ;;  %v8444_v49 = vrot.slane %v8443_v29, 4 }
 0xda7   : > { %v8480_v31 = vpop.xlane.xlu1 %8479 }
 0xda8   : > { %v8457_v43 = vrot.slane %v8456_v14, 2  ;;  %v8445_v41 = vadd.f32 %v8444_v49, %v8443_v29  ;;  %v8481_v54 = vrot.slane %v8480_v31, 4 }
 0xda9   : > { %v8469_v15 = vpop.xlane.xlu0 %8468 }
 0xdaa   : > { %v8446_v1 = vrot.slane %v8445_v41, 2  ;;  %v8482_v11 = vadd.f32 %v8481_v54, %v8480_v31  ;;  %v8470_v56 = vrot.slane %v8469_v15, 4  ;;  %v8458_v4 = vadd.f32 %v8457_v43, %v8456_v14 }
 0xdab   : > { %v8506_v12 = vpop.xlane.xlu1 %8505 }
 0xdac   : > { %v8483_v50 = vrot.slane %v8482_v11, 2  ;;  %v8471_v55 = vadd.f32 %v8470_v56, %v8469_v15  ;;  %v8507_v7 = vrot.slane %v8506_v12, 4  ;;  %v8447_v26 = vadd.f32 %v8446_v1, %v8445_v41 }
 0xdad   : > { %v8495_v18 = vpop.xlane.xlu0 %8494  ;;  %v8459_v22 = vrot.slane %v8458_v4, 1 }
 0xdae   : > { %v8472_v62 = vrot.slane %v8471_v55, 2  ;;  %v8508_v48 = vadd.f32 %v8507_v7, %v8506_v12  ;;  %v8496_v51 = vrot.slane %v8495_v18, 4  ;;  %v8448_v25 = vrot.slane %v8447_v26, 1 }
 0xdaf   : > { %v8484_v27 = vadd.f32 %v8483_v50, %v8482_v11  ;;  %v8460_v38 = vadd.f32 %v8459_v22, %v8458_v4 }
 0xdb0   : > { %v8509_v28 = vrot.slane %v8508_v48, 2  ;;  %v8497_v53 = vadd.f32 %v8496_v51, %v8495_v18  ;;  %v8449_v47 = vadd.f32 %v8448_v25, %v8447_v26  ;;  %v8473_v0 = vadd.f32 %v8472_v62, %v8471_v55  ;;  %v8881_v26 = vld [vmem:[#allocation34] sm:$0xff] }
 0xdb1   : > { %v8485_v2 = vrot.slane %v8484_v27, 1  ;;  %14023 = vmatprep.subr.mxu1 %v8881_v26 }
 0xdb2   : > { %v8498_v40 = vrot.slane %v8497_v53, 2  ;;  %14189 = vpush %v8449_v47  ;;  %v8474_v35 = vrot.slane %v8473_v0, 1  ;;  %v8510_v46 = vadd.f32 %v8509_v28, %v8508_v48  ;;  %14024 = vmatpush3.msra.mxu1 %v8881_v26 }
 0xdb3   : > { %14191 = vpush %v8460_v38  ;;  %v8486_v59 = vadd.f32 %v8485_v2, %v8484_v27  ;;  %14037 = vmatprep.subr.mxu1 %v8881_v26 }
 0xdb4   : > { %v8475_v39 = vadd.f32 %v8474_v35, %v8473_v0  ;;  %v8499_v19 = vadd.f32 %v8498_v40, %v8497_v53  ;;  %v8511_v10 = vrot.slane %v8510_v46, 1 }
 0xdb6   : > { %14193 = vpush %v8475_v39  ;;  %v8500_v8 = vrot.slane %v8499_v19, 1  ;;  %v8512_v6 = vadd.f32 %v8511_v10, %v8510_v46 }
 0xdb7   : > { %14195 = vpush %v8486_v59 }
 0xdb8   : > { %v8501_v13 = vadd.f32 %v8500_v8, %v8499_v19 }
 0xdba   : > { %14197 = vpush %v8501_v13 }
 0xdbb   : > { %14199 = vpush %v8512_v6 }
 0xde3   : > { %s14190_s13 = spop %14189 }
 0xde4   : > { %s8451_s0 = smul.f32 0.0051020407, %s14190_s13  ;;  %s14192_s26 = spop %14191 }
 0xde5   : > { %v8958_v37 = vpop.f32.mrf.mxu1  ;;  %s8462_s11 = smul.f32 0.0051020407, %s14192_s26  ;;  %s20631_s26 = sld [smem:[#allocation189_spill]] }
 0xde6   : > { %13902 = vmatmul.mubr.msk.f32.vlgmr.msra.gmra.mxu0 %vm8972_vm7, %v8958_v37  ;;  %v8463_v17 = vstv %s8451_s0 }
 0xde7   : > { %v13892_v21 = vpop.f32.mrf.mxu1  ;;  %13904 = vmatprep.mubr.msk.f32.mxu0 %vm15504_vm4, %v20629_v32  ;;  %13926 = vmatpush3.msra.mxu0 %v19620_v61  ;;  %8464 = vst [vmem:[%s18379_s4 + $0x6] sm:$0x1] %v8463_v17  ;;  %v8465_v3 = vstv %s8462_s11  ;;  %s14194_s2 = spop %14193 }
 0xde8   : > { %13951 = vmatprep.subr.mxu0 %v20629_v32  ;;  %8466 = vst [vmem:[%s18384_s25 + $0x6] sm:$0x1] %v8465_v3  ;;  %s8477_s28 = smul.f32 0.0051020407, %s14194_s2  ;;  %s14196_s29 = spop %14195 }
 0xde9   : > { %v8963_v33 = vpop.f32.mrf.mxu1  ;;  %s8488_s8 = smul.f32 0.0051020407, %s14196_s29 }
 0xdea   : > { %13905 = vmatmul.mubr.msk.f32.gmra.mxu0 %vm8972_vm7, %v8963_v33  ;;  %v8489_v60 = vstv %s8477_s28 }
 0xdeb   : > { %v13895_v58 = vpop.f32.mrf.mxu1  ;;  %13907 = vmatprep.mubr.msk.f32.mxu0 %vm15504_vm4, %v20629_v32  ;;  %8490 = vst [vmem:[%s18379_s4 + $0x7] sm:$0x1] %v8489_v60  ;;  %v8491_v52 = vstv %s8488_s8  ;;  %s14198_s27 = spop %14197 }
 0xdec   : > { %8492 = vst [vmem:[%s18384_s25 + $0x7] sm:$0x1] %v8491_v52  ;;  %s8503_s14 = smul.f32 0.0051020407, %s14198_s27  ;;  %s14200_s30 = spop %14199 }
 0xded   : > { %v8968_v36 = vpop.f32.mrf.mxu1  ;;  %s8514_s6 = smul.f32 0.0051020407, %s14200_s30 }
 0xdee   : > { %13908 = vmatmul.mubr.msk.f32.gmra.mxu0 %vm8972_vm7, %v8968_v36  ;;  %v8515_v23 = vstv %s8503_s14 }
 0xdef   : > { %v13898_v16 = vpop.f32.mrf.mxu1  ;;  %13927 = vmatprep.mubr.msk.f32.mxu0 %vm15504_vm4, %v20629_v32  ;;  %8516 = vst [vmem:[%s18379_s4 + $0x8] sm:$0x1] %v8515_v23  ;;  %v8517_v5 = vstv %s8514_s6 }
 0xdf0   : > { %8518 = vst [vmem:[%s18384_s25 + $0x8] sm:$0x1] %v8517_v5 }
 0xdf1   : > { %v9128_v24 = vpop.f32.mrf.mxu1 }
 0xdf2   : > { %13928 = vmatmul.mubr.msk.f32.vlgmr.msra.gmra.mxu0 %vm8972_vm7, %v9128_v24 }
 0xdf3   : > { %v13918_v20 = vpop.f32.mrf.mxu1  ;;  %13930 = vmatprep.mubr.msk.f32.mxu0 %vm15504_vm4, %v20629_v32  ;;  %13952 = vmatpush3.msra.mxu0 %v19620_v61 }
 0xdf4   : > { %13977 = vmatprep.subr.mxu0 %v20629_v32 }
 0xdf5   : > { %v9133_v9 = vpop.f32.mrf.mxu1 }
 0xdf6   : > { %13931 = vmatmul.mubr.msk.f32.gmra.mxu0 %vm8972_vm7, %v9133_v9 }
 0xdf7   : > { %v13921_v34 = vpop.f32.mrf.mxu1  ;;  %13933 = vmatprep.mubr.msk.f32.mxu0 %vm15504_vm4, %v20629_v32 }
 0xdf9   : > { %v9138_v30 = vpop.f32.mrf.mxu1 }
 0xdfa   : > { %13934 = vmatmul.mubr.msk.f32.gmra.mxu0 %vm8972_vm7, %v9138_v30 }
 0xdfb   : > { %v13924_v29 = vpop.f32.mrf.mxu1  ;;  %13953 = vmatprep.mubr.msk.f32.mxu0 %vm15504_vm4, %v20629_v32 }
 0xdfd   : > { %v9327_v14 = vpop.f32.mrf.mxu1 }
 0xdfe   : > { %13954 = vmatmul.mubr.msk.f32.vlgmr.msra.gmra.mxu0 %vm8972_vm7, %v9327_v14 }
 0xdff   : > { %v13944_v49 = vpop.f32.mrf.mxu1  ;;  %13956 = vmatprep.mubr.msk.f32.mxu0 %vm15504_vm4, %v20629_v32  ;;  %13978 = vmatpush3.msra.mxu0 %v19620_v61 }
 0xe00   : > { %14003 = vmatprep.subr.mxu0 %v20629_v32 }
 0xe01   : > { %v9332_v31 = vpop.f32.mrf.mxu1 }
 0xe02   : > { %13957 = vmatmul.mubr.msk.f32.gmra.mxu0 %vm8972_vm7, %v9332_v31 }
 0xe03   : > { %v13947_v43 = vpop.f32.mrf.mxu1  ;;  %13959 = vmatprep.mubr.msk.f32.mxu0 %vm15504_vm4, %v20629_v32 }
 0xe05   : > { %v9337_v41 = vpop.f32.mrf.mxu1 }
 0xe06   : > { %13960 = vmatmul.mubr.msk.f32.gmra.mxu0 %vm8972_vm7, %v9337_v41 }
 0xe07   : > { %v13950_v54 = vpop.f32.mrf.mxu1  ;;  %13979 = vmatprep.mubr.msk.f32.mxu0 %vm15504_vm4, %v20629_v32 }
 0xe09   : > { %v9502_v15 = vpop.f32.mrf.mxu1 }
 0xe0a   : > { %13980 = vmatmul.mubr.msk.f32.vlgmr.msra.gmra.mxu0 %vm8972_vm7, %v9502_v15 }
 0xe0b   : > { %14004 = vmatpush3.msra.mxu0 %v19620_v61  ;;  %v13970_v1 = vpop.f32.mrf.mxu1  ;;  %13982 = vmatprep.mubr.msk.f32.mxu0 %vm15504_vm4, %v20629_v32 }
 0xe0c   : > { %14028 = vmatprep.subr.mxu0 %v19522_v44 }
 0xe0d   : > { %v9507_v11 = vpop.f32.mrf.mxu1 }
 0xe0e   : > { %13983 = vmatmul.mubr.msk.f32.gmra.mxu0 %vm8972_vm7, %v9507_v11 }
 0xe0f   : > { %v13973_v56 = vpop.f32.mrf.mxu1  ;;  %13985 = vmatprep.mubr.msk.f32.mxu0 %vm15504_vm4, %v20629_v32 }
 0xe11   : > { %v9512_v4 = vpop.f32.mrf.mxu1 }
 0xe12   : > { %13986 = vmatmul.mubr.msk.f32.gmra.mxu0 %vm8972_vm7, %v9512_v4 }
 0xe13   : > { %v13976_v12 = vpop.f32.mrf.mxu1  ;;  %14005 = vmatprep.mubr.msk.f32.mxu0 %vm15504_vm4, %v20629_v32 }
 0xe15   : > { %v9677_v61 = vpop.f32.mrf.mxu1 }
 0xe16   : > { %14006 = vmatmul.mubr.msk.f32.vlgmr.msra.gmra.mxu0 %vm8972_vm7, %v9677_v61 }
 0xe17   : > { %14029 = vmatpush3.msra.mxu0 %v19522_v44  ;;  %v13996_v50 = vpop.f32.mrf.mxu1  ;;  %14008 = vmatprep.mubr.msk.f32.mxu0 %vm15504_vm4, %v20629_v32 }
 0xe18   : > { %14030 = vmatprep.subr.mxu0 %v19528_v45 }
 0xe19   : > { %14031 = vmatpush3.msra.mxu0 %v19528_v45  ;;  %v9682_v55 = vpop.f32.mrf.mxu1 }
 0xe1a   : > { %14032 = vmatprep.subr.mxu0 %v19534_v63  ;;  %14009 = vmatmul.mubr.msk.f32.gmra.mxu0 %vm8972_vm7, %v9682_v55 }
 0xe1b   : > { %14033 = vmatpush3.msra.mxu0 %v19534_v63  ;;  %v13999_v7 = vpop.f32.mrf.mxu1  ;;  %14011 = vmatprep.mubr.msk.f32.mxu0 %vm15504_vm4, %v20629_v32 }
 0xe1c   : > { %14042 = vmatprep.subr.mxu0 %v20629_v32 }
 0xe1d   : > { %v9687_v44 = vpop.f32.mrf.mxu1 }
 0xe1e   : > { %14012 = vmatmul.mubr.msk.f32.gmra.mxu0 %vm8972_vm7, %v9687_v44 }
 0xe1f   : > { %14034 = vmatprep.mubr.msk.f32.mxu0 %vm8882_vm6, %v19624_v57  ;;  %v14002_v45 = vpop.f32.mrf.mxu1 }
 0xe21   : > { %v14022_v63 = vpop.f32.mrf.mxu1 }
 0xe22   : > { %14035 = vmatmul.mubr.msk.f32.vlgmr.msra.gmra.mxu0 %vm8882_vm6, %v19628_v42 }
 0xe23   : > { %14046 = vmatprep.mubr.msk.f32.mxu0 %vm15504_vm4, %v20629_v32  ;;  %v9951_v18 = vpop.f32.mrf.mxu1 }
 0xe24   : > { %14025 = vmatprep.mubr.msk.f32.mxu1 %vm8972_vm7, %v9951_v18 }
 0xe25   : > { %14026 = vmatmul.mubr.msk.f32.vlgmr.msra.gmra.mxu1 %vm8972_vm7, %v14022_v63 }
 0xe26   : > { %14038 = vmatpush3.msra.mxu1 %v8881_v26 }
 0xe27   : > { %14055 = vmatprep.subr.mxu1 %v20629_v32 }
 0xea6   : > { %v9048_v57 = vpop.f32.mrf.mxu0 }
 0xea7   : > { %v9231_v39 = vmul.f32 %v9048_v57, %v9048_v57 }
 0xea8   : > { %v13903_v22 = vpop.f32.mrf.mxu0 }
 0xea9   : > { %v8876_v22 = vld [vmem:[#allocation31] sm:$0xff] }
 0xeaa   : > { %v9053_v62 = vpop.f32.mrf.mxu0 }
 0xeab   : > { %v9232_v13 = vmul.f32 %v9053_v62, %v9053_v62 }
 0xeac   : > { %v13906_v42 = vpop.f32.mrf.mxu0 }
 0xeae   : > { %v9058_v48 = vpop.f32.mrf.mxu0 }
 0xeaf   : > { %v9233_v52 = vmul.f32 %v9058_v48, %v9058_v48 }
 0xeb0   : > { %v13909_v51 = vpop.f32.mrf.mxu0 }
 0xeb2   : > { %v9217_v25 = vpop.f32.mrf.mxu0 }
 0xeb3   : > { %v9234_v35 = vmul.f32 %v9217_v25, %v9217_v25  ;;  %v9237_v41 = vmul.f32 %v9217_v25, %v9048_v57 }
 0xeb4   : > { %v13929_v27 = vpop.f32.mrf.mxu0 }
 0xeb5   : > { %v9246_v59 = vadd.f32 %v9234_v35, %v9231_v39  ;;  %v9240_v50 = vmul.f32 2.0, %v9237_v41 }
 0xeb6   : > { %v9222_v28 = vpop.f32.mrf.mxu0 }
 0xeb7   : > { %v9235_v10 = vmul.f32 %v9222_v28, %v9222_v28  ;;  %v9249_v21 = vadd.f32 0.0001, %v9246_v59  ;;  %v9238_v4 = vmul.f32 %v9222_v28, %v9053_v62  ;;  %v9243_v42 = vadd.f32 0.0001, %v9240_v50 }
 0xeb8   : > { %v13932_v53 = vpop.f32.mrf.mxu0 }
 0xeb9   : > { %v9247_v3 = vadd.f32 %v9235_v10, %v9232_v13  ;;  %14654 = vrcp.f32 %v9249_v21  ;;  %v9241_v51 = vmul.f32 2.0, %v9238_v4 }
 0xeba   : > { %v9227_v47 = vpop.f32.mrf.mxu0 }
 0xebb   : > { %v9236_v33 = vmul.f32 %v9227_v47, %v9227_v47  ;;  %v9250_v24 = vadd.f32 0.0001, %v9247_v3  ;;  %v9239_v45 = vmul.f32 %v9227_v47, %v9058_v48 }
 0xebc   : > { %v13935_v0 = vpop.f32.mrf.mxu0 }
 0xebd   : > { %v9248_v20 = vadd.f32 %v9236_v33, %v9233_v52  ;;  %v9242_v48 = vmul.f32 2.0, %v9239_v45 }
 0xebe   : > { %v9416_v38 = vpop.f32.mrf.mxu0 }
 0xebf   : > { %v9430_v37 = vsub.f32 %v9416_v38, %v9231_v39  ;;  %v9251_v31 = vadd.f32 0.0001, %v9248_v20  ;;  %v9244_v39 = vadd.f32 0.0001, %v9241_v51  ;;  %v9245_v21 = vadd.f32 0.0001, %v9242_v48 }
 0xec0   : > { %v13955_v2 = vpop.f32.mrf.mxu0  ;;  %v19729_v20 = vld [vmem:[%s20630_s12 + $0x8] sm:$0xff] }
 0xec2   : > { %v9421_v40 = vpop.f32.mrf.mxu0 }
 0xec3   : > { %v9431_v23 = vsub.f32 %v9421_v40, %v9232_v13 }
 0xec4   : > { %v13958_v46 = vpop.f32.mrf.mxu0 }
 0xec5   : > { %v8877_v46 = vld [vmem:[#allocation31 + $0x8] sm:$0xff] }
 0xec6   : > { %v9426_v19 = vpop.f32.mrf.mxu0  ;;  %v14655_v44 = vpop.eup %14654 }
 0xec7   : > { %v9432_v29 = vsub.f32 %v9426_v19, %v9233_v52  ;;  %v9253_v2 = vmul.f32 %v14655_v44, %v9243_v42 }
 0xec8   : > { %v13961_v8 = vpop.f32.mrf.mxu0 }
 0xeca   : > { %v9591_v6 = vpop.f32.mrf.mxu0 }
 0xecb   : > { %v9605_v17 = vsub.f32 %v9591_v6, %v9234_v35 }
 0xecc   : > { %v13981_v60 = vpop.f32.mrf.mxu0 }
 0xecd   : > { %v9789_v58 = vadd.f32 %v9605_v17, %v9430_v37  ;;  %v8878_v17 = vld [vmem:[#allocation31 + $0x10] sm:$0xff] }
 0xece   : > { %v9596_v36 = vpop.f32.mrf.mxu0 }
 0xecf   : > { %v9792_v16 = vadd.f32 0.0009, %v9789_v58  ;;  %v9606_v5 = vsub.f32 %v9596_v36, %v9235_v10 }
 0xed0   : > { %v13984_v9 = vpop.f32.mrf.mxu0 }
 0xed1   : > { %14656 = vrcp.f32 %v9792_v16  ;;  %v9790_v34 = vadd.f32 %v9606_v5, %v9431_v23  ;;  %v19738_v9 = vld [vmem:[%s20630_s12 + $0x10] sm:$0xff] }
 0xed2   : > { %v9601_v30 = vpop.f32.mrf.mxu0  ;;  %14658 = vrcp.f32 %v9250_v24  ;;  %v19717_v24 = vld [vmem:[%s20630_s12] sm:$0xff] }
 0xed3   : > { %v9793_v14 = vadd.f32 0.0009, %v9790_v34  ;;  %v9607_v49 = vsub.f32 %v9601_v30, %v9236_v33  ;;  %v19744_v34 = vld [vmem:[#allocation36] sm:$0xf] }
 0xed4   : > { %v13987_v43 = vpop.f32.mrf.mxu0 }
 0xed5   : > { %14660 = vrcp.f32 %v9793_v14  ;;  %v9791_v54 = vadd.f32 %v9607_v49, %v9432_v29 }
 0xed6   : > { %v9766_v15 = vpop.f32.mrf.mxu0  ;;  %14662 = vrcp.f32 %v9251_v31 }
 0xed7   : > { %v9794_v1 = vadd.f32 0.0009, %v9791_v54  ;;  %v9780_v11 = vsub.f32 %v9766_v15, %v9237_v41 }
 0xed8   : > { %v14007_v56 = vpop.f32.mrf.mxu0 }
 0xed9   : > { %14664 = vrcp.f32 %v9794_v1  ;;  %v9783_v12 = vmul.f32 2.0, %v9780_v11 }
 0xeda   : > { %v9771_v61 = vpop.f32.mrf.mxu0 }
 0xedb   : > { %v9781_v55 = vsub.f32 %v9771_v61, %v9238_v4  ;;  %v9786_v63 = vadd.f32 0.0009, %v9783_v12 }
 0xedc   : > { %v14010_v7 = vpop.f32.mrf.mxu0 }
 0xedd   : > { %v9784_v26 = vmul.f32 2.0, %v9781_v55 }
 0xede   : > { %v14657_v18 = vpop.eup %14656  ;;  %v9776_v57 = vpop.f32.mrf.mxu0 }
 0xedf   : > { %v9782_v25 = vsub.f32 %v9776_v57, %v9239_v45  ;;  %v9796_v27 = vmul.f32 %v14657_v18, %v9786_v63  ;;  %v14659_v0 = vpop.eup %14658  ;;  %v9787_v62 = vadd.f32 0.0009, %v9784_v26 }
 0xee0   : > { %v14013_v53 = vpop.f32.mrf.mxu0  ;;  %v9255_v6 = vmul.f32 %v14659_v0, %v9244_v39 }
 0xee1   : > { %v9785_v28 = vmul.f32 2.0, %v9782_v25  ;;  %v9801_v38 = vmul.f32 %v9796_v27, %v8876_v22 }
 0xee2   : > { %v14661_v40 = vpop.eup %14660  ;;  %v14036_v35 = vpop.f32.mrf.mxu0 }
 0xee3   : > { %9817 = vadd.xlane.f32.xlu1 %v9801_v38  ;;  %v9804_v47 = vmul.f32 %v9801_v38, %v9253_v2  ;;  %v9798_v19 = vmul.f32 %v14661_v40, %v9787_v62  ;;  %v14663_v10 = vpop.eup %14662  ;;  %v9788_v8 = vadd.f32 0.0009, %v9785_v28 }
 0xee4   : > { %v10109_v59 = vpop.f32.mrf.mxu0  ;;  %v9257_v58 = vmul.f32 %v14663_v10, %v9245_v21 }
 0xee5   : > { %14039 = vmatprep.mubr.msk.f32.mxu1 %vm8972_vm7, %v10109_v59  ;;  %9807 = vadd.xlane.f32.xlu0 %v9804_v47  ;;  %v9802_v13 = vmul.f32 %v9798_v19, %v8877_v46  ;;  %v14027_v36 = vpop.f32.mrf.mxu1 }
 0xee6   : > { %v14665_v37 = vpop.eup %14664  ;;  %14040 = vmatmul.mubr.msk.f32.vlgmr.msra.gmra.mxu1 %vm8972_vm7, %v14036_v35  ;;  %v19708_v23 = vmul.f32 0.25, %v14027_v36 }
 0xee7   : > { %9841 = vadd.xlane.f32.xlu1 %v9802_v13  ;;  %v9805_v3 = vmul.f32 %v9802_v13, %v9255_v6  ;;  %v9800_v33 = vmul.f32 %v14665_v37, %v9788_v8  ;;  %14057 = vmatprep.mubr.msk.f32.mxu1 %vm15504_vm4, %v20629_v32  ;;  %v10032_v16 = vpop.f32.mrf.mxu1 }
 0xee8   : > { %v19710_v5 = vmul.f32 0.25, %v10032_v16  ;;  %14043 = vmatpush3.msk.msra.mxu0 %vm10218_vm8, %v19708_v23  ;;  %14056 = vmatpush3.msk.msra.mxu1 %vm10218_vm8, %v19744_v34  ;;  %v10595_v6 = vmul.f32 %v19708_v23, %v19708_v23 }
 0xee9   : > { %9831 = vadd.xlane.f32.xlu0 %v9805_v3  ;;  %v9803_v60 = vmul.f32 %v9800_v33, %v8878_v17  ;;  %14044 = vmatprep.subr.mxu0 %v20629_v32 }
 0xeea   : > { %14045 = vmatpush3.msra.mxu0 %v19710_v5  ;;  %14079 = vmatprep.subr.mxu1 %v20629_v32  ;;  %v10594_v37 = vmul.f32 %v19710_v5, %v19710_v5 }
 0xeeb   : > { %9865 = vadd.xlane.f32.xlu1 %v9803_v60  ;;  %v9806_v52 = vmul.f32 %v9803_v60, %v9257_v58  ;;  %14047 = vmatmul.mubr.msk.f32.vlgmr.msra.gmra.mxu0 %vm10208_vm9, %v19717_v24 }
 0xeec   : > { %14066 = vmatprep.subr.mxu0 %v20629_v32  ;;  %14049 = vmatprep.mubr.msk.f32.mxu0 %vm15504_vm4, %v20629_v32 }
 0xeed   : > { %9855 = vadd.xlane.f32.xlu0 %v9806_v52 }
 0xeef   : > { %14050 = vmatmul.mubr.msk.f32.gmra.mxu0 %vm10208_vm9, %v19729_v20 }
 0xef0   : > { %14052 = vmatprep.mubr.msk.f32.mxu0 %vm15504_vm4, %v20629_v32 }
 0xef3   : > { %14053 = vmatmul.mubr.msk.f32.gmra.mxu0 %vm10208_vm9, %v19738_v9 }
 0xef4   : > { %14070 = vmatprep.mubr.msk.f32.mxu0 %vm15504_vm4, %v20629_v32 }
 0xf6c   : > { %v9818_v30 = vpop.xlane.xlu1 %9817 }
 0xf6d   : > { %v9819_v29 = vrot.slane %v9818_v30, 4 }
 0xf6e   : > { %v9808_v14 = vpop.xlane.xlu0 %9807 }
 0xf6f   : > { %v9820_v49 = vadd.f32 %v9819_v29, %v9818_v30  ;;  %v9809_v31 = vrot.slane %v9808_v14, 4 }
 0xf70   : > { %v9842_v43 = vpop.xlane.xlu1 %9841 }
 0xf71   : > { %v9821_v41 = vrot.slane %v9820_v49, 2  ;;  %v9810_v54 = vadd.f32 %v9809_v31, %v9808_v14  ;;  %v9843_v15 = vrot.slane %v9842_v43, 4 }
 0xf72   : > { %v9832_v1 = vpop.xlane.xlu0 %9831 }
 0xf73   : > { %v9811_v11 = vrot.slane %v9810_v54, 2  ;;  %v9844_v56 = vadd.f32 %v9843_v15, %v9842_v43  ;;  %v9833_v4 = vrot.slane %v9832_v1, 4  ;;  %v9822_v12 = vadd.f32 %v9821_v41, %v9820_v49 }
 0xf74   : > { %v9866_v61 = vpop.xlane.xlu1 %9865 }
 0xf75   : > { %v9845_v50 = vrot.slane %v9844_v56, 2  ;;  %v9834_v55 = vadd.f32 %v9833_v4, %v9832_v1  ;;  %v9867_v7 = vrot.slane %v9866_v61, 4  ;;  %v9812_v44 = vadd.f32 %v9811_v11, %v9810_v54 }
 0xf76   : > { %v9856_v45 = vpop.xlane.xlu0 %9855  ;;  %v9823_v63 = vrot.slane %v9822_v12, 1 }
 0xf77   : > { %v9835_v26 = vrot.slane %v9834_v55, 2  ;;  %v9868_v18 = vadd.f32 %v9867_v7, %v9866_v61  ;;  %v9857_v57 = vrot.slane %v9856_v45, 4  ;;  %v9813_v22 = vrot.slane %v9812_v44, 1 }
 0xf78   : > { %v9846_v42 = vadd.f32 %v9845_v50, %v9844_v56  ;;  %v9824_v0 = vadd.f32 %v9823_v63, %v9822_v12 }
 0xf79   : > { %v9869_v51 = vrot.slane %v9868_v18, 2  ;;  %v9858_v25 = vadd.f32 %v9857_v57, %v9856_v45  ;;  %v9814_v27 = vadd.f32 %v9813_v22, %v9812_v44  ;;  %v9836_v53 = vadd.f32 %v9835_v26, %v9834_v55 }
 0xf7a   : > { %v9847_v62 = vrot.slane %v9846_v42, 1 }
 0xf7b   : > { %v9859_v28 = vrot.slane %v9858_v25, 2  ;;  %14201 = vpush %v9814_v27  ;;  %v9837_v38 = vrot.slane %v9836_v53, 1  ;;  %v9870_v2 = vadd.f32 %v9869_v51, %v9868_v18 }
 0xf7c   : > { %14203 = vpush %v9824_v0  ;;  %v9848_v46 = vadd.f32 %v9847_v62, %v9846_v42 }
 0xf7d   : > { %v9838_v40 = vadd.f32 %v9837_v38, %v9836_v53  ;;  %v9860_v35 = vadd.f32 %v9859_v28, %v9858_v25  ;;  %v9871_v39 = vrot.slane %v9870_v2, 1 }
 0xf7f   : > { %14205 = vpush %v9838_v40  ;;  %v9861_v48 = vrot.slane %v9860_v35, 1  ;;  %v9872_v19 = vadd.f32 %v9871_v39, %v9870_v2 }
 0xf80   : > { %14207 = vpush %v9848_v46 }
 0xf81   : > { %v9862_v47 = vadd.f32 %v9861_v48, %v9860_v35 }
 0xf83   : > { %14209 = vpush %v9862_v47 }
 0xf84   : > { %14211 = vpush %v9872_v19 }
 0xfa6   : > { %v14041_v59 = vpop.f32.mrf.mxu1 }
 0xfa7   : > { %v10200_v10 = vmul.f32 0.25, %v14041_v59 }
 0xfa8   : > { %v10190_v8 = vpop.f32.mrf.mxu1 }
 0xfa9   : > { %v10199_v13 = vmul.f32 0.25, %v10190_v8  ;;  %14067 = vmatpush3.msk.msra.mxu0 %vm10218_vm8, %v10200_v10  ;;  %v10772_v60 = vmul.f32 %v10200_v10, %v10200_v10  ;;  %v10949_v16 = vmul.f32 %v10200_v10, %v19708_v23 }
 0xfaa   : > { %14068 = vmatprep.subr.mxu0 %v20629_v32 }
 0xfab   : > { %14069 = vmatpush3.msra.mxu0 %v10199_v13  ;;  %v10771_v36 = vmul.f32 %v10199_v13, %v10199_v13  ;;  %v10948_v30 = vmul.f32 %v10199_v13, %v19710_v5  ;;  %v10288_v23 = vpop.f32.mrf.mxu0 }
 0xfac   : > { %s14202_s11 = spop %14201  ;;  %14071 = vmatmul.mubr.msk.f32.vlgmr.msra.gmra.mxu0 %vm10208_vm9, %v19717_v24  ;;  %14090 = vmatprep.subr.mxu0 %v20629_v32 }
 0xfad   : > { %s9816_s2 = smul.f32 0.027777778, %s14202_s11  ;;  %s14204_s28 = spop %14203  ;;  %14073 = vmatprep.mubr.msk.f32.mxu0 %vm15504_vm4, %v20629_v32  ;;  %14091 = vmatpush3.msk.msra.mxu0 %vm10218_vm8, %v10595_v6  ;;  %v14048_v5 = vpop.f32.mrf.mxu0 }
 0xfae   : > { %s9826_s29 = smul.f32 0.027777778, %s14204_s28  ;;  %14092 = vmatprep.subr.mxu0 %v20629_v32  ;;  %14058 = vmatmul.mubr.msk.f32.vlgmr.msra.gmra.mxu1 %vm10302_vm10, %v10288_v23 }
 0xfaf   : > { %v9827_v17 = vstv %s9816_s2  ;;  %14093 = vmatpush3.msra.mxu0 %v10594_v37  ;;  %14060 = vmatprep.mubr.msk.f32.mxu1 %vm15504_vm4, %v20629_v32 }
 0xfb0   : > { %9828 = vst [vmem:[%s18379_s4 + $0x9] sm:$0x1] %v9827_v17  ;;  %v9829_v21 = vstv %s9826_s29  ;;  %s14206_s8 = spop %14205  ;;  %14074 = vmatmul.mubr.msk.f32.gmra.mxu0 %vm10208_vm9, %v19729_v20  ;;  %14114 = vmatprep.subr.mxu0 %v20629_v32 }
 0xfb1   : > { %9830 = vst [vmem:[%s18384_s25 + $0x9] sm:$0x1] %v9829_v21  ;;  %s9840_s27 = smul.f32 0.027777778, %s14206_s8  ;;  %s14208_s14 = spop %14207  ;;  %14076 = vmatprep.mubr.msk.f32.mxu0 %vm15504_vm4, %v20629_v32  ;;  %14080 = vmatpush3.msk.msra.mxu1 %vm10218_vm8, %v19744_v34 }
 0xfb2   : > { %s9850_s30 = smul.f32 0.027777778, %s14208_s14  ;;  %14103 = vmatprep.subr.mxu1 %v20629_v32 }
 0xfb3   : > { %v9851_v3 = vstv %s9840_s27 }
 0xfb4   : > { %9852 = vst [vmem:[%s18379_s4 + $0xa] sm:$0x1] %v9851_v3  ;;  %v9853_v33 = vstv %s9850_s30  ;;  %s14210_s6 = spop %14209  ;;  %14077 = vmatmul.mubr.msk.f32.gmra.mxu0 %vm10208_vm9, %v19738_v9 }
 0xfb5   : > { %9854 = vst [vmem:[%s18384_s25 + $0xa] sm:$0x1] %v9853_v33  ;;  %s9864_s1 = smul.f32 0.027777778, %s14210_s6  ;;  %s14212_s22 = spop %14211  ;;  %14094 = vmatprep.mubr.msk.f32.mxu0 %vm15504_vm4, %v20629_v32 }
 0xfb6   : > { %s9874_s24 = smul.f32 0.027777778, %s14212_s22 }
 0xfb7   : > { %v9875_v58 = vstv %s9864_s1 }
 0xfb8   : > { %9876 = vst [vmem:[%s18379_s4 + $0xb] sm:$0x1] %v9875_v58  ;;  %v9877_v52 = vstv %s9874_s24  ;;  %14095 = vmatmul.mubr.msk.f32.vlgmr.msra.gmra.mxu0 %vm10208_vm9, %v19717_v24 }
 0xfb9   : > { %9878 = vst [vmem:[%s18384_s25 + $0xb] sm:$0x1] %v9877_v52  ;;  %14115 = vmatpush3.msk.msra.mxu0 %vm10218_vm8, %v10772_v60  ;;  %14097 = vmatprep.mubr.msk.f32.mxu0 %vm15504_vm4, %v20629_v32 }
 0xfba   : > { %14116 = vmatprep.subr.mxu0 %v20629_v32 }
 0xfbb   : > { %14117 = vmatpush3.msra.mxu0 %v10771_v36 }
 0xfbc   : > { %14098 = vmatmul.mubr.msk.f32.gmra.mxu0 %vm10208_vm9, %v19729_v20  ;;  %14138 = vmatprep.subr.mxu0 %v20629_v32 }
 0xfbd   : > { %14100 = vmatprep.mubr.msk.f32.mxu0 %vm15504_vm4, %v20629_v32 }
 0xfc0   : > { %14101 = vmatmul.mubr.msk.f32.gmra.mxu0 %vm10208_vm9, %v19738_v9 }
 0xfc1   : > { %14118 = vmatprep.mubr.msk.f32.mxu0 %vm15504_vm4, %v20629_v32 }
 0xfc4   : > { %14119 = vmatmul.mubr.msk.f32.vlgmr.msra.gmra.mxu0 %vm10208_vm9, %v19717_v24 }
 0xfc5   : > { %14139 = vmatpush3.msk.msra.mxu0 %vm10218_vm8, %v10949_v16  ;;  %14121 = vmatprep.mubr.msk.f32.mxu0 %vm15504_vm4, %v20629_v32 }
 0xfc6   : > { %14140 = vmatprep.subr.mxu0 %v20629_v32 }
 0xfc7   : > { %14141 = vmatpush3.msra.mxu0 %v10948_v30 }
 0xfc8   : > { %14122 = vmatmul.mubr.msk.f32.gmra.mxu0 %vm10208_vm9, %v19729_v20 }
 0xfc9   : > { %14124 = vmatprep.mubr.msk.f32.mxu0 %vm15504_vm4, %v20629_v32 }
 0xfcc   : > { %14125 = vmatmul.mubr.msk.f32.gmra.mxu0 %vm10208_vm9, %v19738_v9 }
 0xfcd   : > { %14142 = vmatprep.mubr.msk.f32.mxu0 %vm15504_vm4, %v20629_v32 }
 0xfd0   : > { %14143 = vmatmul.mubr.msk.f32.vlgmr.msra.gmra.mxu0 %vm10208_vm9, %v19717_v24  ;;  %v10293_v24 = vpop.f32.mrf.mxu0 }
 0xfd1   : > { %14145 = vmatprep.mubr.msk.f32.mxu0 %vm15504_vm4, %v20629_v32  ;;  %14061 = vmatmul.mubr.msk.f32.gmra.mxu1 %vm10302_vm10, %v10293_v24 }
 0xfd2   : > { %14063 = vmatprep.mubr.msk.f32.mxu1 %vm15504_vm4, %v20629_v32 }
 0xfd4   : > { %14146 = vmatmul.mubr.msk.f32.gmra.mxu0 %vm10208_vm9, %v19729_v20  ;;  %v14051_v20 = vpop.f32.mrf.mxu0 }
 0xfd5   : > { %14148 = vmatprep.mubr.msk.f32.mxu0 %vm15504_vm4, %v20629_v32 }
 0xfd8   : > { %14149 = vmatmul.mubr.msk.f32.gmra.mxu0 %vm10208_vm9, %v19738_v9  ;;  %v10298_v9 = vpop.f32.mrf.mxu0 }
 0xfd9   : > { %14064 = vmatmul.mubr.msk.f32.gmra.mxu1 %vm10302_vm10, %v10298_v9 }
 0xfda   : > { %v14054_v29 = vpop.f32.mrf.mxu0  ;;  %14081 = vmatprep.mubr.msk.f32.mxu1 %vm15504_vm4, %v20629_v32 }
0x106c   : > { %v10464_v14 = vpop.f32.mrf.mxu0 }
0x106d   : > { %14082 = vmatmul.mubr.msk.f32.vlgmr.msra.gmra.mxu1 %vm10302_vm10, %v10464_v14 }
0x106e   : > { %v14072_v49 = vpop.f32.mrf.mxu0  ;;  %14084 = vmatprep.mubr.msk.f32.mxu1 %vm15504_vm4, %v20629_v32  ;;  %14104 = vmatpush3.msk.msra.mxu1 %vm10218_vm8, %v19744_v34  ;;  %v10381_v42 = vpop.f32.mrf.mxu1 }
0x106f   : > { %14127 = vmatprep.subr.mxu1 %v20629_v32  ;;  %v10567_v19 = vmul.f32 %v10381_v42, %v10381_v42 }
0x1070   : > { %v10469_v31 = vpop.f32.mrf.mxu0  ;;  %v14059_v51 = vpop.f32.mrf.mxu1 }
0x1071   : > { %14085 = vmatmul.mubr.msk.f32.gmra.mxu1 %vm10302_vm10, %v10469_v31 }
0x1072   : > { %v14075_v43 = vpop.f32.mrf.mxu0  ;;  %14087 = vmatprep.mubr.msk.f32.mxu1 %vm15504_vm4, %v20629_v32 }
0x1074   : > { %v10474_v41 = vpop.f32.mrf.mxu0 }
0x1075   : > { %14088 = vmatmul.mubr.msk.f32.gmra.mxu1 %vm10302_vm10, %v10474_v41 }
0x1076   : > { %v14078_v54 = vpop.f32.mrf.mxu0  ;;  %14105 = vmatprep.mubr.msk.f32.mxu1 %vm15504_vm4, %v20629_v32 }
0x1078   : > { %v10665_v15 = vpop.f32.mrf.mxu0 }
0x1079   : > { %14106 = vmatmul.mubr.msk.f32.vlgmr.msra.gmra.mxu1 %vm10302_vm10, %v10665_v15 }
0x107a   : > { %v14096_v1 = vpop.f32.mrf.mxu0  ;;  %14108 = vmatprep.mubr.msk.f32.mxu1 %vm15504_vm4, %v20629_v32  ;;  %14128 = vmatpush3.msk.msra.mxu1 %vm10218_vm8, %v19744_v34 }
0x107b   : > { %14151 = vmatprep.subr.mxu1 %v20629_v32 }
0x107c   : > { %v10670_v11 = vpop.f32.mrf.mxu0 }
0x107d   : > { %14109 = vmatmul.mubr.msk.f32.gmra.mxu1 %vm10302_vm10, %v10670_v11 }
0x107e   : > { %v14099_v56 = vpop.f32.mrf.mxu0  ;;  %14111 = vmatprep.mubr.msk.f32.mxu1 %vm15504_vm4, %v20629_v32 }
0x1080   : > { %v10675_v4 = vpop.f32.mrf.mxu0 }
0x1081   : > { %14112 = vmatmul.mubr.msk.f32.gmra.mxu1 %vm10302_vm10, %v10675_v4 }
0x1082   : > { %v14102_v12 = vpop.f32.mrf.mxu0  ;;  %14129 = vmatprep.mubr.msk.f32.mxu1 %vm15504_vm4, %v20629_v32 }
0x1084   : > { %v10842_v61 = vpop.f32.mrf.mxu0 }
0x1085   : > { %14130 = vmatmul.mubr.msk.f32.vlgmr.msra.gmra.mxu1 %vm10302_vm10, %v10842_v61 }
0x1086   : > { %v14120_v50 = vpop.f32.mrf.mxu0  ;;  %14132 = vmatprep.mubr.msk.f32.mxu1 %vm15504_vm4, %v20629_v32  ;;  %14152 = vmatpush3.msk.msra.mxu1 %vm10218_vm8, %v19744_v34 }
0x1088   : > { %v10847_v55 = vpop.f32.mrf.mxu0 }
0x1089   : > { %14133 = vmatmul.mubr.msk.f32.gmra.mxu1 %vm10302_vm10, %v10847_v55 }
0x108a   : > { %v14123_v7 = vpop.f32.mrf.mxu0  ;;  %14135 = vmatprep.mubr.msk.f32.mxu1 %vm15504_vm4, %v20629_v32 }
0x108c   : > { %v10852_v44 = vpop.f32.mrf.mxu0 }
0x108d   : > { %14136 = vmatmul.mubr.msk.f32.gmra.mxu1 %vm10302_vm10, %v10852_v44 }
0x108e   : > { %v14126_v45 = vpop.f32.mrf.mxu0  ;;  %14153 = vmatprep.mubr.msk.f32.mxu1 %vm15504_vm4, %v20629_v32 }
0x1090   : > { %v11019_v63 = vpop.f32.mrf.mxu0 }
0x1091   : > { %14154 = vmatmul.mubr.msk.f32.vlgmr.msra.gmra.mxu1 %vm10302_vm10, %v11019_v63  ;;  %v10386_v25 = vpop.f32.mrf.mxu1 }
0x1092   : > { %v14144_v26 = vpop.f32.mrf.mxu0  ;;  %14156 = vmatprep.mubr.msk.f32.mxu1 %vm15504_vm4, %v20629_v32  ;;  %v10568_v6 = vmul.f32 %v10386_v25, %v10386_v25 }
0x1093   : > { %v14062_v27 = vpop.f32.mrf.mxu1 }
0x1094   : > { %v11024_v34 = vpop.f32.mrf.mxu0 }
0x1095   : > { %14157 = vmatmul.mubr.msk.f32.gmra.mxu1 %vm10302_vm10, %v11024_v34 }
0x1096   : > { %v14147_v18 = vpop.f32.mrf.mxu0  ;;  %14159 = vmatprep.mubr.msk.f32.mxu1 %vm15504_vm4, %v20629_v32 }
0x1098   : > { %v11029_v57 = vpop.f32.mrf.mxu0 }
0x1099   : > { %14160 = vmatmul.mubr.msk.f32.gmra.mxu1 %vm10302_vm10, %v11029_v57  ;;  %v10391_v53 = vpop.f32.mrf.mxu1 }
0x109a   : > { %v14150_v22 = vpop.f32.mrf.mxu0  ;;  %v10569_v36 = vmul.f32 %v10391_v53, %v10391_v53 }
0x109b   : > { %v14065_v0 = vpop.f32.mrf.mxu1 }
0x112d   : > { %v10553_v62 = vpop.f32.mrf.mxu1 }
0x112e   : > { %v10570_v32 = vmul.f32 %v10553_v62, %v10553_v62  ;;  %v10573_v15 = vmul.f32 %v10553_v62, %v10381_v42  ;;  %v10205_v42 = vld [vmem:[%s20631_s26] sm:$0xff] }
0x112f   : > { %v14083_v28 = vpop.f32.mrf.mxu1 }
0x1130   : > { %v10582_v10 = vadd.f32 %v10570_v32, %v10567_v19  ;;  %v10576_v7 = vmul.f32 2.0, %v10573_v15 }
0x1131   : > { %v10558_v38 = vpop.f32.mrf.mxu1 }
0x1132   : > { %v10571_v8 = vmul.f32 %v10558_v38, %v10558_v38  ;;  %v10585_v3 = vadd.f32 0.0001, %v10582_v10  ;;  %v10574_v61 = vmul.f32 %v10558_v38, %v10386_v25  ;;  %v10579_v51 = vadd.f32 0.0001, %v10576_v7 }
0x1133   : > { %v14086_v2 = vpop.f32.mrf.mxu1 }
0x1134   : > { %v10583_v33 = vadd.f32 %v10571_v8, %v10568_v6  ;;  %14666 = vrcp.f32 %v10585_v3  ;;  %v10577_v27 = vmul.f32 2.0, %v10574_v61 }
0x1135   : > { %v10563_v40 = vpop.f32.mrf.mxu1 }
0x1136   : > { %v10572_v60 = vmul.f32 %v10563_v40, %v10563_v40  ;;  %v10586_v24 = vadd.f32 0.0001, %v10583_v33  ;;  %v10575_v26 = vmul.f32 %v10563_v40, %v10391_v53  ;;  %v10206_v53 = vld [vmem:[%s20631_s26 + $0x8] sm:$0xff]  ;;  %v10580_v40 = vadd.f32 0.0001, %v10577_v27 }
0x1137   : > { %v14089_v35 = vpop.f32.mrf.mxu1 }
0x1138   : > { %v10584_v20 = vadd.f32 %v10572_v60, %v10569_v36 }
0x1139   : > { %v10754_v46 = vpop.f32.mrf.mxu1 }
0x113a   : > { %v10768_v17 = vsub.f32 %v10754_v46, %v10567_v19  ;;  %v10587_v41 = vadd.f32 0.0001, %v10584_v20 }
0x113b   : > { %v14107_v39 = vpop.f32.mrf.mxu1 }
0x113d   : > { %v10759_v48 = vpop.f32.mrf.mxu1 }
0x113e   : > { %v10769_v30 = vsub.f32 %v10759_v48, %v10568_v6  ;;  %v10578_v48 = vmul.f32 2.0, %v10575_v26  ;;  %v10207_v6 = vld [vmem:[%s20631_s26 + $0x10] sm:$0xff] }
0x113f   : > { %v14110_v47 = vpop.f32.mrf.mxu1 }
0x1141   : > { %v10764_v59 = vpop.f32.mrf.mxu1  ;;  %v14667_v63 = vpop.eup %14666 }
0x1142   : > { %v10770_v49 = vsub.f32 %v10764_v59, %v10569_v36  ;;  %v10589_v46 = vmul.f32 %v14667_v63, %v10579_v51 }
0x1143   : > { %v14113_v13 = vpop.f32.mrf.mxu1 }
0x1145   : > { %v10931_v37 = vpop.f32.mrf.mxu1 }
0x1146   : > { %v10945_v21 = vsub.f32 %v10931_v37, %v10570_v32  ;;  %v10581_v37 = vadd.f32 0.0001, %v10578_v48 }
0x1147   : > { %v14131_v58 = vpop.f32.mrf.mxu1 }
0x1148   : > { %v11131_v52 = vadd.f32 %v10945_v21, %v10768_v17 }
0x1149   : > { %v10936_v16 = vpop.f32.mrf.mxu1 }
0x114a   : > { %v11134_v23 = vadd.f32 0.0009, %v11131_v52  ;;  %v10946_v5 = vsub.f32 %v10936_v16, %v10571_v8 }
0x114b   : > { %v14134_v9 = vpop.f32.mrf.mxu1 }
0x114c   : > { %14668 = vrcp.f32 %v11134_v23  ;;  %v11132_v29 = vadd.f32 %v10946_v5, %v10769_v30 }
0x114d   : > { %v10941_v14 = vpop.f32.mrf.mxu1  ;;  %14670 = vrcp.f32 %v10586_v24 }
0x114e   : > { %v11135_v31 = vadd.f32 0.0009, %v11132_v29  ;;  %v10947_v43 = vsub.f32 %v10941_v14, %v10572_v60 }
0x114f   : > { %v14137_v54 = vpop.f32.mrf.mxu1 }
0x1150   : > { %14672 = vrcp.f32 %v11135_v31  ;;  %v11133_v1 = vadd.f32 %v10947_v43, %v10770_v49 }
0x1151   : > { %v11108_v11 = vpop.f32.mrf.mxu1  ;;  %14674 = vrcp.f32 %v10587_v41 }
0x1152   : > { %v11136_v56 = vadd.f32 0.0009, %v11133_v1  ;;  %v11122_v4 = vsub.f32 %v11108_v11, %v10573_v15 }
0x1153   : > { %v14155_v12 = vpop.f32.mrf.mxu1 }
0x1154   : > { %14676 = vrcp.f32 %v11136_v56  ;;  %v11125_v50 = vmul.f32 2.0, %v11122_v4 }
0x1155   : > { %v11113_v55 = vpop.f32.mrf.mxu1 }
0x1156   : > { %v11123_v44 = vsub.f32 %v11113_v55, %v10574_v61  ;;  %v11128_v34 = vadd.f32 0.0009, %v11125_v50 }
0x1157   : > { %v14158_v45 = vpop.f32.mrf.mxu1 }
0x1158   : > { %v11126_v18 = vmul.f32 2.0, %v11123_v44 }
0x1159   : > { %v14669_v57 = vpop.eup %14668  ;;  %v11118_v22 = vpop.f32.mrf.mxu1 }
0x115a   : > { %v11124_v0 = vsub.f32 %v11118_v22, %v10575_v26  ;;  %v11138_v25 = vmul.f32 %v14669_v57, %v11128_v34  ;;  %v14671_v28 = vpop.eup %14670  ;;  %v11129_v38 = vadd.f32 0.0009, %v11126_v18 }
0x115b   : > { %v14161_v62 = vpop.f32.mrf.mxu1  ;;  %v10591_v8 = vmul.f32 %v14671_v28, %v10580_v40 }
0x115c   : > { %v11127_v2 = vmul.f32 2.0, %v11124_v0  ;;  %v11143_v35 = vmul.f32 %v11138_v25, %v10205_v42 }
0x115d   : > { %v14673_v39 = vpop.eup %14672 }
0x115e   : > { %11159 = vadd.xlane.f32.xlu1 %v11143_v35  ;;  %v11146_v32 = vmul.f32 %v11143_v35, %v10589_v46  ;;  %v11140_v47 = vmul.f32 %v14673_v39, %v11129_v38  ;;  %v14675_v19 = vpop.eup %14674  ;;  %v11130_v59 = vadd.f32 0.0009, %v11127_v2 }
0x115f   : > { %v10593_v33 = vmul.f32 %v14675_v19, %v10581_v37 }
0x1160   : > { %11149 = vadd.xlane.f32.xlu0 %v11146_v32  ;;  %v11144_v10 = vmul.f32 %v11140_v47, %v10206_v53 }
0x1161   : > { %v14677_v13 = vpop.eup %14676 }
0x1162   : > { %11183 = vadd.xlane.f32.xlu1 %v11144_v10  ;;  %v11147_v17 = vmul.f32 %v11144_v10, %v10591_v8  ;;  %v11142_v21 = vmul.f32 %v14677_v13, %v11130_v59 }
0x1164   : > { %11173 = vadd.xlane.f32.xlu0 %v11147_v17  ;;  %v11145_v3 = vmul.f32 %v11142_v21, %v10207_v6 }
0x1166   : > { %11207 = vadd.xlane.f32.xlu1 %v11145_v3  ;;  %v11148_v60 = vmul.f32 %v11145_v3, %v10593_v33 }
0x1168   : > { %11197 = vadd.xlane.f32.xlu0 %v11148_v60 }
0x11e7   : > { %v11160_v58 = vpop.xlane.xlu1 %11159 }
0x11e8   : > { %v11161_v52 = vrot.slane %v11160_v58, 4 }
0x11e9   : > { %v11150_v36 = vpop.xlane.xlu0 %11149 }
0x11ea   : > { %v11162_v16 = vadd.f32 %v11161_v52, %v11160_v58  ;;  %v11151_v30 = vrot.slane %v11150_v36, 4 }
0x11eb   : > { %v11184_v23 = vpop.xlane.xlu1 %11183 }
0x11ec   : > { %v11163_v5 = vrot.slane %v11162_v16, 2  ;;  %v11152_v24 = vadd.f32 %v11151_v30, %v11150_v36  ;;  %v11185_v20 = vrot.slane %v11184_v23, 4 }
0x11ed   : > { %v11174_v9 = vpop.xlane.xlu0 %11173 }
0x11ee   : > { %v11153_v29 = vrot.slane %v11152_v24, 2  ;;  %v11186_v14 = vadd.f32 %v11185_v20, %v11184_v23  ;;  %v11175_v49 = vrot.slane %v11174_v9, 4  ;;  %v11164_v31 = vadd.f32 %v11163_v5, %v11162_v16 }
0x11ef   : > { %v11208_v43 = vpop.xlane.xlu1 %11207 }
0x11f0   : > { %v11187_v41 = vrot.slane %v11186_v14, 2  ;;  %v11176_v54 = vadd.f32 %v11175_v49, %v11174_v9  ;;  %v11209_v15 = vrot.slane %v11208_v43, 4  ;;  %v11154_v1 = vadd.f32 %v11153_v29, %v11152_v24 }
0x11f1   : > { %v11198_v11 = vpop.xlane.xlu0 %11197  ;;  %v11165_v56 = vrot.slane %v11164_v31, 1 }
0x11f2   : > { %v11177_v4 = vrot.slane %v11176_v54, 2  ;;  %v11210_v12 = vadd.f32 %v11209_v15, %v11208_v43  ;;  %v11199_v61 = vrot.slane %v11198_v11, 4  ;;  %v11155_v50 = vrot.slane %v11154_v1, 1 }
0x11f3   : > { %v11188_v55 = vadd.f32 %v11187_v41, %v11186_v14  ;;  %v11166_v26 = vadd.f32 %v11165_v56, %v11164_v31 }
0x11f4   : > { %v11211_v7 = vrot.slane %v11210_v12, 2  ;;  %v11200_v44 = vadd.f32 %v11199_v61, %v11198_v11  ;;  %v11156_v45 = vadd.f32 %v11155_v50, %v11154_v1  ;;  %v11178_v63 = vadd.f32 %v11177_v4, %v11176_v54 }
0x11f5   : > { %v11189_v34 = vrot.slane %v11188_v55, 1 }
0x11f6   : > { %v11212_v18 = vadd.f32 %v11211_v7, %v11210_v12  ;;  %v11201_v57 = vrot.slane %v11200_v44, 2  ;;  %14213 = vpush %v11156_v45  ;;  %v11179_v22 = vrot.slane %v11178_v63, 1 }
0x11f7   : > { %14215 = vpush %v11166_v26  ;;  %v11190_v27 = vadd.f32 %v11189_v34, %v11188_v55 }
0x11f8   : > { %v11202_v42 = vadd.f32 %v11201_v57, %v11200_v44  ;;  %v11180_v51 = vadd.f32 %v11179_v22, %v11178_v63  ;;  %v11213_v0 = vrot.slane %v11212_v18, 1 }
0x11fa   : > { %14217 = vpush %v11180_v51  ;;  %v11203_v25 = vrot.slane %v11202_v42, 1  ;;  %v11214_v28 = vadd.f32 %v11213_v0, %v11212_v18 }
0x11fb   : > { %14219 = vpush %v11190_v27 }
0x11fc   : > { %v11204_v62 = vadd.f32 %v11203_v25, %v11202_v42 }
0x11fe   : > { %14221 = vpush %v11204_v62 }
0x11ff   : > { %14223 = vpush %v11214_v28 }
0x1227   : > { %s14214_s8 = spop %14213 }
0x1228   : > { %s11158_s27 = smul.f32 0.25, %s14214_s8  ;;  %s14216_s14 = spop %14215 }
0x1229   : > { %s11168_s30 = smul.f32 0.25, %s14216_s14 }
0x122a   : > { %v11169_v38 = vstv %s11158_s27 }
0x122b   : > { %11170 = vst [vmem:[%s18379_s4 + $0xc] sm:$0x1] %v11169_v38  ;;  %v11171_v2 = vstv %s11168_s30  ;;  %s14218_s6 = spop %14217 }
0x122c   : > { %11172 = vst [vmem:[%s18384_s25 + $0xc] sm:$0x1] %v11171_v2  ;;  %s11182_s1 = smul.f32 0.25, %s14218_s6  ;;  %s14220_s22 = spop %14219 }
0x122d   : > { %s11192_s24 = smul.f32 0.25, %s14220_s22 }
0x122e   : > { %v11193_v35 = vstv %s11182_s1 }
0x122f   : > { %11194 = vst [vmem:[%s18379_s4 + $0xd] sm:$0x1] %v11193_v35  ;;  %v11195_v46 = vstv %s11192_s24  ;;  %s14222_s13 = spop %14221 }
0x1230   : > { %11196 = vst [vmem:[%s18384_s25 + $0xd] sm:$0x1] %v11195_v46  ;;  %s11206_s0 = smul.f32 0.25, %s14222_s13  ;;  %s14224_s11 = spop %14223 }
0x1231   : > { %s11216_s2 = smul.f32 0.25, %s14224_s11 }
0x1232   : > { %v11217_v39 = vstv %s11206_s0 }
0x1233   : > { %11218 = vst [vmem:[%s18379_s4 + $0xe] sm:$0x1] %v11217_v39  ;;  %v11219_v53 = vstv %s11216_s2 }
0x1234   : > { %11220 = vst [vmem:[%s18384_s25 + $0xe] sm:$0x1] %v11219_v53 }
0x1235 PF: > { %p50_p6 = scmp.ge.s32.totalorder %s15890_s9, 4   ;;  %s20632_s27 = smov %s15466_s3 }
0x1236   : > { %s20633_s3 = smov %s15470_s7  ;;  %s20634_s7 = smov %s15901_s5 }
0x1237   : > { %s20635_s28 = smov %s15890_s9  ;;  %52 = sbr.rel (!%p50_p6) target bundleno = 35 (0x23), region = 269 }
0x123c   :  { %11258 = vsyncpa [#allocation3], 1 }
0x123d   :  { %11260 = vsyncpa [#allocation3 + $0x1], 1 }
0x123e   :  { %11261 = vsyncpa [#allocation5], 1 }
0x123f   :  { %11263 = vsyncpa [#allocation5 + $0x1], 1 }
0x1240   :  { %11264 = vsyncpa [#allocation8], 1 }
0x1241   :  { %11265 = vsyncpa [#allocation11], 1 }
0x1242   :  { %11266 = vsyncpa [#allocation14], 1 }
0x1243   :  { %11267 = vsyncpa [#allocation17], 1 }
0x1244   :  { %11268 = vsyncpa [#allocation20], 1 }
0x1245   :  { %11269 = vsyncpa [#allocation23], 1 }
0x1246   :  { %11270 = vsyncpa [#allocation26], 1 }
0x1247   :  { %11271 = vsyncpa [#allocation29], 1 }
0x1248   :  { %11272 = vsyncpa [#allocation32], 1 }
0x1249   :  { %11273 = vsyncpa [#allocation35], 1 }

</bundles_post_ra>
